<compile_context>
chip_gen: v7x
topology: tpu7x:2x2x1
jax: 0.10.0
libtpu: 0.0.40
codegen_flags: <defaults>
</compile_context>

<pallas_src>
import math

import jax
import jax.numpy as jnp
from jax import lax
from jax.experimental import pallas as pl
from jax.experimental.pallas import tpu as pltpu

D_MODEL = 64
N_HEADS = 4
HEAD_DIM = D_MODEL // N_HEADS       # 16
FF_DIM = 128
PATCH = 4
IMG = 32
GRID_HW = IMG // PATCH              # 8
SEQ = GRID_HW * GRID_HW             # 64
NUM_CLASSES = 10
NUM_LAYERS = 2
LN_EPS = 1e-5
PATCH_K = 3 * PATCH * PATCH         # 48
PATCH_K_PAD = 64                    # padded contraction dim (sublane aligned)
FC_OUT_PAD = 128                    # lane-dense padded classifier width
ATTN_SCALE = 1.0 / math.sqrt(HEAD_DIM)

# Bias/LN slab layout: rows 8*l + {0..7} per layer, row 16 = fc bias.
SLAB_W = 3 * D_MODEL                # 192 lanes (widest vector = qkv bias)
ROW_BQKV, ROW_BO, ROW_LN1G, ROW_LN1B = 0, 1, 2, 3
ROW_BFF1, ROW_BFF2, ROW_LN2G, ROW_LN2B = 4, 5, 6, 7
ROW_FC = NUM_LAYERS * 8             # 16
N_SLAB_ROWS = ROW_FC + 1            # 17


def _layernorm(x, gamma, beta):
    # Single-pass: sum(x) and sum(x*x) issue back-to-back, var = E[x^2]-mu^2.
    inv_n = 1.0 / x.shape[-1]
    s1 = jnp.sum(x, axis=-1, keepdims=True)
    s2 = jnp.sum(x * x, axis=-1, keepdims=True)
    mu = s1 * inv_n
    var = s2 * inv_n - mu * mu
    return (x - mu) * lax.rsqrt(var + LN_EPS) * gamma + beta


# ---------------------------------------------------------------------------
# Fused kernel: patch-embed + pos-enc + 2 encoder layers + classifier
# ---------------------------------------------------------------------------
def vit_fused_kernel(
    xp_ref, wpe_ref, posb_ref,
    wqkv_ref, wo_ref, wff1_ref, wff2_ref, bias_ref,
    wfc_hbm_ref,                     # raw HBM ref (memory_space=pl.ANY)
    o_ref,
    wfc_vmem_ref, wfc_sem,           # scratch: classifier-weight buffer + DMA sem
):
    BS = xp_ref.shape[0]             # B * SEQ
    B = BS // SEQ

    # Kick off the big classifier-weight DMA now; it overlaps the encoder.
    wfc_copy = pltpu.make_async_copy(wfc_hbm_ref, wfc_vmem_ref, wfc_sem)
    wfc_copy.start()

    # ---- patch embedding (unfolded conv as matmul) + pos-enc (+conv bias) ---
    h = (jnp.dot(xp_ref[...], wpe_ref[...], preferred_element_type=jnp.float32)
         + posb_ref[...])                                   # (B*S, E) f32

    # ---- transformer encoder layers (post-norm, ReLU FFN) -------------------
    for l in range(NUM_LAYERS):
        r0 = 8 * l

        # fused QKV projection: (B*S, E) @ (E, 3E); scale folded into Q cols.
        qkv = (jnp.dot(h.astype(jnp.bfloat16), wqkv_ref[l],
                       preferred_element_type=jnp.float32)
               + bias_ref[r0 + ROW_BQKV:r0 + ROW_BQKV + 1, :])
        qkv_b = qkv.astype(jnp.bfloat16)                    # cast ONCE per layer
        qkv3 = qkv_b.reshape(B, SEQ, 3 * D_MODEL)           # (B, S, 3E) bf16

        # attention: static loop over heads, batched over B inside each einsum;
        # out-projection accumulated per head (no ctx scratch / masked stores).
        attn = None
        for hd in range(N_HEADS):
            lo = hd * HEAD_DIM
            qh = qkv3[:, :, lo:lo + HEAD_DIM]                             # bf16
            kh = qkv3[:, :, D_MODEL + lo:D_MODEL + lo + HEAD_DIM]
            vh = qkv3[:, :, 2 * D_MODEL + lo:2 * D_MODEL + lo + HEAD_DIM]

            s = jnp.einsum('bqd,bkd->bqk', qh, kh,
                           preferred_element_type=jnp.float32)
            s = s - jnp.max(s, axis=-1, keepdims=True)
            p = jnp.exp(s)
            p = p * pl.reciprocal(jnp.sum(p, axis=-1, keepdims=True),
                                  approx=True)
            ctx_h = jnp.einsum('bqk,bkd->bqd', p.astype(jnp.bfloat16), vh,
                               preferred_element_type=jnp.float32)
            part = jnp.dot(
                ctx_h.reshape(BS, HEAD_DIM).astype(jnp.bfloat16),
                wo_ref[l, lo:lo + HEAD_DIM, :],
                preferred_element_type=jnp.float32)                       # (B*S, E)
            attn = part if attn is None else attn + part
        attn = attn + bias_ref[r0 + ROW_BO:r0 + ROW_BO + 1, :D_MODEL]

        # TODO(synk): dropout(p=0.1) after attention / inside FFN is identity (eval).
        x1 = _layernorm(h + attn,
                        bias_ref[r0 + ROW_LN1G:r0 + ROW_LN1G + 1, :D_MODEL],
                        bias_ref[r0 + ROW_LN1B:r0 + ROW_LN1B + 1, :D_MODEL])

        ff = (jnp.dot(x1.astype(jnp.bfloat16), wff1_ref[l],
                      preferred_element_type=jnp.float32)
              + bias_ref[r0 + ROW_BFF1:r0 + ROW_BFF1 + 1, :FF_DIM])
        ff = jnp.maximum(ff, 0.0)                           # ReLU (torch default)
        ff = (jnp.dot(ff.astype(jnp.bfloat16), wff2_ref[l],
                      preferred_element_type=jnp.float32)
              + bias_ref[r0 + ROW_BFF2:r0 + ROW_BFF2 + 1, :D_MODEL])
        h = _layernorm(x1 + ff,
                       bias_ref[r0 + ROW_LN2G:r0 + ROW_LN2G + 1, :D_MODEL],
                       bias_ref[r0 + ROW_LN2B:r0 + ROW_LN2B + 1, :D_MODEL])

    # ---- classifier: flatten (B, S, E) -> (B, S*E) via lane concat ----------
    # Row-major (s, e) order matches torch's permute(1,0,2).flatten(1).
    h3 = h.reshape(B, SEQ, D_MODEL)
    groups = []
    for s0 in range(0, SEQ, 8):
        groups.append(jnp.concatenate(
            [h3[:, s, :] for s in range(s0, s0 + 8)], axis=-1))
    hflat = jnp.concatenate(groups, axis=-1)                # (B, S*E) f32

    wfc_copy.wait()                                         # weights now in VMEM
    o_ref[...] = (jnp.dot(hflat.astype(jnp.bfloat16), wfc_vmem_ref[...],
                          preferred_element_type=jnp.float32)
                  + bias_ref[ROW_FC:ROW_FC + 1, :FC_OUT_PAD])


# ---------------------------------------------------------------------------
# Parameter construction (deterministic, synthetic, kernel-ready layouts)
# ---------------------------------------------------------------------------
def init_params(key):
    keys = jax.random.split(key, 4)
    sc = 0.02

    def normal(k, shape, s=sc):
        return jax.random.normal(k, shape, jnp.float32) * s

    # patch embed: nn.Conv2d(3, 64, k=4, s=4) weight (O, C, kh, kw); flattened
    # (C, kh, kw) order matches the patch extraction, pre-transposed, K padded.
    conv_w = normal(keys[0], (D_MODEL, 3, PATCH, PATCH))
    w_pe = conv_w.reshape(D_MODEL, PATCH_K).T                          # (48, 64)
    w_pe = jnp.pad(w_pe, ((0, PATCH_K_PAD - PATCH_K), (0, 0)))         # (64, 64)
    b_pe = jnp.zeros((D_MODEL,), jnp.float32)

    # positional encoding torch.randn(1, 64, 8, 8) -> (S, E), s = i*8 + j.
    # Conv bias is pre-added so the kernel does a single add.
    pos = jax.random.normal(keys[1], (1, D_MODEL, GRID_HW, GRID_HW), jnp.float32)
    posb = pos.reshape(D_MODEL, SEQ).T + b_pe[None, :]                 # (64, 64)

    # classifier nn.Linear(S*E, 10): weight (10, 4096) -> transposed + padded.
    fc_w = normal(keys[2], (NUM_CLASSES, SEQ * D_MODEL))
    w_fc = jnp.pad(fc_w.T, ((0, 0), (0, FC_OUT_PAD - NUM_CLASSES)))    # (4096, 128)
    b_fc = jnp.zeros((NUM_CLASSES,), jnp.float32)

    lk = jax.random.split(keys[3], NUM_LAYERS * 4)
    w_qkv = jnp.stack([normal(lk[l * 4 + 0], (D_MODEL, 3 * D_MODEL))
                       for l in range(NUM_LAYERS)])
    # fold softmax 1/sqrt(head_dim) into the Q projection (weights and bias)
    w_qkv = w_qkv.at[:, :, :D_MODEL].multiply(ATTN_SCALE)
    w_o = jnp.stack([normal(lk[l * 4 + 1], (D_MODEL, D_MODEL))
                     for l in range(NUM_LAYERS)])
    w_ff1 = jnp.stack([normal(lk[l * 4 + 2], (D_MODEL, FF_DIM))
                       for l in range(NUM_LAYERS)])
    w_ff2 = jnp.stack([normal(lk[l * 4 + 3], (FF_DIM, D_MODEL))
                       for l in range(NUM_LAYERS)])

    # ---- single bias/LN slab: one DMA instead of 14 tiny ones ---------------
    def row(v):
        v = v.astype(jnp.float32)
        return jnp.pad(v, (0, SLAB_W - v.shape[0]))

    rows = []
    for _ in range(NUM_LAYERS):
        b_qkv = jnp.zeros((3 * D_MODEL,), jnp.float32)
        b_qkv = b_qkv.at[:D_MODEL].multiply(ATTN_SCALE)  # keep scale-fold consistent
        rows += [
            row(b_qkv),                               # 0: qkv bias (Q pre-scaled)
            row(jnp.zeros((D_MODEL,))),               # 1: attn out-proj bias
            row(jnp.ones((D_MODEL,))),                # 2: ln1 gamma
            row(jnp.zeros((D_MODEL,))),               # 3: ln1 beta
            row(jnp.zeros((FF_DIM,))),                # 4: ffn bias 1
            row(jnp.zeros((D_MODEL,))),               # 5: ffn bias 2
            row(jnp.ones((D_MODEL,))),                # 6: ln2 gamma
            row(jnp.zeros((D_MODEL,))),               # 7: ln2 beta
        ]
    rows.append(row(b_fc))                            # 16: fc bias (10 used of 128)
    bias_slab = jnp.stack(rows)                       # (17, 192) f32

    return {
        # MXU operands stored in bf16; biases / LN params / pos stay f32.
        "w_pe": w_pe.astype(jnp.bfloat16),
        "posb": posb,                                 # (SEQ, D_MODEL) f32
        "w_qkv": w_qkv.astype(jnp.bfloat16),
        "w_o": w_o.astype(jnp.bfloat16),
        "w_ff1": w_ff1.astype(jnp.bfloat16),
        "w_ff2": w_ff2.astype(jnp.bfloat16),
        "bias": bias_slab,
        "w_fc": w_fc.astype(jnp.bfloat16),            # (4096, 128)
    }


# ---------------------------------------------------------------------------
# Forward pass: data-prep glue + single fused pallas_call
# ---------------------------------------------------------------------------
def vit_forward(x, params):
    B = x.shape[0]
    # Non-overlapping 4x4 patches: (B,3,32,32) -> (B*S, 48) in (C, kh, kw) order,
    # padded to K=64 and cast to bf16 for the MXU.
    xp = x.reshape(B, 3, GRID_HW, PATCH, GRID_HW, PATCH)
    xp = xp.transpose(0, 2, 4, 1, 3, 5).reshape(B * SEQ, PATCH_K)
    xp = jnp.pad(xp, ((0, 0), (0, PATCH_K_PAD - PATCH_K))).astype(jnp.bfloat16)
    posb = jnp.tile(params["posb"], (B, 1))           # (B*S, E) f32, tiled host-side

    inputs = [
        xp, params["w_pe"], posb,
        params["w_qkv"], params["w_o"], params["w_ff1"], params["w_ff2"],
        params["bias"], params["w_fc"],
    ]

    def full_spec(a):
        nd = a.ndim
        return pl.BlockSpec(a.shape, lambda i, _nd=nd: (0,) * _nd)

    in_specs = ([full_spec(a) for a in inputs[:-1]]
                + [pl.BlockSpec(memory_space=pl.ANY)])       # w_fc stays in HBM

    logits_pad = pl.pallas_call(
        vit_fused_kernel,
        out_shape=jax.ShapeDtypeStruct((B, FC_OUT_PAD), jnp.float32),
        grid=(1,),
        in_specs=in_specs,
        out_specs=pl.BlockSpec((B, FC_OUT_PAD), lambda i: (0, 0)),
        scratch_shapes=[
            pltpu.VMEM((SEQ * D_MODEL, FC_OUT_PAD), jnp.bfloat16),  # w_fc buffer
            pltpu.SemaphoreType.DMA,                                 # its DMA sem
        ],
        compiler_params=pltpu.CompilerParams(dimension_semantics=("arbitrary",)),
    )(*inputs)

    return logits_pad[:, :NUM_CLASSES]


if __name__ == "__main__":
    key = jax.random.PRNGKey(0)
    pkey, xkey = jax.random.split(key)
    params = init_params(pkey)

    # NCHW input; spatial 32x32 is required by the 8x8 positional-encoding grid.
    x = jax.random.normal(xkey, (2, 3, IMG, IMG), jnp.float32)

    logits = jax.jit(vit_forward)(x, params)
    logits = jax.block_until_ready(logits)
    assert logits.shape == (2, NUM_CLASSES)
    assert bool(jnp.all(jnp.isfinite(logits)))
    print("KERNEL_OK")
</pallas_src>

<mosaic_0001>
module attributes {stable_mosaic.version = 11 : i64} {
  func.func @vit_fused_kernel(%arg0: i32, %arg1: memref<128x64xbf16, #tpu.memory_space<vmem>>, %arg2: memref<64x64xbf16, #tpu.memory_space<vmem>>, %arg3: memref<128x64xf32, #tpu.memory_space<vmem>>, %arg4: memref<2x64x192xbf16, #tpu.memory_space<vmem>>, %arg5: memref<2x64x64xbf16, #tpu.memory_space<vmem>>, %arg6: memref<2x64x128xbf16, #tpu.memory_space<vmem>>, %arg7: memref<2x128x64xbf16, #tpu.memory_space<vmem>>, %arg8: memref<17x192xf32, #tpu.memory_space<vmem>>, %arg9: memref<4096x128xbf16, #tpu.memory_space<any>>, %arg10: memref<2x128xf32, #tpu.memory_space<vmem>>, %arg11: memref<4096x128xbf16, #tpu.memory_space<vmem>>, %arg12: memref<!tpu.dma_semaphore, #tpu.memory_space<semaphore_mem>>) attributes {dimension_semantics = [#tpu.dimension_semantics<arbitrary>], iteration_bounds = array<i64: 1>, scalar_prefetch = 0 : i64, scratch_operands = 2 : i64, tpu.core_type = #tpu.core_type<tc>, window_params = [{pipeline_mode = #tpu.pipeline_mode<synchronous>, transform_indices = @transform_0, window_bounds = array<i64: 128, 64>}, {pipeline_mode = #tpu.pipeline_mode<synchronous>, transform_indices = @transform_1, window_bounds = array<i64: 64, 64>}, {pipeline_mode = #tpu.pipeline_mode<synchronous>, transform_indices = @transform_2, window_bounds = array<i64: 128, 64>}, {pipeline_mode = #tpu.pipeline_mode<synchronous>, transform_indices = @transform_3, window_bounds = array<i64: 2, 64, 192>}, {pipeline_mode = #tpu.pipeline_mode<synchronous>, transform_indices = @transform_4, window_bounds = array<i64: 2, 64, 64>}, {pipeline_mode = #tpu.pipeline_mode<synchronous>, transform_indices = @transform_5, window_bounds = array<i64: 2, 64, 128>}, {pipeline_mode = #tpu.pipeline_mode<synchronous>, transform_indices = @transform_6, window_bounds = array<i64: 2, 128, 64>}, {pipeline_mode = #tpu.pipeline_mode<synchronous>, transform_indices = @transform_7, window_bounds = array<i64: 17, 192>}, {}, {pipeline_mode = #tpu.pipeline_mode<synchronous>, transform_indices = @transform_9, window_bounds = array<i64: 2, 128>}]} {
    tpu.enqueue_dma source(%arg9 : memref<4096x128xbf16, #tpu.memory_space<any>>) target(%arg11 : memref<4096x128xbf16, #tpu.memory_space<vmem>>) target_semaphore(%arg12 : memref<!tpu.dma_semaphore, #tpu.memory_space<semaphore_mem>>)
    %c0 = arith.constant 0 : index
    %c0_0 = arith.constant 0 : index
    %0 = vector.load %arg1[%c0, %c0_0] : memref<128x64xbf16, #tpu.memory_space<vmem>>, vector<128x64xbf16>
    %c0_1 = arith.constant 0 : index
    %c0_2 = arith.constant 0 : index
    %1 = vector.load %arg2[%c0_1, %c0_2] : memref<64x64xbf16, #tpu.memory_space<vmem>>, vector<64x64xbf16>
    %cst = arith.constant dense<0.000000e+00> : vector<128x64xf32>
    %2 = tpu.matmul %0, %1, %cst {dimension_numbers = #tpu.dot_dimension_numbers<[1], [0], [0], [1], [0, 0, 1, 1], [], []>} : vector<128x64xbf16>, vector<64x64xbf16>, vector<128x64xf32> -> vector<128x64xf32>
    %c0_3 = arith.constant 0 : index
    %c0_4 = arith.constant 0 : index
    %3 = vector.load %arg3[%c0_3, %c0_4] : memref<128x64xf32, #tpu.memory_space<vmem>>, vector<128x64xf32>
    %4 = arith.addf %2, %3 : vector<128x64xf32>
    %5 = arith.truncf %4 : vector<128x64xf32> to vector<128x64xbf16>
    %c0_5 = arith.constant 0 : index
    %c0_6 = arith.constant 0 : index
    %c0_7 = arith.constant 0 : index
    %6 = vector.load %arg4[%c0_5, %c0_6, %c0_7] : memref<2x64x192xbf16, #tpu.memory_space<vmem>>, vector<1x64x192xbf16>
    %7 = vector.shape_cast %6 : vector<1x64x192xbf16> to vector<64x192xbf16>
    %cst_8 = arith.constant dense<0.000000e+00> : vector<128x192xf32>
    %8 = tpu.matmul %5, %7, %cst_8 {dimension_numbers = #tpu.dot_dimension_numbers<[1], [0], [0], [1], [0, 0, 1, 1], [], []>} : vector<128x64xbf16>, vector<64x192xbf16>, vector<128x192xf32> -> vector<128x192xf32>
    %c0_9 = arith.constant 0 : index
    %c0_10 = arith.constant 0 : index
    %9 = vector.load %arg8[%c0_9, %c0_10] : memref<17x192xf32, #tpu.memory_space<vmem>>, vector<1x192xf32>
    %10 = vector.broadcast %9 : vector<1x192xf32> to vector<128x192xf32>
    %11 = arith.addf %8, %10 : vector<128x192xf32>
    %12 = arith.truncf %11 : vector<128x192xf32> to vector<128x192xbf16>
    %13 = vector.shape_cast %12 : vector<128x192xbf16> to vector<2x64x192xbf16>
    %14 = vector.extract_strided_slice %13 {offsets = [0, 0, 0], sizes = [2, 64, 16], strides = [1, 1, 1]} : vector<2x64x192xbf16> to vector<2x64x16xbf16>
    %15 = vector.extract_strided_slice %13 {offsets = [0, 0, 64], sizes = [2, 64, 16], strides = [1, 1, 1]} : vector<2x64x192xbf16> to vector<2x64x16xbf16>
    %16 = vector.extract_strided_slice %13 {offsets = [0, 0, 128], sizes = [2, 64, 16], strides = [1, 1, 1]} : vector<2x64x192xbf16> to vector<2x64x16xbf16>
    "tpu.trace_start"() <{level = 10 : i32, message = "bqd,bkd->bqk"}> : () -> ()
    %cst_11 = arith.constant dense<0.000000e+00> : vector<2x64x64xf32>
    %17 = tpu.matmul %14, %15, %cst_11 {dimension_numbers = #tpu.dot_dimension_numbers<[2], [2], [1], [1], [0, 0, 0, 1, 1, 1], [0], [0]>} : vector<2x64x16xbf16>, vector<2x64x16xbf16>, vector<2x64x64xf32> -> vector<2x64x64xf32>
    "tpu.trace_stop"() : () -> ()
    %cst_12 = arith.constant dense<0xFF800000> : vector<2x64xf32>
    %18 = vector.multi_reduction <maximumf>, %17, %cst_12 [2] : vector<2x64x64xf32> to vector<2x64xf32>
    %19 = vector.shape_cast %18 : vector<2x64xf32> to vector<2x64x1xf32>
    %20 = vector.broadcast %19 : vector<2x64x1xf32> to vector<2x64x64xf32>
    %21 = arith.subf %17, %20 : vector<2x64x64xf32>
    %22 = math.exp %21 : vector<2x64x64xf32>
    %cst_13 = arith.constant dense<0.000000e+00> : vector<2x64xf32>
    %23 = vector.multi_reduction <add>, %22, %cst_13 [2] : vector<2x64x64xf32> to vector<2x64xf32>
    %24 = vector.shape_cast %23 : vector<2x64xf32> to vector<2x64x1xf32>
    %25 = tpu.reciprocal %24 {approx = true} : vector<2x64x1xf32> -> vector<2x64x1xf32>
    %26 = vector.broadcast %25 : vector<2x64x1xf32> to vector<2x64x64xf32>
    %27 = arith.mulf %22, %26 : vector<2x64x64xf32>
    %28 = arith.truncf %27 : vector<2x64x64xf32> to vector<2x64x64xbf16>
    "tpu.trace_start"() <{level = 10 : i32, message = "bqk,bkd->bqd"}> : () -> ()
    %cst_14 = arith.constant dense<0.000000e+00> : vector<2x64x16xf32>
    %29 = tpu.matmul %28, %16, %cst_14 {dimension_numbers = #tpu.dot_dimension_numbers<[2], [1], [1], [2], [0, 0, 0, 1, 1, 2], [0], [0]>} : vector<2x64x64xbf16>, vector<2x64x16xbf16>, vector<2x64x16xf32> -> vector<2x64x16xf32>
    "tpu.trace_stop"() : () -> ()
    %30 = vector.shape_cast %29 : vector<2x64x16xf32> to vector<128x16xf32>
    %31 = arith.truncf %30 : vector<128x16xf32> to vector<128x16xbf16>
    %c0_15 = arith.constant 0 : index
    %c0_16 = arith.constant 0 : index
    %c0_17 = arith.constant 0 : index
    %32 = vector.load %arg5[%c0_15, %c0_16, %c0_17] : memref<2x64x64xbf16, #tpu.memory_space<vmem>>, vector<1x16x64xbf16>
    %33 = vector.shape_cast %32 : vector<1x16x64xbf16> to vector<16x64xbf16>
    %cst_18 = arith.constant dense<0.000000e+00> : vector<128x64xf32>
    %34 = tpu.matmul %31, %33, %cst_18 {dimension_numbers = #tpu.dot_dimension_numbers<[1], [0], [0], [1], [0, 0, 1, 1], [], []>} : vector<128x16xbf16>, vector<16x64xbf16>, vector<128x64xf32> -> vector<128x64xf32>
    %35 = vector.extract_strided_slice %13 {offsets = [0, 0, 16], sizes = [2, 64, 16], strides = [1, 1, 1]} : vector<2x64x192xbf16> to vector<2x64x16xbf16>
    %36 = vector.extract_strided_slice %13 {offsets = [0, 0, 80], sizes = [2, 64, 16], strides = [1, 1, 1]} : vector<2x64x192xbf16> to vector<2x64x16xbf16>
    %37 = vector.extract_strided_slice %13 {offsets = [0, 0, 144], sizes = [2, 64, 16], strides = [1, 1, 1]} : vector<2x64x192xbf16> to vector<2x64x16xbf16>
    "tpu.trace_start"() <{level = 10 : i32, message = "bqd,bkd->bqk"}> : () -> ()
    %cst_19 = arith.constant dense<0.000000e+00> : vector<2x64x64xf32>
    %38 = tpu.matmul %35, %36, %cst_19 {dimension_numbers = #tpu.dot_dimension_numbers<[2], [2], [1], [1], [0, 0, 0, 1, 1, 1], [0], [0]>} : vector<2x64x16xbf16>, vector<2x64x16xbf16>, vector<2x64x64xf32> -> vector<2x64x64xf32>
    "tpu.trace_stop"() : () -> ()
    %cst_20 = arith.constant dense<0xFF800000> : vector<2x64xf32>
    %39 = vector.multi_reduction <maximumf>, %38, %cst_20 [2] : vector<2x64x64xf32> to vector<2x64xf32>
    %40 = vector.shape_cast %39 : vector<2x64xf32> to vector<2x64x1xf32>
    %41 = vector.broadcast %40 : vector<2x64x1xf32> to vector<2x64x64xf32>
    %42 = arith.subf %38, %41 : vector<2x64x64xf32>
    %43 = math.exp %42 : vector<2x64x64xf32>
    %cst_21 = arith.constant dense<0.000000e+00> : vector<2x64xf32>
    %44 = vector.multi_reduction <add>, %43, %cst_21 [2] : vector<2x64x64xf32> to vector<2x64xf32>
    %45 = vector.shape_cast %44 : vector<2x64xf32> to vector<2x64x1xf32>
    %46 = tpu.reciprocal %45 {approx = true} : vector<2x64x1xf32> -> vector<2x64x1xf32>
    %47 = vector.broadcast %46 : vector<2x64x1xf32> to vector<2x64x64xf32>
    %48 = arith.mulf %43, %47 : vector<2x64x64xf32>
    %49 = arith.truncf %48 : vector<2x64x64xf32> to vector<2x64x64xbf16>
    "tpu.trace_start"() <{level = 10 : i32, message = "bqk,bkd->bqd"}> : () -> ()
    %cst_22 = arith.constant dense<0.000000e+00> : vector<2x64x16xf32>
    %50 = tpu.matmul %49, %37, %cst_22 {dimension_numbers = #tpu.dot_dimension_numbers<[2], [1], [1], [2], [0, 0, 0, 1, 1, 2], [0], [0]>} : vector<2x64x64xbf16>, vector<2x64x16xbf16>, vector<2x64x16xf32> -> vector<2x64x16xf32>
    "tpu.trace_stop"() : () -> ()
    %51 = vector.shape_cast %50 : vector<2x64x16xf32> to vector<128x16xf32>
    %52 = arith.truncf %51 : vector<128x16xf32> to vector<128x16xbf16>
    %c0_23 = arith.constant 0 : index
    %c16 = arith.constant 16 : index
    %c0_24 = arith.constant 0 : index
    %53 = vector.load %arg5[%c0_23, %c16, %c0_24] : memref<2x64x64xbf16, #tpu.memory_space<vmem>>, vector<1x16x64xbf16>
    %54 = vector.shape_cast %53 : vector<1x16x64xbf16> to vector<16x64xbf16>
    %cst_25 = arith.constant dense<0.000000e+00> : vector<128x64xf32>
    %55 = tpu.matmul %52, %54, %cst_25 {dimension_numbers = #tpu.dot_dimension_numbers<[1], [0], [0], [1], [0, 0, 1, 1], [], []>} : vector<128x16xbf16>, vector<16x64xbf16>, vector<128x64xf32> -> vector<128x64xf32>
    %56 = arith.addf %34, %55 : vector<128x64xf32>
    %57 = vector.extract_strided_slice %13 {offsets = [0, 0, 32], sizes = [2, 64, 16], strides = [1, 1, 1]} : vector<2x64x192xbf16> to vector<2x64x16xbf16>
    %58 = vector.extract_strided_slice %13 {offsets = [0, 0, 96], sizes = [2, 64, 16], strides = [1, 1, 1]} : vector<2x64x192xbf16> to vector<2x64x16xbf16>
    %59 = vector.extract_strided_slice %13 {offsets = [0, 0, 160], sizes = [2, 64, 16], strides = [1, 1, 1]} : vector<2x64x192xbf16> to vector<2x64x16xbf16>
    "tpu.trace_start"() <{level = 10 : i32, message = "bqd,bkd->bqk"}> : () -> ()
    %cst_26 = arith.constant dense<0.000000e+00> : vector<2x64x64xf32>
    %60 = tpu.matmul %57, %58, %cst_26 {dimension_numbers = #tpu.dot_dimension_numbers<[2], [2], [1], [1], [0, 0, 0, 1, 1, 1], [0], [0]>} : vector<2x64x16xbf16>, vector<2x64x16xbf16>, vector<2x64x64xf32> -> vector<2x64x64xf32>
    "tpu.trace_stop"() : () -> ()
    %cst_27 = arith.constant dense<0xFF800000> : vector<2x64xf32>
    %61 = vector.multi_reduction <maximumf>, %60, %cst_27 [2] : vector<2x64x64xf32> to vector<2x64xf32>
    %62 = vector.shape_cast %61 : vector<2x64xf32> to vector<2x64x1xf32>
    %63 = vector.broadcast %62 : vector<2x64x1xf32> to vector<2x64x64xf32>
    %64 = arith.subf %60, %63 : vector<2x64x64xf32>
    %65 = math.exp %64 : vector<2x64x64xf32>
    %cst_28 = arith.constant dense<0.000000e+00> : vector<2x64xf32>
    %66 = vector.multi_reduction <add>, %65, %cst_28 [2] : vector<2x64x64xf32> to vector<2x64xf32>
    %67 = vector.shape_cast %66 : vector<2x64xf32> to vector<2x64x1xf32>
    %68 = tpu.reciprocal %67 {approx = true} : vector<2x64x1xf32> -> vector<2x64x1xf32>
    %69 = vector.broadcast %68 : vector<2x64x1xf32> to vector<2x64x64xf32>
    %70 = arith.mulf %65, %69 : vector<2x64x64xf32>
    %71 = arith.truncf %70 : vector<2x64x64xf32> to vector<2x64x64xbf16>
    "tpu.trace_start"() <{level = 10 : i32, message = "bqk,bkd->bqd"}> : () -> ()
    %cst_29 = arith.constant dense<0.000000e+00> : vector<2x64x16xf32>
    %72 = tpu.matmul %71, %59, %cst_29 {dimension_numbers = #tpu.dot_dimension_numbers<[2], [1], [1], [2], [0, 0, 0, 1, 1, 2], [0], [0]>} : vector<2x64x64xbf16>, vector<2x64x16xbf16>, vector<2x64x16xf32> -> vector<2x64x16xf32>
    "tpu.trace_stop"() : () -> ()
    %73 = vector.shape_cast %72 : vector<2x64x16xf32> to vector<128x16xf32>
    %74 = arith.truncf %73 : vector<128x16xf32> to vector<128x16xbf16>
    %c0_30 = arith.constant 0 : index
    %c32 = arith.constant 32 : index
    %c0_31 = arith.constant 0 : index
    %75 = vector.load %arg5[%c0_30, %c32, %c0_31] : memref<2x64x64xbf16, #tpu.memory_space<vmem>>, vector<1x16x64xbf16>
    %76 = vector.shape_cast %75 : vector<1x16x64xbf16> to vector<16x64xbf16>
    %cst_32 = arith.constant dense<0.000000e+00> : vector<128x64xf32>
    %77 = tpu.matmul %74, %76, %cst_32 {dimension_numbers = #tpu.dot_dimension_numbers<[1], [0], [0], [1], [0, 0, 1, 1], [], []>} : vector<128x16xbf16>, vector<16x64xbf16>, vector<128x64xf32> -> vector<128x64xf32>
    %78 = arith.addf %56, %77 : vector<128x64xf32>
    %79 = vector.extract_strided_slice %13 {offsets = [0, 0, 48], sizes = [2, 64, 16], strides = [1, 1, 1]} : vector<2x64x192xbf16> to vector<2x64x16xbf16>
    %80 = vector.extract_strided_slice %13 {offsets = [0, 0, 112], sizes = [2, 64, 16], strides = [1, 1, 1]} : vector<2x64x192xbf16> to vector<2x64x16xbf16>
    %81 = vector.extract_strided_slice %13 {offsets = [0, 0, 176], sizes = [2, 64, 16], strides = [1, 1, 1]} : vector<2x64x192xbf16> to vector<2x64x16xbf16>
    "tpu.trace_start"() <{level = 10 : i32, message = "bqd,bkd->bqk"}> : () -> ()
    %cst_33 = arith.constant dense<0.000000e+00> : vector<2x64x64xf32>
    %82 = tpu.matmul %79, %80, %cst_33 {dimension_numbers = #tpu.dot_dimension_numbers<[2], [2], [1], [1], [0, 0, 0, 1, 1, 1], [0], [0]>} : vector<2x64x16xbf16>, vector<2x64x16xbf16>, vector<2x64x64xf32> -> vector<2x64x64xf32>
    "tpu.trace_stop"() : () -> ()
    %cst_34 = arith.constant dense<0xFF800000> : vector<2x64xf32>
    %83 = vector.multi_reduction <maximumf>, %82, %cst_34 [2] : vector<2x64x64xf32> to vector<2x64xf32>
    %84 = vector.shape_cast %83 : vector<2x64xf32> to vector<2x64x1xf32>
    %85 = vector.broadcast %84 : vector<2x64x1xf32> to vector<2x64x64xf32>
    %86 = arith.subf %82, %85 : vector<2x64x64xf32>
    %87 = math.exp %86 : vector<2x64x64xf32>
    %cst_35 = arith.constant dense<0.000000e+00> : vector<2x64xf32>
    %88 = vector.multi_reduction <add>, %87, %cst_35 [2] : vector<2x64x64xf32> to vector<2x64xf32>
    %89 = vector.shape_cast %88 : vector<2x64xf32> to vector<2x64x1xf32>
    %90 = tpu.reciprocal %89 {approx = true} : vector<2x64x1xf32> -> vector<2x64x1xf32>
    %91 = vector.broadcast %90 : vector<2x64x1xf32> to vector<2x64x64xf32>
    %92 = arith.mulf %87, %91 : vector<2x64x64xf32>
    %93 = arith.truncf %92 : vector<2x64x64xf32> to vector<2x64x64xbf16>
    "tpu.trace_start"() <{level = 10 : i32, message = "bqk,bkd->bqd"}> : () -> ()
    %cst_36 = arith.constant dense<0.000000e+00> : vector<2x64x16xf32>
    %94 = tpu.matmul %93, %81, %cst_36 {dimension_numbers = #tpu.dot_dimension_numbers<[2], [1], [1], [2], [0, 0, 0, 1, 1, 2], [0], [0]>} : vector<2x64x64xbf16>, vector<2x64x16xbf16>, vector<2x64x16xf32> -> vector<2x64x16xf32>
    "tpu.trace_stop"() : () -> ()
    %95 = vector.shape_cast %94 : vector<2x64x16xf32> to vector<128x16xf32>
    %96 = arith.truncf %95 : vector<128x16xf32> to vector<128x16xbf16>
    %c0_37 = arith.constant 0 : index
    %c48 = arith.constant 48 : index
    %c0_38 = arith.constant 0 : index
    %97 = vector.load %arg5[%c0_37, %c48, %c0_38] : memref<2x64x64xbf16, #tpu.memory_space<vmem>>, vector<1x16x64xbf16>
    %98 = vector.shape_cast %97 : vector<1x16x64xbf16> to vector<16x64xbf16>
    %cst_39 = arith.constant dense<0.000000e+00> : vector<128x64xf32>
    %99 = tpu.matmul %96, %98, %cst_39 {dimension_numbers = #tpu.dot_dimension_numbers<[1], [0], [0], [1], [0, 0, 1, 1], [], []>} : vector<128x16xbf16>, vector<16x64xbf16>, vector<128x64xf32> -> vector<128x64xf32>
    %100 = arith.addf %78, %99 : vector<128x64xf32>
    %c1 = arith.constant 1 : index
    %c0_40 = arith.constant 0 : index
    %101 = vector.load %arg8[%c1, %c0_40] : memref<17x192xf32, #tpu.memory_space<vmem>>, vector<1x64xf32>
    %102 = vector.broadcast %101 : vector<1x64xf32> to vector<128x64xf32>
    %103 = arith.addf %100, %102 : vector<128x64xf32>
    %104 = arith.addf %4, %103 : vector<128x64xf32>
    %c2 = arith.constant 2 : index
    %c0_41 = arith.constant 0 : index
    %105 = vector.load %arg8[%c2, %c0_41] : memref<17x192xf32, #tpu.memory_space<vmem>>, vector<1x64xf32>
    %c3 = arith.constant 3 : index
    %c0_42 = arith.constant 0 : index
    %106 = vector.load %arg8[%c3, %c0_42] : memref<17x192xf32, #tpu.memory_space<vmem>>, vector<1x64xf32>
    %cst_43 = arith.constant dense<0.000000e+00> : vector<128xf32>
    %107 = vector.multi_reduction <add>, %104, %cst_43 [1] : vector<128x64xf32> to vector<128xf32>
    %108 = vector.shape_cast %107 : vector<128xf32> to vector<128x1xf32>
    %109 = arith.mulf %104, %104 : vector<128x64xf32>
    %cst_44 = arith.constant dense<0.000000e+00> : vector<128xf32>
    %110 = vector.multi_reduction <add>, %109, %cst_44 [1] : vector<128x64xf32> to vector<128xf32>
    %111 = vector.shape_cast %110 : vector<128xf32> to vector<128x1xf32>
    %cst_45 = arith.constant 1.562500e-02 : f32
    %112 = vector.broadcast %cst_45 : f32 to vector<128x1xf32>
    %113 = arith.mulf %108, %112 : vector<128x1xf32>
    %cst_46 = arith.constant 1.562500e-02 : f32
    %114 = vector.broadcast %cst_46 : f32 to vector<128x1xf32>
    %115 = arith.mulf %111, %114 : vector<128x1xf32>
    %116 = arith.mulf %113, %113 : vector<128x1xf32>
    %117 = arith.subf %115, %116 : vector<128x1xf32>
    %118 = vector.broadcast %113 : vector<128x1xf32> to vector<128x64xf32>
    %119 = arith.subf %104, %118 : vector<128x64xf32>
    %cst_47 = arith.constant 9.99999974E-6 : f32
    %120 = vector.broadcast %cst_47 : f32 to vector<128x1xf32>
    %121 = arith.addf %117, %120 : vector<128x1xf32>
    %122 = math.rsqrt %121 : vector<128x1xf32>
    %123 = vector.broadcast %122 : vector<128x1xf32> to vector<128x64xf32>
    %124 = arith.mulf %119, %123 : vector<128x64xf32>
    %125 = vector.broadcast %105 : vector<1x64xf32> to vector<128x64xf32>
    %126 = arith.mulf %124, %125 : vector<128x64xf32>
    %127 = vector.broadcast %106 : vector<1x64xf32> to vector<128x64xf32>
    %128 = arith.addf %126, %127 : vector<128x64xf32>
    %129 = arith.truncf %128 : vector<128x64xf32> to vector<128x64xbf16>
    %c0_48 = arith.constant 0 : index
    %c0_49 = arith.constant 0 : index
    %c0_50 = arith.constant 0 : index
    %130 = vector.load %arg6[%c0_48, %c0_49, %c0_50] : memref<2x64x128xbf16, #tpu.memory_space<vmem>>, vector<1x64x128xbf16>
    %131 = vector.shape_cast %130 : vector<1x64x128xbf16> to vector<64x128xbf16>
    %cst_51 = arith.constant dense<0.000000e+00> : vector<128x128xf32>
    %132 = tpu.matmul %129, %131, %cst_51 {dimension_numbers = #tpu.dot_dimension_numbers<[1], [0], [0], [1], [0, 0, 1, 1], [], []>} : vector<128x64xbf16>, vector<64x128xbf16>, vector<128x128xf32> -> vector<128x128xf32>
    %c4 = arith.constant 4 : index
    %c0_52 = arith.constant 0 : index
    %133 = vector.load %arg8[%c4, %c0_52] : memref<17x192xf32, #tpu.memory_space<vmem>>, vector<1x128xf32>
    %134 = vector.broadcast %133 : vector<1x128xf32> to vector<128x128xf32>
    %135 = arith.addf %132, %134 : vector<128x128xf32>
    %cst_53 = arith.constant 0.000000e+00 : f32
    %136 = vector.broadcast %cst_53 : f32 to vector<128x128xf32>
    %137 = arith.maximumf %135, %136 : vector<128x128xf32>
    %138 = arith.truncf %137 : vector<128x128xf32> to vector<128x128xbf16>
    %c0_54 = arith.constant 0 : index
    %c0_55 = arith.constant 0 : index
    %c0_56 = arith.constant 0 : index
    %139 = vector.load %arg7[%c0_54, %c0_55, %c0_56] : memref<2x128x64xbf16, #tpu.memory_space<vmem>>, vector<1x128x64xbf16>
    %140 = vector.shape_cast %139 : vector<1x128x64xbf16> to vector<128x64xbf16>
    %cst_57 = arith.constant dense<0.000000e+00> : vector<128x64xf32>
    %141 = tpu.matmul %138, %140, %cst_57 {dimension_numbers = #tpu.dot_dimension_numbers<[1], [0], [0], [1], [0, 0, 1, 1], [], []>} : vector<128x128xbf16>, vector<128x64xbf16>, vector<128x64xf32> -> vector<128x64xf32>
    %c5 = arith.constant 5 : index
    %c0_58 = arith.constant 0 : index
    %142 = vector.load %arg8[%c5, %c0_58] : memref<17x192xf32, #tpu.memory_space<vmem>>, vector<1x64xf32>
    %143 = vector.broadcast %142 : vector<1x64xf32> to vector<128x64xf32>
    %144 = arith.addf %141, %143 : vector<128x64xf32>
    %145 = arith.addf %128, %144 : vector<128x64xf32>
    %c6 = arith.constant 6 : index
    %c0_59 = arith.constant 0 : index
    %146 = vector.load %arg8[%c6, %c0_59] : memref<17x192xf32, #tpu.memory_space<vmem>>, vector<1x64xf32>
    %c7 = arith.constant 7 : index
    %c0_60 = arith.constant 0 : index
    %147 = vector.load %arg8[%c7, %c0_60] : memref<17x192xf32, #tpu.memory_space<vmem>>, vector<1x64xf32>
    %cst_61 = arith.constant dense<0.000000e+00> : vector<128xf32>
    %148 = vector.multi_reduction <add>, %145, %cst_61 [1] : vector<128x64xf32> to vector<128xf32>
    %149 = vector.shape_cast %148 : vector<128xf32> to vector<128x1xf32>
    %150 = arith.mulf %145, %145 : vector<128x64xf32>
    %cst_62 = arith.constant dense<0.000000e+00> : vector<128xf32>
    %151 = vector.multi_reduction <add>, %150, %cst_62 [1] : vector<128x64xf32> to vector<128xf32>
    %152 = vector.shape_cast %151 : vector<128xf32> to vector<128x1xf32>
    %cst_63 = arith.constant 1.562500e-02 : f32
    %153 = vector.broadcast %cst_63 : f32 to vector<128x1xf32>
    %154 = arith.mulf %149, %153 : vector<128x1xf32>
    %cst_64 = arith.constant 1.562500e-02 : f32
    %155 = vector.broadcast %cst_64 : f32 to vector<128x1xf32>
    %156 = arith.mulf %152, %155 : vector<128x1xf32>
    %157 = arith.mulf %154, %154 : vector<128x1xf32>
    %158 = arith.subf %156, %157 : vector<128x1xf32>
    %159 = vector.broadcast %154 : vector<128x1xf32> to vector<128x64xf32>
    %160 = arith.subf %145, %159 : vector<128x64xf32>
    %cst_65 = arith.constant 9.99999974E-6 : f32
    %161 = vector.broadcast %cst_65 : f32 to vector<128x1xf32>
    %162 = arith.addf %158, %161 : vector<128x1xf32>
    %163 = math.rsqrt %162 : vector<128x1xf32>
    %164 = vector.broadcast %163 : vector<128x1xf32> to vector<128x64xf32>
    %165 = arith.mulf %160, %164 : vector<128x64xf32>
    %166 = vector.broadcast %146 : vector<1x64xf32> to vector<128x64xf32>
    %167 = arith.mulf %165, %166 : vector<128x64xf32>
    %168 = vector.broadcast %147 : vector<1x64xf32> to vector<128x64xf32>
    %169 = arith.addf %167, %168 : vector<128x64xf32>
    %170 = arith.truncf %169 : vector<128x64xf32> to vector<128x64xbf16>
    %c1_66 = arith.constant 1 : index
    %c0_67 = arith.constant 0 : index
    %c0_68 = arith.constant 0 : index
    %171 = vector.load %arg4[%c1_66, %c0_67, %c0_68] : memref<2x64x192xbf16, #tpu.memory_space<vmem>>, vector<1x64x192xbf16>
    %172 = vector.shape_cast %171 : vector<1x64x192xbf16> to vector<64x192xbf16>
    %cst_69 = arith.constant dense<0.000000e+00> : vector<128x192xf32>
    %173 = tpu.matmul %170, %172, %cst_69 {dimension_numbers = #tpu.dot_dimension_numbers<[1], [0], [0], [1], [0, 0, 1, 1], [], []>} : vector<128x64xbf16>, vector<64x192xbf16>, vector<128x192xf32> -> vector<128x192xf32>
    %c8 = arith.constant 8 : index
    %c0_70 = arith.constant 0 : index
    %174 = vector.load %arg8[%c8, %c0_70] : memref<17x192xf32, #tpu.memory_space<vmem>>, vector<1x192xf32>
    %175 = vector.broadcast %174 : vector<1x192xf32> to vector<128x192xf32>
    %176 = arith.addf %173, %175 : vector<128x192xf32>
    %177 = arith.truncf %176 : vector<128x192xf32> to vector<128x192xbf16>
    %178 = vector.shape_cast %177 : vector<128x192xbf16> to vector<2x64x192xbf16>
    %179 = vector.extract_strided_slice %178 {offsets = [0, 0, 0], sizes = [2, 64, 16], strides = [1, 1, 1]} : vector<2x64x192xbf16> to vector<2x64x16xbf16>
    %180 = vector.extract_strided_slice %178 {offsets = [0, 0, 64], sizes = [2, 64, 16], strides = [1, 1, 1]} : vector<2x64x192xbf16> to vector<2x64x16xbf16>
    %181 = vector.extract_strided_slice %178 {offsets = [0, 0, 128], sizes = [2, 64, 16], strides = [1, 1, 1]} : vector<2x64x192xbf16> to vector<2x64x16xbf16>
    "tpu.trace_start"() <{level = 10 : i32, message = "bqd,bkd->bqk"}> : () -> ()
    %cst_71 = arith.constant dense<0.000000e+00> : vector<2x64x64xf32>
    %182 = tpu.matmul %179, %180, %cst_71 {dimension_numbers = #tpu.dot_dimension_numbers<[2], [2], [1], [1], [0, 0, 0, 1, 1, 1], [0], [0]>} : vector<2x64x16xbf16>, vector<2x64x16xbf16>, vector<2x64x64xf32> -> vector<2x64x64xf32>
    "tpu.trace_stop"() : () -> ()
    %cst_72 = arith.constant dense<0xFF800000> : vector<2x64xf32>
    %183 = vector.multi_reduction <maximumf>, %182, %cst_72 [2] : vector<2x64x64xf32> to vector<2x64xf32>
    %184 = vector.shape_cast %183 : vector<2x64xf32> to vector<2x64x1xf32>
    %185 = vector.broadcast %184 : vector<2x64x1xf32> to vector<2x64x64xf32>
    %186 = arith.subf %182, %185 : vector<2x64x64xf32>
    %187 = math.exp %186 : vector<2x64x64xf32>
    %cst_73 = arith.constant dense<0.000000e+00> : vector<2x64xf32>
    %188 = vector.multi_reduction <add>, %187, %cst_73 [2] : vector<2x64x64xf32> to vector<2x64xf32>
    %189 = vector.shape_cast %188 : vector<2x64xf32> to vector<2x64x1xf32>
    %190 = tpu.reciprocal %189 {approx = true} : vector<2x64x1xf32> -> vector<2x64x1xf32>
    %191 = vector.broadcast %190 : vector<2x64x1xf32> to vector<2x64x64xf32>
    %192 = arith.mulf %187, %191 : vector<2x64x64xf32>
    %193 = arith.truncf %192 : vector<2x64x64xf32> to vector<2x64x64xbf16>
    "tpu.trace_start"() <{level = 10 : i32, message = "bqk,bkd->bqd"}> : () -> ()
    %cst_74 = arith.constant dense<0.000000e+00> : vector<2x64x16xf32>
    %194 = tpu.matmul %193, %181, %cst_74 {dimension_numbers = #tpu.dot_dimension_numbers<[2], [1], [1], [2], [0, 0, 0, 1, 1, 2], [0], [0]>} : vector<2x64x64xbf16>, vector<2x64x16xbf16>, vector<2x64x16xf32> -> vector<2x64x16xf32>
    "tpu.trace_stop"() : () -> ()
    %195 = vector.shape_cast %194 : vector<2x64x16xf32> to vector<128x16xf32>
    %196 = arith.truncf %195 : vector<128x16xf32> to vector<128x16xbf16>
    %c1_75 = arith.constant 1 : index
    %c0_76 = arith.constant 0 : index
    %c0_77 = arith.constant 0 : index
    %197 = vector.load %arg5[%c1_75, %c0_76, %c0_77] : memref<2x64x64xbf16, #tpu.memory_space<vmem>>, vector<1x16x64xbf16>
    %198 = vector.shape_cast %197 : vector<1x16x64xbf16> to vector<16x64xbf16>
    %cst_78 = arith.constant dense<0.000000e+00> : vector<128x64xf32>
    %199 = tpu.matmul %196, %198, %cst_78 {dimension_numbers = #tpu.dot_dimension_numbers<[1], [0], [0], [1], [0, 0, 1, 1], [], []>} : vector<128x16xbf16>, vector<16x64xbf16>, vector<128x64xf32> -> vector<128x64xf32>
    %200 = vector.extract_strided_slice %178 {offsets = [0, 0, 16], sizes = [2, 64, 16], strides = [1, 1, 1]} : vector<2x64x192xbf16> to vector<2x64x16xbf16>
    %201 = vector.extract_strided_slice %178 {offsets = [0, 0, 80], sizes = [2, 64, 16], strides = [1, 1, 1]} : vector<2x64x192xbf16> to vector<2x64x16xbf16>
    %202 = vector.extract_strided_slice %178 {offsets = [0, 0, 144], sizes = [2, 64, 16], strides = [1, 1, 1]} : vector<2x64x192xbf16> to vector<2x64x16xbf16>
    "tpu.trace_start"() <{level = 10 : i32, message = "bqd,bkd->bqk"}> : () -> ()
    %cst_79 = arith.constant dense<0.000000e+00> : vector<2x64x64xf32>
    %203 = tpu.matmul %200, %201, %cst_79 {dimension_numbers = #tpu.dot_dimension_numbers<[2], [2], [1], [1], [0, 0, 0, 1, 1, 1], [0], [0]>} : vector<2x64x16xbf16>, vector<2x64x16xbf16>, vector<2x64x64xf32> -> vector<2x64x64xf32>
    "tpu.trace_stop"() : () -> ()
    %cst_80 = arith.constant dense<0xFF800000> : vector<2x64xf32>
    %204 = vector.multi_reduction <maximumf>, %203, %cst_80 [2] : vector<2x64x64xf32> to vector<2x64xf32>
    %205 = vector.shape_cast %204 : vector<2x64xf32> to vector<2x64x1xf32>
    %206 = vector.broadcast %205 : vector<2x64x1xf32> to vector<2x64x64xf32>
    %207 = arith.subf %203, %206 : vector<2x64x64xf32>
    %208 = math.exp %207 : vector<2x64x64xf32>
    %cst_81 = arith.constant dense<0.000000e+00> : vector<2x64xf32>
    %209 = vector.multi_reduction <add>, %208, %cst_81 [2] : vector<2x64x64xf32> to vector<2x64xf32>
    %210 = vector.shape_cast %209 : vector<2x64xf32> to vector<2x64x1xf32>
    %211 = tpu.reciprocal %210 {approx = true} : vector<2x64x1xf32> -> vector<2x64x1xf32>
    %212 = vector.broadcast %211 : vector<2x64x1xf32> to vector<2x64x64xf32>
    %213 = arith.mulf %208, %212 : vector<2x64x64xf32>
    %214 = arith.truncf %213 : vector<2x64x64xf32> to vector<2x64x64xbf16>
    "tpu.trace_start"() <{level = 10 : i32, message = "bqk,bkd->bqd"}> : () -> ()
    %cst_82 = arith.constant dense<0.000000e+00> : vector<2x64x16xf32>
    %215 = tpu.matmul %214, %202, %cst_82 {dimension_numbers = #tpu.dot_dimension_numbers<[2], [1], [1], [2], [0, 0, 0, 1, 1, 2], [0], [0]>} : vector<2x64x64xbf16>, vector<2x64x16xbf16>, vector<2x64x16xf32> -> vector<2x64x16xf32>
    "tpu.trace_stop"() : () -> ()
    %216 = vector.shape_cast %215 : vector<2x64x16xf32> to vector<128x16xf32>
    %217 = arith.truncf %216 : vector<128x16xf32> to vector<128x16xbf16>
    %c1_83 = arith.constant 1 : index
    %c16_84 = arith.constant 16 : index
    %c0_85 = arith.constant 0 : index
    %218 = vector.load %arg5[%c1_83, %c16_84, %c0_85] : memref<2x64x64xbf16, #tpu.memory_space<vmem>>, vector<1x16x64xbf16>
    %219 = vector.shape_cast %218 : vector<1x16x64xbf16> to vector<16x64xbf16>
    %cst_86 = arith.constant dense<0.000000e+00> : vector<128x64xf32>
    %220 = tpu.matmul %217, %219, %cst_86 {dimension_numbers = #tpu.dot_dimension_numbers<[1], [0], [0], [1], [0, 0, 1, 1], [], []>} : vector<128x16xbf16>, vector<16x64xbf16>, vector<128x64xf32> -> vector<128x64xf32>
    %221 = arith.addf %199, %220 : vector<128x64xf32>
    %222 = vector.extract_strided_slice %178 {offsets = [0, 0, 32], sizes = [2, 64, 16], strides = [1, 1, 1]} : vector<2x64x192xbf16> to vector<2x64x16xbf16>
    %223 = vector.extract_strided_slice %178 {offsets = [0, 0, 96], sizes = [2, 64, 16], strides = [1, 1, 1]} : vector<2x64x192xbf16> to vector<2x64x16xbf16>
    %224 = vector.extract_strided_slice %178 {offsets = [0, 0, 160], sizes = [2, 64, 16], strides = [1, 1, 1]} : vector<2x64x192xbf16> to vector<2x64x16xbf16>
    "tpu.trace_start"() <{level = 10 : i32, message = "bqd,bkd->bqk"}> : () -> ()
    %cst_87 = arith.constant dense<0.000000e+00> : vector<2x64x64xf32>
    %225 = tpu.matmul %222, %223, %cst_87 {dimension_numbers = #tpu.dot_dimension_numbers<[2], [2], [1], [1], [0, 0, 0, 1, 1, 1], [0], [0]>} : vector<2x64x16xbf16>, vector<2x64x16xbf16>, vector<2x64x64xf32> -> vector<2x64x64xf32>
    "tpu.trace_stop"() : () -> ()
    %cst_88 = arith.constant dense<0xFF800000> : vector<2x64xf32>
    %226 = vector.multi_reduction <maximumf>, %225, %cst_88 [2] : vector<2x64x64xf32> to vector<2x64xf32>
    %227 = vector.shape_cast %226 : vector<2x64xf32> to vector<2x64x1xf32>
    %228 = vector.broadcast %227 : vector<2x64x1xf32> to vector<2x64x64xf32>
    %229 = arith.subf %225, %228 : vector<2x64x64xf32>
    %230 = math.exp %229 : vector<2x64x64xf32>
    %cst_89 = arith.constant dense<0.000000e+00> : vector<2x64xf32>
    %231 = vector.multi_reduction <add>, %230, %cst_89 [2] : vector<2x64x64xf32> to vector<2x64xf32>
    %232 = vector.shape_cast %231 : vector<2x64xf32> to vector<2x64x1xf32>
    %233 = tpu.reciprocal %232 {approx = true} : vector<2x64x1xf32> -> vector<2x64x1xf32>
    %234 = vector.broadcast %233 : vector<2x64x1xf32> to vector<2x64x64xf32>
    %235 = arith.mulf %230, %234 : vector<2x64x64xf32>
    %236 = arith.truncf %235 : vector<2x64x64xf32> to vector<2x64x64xbf16>
    "tpu.trace_start"() <{level = 10 : i32, message = "bqk,bkd->bqd"}> : () -> ()
    %cst_90 = arith.constant dense<0.000000e+00> : vector<2x64x16xf32>
    %237 = tpu.matmul %236, %224, %cst_90 {dimension_numbers = #tpu.dot_dimension_numbers<[2], [1], [1], [2], [0, 0, 0, 1, 1, 2], [0], [0]>} : vector<2x64x64xbf16>, vector<2x64x16xbf16>, vector<2x64x16xf32> -> vector<2x64x16xf32>
    "tpu.trace_stop"() : () -> ()
    %238 = vector.shape_cast %237 : vector<2x64x16xf32> to vector<128x16xf32>
    %239 = arith.truncf %238 : vector<128x16xf32> to vector<128x16xbf16>
    %c1_91 = arith.constant 1 : index
    %c32_92 = arith.constant 32 : index
    %c0_93 = arith.constant 0 : index
    %240 = vector.load %arg5[%c1_91, %c32_92, %c0_93] : memref<2x64x64xbf16, #tpu.memory_space<vmem>>, vector<1x16x64xbf16>
    %241 = vector.shape_cast %240 : vector<1x16x64xbf16> to vector<16x64xbf16>
    %cst_94 = arith.constant dense<0.000000e+00> : vector<128x64xf32>
    %242 = tpu.matmul %239, %241, %cst_94 {dimension_numbers = #tpu.dot_dimension_numbers<[1], [0], [0], [1], [0, 0, 1, 1], [], []>} : vector<128x16xbf16>, vector<16x64xbf16>, vector<128x64xf32> -> vector<128x64xf32>
    %243 = arith.addf %221, %242 : vector<128x64xf32>
    %244 = vector.extract_strided_slice %178 {offsets = [0, 0, 48], sizes = [2, 64, 16], strides = [1, 1, 1]} : vector<2x64x192xbf16> to vector<2x64x16xbf16>
    %245 = vector.extract_strided_slice %178 {offsets = [0, 0, 112], sizes = [2, 64, 16], strides = [1, 1, 1]} : vector<2x64x192xbf16> to vector<2x64x16xbf16>
    %246 = vector.extract_strided_slice %178 {offsets = [0, 0, 176], sizes = [2, 64, 16], strides = [1, 1, 1]} : vector<2x64x192xbf16> to vector<2x64x16xbf16>
    "tpu.trace_start"() <{level = 10 : i32, message = "bqd,bkd->bqk"}> : () -> ()
    %cst_95 = arith.constant dense<0.000000e+00> : vector<2x64x64xf32>
    %247 = tpu.matmul %244, %245, %cst_95 {dimension_numbers = #tpu.dot_dimension_numbers<[2], [2], [1], [1], [0, 0, 0, 1, 1, 1], [0], [0]>} : vector<2x64x16xbf16>, vector<2x64x16xbf16>, vector<2x64x64xf32> -> vector<2x64x64xf32>
    "tpu.trace_stop"() : () -> ()
    %cst_96 = arith.constant dense<0xFF800000> : vector<2x64xf32>
    %248 = vector.multi_reduction <maximumf>, %247, %cst_96 [2] : vector<2x64x64xf32> to vector<2x64xf32>
    %249 = vector.shape_cast %248 : vector<2x64xf32> to vector<2x64x1xf32>
    %250 = vector.broadcast %249 : vector<2x64x1xf32> to vector<2x64x64xf32>
    %251 = arith.subf %247, %250 : vector<2x64x64xf32>
    %252 = math.exp %251 : vector<2x64x64xf32>
    %cst_97 = arith.constant dense<0.000000e+00> : vector<2x64xf32>
    %253 = vector.multi_reduction <add>, %252, %cst_97 [2] : vector<2x64x64xf32> to vector<2x64xf32>
    %254 = vector.shape_cast %253 : vector<2x64xf32> to vector<2x64x1xf32>
    %255 = tpu.reciprocal %254 {approx = true} : vector<2x64x1xf32> -> vector<2x64x1xf32>
    %256 = vector.broadcast %255 : vector<2x64x1xf32> to vector<2x64x64xf32>
    %257 = arith.mulf %252, %256 : vector<2x64x64xf32>
    %258 = arith.truncf %257 : vector<2x64x64xf32> to vector<2x64x64xbf16>
    "tpu.trace_start"() <{level = 10 : i32, message = "bqk,bkd->bqd"}> : () -> ()
    %cst_98 = arith.constant dense<0.000000e+00> : vector<2x64x16xf32>
    %259 = tpu.matmul %258, %246, %cst_98 {dimension_numbers = #tpu.dot_dimension_numbers<[2], [1], [1], [2], [0, 0, 0, 1, 1, 2], [0], [0]>} : vector<2x64x64xbf16>, vector<2x64x16xbf16>, vector<2x64x16xf32> -> vector<2x64x16xf32>
    "tpu.trace_stop"() : () -> ()
    %260 = vector.shape_cast %259 : vector<2x64x16xf32> to vector<128x16xf32>
    %261 = arith.truncf %260 : vector<128x16xf32> to vector<128x16xbf16>
    %c1_99 = arith.constant 1 : index
    %c48_100 = arith.constant 48 : index
    %c0_101 = arith.constant 0 : index
    %262 = vector.load %arg5[%c1_99, %c48_100, %c0_101] : memref<2x64x64xbf16, #tpu.memory_space<vmem>>, vector<1x16x64xbf16>
    %263 = vector.shape_cast %262 : vector<1x16x64xbf16> to vector<16x64xbf16>
    %cst_102 = arith.constant dense<0.000000e+00> : vector<128x64xf32>
    %264 = tpu.matmul %261, %263, %cst_102 {dimension_numbers = #tpu.dot_dimension_numbers<[1], [0], [0], [1], [0, 0, 1, 1], [], []>} : vector<128x16xbf16>, vector<16x64xbf16>, vector<128x64xf32> -> vector<128x64xf32>
    %265 = arith.addf %243, %264 : vector<128x64xf32>
    %c9 = arith.constant 9 : index
    %c0_103 = arith.constant 0 : index
    %266 = vector.load %arg8[%c9, %c0_103] : memref<17x192xf32, #tpu.memory_space<vmem>>, vector<1x64xf32>
    %267 = vector.broadcast %266 : vector<1x64xf32> to vector<128x64xf32>
    %268 = arith.addf %265, %267 : vector<128x64xf32>
    %269 = arith.addf %169, %268 : vector<128x64xf32>
    %c10 = arith.constant 10 : index
    %c0_104 = arith.constant 0 : index
    %270 = vector.load %arg8[%c10, %c0_104] : memref<17x192xf32, #tpu.memory_space<vmem>>, vector<1x64xf32>
    %c11 = arith.constant 11 : index
    %c0_105 = arith.constant 0 : index
    %271 = vector.load %arg8[%c11, %c0_105] : memref<17x192xf32, #tpu.memory_space<vmem>>, vector<1x64xf32>
    %cst_106 = arith.constant dense<0.000000e+00> : vector<128xf32>
    %272 = vector.multi_reduction <add>, %269, %cst_106 [1] : vector<128x64xf32> to vector<128xf32>
    %273 = vector.shape_cast %272 : vector<128xf32> to vector<128x1xf32>
    %274 = arith.mulf %269, %269 : vector<128x64xf32>
    %cst_107 = arith.constant dense<0.000000e+00> : vector<128xf32>
    %275 = vector.multi_reduction <add>, %274, %cst_107 [1] : vector<128x64xf32> to vector<128xf32>
    %276 = vector.shape_cast %275 : vector<128xf32> to vector<128x1xf32>
    %cst_108 = arith.constant 1.562500e-02 : f32
    %277 = vector.broadcast %cst_108 : f32 to vector<128x1xf32>
    %278 = arith.mulf %273, %277 : vector<128x1xf32>
    %cst_109 = arith.constant 1.562500e-02 : f32
    %279 = vector.broadcast %cst_109 : f32 to vector<128x1xf32>
    %280 = arith.mulf %276, %279 : vector<128x1xf32>
    %281 = arith.mulf %278, %278 : vector<128x1xf32>
    %282 = arith.subf %280, %281 : vector<128x1xf32>
    %283 = vector.broadcast %278 : vector<128x1xf32> to vector<128x64xf32>
    %284 = arith.subf %269, %283 : vector<128x64xf32>
    %cst_110 = arith.constant 9.99999974E-6 : f32
    %285 = vector.broadcast %cst_110 : f32 to vector<128x1xf32>
    %286 = arith.addf %282, %285 : vector<128x1xf32>
    %287 = math.rsqrt %286 : vector<128x1xf32>
    %288 = vector.broadcast %287 : vector<128x1xf32> to vector<128x64xf32>
    %289 = arith.mulf %284, %288 : vector<128x64xf32>
    %290 = vector.broadcast %270 : vector<1x64xf32> to vector<128x64xf32>
    %291 = arith.mulf %289, %290 : vector<128x64xf32>
    %292 = vector.broadcast %271 : vector<1x64xf32> to vector<128x64xf32>
    %293 = arith.addf %291, %292 : vector<128x64xf32>
    %294 = arith.truncf %293 : vector<128x64xf32> to vector<128x64xbf16>
    %c1_111 = arith.constant 1 : index
    %c0_112 = arith.constant 0 : index
    %c0_113 = arith.constant 0 : index
    %295 = vector.load %arg6[%c1_111, %c0_112, %c0_113] : memref<2x64x128xbf16, #tpu.memory_space<vmem>>, vector<1x64x128xbf16>
    %296 = vector.shape_cast %295 : vector<1x64x128xbf16> to vector<64x128xbf16>
    %cst_114 = arith.constant dense<0.000000e+00> : vector<128x128xf32>
    %297 = tpu.matmul %294, %296, %cst_114 {dimension_numbers = #tpu.dot_dimension_numbers<[1], [0], [0], [1], [0, 0, 1, 1], [], []>} : vector<128x64xbf16>, vector<64x128xbf16>, vector<128x128xf32> -> vector<128x128xf32>
    %c12 = arith.constant 12 : index
    %c0_115 = arith.constant 0 : index
    %298 = vector.load %arg8[%c12, %c0_115] : memref<17x192xf32, #tpu.memory_space<vmem>>, vector<1x128xf32>
    %299 = vector.broadcast %298 : vector<1x128xf32> to vector<128x128xf32>
    %300 = arith.addf %297, %299 : vector<128x128xf32>
    %cst_116 = arith.constant 0.000000e+00 : f32
    %301 = vector.broadcast %cst_116 : f32 to vector<128x128xf32>
    %302 = arith.maximumf %300, %301 : vector<128x128xf32>
    %303 = arith.truncf %302 : vector<128x128xf32> to vector<128x128xbf16>
    %c1_117 = arith.constant 1 : index
    %c0_118 = arith.constant 0 : index
    %c0_119 = arith.constant 0 : index
    %304 = vector.load %arg7[%c1_117, %c0_118, %c0_119] : memref<2x128x64xbf16, #tpu.memory_space<vmem>>, vector<1x128x64xbf16>
    %305 = vector.shape_cast %304 : vector<1x128x64xbf16> to vector<128x64xbf16>
    %cst_120 = arith.constant dense<0.000000e+00> : vector<128x64xf32>
    %306 = tpu.matmul %303, %305, %cst_120 {dimension_numbers = #tpu.dot_dimension_numbers<[1], [0], [0], [1], [0, 0, 1, 1], [], []>} : vector<128x128xbf16>, vector<128x64xbf16>, vector<128x64xf32> -> vector<128x64xf32>
    %c13 = arith.constant 13 : index
    %c0_121 = arith.constant 0 : index
    %307 = vector.load %arg8[%c13, %c0_121] : memref<17x192xf32, #tpu.memory_space<vmem>>, vector<1x64xf32>
    %308 = vector.broadcast %307 : vector<1x64xf32> to vector<128x64xf32>
    %309 = arith.addf %306, %308 : vector<128x64xf32>
    %310 = arith.addf %293, %309 : vector<128x64xf32>
    %c14 = arith.constant 14 : index
    %c0_122 = arith.constant 0 : index
    %311 = vector.load %arg8[%c14, %c0_122] : memref<17x192xf32, #tpu.memory_space<vmem>>, vector<1x64xf32>
    %c15 = arith.constant 15 : index
    %c0_123 = arith.constant 0 : index
    %312 = vector.load %arg8[%c15, %c0_123] : memref<17x192xf32, #tpu.memory_space<vmem>>, vector<1x64xf32>
    %cst_124 = arith.constant dense<0.000000e+00> : vector<128xf32>
    %313 = vector.multi_reduction <add>, %310, %cst_124 [1] : vector<128x64xf32> to vector<128xf32>
    %314 = vector.shape_cast %313 : vector<128xf32> to vector<128x1xf32>
    %315 = arith.mulf %310, %310 : vector<128x64xf32>
    %cst_125 = arith.constant dense<0.000000e+00> : vector<128xf32>
    %316 = vector.multi_reduction <add>, %315, %cst_125 [1] : vector<128x64xf32> to vector<128xf32>
    %317 = vector.shape_cast %316 : vector<128xf32> to vector<128x1xf32>
    %cst_126 = arith.constant 1.562500e-02 : f32
    %318 = vector.broadcast %cst_126 : f32 to vector<128x1xf32>
    %319 = arith.mulf %314, %318 : vector<128x1xf32>
    %cst_127 = arith.constant 1.562500e-02 : f32
    %320 = vector.broadcast %cst_127 : f32 to vector<128x1xf32>
    %321 = arith.mulf %317, %320 : vector<128x1xf32>
    %322 = arith.mulf %319, %319 : vector<128x1xf32>
    %323 = arith.subf %321, %322 : vector<128x1xf32>
    %324 = vector.broadcast %319 : vector<128x1xf32> to vector<128x64xf32>
    %325 = arith.subf %310, %324 : vector<128x64xf32>
    %cst_128 = arith.constant 9.99999974E-6 : f32
    %326 = vector.broadcast %cst_128 : f32 to vector<128x1xf32>
    %327 = arith.addf %323, %326 : vector<128x1xf32>
    %328 = math.rsqrt %327 : vector<128x1xf32>
    %329 = vector.broadcast %328 : vector<128x1xf32> to vector<128x64xf32>
    %330 = arith.mulf %325, %329 : vector<128x64xf32>
    %331 = vector.broadcast %311 : vector<1x64xf32> to vector<128x64xf32>
    %332 = arith.mulf %330, %331 : vector<128x64xf32>
    %333 = vector.broadcast %312 : vector<1x64xf32> to vector<128x64xf32>
    %334 = arith.addf %332, %333 : vector<128x64xf32>
    %335 = vector.shape_cast %334 : vector<128x64xf32> to vector<2x64x64xf32>
    %336 = vector.extract_strided_slice %335 {offsets = [0, 0, 0], sizes = [2, 1, 64], strides = [1, 1, 1]} : vector<2x64x64xf32> to vector<2x1x64xf32>
    %337 = vector.shape_cast %336 : vector<2x1x64xf32> to vector<2x64xf32>
    %338 = vector.extract_strided_slice %335 {offsets = [0, 1, 0], sizes = [2, 1, 64], strides = [1, 1, 1]} : vector<2x64x64xf32> to vector<2x1x64xf32>
    %339 = vector.shape_cast %338 : vector<2x1x64xf32> to vector<2x64xf32>
    %340 = vector.extract_strided_slice %335 {offsets = [0, 2, 0], sizes = [2, 1, 64], strides = [1, 1, 1]} : vector<2x64x64xf32> to vector<2x1x64xf32>
    %341 = vector.shape_cast %340 : vector<2x1x64xf32> to vector<2x64xf32>
    %342 = vector.extract_strided_slice %335 {offsets = [0, 3, 0], sizes = [2, 1, 64], strides = [1, 1, 1]} : vector<2x64x64xf32> to vector<2x1x64xf32>
    %343 = vector.shape_cast %342 : vector<2x1x64xf32> to vector<2x64xf32>
    %344 = vector.extract_strided_slice %335 {offsets = [0, 4, 0], sizes = [2, 1, 64], strides = [1, 1, 1]} : vector<2x64x64xf32> to vector<2x1x64xf32>
    %345 = vector.shape_cast %344 : vector<2x1x64xf32> to vector<2x64xf32>
    %346 = vector.extract_strided_slice %335 {offsets = [0, 5, 0], sizes = [2, 1, 64], strides = [1, 1, 1]} : vector<2x64x64xf32> to vector<2x1x64xf32>
    %347 = vector.shape_cast %346 : vector<2x1x64xf32> to vector<2x64xf32>
    %348 = vector.extract_strided_slice %335 {offsets = [0, 6, 0], sizes = [2, 1, 64], strides = [1, 1, 1]} : vector<2x64x64xf32> to vector<2x1x64xf32>
    %349 = vector.shape_cast %348 : vector<2x1x64xf32> to vector<2x64xf32>
    %350 = vector.extract_strided_slice %335 {offsets = [0, 7, 0], sizes = [2, 1, 64], strides = [1, 1, 1]} : vector<2x64x64xf32> to vector<2x1x64xf32>
    %351 = vector.shape_cast %350 : vector<2x1x64xf32> to vector<2x64xf32>
    %352 = tpu.concatenate %337, %339, %341, %343, %345, %347, %349, %351 in 1 : vector<2x64xf32>, vector<2x64xf32>, vector<2x64xf32>, vector<2x64xf32>, vector<2x64xf32>, vector<2x64xf32>, vector<2x64xf32>, vector<2x64xf32> -> vector<2x512xf32>
    %353 = vector.extract_strided_slice %335 {offsets = [0, 8, 0], sizes = [2, 1, 64], strides = [1, 1, 1]} : vector<2x64x64xf32> to vector<2x1x64xf32>
    %354 = vector.shape_cast %353 : vector<2x1x64xf32> to vector<2x64xf32>
    %355 = vector.extract_strided_slice %335 {offsets = [0, 9, 0], sizes = [2, 1, 64], strides = [1, 1, 1]} : vector<2x64x64xf32> to vector<2x1x64xf32>
    %356 = vector.shape_cast %355 : vector<2x1x64xf32> to vector<2x64xf32>
    %357 = vector.extract_strided_slice %335 {offsets = [0, 10, 0], sizes = [2, 1, 64], strides = [1, 1, 1]} : vector<2x64x64xf32> to vector<2x1x64xf32>
    %358 = vector.shape_cast %357 : vector<2x1x64xf32> to vector<2x64xf32>
    %359 = vector.extract_strided_slice %335 {offsets = [0, 11, 0], sizes = [2, 1, 64], strides = [1, 1, 1]} : vector<2x64x64xf32> to vector<2x1x64xf32>
    %360 = vector.shape_cast %359 : vector<2x1x64xf32> to vector<2x64xf32>
    %361 = vector.extract_strided_slice %335 {offsets = [0, 12, 0], sizes = [2, 1, 64], strides = [1, 1, 1]} : vector<2x64x64xf32> to vector<2x1x64xf32>
    %362 = vector.shape_cast %361 : vector<2x1x64xf32> to vector<2x64xf32>
    %363 = vector.extract_strided_slice %335 {offsets = [0, 13, 0], sizes = [2, 1, 64], strides = [1, 1, 1]} : vector<2x64x64xf32> to vector<2x1x64xf32>
    %364 = vector.shape_cast %363 : vector<2x1x64xf32> to vector<2x64xf32>
    %365 = vector.extract_strided_slice %335 {offsets = [0, 14, 0], sizes = [2, 1, 64], strides = [1, 1, 1]} : vector<2x64x64xf32> to vector<2x1x64xf32>
    %366 = vector.shape_cast %365 : vector<2x1x64xf32> to vector<2x64xf32>
    %367 = vector.extract_strided_slice %335 {offsets = [0, 15, 0], sizes = [2, 1, 64], strides = [1, 1, 1]} : vector<2x64x64xf32> to vector<2x1x64xf32>
    %368 = vector.shape_cast %367 : vector<2x1x64xf32> to vector<2x64xf32>
    %369 = tpu.concatenate %354, %356, %358, %360, %362, %364, %366, %368 in 1 : vector<2x64xf32>, vector<2x64xf32>, vector<2x64xf32>, vector<2x64xf32>, vector<2x64xf32>, vector<2x64xf32>, vector<2x64xf32>, vector<2x64xf32> -> vector<2x512xf32>
    %370 = vector.extract_strided_slice %335 {offsets = [0, 16, 0], sizes = [2, 1, 64], strides = [1, 1, 1]} : vector<2x64x64xf32> to vector<2x1x64xf32>
    %371 = vector.shape_cast %370 : vector<2x1x64xf32> to vector<2x64xf32>
    %372 = vector.extract_strided_slice %335 {offsets = [0, 17, 0], sizes = [2, 1, 64], strides = [1, 1, 1]} : vector<2x64x64xf32> to vector<2x1x64xf32>
    %373 = vector.shape_cast %372 : vector<2x1x64xf32> to vector<2x64xf32>
    %374 = vector.extract_strided_slice %335 {offsets = [0, 18, 0], sizes = [2, 1, 64], strides = [1, 1, 1]} : vector<2x64x64xf32> to vector<2x1x64xf32>
    %375 = vector.shape_cast %374 : vector<2x1x64xf32> to vector<2x64xf32>
    %376 = vector.extract_strided_slice %335 {offsets = [0, 19, 0], sizes = [2, 1, 64], strides = [1, 1, 1]} : vector<2x64x64xf32> to vector<2x1x64xf32>
    %377 = vector.shape_cast %376 : vector<2x1x64xf32> to vector<2x64xf32>
    %378 = vector.extract_strided_slice %335 {offsets = [0, 20, 0], sizes = [2, 1, 64], strides = [1, 1, 1]} : vector<2x64x64xf32> to vector<2x1x64xf32>
    %379 = vector.shape_cast %378 : vector<2x1x64xf32> to vector<2x64xf32>
    %380 = vector.extract_strided_slice %335 {offsets = [0, 21, 0], sizes = [2, 1, 64], strides = [1, 1, 1]} : vector<2x64x64xf32> to vector<2x1x64xf32>
    %381 = vector.shape_cast %380 : vector<2x1x64xf32> to vector<2x64xf32>
    %382 = vector.extract_strided_slice %335 {offsets = [0, 22, 0], sizes = [2, 1, 64], strides = [1, 1, 1]} : vector<2x64x64xf32> to vector<2x1x64xf32>
    %383 = vector.shape_cast %382 : vector<2x1x64xf32> to vector<2x64xf32>
    %384 = vector.extract_strided_slice %335 {offsets = [0, 23, 0], sizes = [2, 1, 64], strides = [1, 1, 1]} : vector<2x64x64xf32> to vector<2x1x64xf32>
    %385 = vector.shape_cast %384 : vector<2x1x64xf32> to vector<2x64xf32>
    %386 = tpu.concatenate %371, %373, %375, %377, %379, %381, %383, %385 in 1 : vector<2x64xf32>, vector<2x64xf32>, vector<2x64xf32>, vector<2x64xf32>, vector<2x64xf32>, vector<2x64xf32>, vector<2x64xf32>, vector<2x64xf32> -> vector<2x512xf32>
    %387 = vector.extract_strided_slice %335 {offsets = [0, 24, 0], sizes = [2, 1, 64], strides = [1, 1, 1]} : vector<2x64x64xf32> to vector<2x1x64xf32>
    %388 = vector.shape_cast %387 : vector<2x1x64xf32> to vector<2x64xf32>
    %389 = vector.extract_strided_slice %335 {offsets = [0, 25, 0], sizes = [2, 1, 64], strides = [1, 1, 1]} : vector<2x64x64xf32> to vector<2x1x64xf32>
    %390 = vector.shape_cast %389 : vector<2x1x64xf32> to vector<2x64xf32>
    %391 = vector.extract_strided_slice %335 {offsets = [0, 26, 0], sizes = [2, 1, 64], strides = [1, 1, 1]} : vector<2x64x64xf32> to vector<2x1x64xf32>
    %392 = vector.shape_cast %391 : vector<2x1x64xf32> to vector<2x64xf32>
    %393 = vector.extract_strided_slice %335 {offsets = [0, 27, 0], sizes = [2, 1, 64], strides = [1, 1, 1]} : vector<2x64x64xf32> to vector<2x1x64xf32>
    %394 = vector.shape_cast %393 : vector<2x1x64xf32> to vector<2x64xf32>
    %395 = vector.extract_strided_slice %335 {offsets = [0, 28, 0], sizes = [2, 1, 64], strides = [1, 1, 1]} : vector<2x64x64xf32> to vector<2x1x64xf32>
    %396 = vector.shape_cast %395 : vector<2x1x64xf32> to vector<2x64xf32>
    %397 = vector.extract_strided_slice %335 {offsets = [0, 29, 0], sizes = [2, 1, 64], strides = [1, 1, 1]} : vector<2x64x64xf32> to vector<2x1x64xf32>
    %398 = vector.shape_cast %397 : vector<2x1x64xf32> to vector<2x64xf32>
    %399 = vector.extract_strided_slice %335 {offsets = [0, 30, 0], sizes = [2, 1, 64], strides = [1, 1, 1]} : vector<2x64x64xf32> to vector<2x1x64xf32>
    %400 = vector.shape_cast %399 : vector<2x1x64xf32> to vector<2x64xf32>
    %401 = vector.extract_strided_slice %335 {offsets = [0, 31, 0], sizes = [2, 1, 64], strides = [1, 1, 1]} : vector<2x64x64xf32> to vector<2x1x64xf32>
    %402 = vector.shape_cast %401 : vector<2x1x64xf32> to vector<2x64xf32>
    %403 = tpu.concatenate %388, %390, %392, %394, %396, %398, %400, %402 in 1 : vector<2x64xf32>, vector<2x64xf32>, vector<2x64xf32>, vector<2x64xf32>, vector<2x64xf32>, vector<2x64xf32>, vector<2x64xf32>, vector<2x64xf32> -> vector<2x512xf32>
    %404 = vector.extract_strided_slice %335 {offsets = [0, 32, 0], sizes = [2, 1, 64], strides = [1, 1, 1]} : vector<2x64x64xf32> to vector<2x1x64xf32>
    %405 = vector.shape_cast %404 : vector<2x1x64xf32> to vector<2x64xf32>
    %406 = vector.extract_strided_slice %335 {offsets = [0, 33, 0], sizes = [2, 1, 64], strides = [1, 1, 1]} : vector<2x64x64xf32> to vector<2x1x64xf32>
    %407 = vector.shape_cast %406 : vector<2x1x64xf32> to vector<2x64xf32>
    %408 = vector.extract_strided_slice %335 {offsets = [0, 34, 0], sizes = [2, 1, 64], strides = [1, 1, 1]} : vector<2x64x64xf32> to vector<2x1x64xf32>
    %409 = vector.shape_cast %408 : vector<2x1x64xf32> to vector<2x64xf32>
    %410 = vector.extract_strided_slice %335 {offsets = [0, 35, 0], sizes = [2, 1, 64], strides = [1, 1, 1]} : vector<2x64x64xf32> to vector<2x1x64xf32>
    %411 = vector.shape_cast %410 : vector<2x1x64xf32> to vector<2x64xf32>
    %412 = vector.extract_strided_slice %335 {offsets = [0, 36, 0], sizes = [2, 1, 64], strides = [1, 1, 1]} : vector<2x64x64xf32> to vector<2x1x64xf32>
    %413 = vector.shape_cast %412 : vector<2x1x64xf32> to vector<2x64xf32>
    %414 = vector.extract_strided_slice %335 {offsets = [0, 37, 0], sizes = [2, 1, 64], strides = [1, 1, 1]} : vector<2x64x64xf32> to vector<2x1x64xf32>
    %415 = vector.shape_cast %414 : vector<2x1x64xf32> to vector<2x64xf32>
    %416 = vector.extract_strided_slice %335 {offsets = [0, 38, 0], sizes = [2, 1, 64], strides = [1, 1, 1]} : vector<2x64x64xf32> to vector<2x1x64xf32>
    %417 = vector.shape_cast %416 : vector<2x1x64xf32> to vector<2x64xf32>
    %418 = vector.extract_strided_slice %335 {offsets = [0, 39, 0], sizes = [2, 1, 64], strides = [1, 1, 1]} : vector<2x64x64xf32> to vector<2x1x64xf32>
    %419 = vector.shape_cast %418 : vector<2x1x64xf32> to vector<2x64xf32>
    %420 = tpu.concatenate %405, %407, %409, %411, %413, %415, %417, %419 in 1 : vector<2x64xf32>, vector<2x64xf32>, vector<2x64xf32>, vector<2x64xf32>, vector<2x64xf32>, vector<2x64xf32>, vector<2x64xf32>, vector<2x64xf32> -> vector<2x512xf32>
    %421 = vector.extract_strided_slice %335 {offsets = [0, 40, 0], sizes = [2, 1, 64], strides = [1, 1, 1]} : vector<2x64x64xf32> to vector<2x1x64xf32>
    %422 = vector.shape_cast %421 : vector<2x1x64xf32> to vector<2x64xf32>
    %423 = vector.extract_strided_slice %335 {offsets = [0, 41, 0], sizes = [2, 1, 64], strides = [1, 1, 1]} : vector<2x64x64xf32> to vector<2x1x64xf32>
    %424 = vector.shape_cast %423 : vector<2x1x64xf32> to vector<2x64xf32>
    %425 = vector.extract_strided_slice %335 {offsets = [0, 42, 0], sizes = [2, 1, 64], strides = [1, 1, 1]} : vector<2x64x64xf32> to vector<2x1x64xf32>
    %426 = vector.shape_cast %425 : vector<2x1x64xf32> to vector<2x64xf32>
    %427 = vector.extract_strided_slice %335 {offsets = [0, 43, 0], sizes = [2, 1, 64], strides = [1, 1, 1]} : vector<2x64x64xf32> to vector<2x1x64xf32>
    %428 = vector.shape_cast %427 : vector<2x1x64xf32> to vector<2x64xf32>
    %429 = vector.extract_strided_slice %335 {offsets = [0, 44, 0], sizes = [2, 1, 64], strides = [1, 1, 1]} : vector<2x64x64xf32> to vector<2x1x64xf32>
    %430 = vector.shape_cast %429 : vector<2x1x64xf32> to vector<2x64xf32>
    %431 = vector.extract_strided_slice %335 {offsets = [0, 45, 0], sizes = [2, 1, 64], strides = [1, 1, 1]} : vector<2x64x64xf32> to vector<2x1x64xf32>
    %432 = vector.shape_cast %431 : vector<2x1x64xf32> to vector<2x64xf32>
    %433 = vector.extract_strided_slice %335 {offsets = [0, 46, 0], sizes = [2, 1, 64], strides = [1, 1, 1]} : vector<2x64x64xf32> to vector<2x1x64xf32>
    %434 = vector.shape_cast %433 : vector<2x1x64xf32> to vector<2x64xf32>
    %435 = vector.extract_strided_slice %335 {offsets = [0, 47, 0], sizes = [2, 1, 64], strides = [1, 1, 1]} : vector<2x64x64xf32> to vector<2x1x64xf32>
    %436 = vector.shape_cast %435 : vector<2x1x64xf32> to vector<2x64xf32>
    %437 = tpu.concatenate %422, %424, %426, %428, %430, %432, %434, %436 in 1 : vector<2x64xf32>, vector<2x64xf32>, vector<2x64xf32>, vector<2x64xf32>, vector<2x64xf32>, vector<2x64xf32>, vector<2x64xf32>, vector<2x64xf32> -> vector<2x512xf32>
    %438 = vector.extract_strided_slice %335 {offsets = [0, 48, 0], sizes = [2, 1, 64], strides = [1, 1, 1]} : vector<2x64x64xf32> to vector<2x1x64xf32>
    %439 = vector.shape_cast %438 : vector<2x1x64xf32> to vector<2x64xf32>
    %440 = vector.extract_strided_slice %335 {offsets = [0, 49, 0], sizes = [2, 1, 64], strides = [1, 1, 1]} : vector<2x64x64xf32> to vector<2x1x64xf32>
    %441 = vector.shape_cast %440 : vector<2x1x64xf32> to vector<2x64xf32>
    %442 = vector.extract_strided_slice %335 {offsets = [0, 50, 0], sizes = [2, 1, 64], strides = [1, 1, 1]} : vector<2x64x64xf32> to vector<2x1x64xf32>
    %443 = vector.shape_cast %442 : vector<2x1x64xf32> to vector<2x64xf32>
    %444 = vector.extract_strided_slice %335 {offsets = [0, 51, 0], sizes = [2, 1, 64], strides = [1, 1, 1]} : vector<2x64x64xf32> to vector<2x1x64xf32>
    %445 = vector.shape_cast %444 : vector<2x1x64xf32> to vector<2x64xf32>
    %446 = vector.extract_strided_slice %335 {offsets = [0, 52, 0], sizes = [2, 1, 64], strides = [1, 1, 1]} : vector<2x64x64xf32> to vector<2x1x64xf32>
    %447 = vector.shape_cast %446 : vector<2x1x64xf32> to vector<2x64xf32>
    %448 = vector.extract_strided_slice %335 {offsets = [0, 53, 0], sizes = [2, 1, 64], strides = [1, 1, 1]} : vector<2x64x64xf32> to vector<2x1x64xf32>
    %449 = vector.shape_cast %448 : vector<2x1x64xf32> to vector<2x64xf32>
    %450 = vector.extract_strided_slice %335 {offsets = [0, 54, 0], sizes = [2, 1, 64], strides = [1, 1, 1]} : vector<2x64x64xf32> to vector<2x1x64xf32>
    %451 = vector.shape_cast %450 : vector<2x1x64xf32> to vector<2x64xf32>
    %452 = vector.extract_strided_slice %335 {offsets = [0, 55, 0], sizes = [2, 1, 64], strides = [1, 1, 1]} : vector<2x64x64xf32> to vector<2x1x64xf32>
    %453 = vector.shape_cast %452 : vector<2x1x64xf32> to vector<2x64xf32>
    %454 = tpu.concatenate %439, %441, %443, %445, %447, %449, %451, %453 in 1 : vector<2x64xf32>, vector<2x64xf32>, vector<2x64xf32>, vector<2x64xf32>, vector<2x64xf32>, vector<2x64xf32>, vector<2x64xf32>, vector<2x64xf32> -> vector<2x512xf32>
    %455 = vector.extract_strided_slice %335 {offsets = [0, 56, 0], sizes = [2, 1, 64], strides = [1, 1, 1]} : vector<2x64x64xf32> to vector<2x1x64xf32>
    %456 = vector.shape_cast %455 : vector<2x1x64xf32> to vector<2x64xf32>
    %457 = vector.extract_strided_slice %335 {offsets = [0, 57, 0], sizes = [2, 1, 64], strides = [1, 1, 1]} : vector<2x64x64xf32> to vector<2x1x64xf32>
    %458 = vector.shape_cast %457 : vector<2x1x64xf32> to vector<2x64xf32>
    %459 = vector.extract_strided_slice %335 {offsets = [0, 58, 0], sizes = [2, 1, 64], strides = [1, 1, 1]} : vector<2x64x64xf32> to vector<2x1x64xf32>
    %460 = vector.shape_cast %459 : vector<2x1x64xf32> to vector<2x64xf32>
    %461 = vector.extract_strided_slice %335 {offsets = [0, 59, 0], sizes = [2, 1, 64], strides = [1, 1, 1]} : vector<2x64x64xf32> to vector<2x1x64xf32>
    %462 = vector.shape_cast %461 : vector<2x1x64xf32> to vector<2x64xf32>
    %463 = vector.extract_strided_slice %335 {offsets = [0, 60, 0], sizes = [2, 1, 64], strides = [1, 1, 1]} : vector<2x64x64xf32> to vector<2x1x64xf32>
    %464 = vector.shape_cast %463 : vector<2x1x64xf32> to vector<2x64xf32>
    %465 = vector.extract_strided_slice %335 {offsets = [0, 61, 0], sizes = [2, 1, 64], strides = [1, 1, 1]} : vector<2x64x64xf32> to vector<2x1x64xf32>
    %466 = vector.shape_cast %465 : vector<2x1x64xf32> to vector<2x64xf32>
    %467 = vector.extract_strided_slice %335 {offsets = [0, 62, 0], sizes = [2, 1, 64], strides = [1, 1, 1]} : vector<2x64x64xf32> to vector<2x1x64xf32>
    %468 = vector.shape_cast %467 : vector<2x1x64xf32> to vector<2x64xf32>
    %469 = vector.extract_strided_slice %335 {offsets = [0, 63, 0], sizes = [2, 1, 64], strides = [1, 1, 1]} : vector<2x64x64xf32> to vector<2x1x64xf32>
    %470 = vector.shape_cast %469 : vector<2x1x64xf32> to vector<2x64xf32>
    %471 = tpu.concatenate %456, %458, %460, %462, %464, %466, %468, %470 in 1 : vector<2x64xf32>, vector<2x64xf32>, vector<2x64xf32>, vector<2x64xf32>, vector<2x64xf32>, vector<2x64xf32>, vector<2x64xf32>, vector<2x64xf32> -> vector<2x512xf32>
    %472 = tpu.concatenate %352, %369, %386, %403, %420, %437, %454, %471 in 1 : vector<2x512xf32>, vector<2x512xf32>, vector<2x512xf32>, vector<2x512xf32>, vector<2x512xf32>, vector<2x512xf32>, vector<2x512xf32>, vector<2x512xf32> -> vector<2x4096xf32>
    tpu.wait_dma2 semaphore(%arg12 : memref<!tpu.dma_semaphore, #tpu.memory_space<semaphore_mem>>) src(%arg9 : memref<4096x128xbf16, #tpu.memory_space<any>>) dst(%arg11 : memref<4096x128xbf16, #tpu.memory_space<vmem>>)
    %473 = arith.truncf %472 : vector<2x4096xf32> to vector<2x4096xbf16>
    %c0_129 = arith.constant 0 : index
    %c0_130 = arith.constant 0 : index
    %474 = vector.load %arg11[%c0_129, %c0_130] : memref<4096x128xbf16, #tpu.memory_space<vmem>>, vector<4096x128xbf16>
    %cst_131 = arith.constant dense<0.000000e+00> : vector<2x128xf32>
    %475 = tpu.matmul %473, %474, %cst_131 {dimension_numbers = #tpu.dot_dimension_numbers<[1], [0], [0], [1], [0, 0, 1, 1], [], []>} : vector<2x4096xbf16>, vector<4096x128xbf16>, vector<2x128xf32> -> vector<2x128xf32>
    %c16_132 = arith.constant 16 : index
    %c0_133 = arith.constant 0 : index
    %476 = vector.load %arg8[%c16_132, %c0_133] : memref<17x192xf32, #tpu.memory_space<vmem>>, vector<1x128xf32>
    %477 = vector.broadcast %476 : vector<1x128xf32> to vector<2x128xf32>
    %478 = arith.addf %475, %477 : vector<2x128xf32>
    %c0_134 = arith.constant 0 : index
    %c0_135 = arith.constant 0 : index
    %479 = vector.load %arg10[%c0_134, %c0_135] : memref<2x128xf32, #tpu.memory_space<vmem>>, vector<2x128xf32>
    tpu.vector_store %arg10[%c0_134, %c0_135], %478 {strides = array<i32>} : memref<2x128xf32, #tpu.memory_space<vmem>>, vector<2x128xf32>,
    return
  }
  func.func @transform_0(%arg0: i32) -> (i32, i32) {
    %c0_i32 = arith.constant 0 : i32
    %c0_i32_0 = arith.constant 0 : i32
    %c0_i32_1 = arith.constant 0 : i32
    return %c0_i32, %c0_i32_0 : i32, i32
  }
  func.func @transform_1(%arg0: i32) -> (i32, i32) {
    %c0_i32 = arith.constant 0 : i32
    %c0_i32_0 = arith.constant 0 : i32
    %c0_i32_1 = arith.constant 0 : i32
    return %c0_i32, %c0_i32_0 : i32, i32
  }
  func.func @transform_2(%arg0: i32) -> (i32, i32) {
    %c0_i32 = arith.constant 0 : i32
    %c0_i32_0 = arith.constant 0 : i32
    %c0_i32_1 = arith.constant 0 : i32
    return %c0_i32, %c0_i32_0 : i32, i32
  }
  func.func @transform_3(%arg0: i32) -> (i32, i32, i32) {
    %c0_i32 = arith.constant 0 : i32
    %c0_i32_0 = arith.constant 0 : i32
    %c0_i32_1 = arith.constant 0 : i32
    %c0_i32_2 = arith.constant 0 : i32
    return %c0_i32, %c0_i32_0, %c0_i32_1 : i32, i32, i32
  }
  func.func @transform_4(%arg0: i32) -> (i32, i32, i32) {
    %c0_i32 = arith.constant 0 : i32
    %c0_i32_0 = arith.constant 0 : i32
    %c0_i32_1 = arith.constant 0 : i32
    %c0_i32_2 = arith.constant 0 : i32
    return %c0_i32, %c0_i32_0, %c0_i32_1 : i32, i32, i32
  }
  func.func @transform_5(%arg0: i32) -> (i32, i32, i32) {
    %c0_i32 = arith.constant 0 : i32
    %c0_i32_0 = arith.constant 0 : i32
    %c0_i32_1 = arith.constant 0 : i32
    %c0_i32_2 = arith.constant 0 : i32
    return %c0_i32, %c0_i32_0, %c0_i32_1 : i32, i32, i32
  }
  func.func @transform_6(%arg0: i32) -> (i32, i32, i32) {
    %c0_i32 = arith.constant 0 : i32
    %c0_i32_0 = arith.constant 0 : i32
    %c0_i32_1 = arith.constant 0 : i32
    %c0_i32_2 = arith.constant 0 : i32
    return %c0_i32, %c0_i32_0, %c0_i32_1 : i32, i32, i32
  }
  func.func @transform_7(%arg0: i32) -> (i32, i32) {
    %c0_i32 = arith.constant 0 : i32
    %c0_i32_0 = arith.constant 0 : i32
    %c0_i32_1 = arith.constant 0 : i32
    return %c0_i32, %c0_i32_0 : i32, i32
  }
  func.func @transform_9(%arg0: i32) -> (i32, i32) {
    %c0_i32 = arith.constant 0 : i32
    %c0_i32_0 = arith.constant 0 : i32
    %c0_i32_1 = arith.constant 0 : i32
    return %c0_i32, %c0_i32_0 : i32, i32
  }
}

</mosaic_0001>

<bundles_post_ra>
// kernel: vit_forward.1
= control target key start
LH: loop header
LB: loop body
LE: loop exit
PB: predicated region body
PF: predicated region fallthrough
CT: control target
= control target key end

     0   :  { %14 = vsyncpa [#allocation5], 0  ;;  %s18896_s0 = inlined_call_operand.vmem [shape: bf16[128,64], index: 0, kind: input, shape index: {}]   ;;  %s18897_s1 = inlined_call_operand.vmem [shape: bf16[64,64], index: 1, kind: input, shape index: {}]   ;;  %s18898_s2 = inlined_call_operand.vmem [shape: f32[128,64], index: 2, kind: input, shape index: {}]   ;;  %s18899_s3 = inlined_call_operand.vmem [shape: bf16[2,64,192], index: 3, kind: input, shape index: {}]   ;;  %s18900_s4 = inlined_call_operand.vmem [shape: bf16[2,64,64], index: 4, kind: input, shape index: {}]   ;;  %s18901_s5 = inlined_call_operand.vmem [shape: bf16[2,64,128], index: 5, kind: input, shape index: {}]   ;;  %s18902_s6 = inlined_call_operand.vmem [shape: bf16[2,128,64], index: 6, kind: input, shape index: {}]   ;;  %s18903_s7 = inlined_call_operand.vmem [shape: f32[17,192], index: 7, kind: input, shape index: {}]   ;;  %s18904_s8 = inlined_call_operand.vmem [shape: bf16[4096,128], index: 8, kind: input, shape index: {}]   ;;  %s18905_s9 = inlined_call_operand.hbm [shape: f32[2,128], index: 9, kind: output, shape index: {}]  }
   0x1   :  { %v13070_v0 = vld [vmem:[%s18904_s8] sm:$0xff]  ;;  %v13075_v1 = vld [vmem:[%s18904_s8 + $0x8] sm:$0xff]  ;;  %v13080_v2 = vld [vmem:[%s18904_s8 + $0x10] sm:$0xff] }
   0x2   :  { %18966 = vst [vmem:[#allocation9_spill] sm:$0xff] %v13070_v0  ;;  %18967 = vst [vmem:[#allocation10_spill] sm:$0xff] %v13075_v1  ;;  %v13085_v3 = vld [vmem:[%s18904_s8 + $0x18] sm:$0xff]  ;;  %v13090_v4 = vld [vmem:[%s18904_s8 + $0x20] sm:$0xff] }
   0x3   :  { %18968 = vst [vmem:[#allocation11_spill] sm:$0xff] %v13080_v2  ;;  %18969 = vst [vmem:[#allocation12_spill] sm:$0xff] %v13085_v3  ;;  %v13095_v5 = vld [vmem:[%s18904_s8 + $0x28] sm:$0xff]  ;;  %v13100_v6 = vld [vmem:[%s18904_s8 + $0x30] sm:$0xff] }
   0x4   :  { %18970 = vst [vmem:[#allocation13_spill] sm:$0xff] %v13090_v4  ;;  %18971 = vst [vmem:[#allocation14_spill] sm:$0xff] %v13095_v5  ;;  %v13105_v7 = vld [vmem:[%s18904_s8 + $0x38] sm:$0xff]  ;;  %v13110_v8 = vld [vmem:[%s18904_s8 + $0x40] sm:$0xff] }
   0x5   :  { %18972 = vst [vmem:[#allocation15_spill] sm:$0xff] %v13100_v6  ;;  %18973 = vst [vmem:[#allocation16_spill] sm:$0xff] %v13105_v7  ;;  %v13115_v9 = vld [vmem:[%s18904_s8 + $0x48] sm:$0xff]  ;;  %v13120_v10 = vld [vmem:[%s18904_s8 + $0x50] sm:$0xff] }
   0x6   :  { %18974 = vst [vmem:[#allocation17_spill] sm:$0xff] %v13110_v8  ;;  %18975 = vst [vmem:[#allocation18_spill] sm:$0xff] %v13115_v9  ;;  %v13125_v11 = vld [vmem:[%s18904_s8 + $0x58] sm:$0xff]  ;;  %v13130_v12 = vld [vmem:[%s18904_s8 + $0x60] sm:$0xff] }
   0x7   :  { %18976 = vst [vmem:[#allocation19_spill] sm:$0xff] %v13120_v10  ;;  %18977 = vst [vmem:[#allocation20_spill] sm:$0xff] %v13125_v11  ;;  %v13135_v13 = vld [vmem:[%s18904_s8 + $0x68] sm:$0xff]  ;;  %v13140_v14 = vld [vmem:[%s18904_s8 + $0x70] sm:$0xff] }
   0x8   :  { %18978 = vst [vmem:[#allocation21_spill] sm:$0xff] %v13130_v12  ;;  %18979 = vst [vmem:[#allocation22_spill] sm:$0xff] %v13135_v13  ;;  %v13145_v15 = vld [vmem:[%s18904_s8 + $0x78] sm:$0xff]  ;;  %v13150_v16 = vld [vmem:[%s18904_s8 + $0x80] sm:$0xff] }
   0x9   :  { %18980 = vst [vmem:[#allocation23_spill] sm:$0xff] %v13140_v14  ;;  %18981 = vst [vmem:[#allocation24_spill] sm:$0xff] %v13145_v15  ;;  %v13155_v17 = vld [vmem:[%s18904_s8 + $0x88] sm:$0xff]  ;;  %v13160_v18 = vld [vmem:[%s18904_s8 + $0x90] sm:$0xff] }
   0xa   :  { %18982 = vst [vmem:[#allocation25_spill] sm:$0xff] %v13150_v16  ;;  %18983 = vst [vmem:[#allocation26_spill] sm:$0xff] %v13155_v17  ;;  %v13165_v19 = vld [vmem:[%s18904_s8 + $0x98] sm:$0xff]  ;;  %v13170_v20 = vld [vmem:[%s18904_s8 + $0xa0] sm:$0xff] }
   0xb   :  { %18984 = vst [vmem:[#allocation27_spill] sm:$0xff] %v13160_v18  ;;  %18985 = vst [vmem:[#allocation28_spill] sm:$0xff] %v13165_v19  ;;  %v13175_v21 = vld [vmem:[%s18904_s8 + $0xa8] sm:$0xff]  ;;  %v13180_v22 = vld [vmem:[%s18904_s8 + $0xb0] sm:$0xff] }
   0xc   :  { %18986 = vst [vmem:[#allocation29_spill] sm:$0xff] %v13170_v20  ;;  %18987 = vst [vmem:[#allocation30_spill] sm:$0xff] %v13175_v21  ;;  %v13185_v23 = vld [vmem:[%s18904_s8 + $0xb8] sm:$0xff]  ;;  %v13190_v24 = vld [vmem:[%s18904_s8 + $0xc0] sm:$0xff] }
   0xd   :  { %18988 = vst [vmem:[#allocation31_spill] sm:$0xff] %v13180_v22  ;;  %18989 = vst [vmem:[#allocation32_spill] sm:$0xff] %v13185_v23  ;;  %v13195_v25 = vld [vmem:[%s18904_s8 + $0xc8] sm:$0xff]  ;;  %v13200_v26 = vld [vmem:[%s18904_s8 + $0xd0] sm:$0xff] }
   0xe   :  { %18990 = vst [vmem:[#allocation33_spill] sm:$0xff] %v13190_v24  ;;  %18991 = vst [vmem:[#allocation34_spill] sm:$0xff] %v13195_v25  ;;  %v13205_v27 = vld [vmem:[%s18904_s8 + $0xd8] sm:$0xff]  ;;  %v13210_v28 = vld [vmem:[%s18904_s8 + $0xe0] sm:$0xff] }
   0xf   :  { %18992 = vst [vmem:[#allocation35_spill] sm:$0xff] %v13200_v26  ;;  %18993 = vst [vmem:[#allocation36_spill] sm:$0xff] %v13205_v27  ;;  %v13215_v29 = vld [vmem:[%s18904_s8 + $0xe8] sm:$0xff]  ;;  %v13220_v30 = vld [vmem:[%s18904_s8 + $0xf0] sm:$0xff] }
  0x10   :  { %18994 = vst [vmem:[#allocation37_spill] sm:$0xff] %v13210_v28  ;;  %18995 = vst [vmem:[#allocation38_spill] sm:$0xff] %v13215_v29  ;;  %v13225_v31 = vld [vmem:[%s18904_s8 + $0xf8] sm:$0xff]  ;;  %v13230_v32 = vld [vmem:[%s18904_s8 + $0x100] sm:$0xff] }
  0x11   :  { %18996 = vst [vmem:[#allocation39_spill] sm:$0xff] %v13220_v30  ;;  %18997 = vst [vmem:[#allocation40_spill] sm:$0xff] %v13225_v31  ;;  %v13235_v33 = vld [vmem:[%s18904_s8 + $0x108] sm:$0xff]  ;;  %v13240_v34 = vld [vmem:[%s18904_s8 + $0x110] sm:$0xff] }
  0x12   :  { %18998 = vst [vmem:[#allocation41_spill] sm:$0xff] %v13230_v32  ;;  %18999 = vst [vmem:[#allocation42_spill] sm:$0xff] %v13235_v33  ;;  %v13245_v35 = vld [vmem:[%s18904_s8 + $0x118] sm:$0xff]  ;;  %v13250_v36 = vld [vmem:[%s18904_s8 + $0x120] sm:$0xff] }
  0x13   :  { %19000 = vst [vmem:[#allocation43_spill] sm:$0xff] %v13240_v34  ;;  %19001 = vst [vmem:[#allocation44_spill] sm:$0xff] %v13245_v35  ;;  %v13255_v37 = vld [vmem:[%s18904_s8 + $0x128] sm:$0xff]  ;;  %v13260_v38 = vld [vmem:[%s18904_s8 + $0x130] sm:$0xff] }
  0x14   :  { %19002 = vst [vmem:[#allocation45_spill] sm:$0xff] %v13250_v36  ;;  %19003 = vst [vmem:[#allocation46_spill] sm:$0xff] %v13255_v37  ;;  %v13265_v39 = vld [vmem:[%s18904_s8 + $0x138] sm:$0xff]  ;;  %v13270_v40 = vld [vmem:[%s18904_s8 + $0x140] sm:$0xff] }
  0x15   :  { %19004 = vst [vmem:[#allocation47_spill] sm:$0xff] %v13260_v38  ;;  %19005 = vst [vmem:[#allocation48_spill] sm:$0xff] %v13265_v39  ;;  %v13275_v41 = vld [vmem:[%s18904_s8 + $0x148] sm:$0xff]  ;;  %v13280_v42 = vld [vmem:[%s18904_s8 + $0x150] sm:$0xff] }
  0x16   :  { %19006 = vst [vmem:[#allocation49_spill] sm:$0xff] %v13270_v40  ;;  %19007 = vst [vmem:[#allocation50_spill] sm:$0xff] %v13275_v41  ;;  %v13285_v43 = vld [vmem:[%s18904_s8 + $0x158] sm:$0xff]  ;;  %v13290_v44 = vld [vmem:[%s18904_s8 + $0x160] sm:$0xff] }
  0x17   :  { %19008 = vst [vmem:[#allocation51_spill] sm:$0xff] %v13280_v42  ;;  %19009 = vst [vmem:[#allocation52_spill] sm:$0xff] %v13285_v43  ;;  %v13295_v45 = vld [vmem:[%s18904_s8 + $0x168] sm:$0xff]  ;;  %v13300_v46 = vld [vmem:[%s18904_s8 + $0x170] sm:$0xff] }
  0x18   :  { %19010 = vst [vmem:[#allocation53_spill] sm:$0xff] %v13290_v44  ;;  %19011 = vst [vmem:[#allocation54_spill] sm:$0xff] %v13295_v45  ;;  %v13305_v47 = vld [vmem:[%s18904_s8 + $0x178] sm:$0xff]  ;;  %v13310_v48 = vld [vmem:[%s18904_s8 + $0x180] sm:$0xff] }
  0x19   :  { %19012 = vst [vmem:[#allocation55_spill] sm:$0xff] %v13300_v46  ;;  %19013 = vst [vmem:[#allocation56_spill] sm:$0xff] %v13305_v47  ;;  %v13315_v49 = vld [vmem:[%s18904_s8 + $0x188] sm:$0xff]  ;;  %v13320_v50 = vld [vmem:[%s18904_s8 + $0x190] sm:$0xff] }
  0x1a   :  { %19014 = vst [vmem:[#allocation57_spill] sm:$0xff] %v13310_v48  ;;  %19015 = vst [vmem:[#allocation58_spill] sm:$0xff] %v13315_v49  ;;  %v13325_v51 = vld [vmem:[%s18904_s8 + $0x198] sm:$0xff]  ;;  %v13330_v52 = vld [vmem:[%s18904_s8 + $0x1a0] sm:$0xff] }
  0x1b   :  { %19016 = vst [vmem:[#allocation59_spill] sm:$0xff] %v13320_v50  ;;  %19017 = vst [vmem:[#allocation60_spill] sm:$0xff] %v13325_v51  ;;  %v13335_v53 = vld [vmem:[%s18904_s8 + $0x1a8] sm:$0xff]  ;;  %v13340_v54 = vld [vmem:[%s18904_s8 + $0x1b0] sm:$0xff] }
  0x1c   :  { %19018 = vst [vmem:[#allocation61_spill] sm:$0xff] %v13330_v52  ;;  %19019 = vst [vmem:[#allocation62_spill] sm:$0xff] %v13335_v53  ;;  %v13345_v55 = vld [vmem:[%s18904_s8 + $0x1b8] sm:$0xff]  ;;  %v13350_v56 = vld [vmem:[%s18904_s8 + $0x1c0] sm:$0xff] }
  0x1d   :  { %19020 = vst [vmem:[#allocation63_spill] sm:$0xff] %v13340_v54  ;;  %19021 = vst [vmem:[#allocation64_spill] sm:$0xff] %v13345_v55  ;;  %v13355_v57 = vld [vmem:[%s18904_s8 + $0x1c8] sm:$0xff]  ;;  %v13360_v58 = vld [vmem:[%s18904_s8 + $0x1d0] sm:$0xff] }
  0x1e   :  { %19022 = vst [vmem:[#allocation65_spill] sm:$0xff] %v13350_v56  ;;  %19023 = vst [vmem:[#allocation66_spill] sm:$0xff] %v13355_v57  ;;  %v13365_v59 = vld [vmem:[%s18904_s8 + $0x1d8] sm:$0xff]  ;;  %v13370_v60 = vld [vmem:[%s18904_s8 + $0x1e0] sm:$0xff] }
  0x1f   :  { %19024 = vst [vmem:[#allocation67_spill] sm:$0xff] %v13360_v58  ;;  %19025 = vst [vmem:[#allocation68_spill] sm:$0xff] %v13365_v59  ;;  %v13375_v61 = vld [vmem:[%s18904_s8 + $0x1e8] sm:$0xff]  ;;  %v13380_v62 = vld [vmem:[%s18904_s8 + $0x1f0] sm:$0xff] }
  0x20   :  { %19026 = vst [vmem:[#allocation69_spill] sm:$0xff] %v13370_v60  ;;  %19027 = vst [vmem:[#allocation70_spill] sm:$0xff] %v13375_v61  ;;  %v13385_v63 = vld [vmem:[%s18904_s8 + $0x1f8] sm:$0xff]  ;;  %v13390_v55 = vld [vmem:[%s18904_s8 + $0x200] sm:$0xff] }
  0x21   :  { %19028 = vst [vmem:[#allocation71_spill] sm:$0xff] %v13380_v62  ;;  %19029 = vst [vmem:[#allocation72_spill] sm:$0xff] %v13385_v63  ;;  %v13395_v39 = vld [vmem:[%s18904_s8 + $0x208] sm:$0xff]  ;;  %v13400_v47 = vld [vmem:[%s18904_s8 + $0x210] sm:$0xff] }
  0x22   :  { %19030 = vst [vmem:[#allocation73_spill] sm:$0xff] %v13390_v55  ;;  %19031 = vst [vmem:[#allocation74_spill] sm:$0xff] %v13395_v39  ;;  %v13405_v54 = vld [vmem:[%s18904_s8 + $0x218] sm:$0xff]  ;;  %v13410_v63 = vld [vmem:[%s18904_s8 + $0x220] sm:$0xff] }
  0x23   :  { %19032 = vst [vmem:[#allocation75_spill] sm:$0xff] %v13400_v47  ;;  %19033 = vst [vmem:[#allocation76_spill] sm:$0xff] %v13405_v54  ;;  %v13415_v55 = vld [vmem:[%s18904_s8 + $0x228] sm:$0xff]  ;;  %v13420_v39 = vld [vmem:[%s18904_s8 + $0x230] sm:$0xff] }
  0x24   :  { %19034 = vst [vmem:[#allocation77_spill] sm:$0xff] %v13410_v63  ;;  %19035 = vst [vmem:[#allocation78_spill] sm:$0xff] %v13415_v55  ;;  %v13425_v47 = vld [vmem:[%s18904_s8 + $0x238] sm:$0xff]  ;;  %v13430_v54 = vld [vmem:[%s18904_s8 + $0x240] sm:$0xff] }
  0x25   :  { %19036 = vst [vmem:[#allocation79_spill] sm:$0xff] %v13420_v39  ;;  %19037 = vst [vmem:[#allocation80_spill] sm:$0xff] %v13425_v47  ;;  %v13435_v63 = vld [vmem:[%s18904_s8 + $0x248] sm:$0xff]  ;;  %v13440_v55 = vld [vmem:[%s18904_s8 + $0x250] sm:$0xff] }
  0x26   :  { %19038 = vst [vmem:[#allocation81_spill] sm:$0xff] %v13430_v54  ;;  %19039 = vst [vmem:[#allocation82_spill] sm:$0xff] %v13435_v63  ;;  %v13445_v39 = vld [vmem:[%s18904_s8 + $0x258] sm:$0xff]  ;;  %v13450_v47 = vld [vmem:[%s18904_s8 + $0x260] sm:$0xff] }
  0x27   :  { %19040 = vst [vmem:[#allocation83_spill] sm:$0xff] %v13440_v55  ;;  %19041 = vst [vmem:[#allocation84_spill] sm:$0xff] %v13445_v39  ;;  %v13455_v54 = vld [vmem:[%s18904_s8 + $0x268] sm:$0xff]  ;;  %v13460_v63 = vld [vmem:[%s18904_s8 + $0x270] sm:$0xff] }
  0x28   :  { %19042 = vst [vmem:[#allocation85_spill] sm:$0xff] %v13450_v47  ;;  %19043 = vst [vmem:[#allocation86_spill] sm:$0xff] %v13455_v54  ;;  %v13465_v55 = vld [vmem:[%s18904_s8 + $0x278] sm:$0xff]  ;;  %v13470_v39 = vld [vmem:[%s18904_s8 + $0x280] sm:$0xff] }
  0x29   :  { %19044 = vst [vmem:[#allocation87_spill] sm:$0xff] %v13460_v63  ;;  %19045 = vst [vmem:[#allocation88_spill] sm:$0xff] %v13465_v55  ;;  %v13475_v47 = vld [vmem:[%s18904_s8 + $0x288] sm:$0xff]  ;;  %v13480_v54 = vld [vmem:[%s18904_s8 + $0x290] sm:$0xff] }
  0x2a   :  { %19046 = vst [vmem:[#allocation89_spill] sm:$0xff] %v13470_v39  ;;  %19047 = vst [vmem:[#allocation90_spill] sm:$0xff] %v13475_v47  ;;  %v13485_v63 = vld [vmem:[%s18904_s8 + $0x298] sm:$0xff]  ;;  %v13490_v55 = vld [vmem:[%s18904_s8 + $0x2a0] sm:$0xff] }
  0x2b   :  { %19048 = vst [vmem:[#allocation91_spill] sm:$0xff] %v13480_v54  ;;  %19049 = vst [vmem:[#allocation92_spill] sm:$0xff] %v13485_v63  ;;  %v13495_v39 = vld [vmem:[%s18904_s8 + $0x2a8] sm:$0xff]  ;;  %v13500_v47 = vld [vmem:[%s18904_s8 + $0x2b0] sm:$0xff] }
  0x2c   :  { %19050 = vst [vmem:[#allocation93_spill] sm:$0xff] %v13490_v55  ;;  %19051 = vst [vmem:[#allocation94_spill] sm:$0xff] %v13495_v39  ;;  %v13505_v54 = vld [vmem:[%s18904_s8 + $0x2b8] sm:$0xff]  ;;  %v13510_v63 = vld [vmem:[%s18904_s8 + $0x2c0] sm:$0xff] }
  0x2d   :  { %19052 = vst [vmem:[#allocation95_spill] sm:$0xff] %v13500_v47  ;;  %19053 = vst [vmem:[#allocation96_spill] sm:$0xff] %v13505_v54  ;;  %v13515_v55 = vld [vmem:[%s18904_s8 + $0x2c8] sm:$0xff]  ;;  %v13520_v39 = vld [vmem:[%s18904_s8 + $0x2d0] sm:$0xff] }
  0x2e   :  { %19054 = vst [vmem:[#allocation97_spill] sm:$0xff] %v13510_v63  ;;  %19055 = vst [vmem:[#allocation98_spill] sm:$0xff] %v13515_v55  ;;  %v13525_v47 = vld [vmem:[%s18904_s8 + $0x2d8] sm:$0xff]  ;;  %v13530_v54 = vld [vmem:[%s18904_s8 + $0x2e0] sm:$0xff] }
  0x2f   :  { %19056 = vst [vmem:[#allocation99_spill] sm:$0xff] %v13520_v39  ;;  %19057 = vst [vmem:[#allocation100_spill] sm:$0xff] %v13525_v47  ;;  %v13535_v63 = vld [vmem:[%s18904_s8 + $0x2e8] sm:$0xff]  ;;  %v13540_v55 = vld [vmem:[%s18904_s8 + $0x2f0] sm:$0xff] }
  0x30   :  { %19058 = vst [vmem:[#allocation101_spill] sm:$0xff] %v13530_v54  ;;  %19059 = vst [vmem:[#allocation102_spill] sm:$0xff] %v13535_v63  ;;  %v13545_v39 = vld [vmem:[%s18904_s8 + $0x2f8] sm:$0xff]  ;;  %v13550_v47 = vld [vmem:[%s18904_s8 + $0x300] sm:$0xff] }
  0x31   :  { %19060 = vst [vmem:[#allocation103_spill] sm:$0xff] %v13540_v55  ;;  %19061 = vst [vmem:[#allocation104_spill] sm:$0xff] %v13545_v39  ;;  %v13555_v54 = vld [vmem:[%s18904_s8 + $0x308] sm:$0xff]  ;;  %v13560_v63 = vld [vmem:[%s18904_s8 + $0x310] sm:$0xff] }
  0x32   :  { %19062 = vst [vmem:[#allocation105_spill] sm:$0xff] %v13550_v47  ;;  %19063 = vst [vmem:[#allocation106_spill] sm:$0xff] %v13555_v54  ;;  %v13565_v55 = vld [vmem:[%s18904_s8 + $0x318] sm:$0xff]  ;;  %v13570_v39 = vld [vmem:[%s18904_s8 + $0x320] sm:$0xff] }
  0x33   :  { %19064 = vst [vmem:[#allocation107_spill] sm:$0xff] %v13560_v63  ;;  %19065 = vst [vmem:[#allocation108_spill] sm:$0xff] %v13565_v55  ;;  %v13575_v47 = vld [vmem:[%s18904_s8 + $0x328] sm:$0xff]  ;;  %v13580_v54 = vld [vmem:[%s18904_s8 + $0x330] sm:$0xff] }
  0x34   :  { %19066 = vst [vmem:[#allocation109_spill] sm:$0xff] %v13570_v39  ;;  %19067 = vst [vmem:[#allocation110_spill] sm:$0xff] %v13575_v47  ;;  %v13585_v63 = vld [vmem:[%s18904_s8 + $0x338] sm:$0xff]  ;;  %v13590_v55 = vld [vmem:[%s18904_s8 + $0x340] sm:$0xff] }
  0x35   :  { %19068 = vst [vmem:[#allocation111_spill] sm:$0xff] %v13580_v54  ;;  %19069 = vst [vmem:[#allocation112_spill] sm:$0xff] %v13585_v63  ;;  %v13595_v39 = vld [vmem:[%s18904_s8 + $0x348] sm:$0xff]  ;;  %v13600_v47 = vld [vmem:[%s18904_s8 + $0x350] sm:$0xff] }
  0x36   :  { %19070 = vst [vmem:[#allocation113_spill] sm:$0xff] %v13590_v55  ;;  %19071 = vst [vmem:[#allocation114_spill] sm:$0xff] %v13595_v39  ;;  %v13605_v54 = vld [vmem:[%s18904_s8 + $0x358] sm:$0xff]  ;;  %v13610_v63 = vld [vmem:[%s18904_s8 + $0x360] sm:$0xff] }
  0x37   :  { %19072 = vst [vmem:[#allocation115_spill] sm:$0xff] %v13600_v47  ;;  %19073 = vst [vmem:[#allocation116_spill] sm:$0xff] %v13605_v54  ;;  %v13615_v55 = vld [vmem:[%s18904_s8 + $0x368] sm:$0xff]  ;;  %v13620_v39 = vld [vmem:[%s18904_s8 + $0x370] sm:$0xff] }
  0x38   :  { %19074 = vst [vmem:[#allocation117_spill] sm:$0xff] %v13610_v63  ;;  %19075 = vst [vmem:[#allocation118_spill] sm:$0xff] %v13615_v55  ;;  %v13625_v47 = vld [vmem:[%s18904_s8 + $0x378] sm:$0xff]  ;;  %v13630_v54 = vld [vmem:[%s18904_s8 + $0x380] sm:$0xff] }
  0x39   :  { %19076 = vst [vmem:[#allocation119_spill] sm:$0xff] %v13620_v39  ;;  %19077 = vst [vmem:[#allocation120_spill] sm:$0xff] %v13625_v47  ;;  %v13635_v63 = vld [vmem:[%s18904_s8 + $0x388] sm:$0xff]  ;;  %v13640_v55 = vld [vmem:[%s18904_s8 + $0x390] sm:$0xff] }
  0x3a   :  { %19078 = vst [vmem:[#allocation121_spill] sm:$0xff] %v13630_v54  ;;  %19079 = vst [vmem:[#allocation122_spill] sm:$0xff] %v13635_v63  ;;  %v13645_v39 = vld [vmem:[%s18904_s8 + $0x398] sm:$0xff]  ;;  %v13650_v47 = vld [vmem:[%s18904_s8 + $0x3a0] sm:$0xff] }
  0x3b   :  { %19080 = vst [vmem:[#allocation123_spill] sm:$0xff] %v13640_v55  ;;  %19081 = vst [vmem:[#allocation124_spill] sm:$0xff] %v13645_v39  ;;  %v13655_v54 = vld [vmem:[%s18904_s8 + $0x3a8] sm:$0xff]  ;;  %v13660_v63 = vld [vmem:[%s18904_s8 + $0x3b0] sm:$0xff] }
  0x3c   :  { %19082 = vst [vmem:[#allocation125_spill] sm:$0xff] %v13650_v47  ;;  %19083 = vst [vmem:[#allocation126_spill] sm:$0xff] %v13655_v54  ;;  %v13665_v55 = vld [vmem:[%s18904_s8 + $0x3b8] sm:$0xff]  ;;  %v13670_v39 = vld [vmem:[%s18904_s8 + $0x3c0] sm:$0xff] }
  0x3d   :  { %19084 = vst [vmem:[#allocation127_spill] sm:$0xff] %v13660_v63  ;;  %19085 = vst [vmem:[#allocation128_spill] sm:$0xff] %v13665_v55  ;;  %v13675_v47 = vld [vmem:[%s18904_s8 + $0x3c8] sm:$0xff]  ;;  %v13680_v54 = vld [vmem:[%s18904_s8 + $0x3d0] sm:$0xff] }
  0x3e   :  { %19086 = vst [vmem:[#allocation129_spill] sm:$0xff] %v13670_v39  ;;  %19087 = vst [vmem:[#allocation130_spill] sm:$0xff] %v13675_v47  ;;  %v13685_v63 = vld [vmem:[%s18904_s8 + $0x3d8] sm:$0xff]  ;;  %v13690_v55 = vld [vmem:[%s18904_s8 + $0x3e0] sm:$0xff] }
  0x3f   :  { %19088 = vst [vmem:[#allocation131_spill] sm:$0xff] %v13680_v54  ;;  %19089 = vst [vmem:[#allocation132_spill] sm:$0xff] %v13685_v63  ;;  %v13695_v39 = vld [vmem:[%s18904_s8 + $0x3e8] sm:$0xff]  ;;  %v13700_v47 = vld [vmem:[%s18904_s8 + $0x3f0] sm:$0xff] }
  0x40   :  { %19090 = vst [vmem:[#allocation133_spill] sm:$0xff] %v13690_v55  ;;  %19091 = vst [vmem:[#allocation134_spill] sm:$0xff] %v13695_v39  ;;  %v13705_v54 = vld [vmem:[%s18904_s8 + $0x3f8] sm:$0xff]  ;;  %v13710_v63 = vld [vmem:[%s18904_s8 + $0x400] sm:$0xff] }
  0x41   :  { %19092 = vst [vmem:[#allocation135_spill] sm:$0xff] %v13700_v47  ;;  %19093 = vst [vmem:[#allocation136_spill] sm:$0xff] %v13705_v54  ;;  %v13715_v55 = vld [vmem:[%s18904_s8 + $0x408] sm:$0xff]  ;;  %v13720_v39 = vld [vmem:[%s18904_s8 + $0x410] sm:$0xff] }
  0x42   :  { %19094 = vst [vmem:[#allocation137_spill] sm:$0xff] %v13710_v63  ;;  %19095 = vst [vmem:[#allocation138_spill] sm:$0xff] %v13715_v55  ;;  %v13725_v47 = vld [vmem:[%s18904_s8 + $0x418] sm:$0xff]  ;;  %v13730_v54 = vld [vmem:[%s18904_s8 + $0x420] sm:$0xff] }
  0x43   :  { %19096 = vst [vmem:[#allocation139_spill] sm:$0xff] %v13720_v39  ;;  %19097 = vst [vmem:[#allocation140_spill] sm:$0xff] %v13725_v47  ;;  %v13735_v63 = vld [vmem:[%s18904_s8 + $0x428] sm:$0xff]  ;;  %v13740_v55 = vld [vmem:[%s18904_s8 + $0x430] sm:$0xff] }
  0x44   :  { %19098 = vst [vmem:[#allocation141_spill] sm:$0xff] %v13730_v54  ;;  %19099 = vst [vmem:[#allocation142_spill] sm:$0xff] %v13735_v63  ;;  %v13745_v39 = vld [vmem:[%s18904_s8 + $0x438] sm:$0xff]  ;;  %v13750_v47 = vld [vmem:[%s18904_s8 + $0x440] sm:$0xff] }
  0x45   :  { %19100 = vst [vmem:[#allocation143_spill] sm:$0xff] %v13740_v55  ;;  %19101 = vst [vmem:[#allocation144_spill] sm:$0xff] %v13745_v39  ;;  %v13755_v54 = vld [vmem:[%s18904_s8 + $0x448] sm:$0xff]  ;;  %v13760_v63 = vld [vmem:[%s18904_s8 + $0x450] sm:$0xff] }
  0x46   :  { %19102 = vst [vmem:[#allocation145_spill] sm:$0xff] %v13750_v47  ;;  %19103 = vst [vmem:[#allocation146_spill] sm:$0xff] %v13755_v54  ;;  %v13765_v55 = vld [vmem:[%s18904_s8 + $0x458] sm:$0xff]  ;;  %v13770_v39 = vld [vmem:[%s18904_s8 + $0x460] sm:$0xff] }
  0x47   :  { %19104 = vst [vmem:[#allocation147_spill] sm:$0xff] %v13760_v63  ;;  %19105 = vst [vmem:[#allocation148_spill] sm:$0xff] %v13765_v55  ;;  %v13775_v47 = vld [vmem:[%s18904_s8 + $0x468] sm:$0xff]  ;;  %v13780_v54 = vld [vmem:[%s18904_s8 + $0x470] sm:$0xff] }
  0x48   :  { %19106 = vst [vmem:[#allocation149_spill] sm:$0xff] %v13770_v39  ;;  %19107 = vst [vmem:[#allocation150_spill] sm:$0xff] %v13775_v47  ;;  %v13785_v63 = vld [vmem:[%s18904_s8 + $0x478] sm:$0xff]  ;;  %v13790_v55 = vld [vmem:[%s18904_s8 + $0x480] sm:$0xff] }
  0x49   :  { %19108 = vst [vmem:[#allocation151_spill] sm:$0xff] %v13780_v54  ;;  %19109 = vst [vmem:[#allocation152_spill] sm:$0xff] %v13785_v63  ;;  %v13795_v39 = vld [vmem:[%s18904_s8 + $0x488] sm:$0xff]  ;;  %v13800_v47 = vld [vmem:[%s18904_s8 + $0x490] sm:$0xff] }
  0x4a   :  { %19110 = vst [vmem:[#allocation153_spill] sm:$0xff] %v13790_v55  ;;  %19111 = vst [vmem:[#allocation154_spill] sm:$0xff] %v13795_v39  ;;  %v13805_v54 = vld [vmem:[%s18904_s8 + $0x498] sm:$0xff]  ;;  %v13810_v63 = vld [vmem:[%s18904_s8 + $0x4a0] sm:$0xff] }
  0x4b   :  { %19112 = vst [vmem:[#allocation155_spill] sm:$0xff] %v13800_v47  ;;  %19113 = vst [vmem:[#allocation156_spill] sm:$0xff] %v13805_v54  ;;  %v13815_v55 = vld [vmem:[%s18904_s8 + $0x4a8] sm:$0xff]  ;;  %v13820_v39 = vld [vmem:[%s18904_s8 + $0x4b0] sm:$0xff] }
  0x4c   :  { %19114 = vst [vmem:[#allocation157_spill] sm:$0xff] %v13810_v63  ;;  %19115 = vst [vmem:[#allocation158_spill] sm:$0xff] %v13815_v55  ;;  %v13825_v47 = vld [vmem:[%s18904_s8 + $0x4b8] sm:$0xff]  ;;  %v13830_v54 = vld [vmem:[%s18904_s8 + $0x4c0] sm:$0xff] }
  0x4d   :  { %19116 = vst [vmem:[#allocation159_spill] sm:$0xff] %v13820_v39  ;;  %19117 = vst [vmem:[#allocation160_spill] sm:$0xff] %v13825_v47  ;;  %v13835_v63 = vld [vmem:[%s18904_s8 + $0x4c8] sm:$0xff]  ;;  %v13840_v55 = vld [vmem:[%s18904_s8 + $0x4d0] sm:$0xff] }
  0x4e   :  { %19118 = vst [vmem:[#allocation161_spill] sm:$0xff] %v13830_v54  ;;  %19119 = vst [vmem:[#allocation162_spill] sm:$0xff] %v13835_v63  ;;  %v13845_v39 = vld [vmem:[%s18904_s8 + $0x4d8] sm:$0xff]  ;;  %v13850_v47 = vld [vmem:[%s18904_s8 + $0x4e0] sm:$0xff] }
  0x4f   :  { %19120 = vst [vmem:[#allocation163_spill] sm:$0xff] %v13840_v55  ;;  %19121 = vst [vmem:[#allocation164_spill] sm:$0xff] %v13845_v39  ;;  %v13855_v54 = vld [vmem:[%s18904_s8 + $0x4e8] sm:$0xff]  ;;  %v13860_v63 = vld [vmem:[%s18904_s8 + $0x4f0] sm:$0xff] }
  0x50   :  { %19122 = vst [vmem:[#allocation165_spill] sm:$0xff] %v13850_v47  ;;  %19123 = vst [vmem:[#allocation166_spill] sm:$0xff] %v13855_v54  ;;  %v13865_v55 = vld [vmem:[%s18904_s8 + $0x4f8] sm:$0xff]  ;;  %v13870_v39 = vld [vmem:[%s18904_s8 + $0x500] sm:$0xff] }
  0x51   :  { %19124 = vst [vmem:[#allocation167_spill] sm:$0xff] %v13860_v63  ;;  %19125 = vst [vmem:[#allocation168_spill] sm:$0xff] %v13865_v55  ;;  %v13875_v47 = vld [vmem:[%s18904_s8 + $0x508] sm:$0xff]  ;;  %v13880_v54 = vld [vmem:[%s18904_s8 + $0x510] sm:$0xff] }
  0x52   :  { %19126 = vst [vmem:[#allocation169_spill] sm:$0xff] %v13870_v39  ;;  %19127 = vst [vmem:[#allocation170_spill] sm:$0xff] %v13875_v47  ;;  %v13885_v63 = vld [vmem:[%s18904_s8 + $0x518] sm:$0xff]  ;;  %v13890_v55 = vld [vmem:[%s18904_s8 + $0x520] sm:$0xff] }
  0x53   :  { %19128 = vst [vmem:[#allocation171_spill] sm:$0xff] %v13880_v54  ;;  %19129 = vst [vmem:[#allocation172_spill] sm:$0xff] %v13885_v63  ;;  %v13895_v39 = vld [vmem:[%s18904_s8 + $0x528] sm:$0xff]  ;;  %v13900_v47 = vld [vmem:[%s18904_s8 + $0x530] sm:$0xff] }
  0x54   :  { %19130 = vst [vmem:[#allocation173_spill] sm:$0xff] %v13890_v55  ;;  %19131 = vst [vmem:[#allocation174_spill] sm:$0xff] %v13895_v39  ;;  %v13905_v54 = vld [vmem:[%s18904_s8 + $0x538] sm:$0xff]  ;;  %v13910_v63 = vld [vmem:[%s18904_s8 + $0x540] sm:$0xff] }
  0x55   :  { %19132 = vst [vmem:[#allocation175_spill] sm:$0xff] %v13900_v47  ;;  %19133 = vst [vmem:[#allocation176_spill] sm:$0xff] %v13905_v54  ;;  %v13915_v55 = vld [vmem:[%s18904_s8 + $0x548] sm:$0xff]  ;;  %v13920_v39 = vld [vmem:[%s18904_s8 + $0x550] sm:$0xff] }
  0x56   :  { %19134 = vst [vmem:[#allocation177_spill] sm:$0xff] %v13910_v63  ;;  %19135 = vst [vmem:[#allocation178_spill] sm:$0xff] %v13915_v55  ;;  %v13925_v47 = vld [vmem:[%s18904_s8 + $0x558] sm:$0xff]  ;;  %v13930_v54 = vld [vmem:[%s18904_s8 + $0x560] sm:$0xff] }
  0x57   :  { %19136 = vst [vmem:[#allocation179_spill] sm:$0xff] %v13920_v39  ;;  %19137 = vst [vmem:[#allocation180_spill] sm:$0xff] %v13925_v47  ;;  %v13935_v63 = vld [vmem:[%s18904_s8 + $0x568] sm:$0xff]  ;;  %v13940_v55 = vld [vmem:[%s18904_s8 + $0x570] sm:$0xff] }
  0x58   :  { %19138 = vst [vmem:[#allocation181_spill] sm:$0xff] %v13930_v54  ;;  %19139 = vst [vmem:[#allocation182_spill] sm:$0xff] %v13935_v63  ;;  %v13945_v39 = vld [vmem:[%s18904_s8 + $0x578] sm:$0xff]  ;;  %v13950_v47 = vld [vmem:[%s18904_s8 + $0x580] sm:$0xff] }
  0x59   :  { %19140 = vst [vmem:[#allocation183_spill] sm:$0xff] %v13940_v55  ;;  %19141 = vst [vmem:[#allocation184_spill] sm:$0xff] %v13945_v39  ;;  %v13955_v54 = vld [vmem:[%s18904_s8 + $0x588] sm:$0xff]  ;;  %v13960_v63 = vld [vmem:[%s18904_s8 + $0x590] sm:$0xff] }
  0x5a   :  { %19142 = vst [vmem:[#allocation185_spill] sm:$0xff] %v13950_v47  ;;  %19143 = vst [vmem:[#allocation186_spill] sm:$0xff] %v13955_v54  ;;  %v13965_v55 = vld [vmem:[%s18904_s8 + $0x598] sm:$0xff]  ;;  %v13970_v39 = vld [vmem:[%s18904_s8 + $0x5a0] sm:$0xff] }
  0x5b   :  { %19144 = vst [vmem:[#allocation187_spill] sm:$0xff] %v13960_v63  ;;  %19145 = vst [vmem:[#allocation188_spill] sm:$0xff] %v13965_v55  ;;  %v13975_v47 = vld [vmem:[%s18904_s8 + $0x5a8] sm:$0xff]  ;;  %v13980_v54 = vld [vmem:[%s18904_s8 + $0x5b0] sm:$0xff] }
  0x5c   :  { %19146 = vst [vmem:[#allocation189_spill] sm:$0xff] %v13970_v39  ;;  %19147 = vst [vmem:[#allocation190_spill] sm:$0xff] %v13975_v47  ;;  %v13985_v63 = vld [vmem:[%s18904_s8 + $0x5b8] sm:$0xff]  ;;  %v13990_v55 = vld [vmem:[%s18904_s8 + $0x5c0] sm:$0xff] }
  0x5d   :  { %19148 = vst [vmem:[#allocation191_spill] sm:$0xff] %v13980_v54  ;;  %19149 = vst [vmem:[#allocation192_spill] sm:$0xff] %v13985_v63  ;;  %v13995_v39 = vld [vmem:[%s18904_s8 + $0x5c8] sm:$0xff]  ;;  %v14000_v47 = vld [vmem:[%s18904_s8 + $0x5d0] sm:$0xff] }
  0x5e   :  { %19150 = vst [vmem:[#allocation193_spill] sm:$0xff] %v13990_v55  ;;  %19151 = vst [vmem:[#allocation194_spill] sm:$0xff] %v13995_v39  ;;  %v14005_v54 = vld [vmem:[%s18904_s8 + $0x5d8] sm:$0xff]  ;;  %v14010_v63 = vld [vmem:[%s18904_s8 + $0x5e0] sm:$0xff] }
  0x5f   :  { %19152 = vst [vmem:[#allocation195_spill] sm:$0xff] %v14000_v47  ;;  %19153 = vst [vmem:[#allocation196_spill] sm:$0xff] %v14005_v54  ;;  %v14015_v55 = vld [vmem:[%s18904_s8 + $0x5e8] sm:$0xff]  ;;  %v14020_v39 = vld [vmem:[%s18904_s8 + $0x5f0] sm:$0xff] }
  0x60   :  { %19154 = vst [vmem:[#allocation197_spill] sm:$0xff] %v14010_v63  ;;  %19155 = vst [vmem:[#allocation198_spill] sm:$0xff] %v14015_v55  ;;  %v14025_v47 = vld [vmem:[%s18904_s8 + $0x5f8] sm:$0xff]  ;;  %v14030_v54 = vld [vmem:[%s18904_s8 + $0x600] sm:$0xff] }
  0x61   :  { %19156 = vst [vmem:[#allocation199_spill] sm:$0xff] %v14020_v39  ;;  %19157 = vst [vmem:[#allocation200_spill] sm:$0xff] %v14025_v47  ;;  %v14035_v63 = vld [vmem:[%s18904_s8 + $0x608] sm:$0xff]  ;;  %v14040_v55 = vld [vmem:[%s18904_s8 + $0x610] sm:$0xff] }
  0x62   :  { %19158 = vst [vmem:[#allocation201_spill] sm:$0xff] %v14030_v54  ;;  %19159 = vst [vmem:[#allocation202_spill] sm:$0xff] %v14035_v63  ;;  %v14045_v39 = vld [vmem:[%s18904_s8 + $0x618] sm:$0xff]  ;;  %v14050_v47 = vld [vmem:[%s18904_s8 + $0x620] sm:$0xff] }
  0x63   :  { %19160 = vst [vmem:[#allocation203_spill] sm:$0xff] %v14040_v55  ;;  %19161 = vst [vmem:[#allocation204_spill] sm:$0xff] %v14045_v39  ;;  %v14055_v54 = vld [vmem:[%s18904_s8 + $0x628] sm:$0xff]  ;;  %v14060_v63 = vld [vmem:[%s18904_s8 + $0x630] sm:$0xff] }
  0x64   :  { %19162 = vst [vmem:[#allocation205_spill] sm:$0xff] %v14050_v47  ;;  %19163 = vst [vmem:[#allocation206_spill] sm:$0xff] %v14055_v54  ;;  %v14065_v55 = vld [vmem:[%s18904_s8 + $0x638] sm:$0xff]  ;;  %v14070_v39 = vld [vmem:[%s18904_s8 + $0x640] sm:$0xff] }
  0x65   :  { %19164 = vst [vmem:[#allocation207_spill] sm:$0xff] %v14060_v63  ;;  %19165 = vst [vmem:[#allocation208_spill] sm:$0xff] %v14065_v55  ;;  %v14075_v47 = vld [vmem:[%s18904_s8 + $0x648] sm:$0xff]  ;;  %v14080_v54 = vld [vmem:[%s18904_s8 + $0x650] sm:$0xff] }
  0x66   :  { %19166 = vst [vmem:[#allocation209_spill] sm:$0xff] %v14070_v39  ;;  %19167 = vst [vmem:[#allocation210_spill] sm:$0xff] %v14075_v47  ;;  %v14085_v63 = vld [vmem:[%s18904_s8 + $0x658] sm:$0xff]  ;;  %v14090_v55 = vld [vmem:[%s18904_s8 + $0x660] sm:$0xff] }
  0x67   :  { %19168 = vst [vmem:[#allocation211_spill] sm:$0xff] %v14080_v54  ;;  %19169 = vst [vmem:[#allocation212_spill] sm:$0xff] %v14085_v63  ;;  %v14095_v39 = vld [vmem:[%s18904_s8 + $0x668] sm:$0xff]  ;;  %v14100_v47 = vld [vmem:[%s18904_s8 + $0x670] sm:$0xff] }
  0x68   :  { %19170 = vst [vmem:[#allocation213_spill] sm:$0xff] %v14090_v55  ;;  %19171 = vst [vmem:[#allocation214_spill] sm:$0xff] %v14095_v39  ;;  %v14105_v54 = vld [vmem:[%s18904_s8 + $0x678] sm:$0xff]  ;;  %v14110_v63 = vld [vmem:[%s18904_s8 + $0x680] sm:$0xff] }
  0x69   :  { %19172 = vst [vmem:[#allocation215_spill] sm:$0xff] %v14100_v47  ;;  %19173 = vst [vmem:[#allocation216_spill] sm:$0xff] %v14105_v54  ;;  %v14115_v55 = vld [vmem:[%s18904_s8 + $0x688] sm:$0xff]  ;;  %v14120_v39 = vld [vmem:[%s18904_s8 + $0x690] sm:$0xff] }
  0x6a   :  { %19174 = vst [vmem:[#allocation217_spill] sm:$0xff] %v14110_v63  ;;  %19175 = vst [vmem:[#allocation218_spill] sm:$0xff] %v14115_v55  ;;  %v14125_v47 = vld [vmem:[%s18904_s8 + $0x698] sm:$0xff]  ;;  %v14130_v54 = vld [vmem:[%s18904_s8 + $0x6a0] sm:$0xff] }
  0x6b   :  { %19176 = vst [vmem:[#allocation219_spill] sm:$0xff] %v14120_v39  ;;  %19177 = vst [vmem:[#allocation220_spill] sm:$0xff] %v14125_v47  ;;  %v14135_v63 = vld [vmem:[%s18904_s8 + $0x6a8] sm:$0xff]  ;;  %v14140_v55 = vld [vmem:[%s18904_s8 + $0x6b0] sm:$0xff] }
  0x6c   :  { %19178 = vst [vmem:[#allocation221_spill] sm:$0xff] %v14130_v54  ;;  %19179 = vst [vmem:[#allocation222_spill] sm:$0xff] %v14135_v63  ;;  %v14145_v39 = vld [vmem:[%s18904_s8 + $0x6b8] sm:$0xff]  ;;  %v14150_v47 = vld [vmem:[%s18904_s8 + $0x6c0] sm:$0xff] }
  0x6d   :  { %19180 = vst [vmem:[#allocation223_spill] sm:$0xff] %v14140_v55  ;;  %19181 = vst [vmem:[#allocation224_spill] sm:$0xff] %v14145_v39  ;;  %v14155_v54 = vld [vmem:[%s18904_s8 + $0x6c8] sm:$0xff]  ;;  %v14160_v63 = vld [vmem:[%s18904_s8 + $0x6d0] sm:$0xff] }
  0x6e   :  { %19182 = vst [vmem:[#allocation225_spill] sm:$0xff] %v14150_v47  ;;  %19183 = vst [vmem:[#allocation226_spill] sm:$0xff] %v14155_v54  ;;  %v14165_v55 = vld [vmem:[%s18904_s8 + $0x6d8] sm:$0xff]  ;;  %v14170_v39 = vld [vmem:[%s18904_s8 + $0x6e0] sm:$0xff] }
  0x6f   :  { %19184 = vst [vmem:[#allocation227_spill] sm:$0xff] %v14160_v63  ;;  %19185 = vst [vmem:[#allocation228_spill] sm:$0xff] %v14165_v55  ;;  %v14175_v47 = vld [vmem:[%s18904_s8 + $0x6e8] sm:$0xff]  ;;  %v14180_v54 = vld [vmem:[%s18904_s8 + $0x6f0] sm:$0xff] }
  0x70   :  { %19186 = vst [vmem:[#allocation229_spill] sm:$0xff] %v14170_v39  ;;  %19187 = vst [vmem:[#allocation230_spill] sm:$0xff] %v14175_v47  ;;  %v14185_v63 = vld [vmem:[%s18904_s8 + $0x6f8] sm:$0xff]  ;;  %v14190_v55 = vld [vmem:[%s18904_s8 + $0x700] sm:$0xff] }
  0x71   :  { %19188 = vst [vmem:[#allocation231_spill] sm:$0xff] %v14180_v54  ;;  %19189 = vst [vmem:[#allocation232_spill] sm:$0xff] %v14185_v63  ;;  %v14195_v39 = vld [vmem:[%s18904_s8 + $0x708] sm:$0xff]  ;;  %v14200_v47 = vld [vmem:[%s18904_s8 + $0x710] sm:$0xff] }
  0x72   :  { %19190 = vst [vmem:[#allocation233_spill] sm:$0xff] %v14190_v55  ;;  %19191 = vst [vmem:[#allocation234_spill] sm:$0xff] %v14195_v39  ;;  %v14205_v54 = vld [vmem:[%s18904_s8 + $0x718] sm:$0xff]  ;;  %v14210_v63 = vld [vmem:[%s18904_s8 + $0x720] sm:$0xff] }
  0x73   :  { %19192 = vst [vmem:[#allocation235_spill] sm:$0xff] %v14200_v47  ;;  %19193 = vst [vmem:[#allocation236_spill] sm:$0xff] %v14205_v54  ;;  %v14215_v55 = vld [vmem:[%s18904_s8 + $0x728] sm:$0xff]  ;;  %v14220_v39 = vld [vmem:[%s18904_s8 + $0x730] sm:$0xff] }
  0x74   :  { %19194 = vst [vmem:[#allocation237_spill] sm:$0xff] %v14210_v63  ;;  %19195 = vst [vmem:[#allocation238_spill] sm:$0xff] %v14215_v55  ;;  %v14225_v47 = vld [vmem:[%s18904_s8 + $0x738] sm:$0xff]  ;;  %v14230_v54 = vld [vmem:[%s18904_s8 + $0x740] sm:$0xff] }
  0x75   :  { %19196 = vst [vmem:[#allocation239_spill] sm:$0xff] %v14220_v39  ;;  %19197 = vst [vmem:[#allocation240_spill] sm:$0xff] %v14225_v47  ;;  %v14235_v63 = vld [vmem:[%s18904_s8 + $0x748] sm:$0xff]  ;;  %v14240_v55 = vld [vmem:[%s18904_s8 + $0x750] sm:$0xff] }
  0x76   :  { %19198 = vst [vmem:[#allocation241_spill] sm:$0xff] %v14230_v54  ;;  %19199 = vst [vmem:[#allocation242_spill] sm:$0xff] %v14235_v63  ;;  %v14245_v39 = vld [vmem:[%s18904_s8 + $0x758] sm:$0xff]  ;;  %v14250_v47 = vld [vmem:[%s18904_s8 + $0x760] sm:$0xff] }
  0x77   :  { %19200 = vst [vmem:[#allocation243_spill] sm:$0xff] %v14240_v55  ;;  %19201 = vst [vmem:[#allocation244_spill] sm:$0xff] %v14245_v39  ;;  %v14255_v54 = vld [vmem:[%s18904_s8 + $0x768] sm:$0xff]  ;;  %v14260_v63 = vld [vmem:[%s18904_s8 + $0x770] sm:$0xff] }
  0x78   :  { %19202 = vst [vmem:[#allocation245_spill] sm:$0xff] %v14250_v47  ;;  %19203 = vst [vmem:[#allocation246_spill] sm:$0xff] %v14255_v54  ;;  %v14265_v55 = vld [vmem:[%s18904_s8 + $0x778] sm:$0xff]  ;;  %v14270_v39 = vld [vmem:[%s18904_s8 + $0x780] sm:$0xff] }
  0x79   :  { %19204 = vst [vmem:[#allocation247_spill] sm:$0xff] %v14260_v63  ;;  %19205 = vst [vmem:[#allocation248_spill] sm:$0xff] %v14265_v55  ;;  %v14275_v47 = vld [vmem:[%s18904_s8 + $0x788] sm:$0xff]  ;;  %v14280_v54 = vld [vmem:[%s18904_s8 + $0x790] sm:$0xff] }
  0x7a   :  { %19206 = vst [vmem:[#allocation249_spill] sm:$0xff] %v14270_v39  ;;  %19207 = vst [vmem:[#allocation250_spill] sm:$0xff] %v14275_v47  ;;  %v14285_v63 = vld [vmem:[%s18904_s8 + $0x798] sm:$0xff]  ;;  %v14290_v55 = vld [vmem:[%s18904_s8 + $0x7a0] sm:$0xff] }
  0x7b   :  { %19208 = vst [vmem:[#allocation251_spill] sm:$0xff] %v14280_v54  ;;  %19209 = vst [vmem:[#allocation252_spill] sm:$0xff] %v14285_v63  ;;  %v14295_v39 = vld [vmem:[%s18904_s8 + $0x7a8] sm:$0xff]  ;;  %v14300_v47 = vld [vmem:[%s18904_s8 + $0x7b0] sm:$0xff] }
  0x7c   :  { %19210 = vst [vmem:[#allocation253_spill] sm:$0xff] %v14290_v55  ;;  %19211 = vst [vmem:[#allocation254_spill] sm:$0xff] %v14295_v39  ;;  %v14305_v54 = vld [vmem:[%s18904_s8 + $0x7b8] sm:$0xff]  ;;  %v14310_v63 = vld [vmem:[%s18904_s8 + $0x7c0] sm:$0xff] }
  0x7d   :  { %19212 = vst [vmem:[#allocation255_spill] sm:$0xff] %v14300_v47  ;;  %19213 = vst [vmem:[#allocation256_spill] sm:$0xff] %v14305_v54  ;;  %v14315_v55 = vld [vmem:[%s18904_s8 + $0x7c8] sm:$0xff]  ;;  %v14320_v39 = vld [vmem:[%s18904_s8 + $0x7d0] sm:$0xff] }
  0x7e   :  { %19214 = vst [vmem:[#allocation257_spill] sm:$0xff] %v14310_v63  ;;  %19215 = vst [vmem:[#allocation258_spill] sm:$0xff] %v14315_v55  ;;  %v14325_v47 = vld [vmem:[%s18904_s8 + $0x7d8] sm:$0xff]  ;;  %v14330_v54 = vld [vmem:[%s18904_s8 + $0x7e0] sm:$0xff] }
  0x7f   :  { %19216 = vst [vmem:[#allocation259_spill] sm:$0xff] %v14320_v39  ;;  %19217 = vst [vmem:[#allocation260_spill] sm:$0xff] %v14325_v47  ;;  %v14335_v63 = vld [vmem:[%s18904_s8 + $0x7e8] sm:$0xff]  ;;  %v14340_v55 = vld [vmem:[%s18904_s8 + $0x7f0] sm:$0xff] }
  0x80   :  { %19218 = vst [vmem:[#allocation261_spill] sm:$0xff] %v14330_v54  ;;  %19219 = vst [vmem:[#allocation262_spill] sm:$0xff] %v14335_v63  ;;  %v14345_v39 = vld [vmem:[%s18904_s8 + $0x7f8] sm:$0xff] }
  0x81   :  { %19220 = vst [vmem:[#allocation263_spill] sm:$0xff] %v14340_v55  ;;  %19221 = vst [vmem:[#allocation264_spill] sm:$0xff] %v14345_v39 }
  0x82   :  { %583 = vsyncadd [#allocation3], 32768  ;;  %v12274_v54 = vld [vmem:[%s18897_s1] sm:$0xff]   ;;  %v12275_v47 = vld [vmem:[%s18897_s1 + $0x8] sm:$0xff]   ;;  %vm688_vm0 = vcmask 523264   ;;  %v19224_v36 = vmov 0  }
  0x83   :  { %11233 = vmatprep.subr.bf16.mxu0 %v12274_v54  ;;  %v12276_v55 = vld [vmem:[%s18897_s1 + $0x10] sm:$0xff]   ;;  %v12278_v39 = vld [vmem:[%s18896_s0] sm:$0xff]   ;;  %v12277_v63 = vld [vmem:[%s18897_s1 + $0x18] sm:$0xff]   ;;  %vm1043_vm1 = vcmask 130048   ;;  %s13009_s19 = smov 64   ;;  %s13010_s20 = smov 48  }
  0x84   :  { %11234 = vmatpush3.bf16.msra.mxu0 %v12274_v54  ;;  %11241 = vmatprep.mubr.msk.bf16.mxu0 %vm688_vm0, %v12278_v39  ;;  %v12279_v54 = vld [vmem:[%s18896_s0 + $0x8] sm:$0xff]   ;;  %v12291_v62 = vld [vmem:[%s18899_s3 + $0x10] ss:$8 sps:$4 sm:$0xff]   ;;  %v616_v42 = vld [vmem:[%s18898_s2 + $0x40] sm:$0xff]  ;;  %s13011_s21 = smov 112   ;;  %s13012_s22 = smov 32  }
  0x85   :  { %11235 = vmatprep.subr.bf16.mxu0 %v12275_v47  ;;  %v12286_v38 = vld [vmem:[%s18899_s3 + $0x4] ss:$8 sps:$4 sm:$0xff]   ;;  %v12288_v39 = vld [vmem:[%s18899_s3] ss:$8 sps:$4 sm:$0xff]   ;;  %v12281_v46 = vld [vmem:[%s18896_s0 + $0x18] sm:$0xff]   ;;  %s13013_s23 = smov 96  }
  0x86   :  { %902 = vmatprep.subr.bf16.mxu1 %v12286_v38  ;;  %v12282_v38 = vld [vmem:[%s18896_s0 + $0x20] sm:$0xff]   ;;  %v610_v45 = vld [vmem:[%s18898_s2 + $0x10] sm:$0xff]  ;;  %v613_v44 = vld [vmem:[%s18898_s2 + $0x28] sm:$0xff]  ;;  %s13014_s27 = smov 16   ;;  %s13015_s30 = smov 80   ;;  %vm8839_vm2 = vcmask 1041409  }
  0x87   :  { %903 = vmatpush1.bf16.msra.mxu1 %v12288_v39  ;;  %v12294_v39 = vld [vmem:[%s18899_s3 + $0x20] ss:$8 sps:$4 sm:$0xff]   ;;  %v614_v43 = vld [vmem:[%s18898_s2 + $0x30] sm:$0xff]  ;;  %v619_v49 = vld [vmem:[%s18898_s2 + $0x58] sm:$0xff] }
  0x88   :  { %11236 = vmatpush3.bf16.msra.mxu0 %v12275_v47  ;;  %v12280_v47 = vld [vmem:[%s18896_s0 + $0x10] sm:$0xff]  }
  0x89   :  { %11237 = vmatprep.subr.bf16.mxu0 %v12276_v55 }
  0x8c   :  { %11238 = vmatpush3.bf16.msra.mxu0 %v12276_v55  ;;  %v12289_v55 = vld [vmem:[%s18899_s3 + $0x14] ss:$8 sps:$4 sm:$0xff]  }
  0x8d   :  { %11239 = vmatprep.subr.bf16.mxu0 %v12277_v63  ;;  %904 = vmatprep.subr.bf16.mxu1 %v12289_v55  ;;  %v12297_v55 = vld [vmem:[%s18899_s3 + $0x30] ss:$8 sps:$4 sm:$0xff]  }
  0x8e   :  { %905 = vmatpush1.bf16.msra.mxu1 %v12291_v62  ;;  %v12284_v62 = vld [vmem:[%s18896_s0 + $0x30] sm:$0xff]  }
  0x90   :  { %11240 = vmatpush3.bf16.msra.mxu0 %v12277_v63  ;;  %v12283_v63 = vld [vmem:[%s18896_s0 + $0x28] sm:$0xff]  }
  0x93   :  { %11242 = vmatmul.mubr.msk.bf16.vlgmr.msra.gmra.mrb[0].mxu0 %vm688_vm0, %v12279_v54  ;;  %v12285_v54 = vld [vmem:[%s18896_s0 + $0x38] sm:$0xff]  }
  0x94   :  { %11245 = vmatprep.mubr.msk.bf16.mxu0 %vm688_vm0, %v12280_v47  ;;  %v12295_v47 = vld [vmem:[%s18899_s3 + $0x34] ss:$8 sps:$4 sm:$0xff]  }
  0x9b   :  { %11246 = vmatmul.mubr.msk.bf16.gmra.mrb[4].mxu0 %vm688_vm0, %v12281_v46  ;;  %v12292_v46 = vld [vmem:[%s18899_s3 + $0x24] ss:$8 sps:$4 sm:$0xff]  }
  0x9c   :  { %11249 = vmatprep.mubr.msk.bf16.mxu0 %vm688_vm0, %v12282_v38  ;;  %906 = vmatprep.subr.bf16.mxu1 %v12292_v46  ;;  %v18906_v38 = vmov 0   ;;  %v609_v46 = vld [vmem:[%s18898_s2 + $0x8] sm:$0xff] }
  0x9d   :  { %907 = vmatpush1.bf16.msra.mxu1 %v12294_v39  ;;  %934 = vmatprep.mubr.bf16.mxu1 %v18906_v38 }
  0x9e   :  { %908 = vmatprep.subr.bf16.mxu1 %v12295_v47 }
  0xa1   :  { %909 = vmatpush1.bf16.msra.mxu1 %v12297_v55  ;;  %v611_v55 = vld [vmem:[%s18898_s2 + $0x18] sm:$0xff] }
  0xa3   :  { %11250 = vmatmul.mubr.msk.bf16.gmra.mrb[8].mxu0 %vm688_vm0, %v12283_v63 }
  0xa4   :  { %11253 = vmatprep.mubr.msk.bf16.mxu0 %vm688_vm0, %v12284_v62 }
  0xab   :  { %11254 = vmatmul.mubr.msk.bf16.gmra.mrb[12].mxu0 %vm688_vm0, %v12285_v54  ;;  %v608_v54 = vld [vmem:[%s18898_s2] sm:$0xff] }
 0x166   :  { %v11243_v63 = vpop.f32.mrb[0].mxu0 }
 0x167   :  { %v747_v62 = vpop.f32.mrb[1].mxu0 }
 0x168   :  { %v11244_v39 = vpop.f32.mrb[2].mxu0  ;;  %v14422_v37 = vadd.f32 %v747_v62, %v608_v54 }
 0x169   :  { %v750_v53 = vpop.f32.mrb[3].mxu0  ;;  %v14436_v62 = vadd.f32 %v11244_v39, %v611_v55 }
 0x16a   :  { %19222 = vst [vmem:[#allocation265_spill] sm:$0xff] %v14422_v37  ;;  %v14424_v61 = vadd.f32 %v750_v53, %v609_v46  ;;  %v14438_v46 = vadd.f32 %v11243_v63, %v610_v45 }
 0x16b   :  { %19225 = vst [vmem:[#allocation267_spill] sm:$0xff] %v14436_v62 }
 0x16c   :  { %19223 = vst [vmem:[#allocation266_spill] sm:$0xff] %v14424_v61  ;;  %v810_v47 = vpack.c.bf16 %v14424_v61, %v14422_v37  ;;  %19226 = vst [vmem:[#allocation268_spill] sm:$0xff] %v14438_v46  ;;  %v811_v60 = vpack.c.bf16 %v14436_v62, %v14438_v46 }
 0x16e   :  { %10179 = vmatmul.mubr.msk.bf16.vlgmr.msra.gmra.mrb[0].mxu1 %vm688_vm0, %v810_v47  ;;  %v11247_v38 = vpop.f32.mrb[4].mxu0  ;;  %v612_v47 = vld [vmem:[%s18898_s2 + $0x20] sm:$0xff] }
 0x16f   :  { %v763_v52 = vpop.f32.mrb[5].mxu0  ;;  %944 = vmatprep.mubr.bf16.mxu1 %v19224_v36 }
 0x170   :  { %v11248_v53 = vpop.f32.mrb[6].mxu0  ;;  %v14450_v55 = vadd.f32 %v763_v52, %v612_v47  ;;  %v14464_v52 = vadd.f32 %v11247_v38, %v614_v43 }
 0x171   :  { %v766_v54 = vpop.f32.mrb[7].mxu0 }
 0x172   :  { %19227 = vst [vmem:[#allocation269_spill] sm:$0xff] %v14450_v55  ;;  %v14452_v45 = vadd.f32 %v766_v54, %v613_v44  ;;  %19229 = vst [vmem:[#allocation271_spill] sm:$0xff] %v14464_v52 }
 0x174   :  { %19228 = vst [vmem:[#allocation270_spill] sm:$0xff] %v14452_v45  ;;  %v812_v59 = vpack.c.bf16 %v14452_v45, %v14450_v55 }
 0x176   :  { %10180 = vmatmul.mubr.msk.bf16.gmra.mrb[4].mxu1 %vm688_vm0, %v811_v60  ;;  %v11251_v51 = vpop.f32.mrb[8].mxu0  ;;  %v615_v60 = vld [vmem:[%s18898_s2 + $0x38] sm:$0xff] }
 0x177   :  { %954 = vmatprep.mubr.bf16.mxu1 %v19224_v36  ;;  %v779_v39 = vpop.f32.mrb[9].mxu0  ;;  %v14466_v54 = vadd.f32 %v11248_v53, %v615_v60  ;;  %v618_v60 = vld [vmem:[%s18898_s2 + $0x50] sm:$0xff] }
 0x178   :  { %v11252_v63 = vpop.f32.mrb[10].mxu0  ;;  %v14478_v43 = vadd.f32 %v779_v39, %v616_v42  ;;  %v620_v39 = vld [vmem:[%s18898_s2 + $0x60] sm:$0xff] }
 0x179   :  { %v782_v35 = vpop.f32.mrb[11].mxu0  ;;  %19230 = vst [vmem:[#allocation272_spill] sm:$0xff] %v14466_v54  ;;  %v813_v58 = vpack.c.bf16 %v14466_v54, %v14464_v52  ;;  %v14494_v42 = vadd.f32 %v11252_v63, %v619_v49  ;;  %v622_v63 = vld [vmem:[%s18898_s2 + $0x70] sm:$0xff] }
 0x17a   :  { %19231 = vst [vmem:[#allocation273_spill] sm:$0xff] %v14478_v43 }
 0x17b   :  { %19234 = vst [vmem:[#allocation276_spill] sm:$0xff] %v14494_v42 }
 0x17e   :  { %10181 = vmatmul.mubr.msk.bf16.gmra.mrb[8].mxu1 %vm688_vm0, %v812_v59  ;;  %v11255_v50 = vpop.f32.mrb[12].mxu0  ;;  %v617_v59 = vld [vmem:[%s18898_s2 + $0x48] sm:$0xff] }
 0x17f   :  { %964 = vmatprep.mubr.bf16.mxu1 %v19224_v36  ;;  %v795_v44 = vpop.f32.mrb[13].mxu0  ;;  %v14480_v38 = vadd.f32 %v782_v35, %v617_v59  ;;  %v621_v59 = vld [vmem:[%s18898_s2 + $0x68] sm:$0xff] }
 0x180   :  { %v11256_v47 = vpop.f32.mrb[14].mxu0 }
 0x181   :  { %v798_v34 = vpop.f32.mrb[15].mxu0  ;;  %19232 = vst [vmem:[#allocation274_spill] sm:$0xff] %v14480_v38  ;;  %v814_v53 = vpack.c.bf16 %v14480_v38, %v14478_v43 }
 0x186   :  { %10182 = vmatmul.mubr.msk.bf16.gmra.mrb[12].mxu1 %vm688_vm0, %v813_v58  ;;  %v14492_v58 = vadd.f32 %v11251_v51, %v618_v60  ;;  %v14508_v51 = vadd.f32 %v798_v34, %v621_v59  ;;  %v623_v60 = vld [vmem:[%s18898_s2 + $0x78] sm:$0xff] }
 0x187   :  { %974 = vmatprep.mubr.bf16.mxu1 %v19224_v36 }
 0x188   :  { %19233 = vst [vmem:[#allocation275_spill] sm:$0xff] %v14492_v58  ;;  %v815_v35 = vpack.c.bf16 %v14494_v42, %v14492_v58  ;;  %19236 = vst [vmem:[#allocation278_spill] sm:$0xff] %v14508_v51 }
 0x18e   :  { %10183 = vmatmul.mubr.msk.bf16.gmra.mrb[16].mxu1 %vm688_vm0, %v814_v53  ;;  %v14506_v53 = vadd.f32 %v795_v44, %v620_v39  ;;  %v14522_v44 = vadd.f32 %v11256_v47, %v623_v60  ;;  %v828_v39 = vlaneseq }
 0x18f   :  { %984 = vmatprep.mubr.bf16.mxu1 %v19224_v36 }
 0x190   :  { %19235 = vst [vmem:[#allocation277_spill] sm:$0xff] %v14506_v53  ;;  %v816_v49 = vpack.c.bf16 %v14508_v51, %v14506_v53  ;;  %19238 = vst [vmem:[#allocation280_spill] sm:$0xff] %v14522_v44  ;;  %v14527_v59 = vshrl.u32 %v828_v39, 7 }
 0x192   :  { %19239 = vst [vmem:[#allocation281_spill] sm:$0xff] %v14527_v59  ;;  %v18908_v33 = vsub.s32 0, %v14527_v59  ;;  %v18909_v57 = vsub.s32 1, %v14527_v59 }
 0x196   :  { %10184 = vmatmul.mubr.msk.bf16.gmra.mrb[20].mxu1 %vm688_vm0, %v815_v35  ;;  %v14520_v35 = vadd.f32 %v11255_v50, %v622_v63 }
 0x197   :  { %994 = vmatprep.mubr.bf16.mxu1 %v19224_v36 }
 0x198   :  { %19237 = vst [vmem:[#allocation279_spill] sm:$0xff] %v14520_v35  ;;  %v817_v34 = vpack.c.bf16 %v14522_v44, %v14520_v35 }
 0x19e   :  { %10185 = vmatmul.mubr.msk.bf16.gmra.mrb[24].mxu1 %vm688_vm0, %v816_v49  ;;  %v826_v49 = vld [vmem:[%s18903_s7] ss:$8 sm:$0x3] }
 0x19f   :  { %1004 = vmatprep.mubr.bf16.mxu1 %v19224_v36  ;;  %v14536_v50 = vrot.slane %v826_v49, %v18908_v33  ;;  %v14540_v63 = vrot.slane %v826_v49, %v18909_v57 }
 0x1a6   :  { %10186 = vmatmul.mubr.msk.bf16.gmra.mrb[28].mxu1 %vm688_vm0, %v817_v34 }
 0x241   :  { %v936_v47 = vpop.f32.mrb[0].mxu1 }
 0x242   :  { %v938_v60 = vpop.f32.mrb[1].mxu1  ;;  %v937_v39 = vadd.f32 %v936_v47, %v14536_v50 }
 0x243   :  { %v940_v34 = vpop.f32.mrb[2].mxu1  ;;  %v939_v32 = vadd.f32 %v938_v60, %v14540_v63 }
 0x244   :  { %v941_v41 = vadd.f32 %v940_v34, %v14536_v50  ;;  %v942_v48 = vpop.f32.mrb[3].mxu1 }
 0x245   :  { %v943_v56 = vadd.f32 %v942_v48, %v14540_v63 }
 0x246   :  { %v14546_v40 = vpack.c.bf16 %v941_v41, %v937_v39 }
 0x247   :  { %v14548_v33 = vpack.c.bf16 %v943_v56, %v939_v32 }
 0x248   :  { %11265 = vmatprep.mubr.msk.bf16.mxu1 %vm1043_vm1, %v14546_v40 }
 0x249   :  { %v946_v49 = vpop.f32.mrb[4].mxu1 }
 0x24a   :  { %v948_v57 = vpop.f32.mrb[5].mxu1  ;;  %v947_v47 = vadd.f32 %v946_v49, %v14536_v50 }
 0x24b   :  { %v950_v23 = vpop.f32.mrb[6].mxu1  ;;  %v949_v60 = vadd.f32 %v948_v57, %v14540_v63 }
 0x24c   :  { %v951_v34 = vadd.f32 %v950_v23, %v14536_v50  ;;  %v952_v7 = vpop.f32.mrb[7].mxu1 }
 0x24d   :  { %v953_v48 = vadd.f32 %v952_v7, %v14540_v63 }
 0x24e   :  { %v14556_v31 = vpack.c.bf16 %v951_v34, %v947_v47 }
 0x24f   :  { %v14558_v41 = vpack.c.bf16 %v953_v48, %v949_v60 }
 0x251   :  { %v956_v32 = vpop.f32.mrb[8].mxu1 }
 0x252   :  { %v958_v56 = vpop.f32.mrb[9].mxu1  ;;  %v957_v15 = vadd.f32 %v956_v32, %v14536_v50 }
 0x253   :  { %v960_v39 = vpop.f32.mrb[10].mxu1  ;;  %v959_v49 = vadd.f32 %v958_v56, %v14540_v63 }
 0x254   :  { %v961_v22 = vadd.f32 %v960_v39, %v14536_v50  ;;  %v962_v6 = vpop.f32.mrb[11].mxu1 }
 0x255   :  { %v963_v23 = vadd.f32 %v962_v6, %v14540_v63 }
 0x256   :  { %v14564_v30 = vpack.c.bf16 %v961_v22, %v957_v15 }
 0x257   :  { %v14566_v57 = vpack.c.bf16 %v963_v23, %v959_v49 }
 0x259   :  { %v966_v7 = vpop.f32.mrb[12].mxu1 }
 0x25a   :  { %v967_v47 = vadd.f32 %v966_v7, %v14536_v50  ;;  %v968_v34 = vpop.f32.mrb[13].mxu1 }
 0x25b   :  { %v970_v60 = vpop.f32.mrb[14].mxu1  ;;  %v969_v32 = vadd.f32 %v968_v34, %v14540_v63 }
 0x25c   :  { %v971_v48 = vadd.f32 %v970_v60, %v14536_v50  ;;  %v972_v14 = vpop.f32.mrb[15].mxu1 }
 0x25d   :  { %v973_v39 = vadd.f32 %v972_v14, %v14540_v63 }
 0x25e   :  { %v14572_v21 = vpack.c.bf16 %v971_v48, %v967_v47 }
 0x25f   :  { %v14574_v56 = vpack.c.bf16 %v973_v39, %v969_v32 }
 0x261   :  { %v976_v6 = vpop.f32.mrb[16].mxu1 }
 0x262   :  { %v978_v15 = vpop.f32.mrb[17].mxu1  ;;  %v977_v49 = vadd.f32 %v976_v6, %v14536_v50 }
 0x263   :  { %v980_v22 = vpop.f32.mrb[18].mxu1  ;;  %v979_v5 = vadd.f32 %v978_v15, %v14540_v63 }
 0x264   :  { %v981_v23 = vadd.f32 %v980_v22, %v14536_v50  ;;  %v982_v7 = vpop.f32.mrb[19].mxu1 }
 0x265   :  { %v983_v60 = vadd.f32 %v982_v7, %v14540_v63 }
 0x266   :  { %v14580_v29 = vpack.c.bf16 %v981_v23, %v977_v49 }
 0x267   :  { %v14582_v34 = vpack.c.bf16 %v983_v60, %v979_v5 }
 0x268   :  { %1137 = vrot.lane.b32.xlu0 %v14580_v29, %s13009_s19  ;;  %11281 = vmatprep.mubr.msk.bf16.mxu0 %vm1043_vm1, %v14580_v29 }
 0x269   :  { %v986_v14 = vpop.f32.mrb[20].mxu1 }
 0x26a   :  { %v988_v47 = vpop.f32.mrb[21].mxu1  ;;  %v987_v32 = vadd.f32 %v986_v14, %v14536_v50 }
 0x26b   :  { %v990_v48 = vpop.f32.mrb[22].mxu1  ;;  %v989_v15 = vadd.f32 %v988_v47, %v14540_v63 }
 0x26c   :  { %v991_v39 = vadd.f32 %v990_v48, %v14536_v50  ;;  %v992_v6 = vpop.f32.mrb[23].mxu1 }
 0x26d   :  { %v993_v5 = vadd.f32 %v992_v6, %v14540_v63 }
 0x26e   :  { %v14592_v22 = vpack.c.bf16 %v991_v39, %v987_v32 }
 0x26f   :  { %v14594_v49 = vpack.c.bf16 %v993_v5, %v989_v15 }
 0x270   :  { %19240 = vst [vmem:[#allocation282_spill] sm:$0xff] %v14592_v22  ;;  %1139 = vrot.lane.b32.xlu0 %v14592_v22, %s13009_s19 }
 0x271   :  { %v996_v23 = vpop.f32.mrb[24].mxu1 }
 0x272   :  { %v998_v7 = vpop.f32.mrb[25].mxu1  ;;  %v997_v13 = vadd.f32 %v996_v23, %v14536_v50 }
 0x273   :  { %v1000_v60 = vpop.f32.mrb[26].mxu1  ;;  %v999_v47 = vadd.f32 %v998_v7, %v14540_v63 }
 0x274   :  { %v1001_v14 = vadd.f32 %v1000_v60, %v14536_v50  ;;  %v1002_v48 = vpop.f32.mrb[27].mxu1  ;;  %1035 = vrot.lane.b32.xlu0 %v14546_v40, %s13009_s19 }
 0x275   :  { %v1003_v32 = vadd.f32 %v1002_v48, %v14540_v63 }
 0x276   :  { %v14604_v39 = vpack.c.bf16 %v1001_v14, %v997_v13 }
 0x277   :  { %v14606_v6 = vpack.c.bf16 %v1003_v32, %v999_v47 }
 0x278   :  { %19241 = vst [vmem:[#allocation283_spill] sm:$0xff] %v14604_v39  ;;  %1141 = vrot.lane.b32.xlu1 %v14604_v39, %s13009_s19  ;;  %1039 = vrot.lane.b32.xlu0 %v14564_v30, %s13009_s19 }
 0x279   :  { %v1006_v15 = vpop.f32.mrb[28].mxu1 }
 0x27a   :  { %v1008_v5 = vpop.f32.mrb[29].mxu1  ;;  %v1007_v60 = vadd.f32 %v1006_v15, %v14536_v50 }
 0x27b   :  { %v1010_v23 = vpop.f32.mrb[30].mxu1  ;;  %v1009_v48 = vadd.f32 %v1008_v5, %v14540_v63 }
 0x27c   :  { %v1011_v20 = vadd.f32 %v1010_v23, %v14536_v50  ;;  %v1012_v7 = vpop.f32.mrb[31].mxu1 }
 0x27d   :  { %v1013_v13 = vadd.f32 %v1012_v7, %v14540_v63 }
 0x27e   :  { %v14616_v14 = vpack.c.bf16 %v1011_v20, %v1007_v60 }
 0x27f   :  { %v14618_v47 = vpack.c.bf16 %v1013_v13, %v1009_v48 }
 0x280   :  { %19242 = vst [vmem:[#allocation284_spill] sm:$0xff] %v14616_v14  ;;  %1143 = vrot.lane.b32.xlu1 %v14616_v14, %s13009_s19 }
 0x284   :  { %1037 = vrot.lane.b32.xlu1 %v14556_v31, %s13009_s19 }
 0x288   :  { %1041 = vrot.lane.b32.xlu1 %v14572_v21, %s13009_s19 }
 0x28c   :  { %1695 = vrot.lane.b32.xlu1 %v14580_v29, %s13010_s20 }
 0x2da   :  { %v1138_v50 = vpop.permute.xlu0 %1137 }
 0x2db   :  { %12125 = vmatprep.subr.msk.bf16.mxu0 %vm1043_vm1, %v1138_v50  ;;  %v1158_v20 = vsel %vm1043_vm1, %v1138_v50, 0 }
 0x2dc   :  { %11274 = vmatpush3.bf16.xpose.msra.mxu0 %v1158_v20 }
 0x2e2   :  { %v1140_v63 = vpop.permute.xlu0 %1139 }
 0x2e3   :  { %12126 = vmatprep.subr.msk.bf16.mxu0 %vm1043_vm1, %v1140_v63  ;;  %v1161_v32 = vsel %vm1043_vm1, %v1140_v63, 0 }
 0x2e4   :  { %11276 = vmatpush3.bf16.xpose.msra.mxu0 %v1161_v32 }
 0x2e6   :  { %v1036_v15 = vpop.permute.xlu0 %1035 }
 0x2e7   :  { %12121 = vmatprep.subr.msk.bf16.mxu1 %vm1043_vm1, %v1036_v15  ;;  %v1057_v5 = vsel %vm1043_vm1, %v1036_v15, 0 }
 0x2e8   :  { %11258 = vmatpush3.bf16.xpose.msra.mxu1 %v1057_v5 }
 0x2ea   :  { %v1142_v23 = vpop.permute.xlu1 %1141  ;;  %v1040_v20 = vpop.permute.xlu0 %1039 }
 0x2eb   :  { %12127 = vmatprep.subr.msk.bf16.mxu0 %vm1043_vm1, %v1142_v23  ;;  %v1164_v60 = vsel %vm1043_vm1, %v1142_v23, 0  ;;  %v1063_v63 = vsel %vm1043_vm1, %v1040_v20, 0 }
 0x2ec   :  { %11278 = vmatpush3.bf16.xpose.msra.mxu0 %v1164_v60 }
 0x2f2   :  { %v1144_v7 = vpop.permute.xlu1 %1143 }
 0x2f3   :  { %12128 = vmatprep.subr.msk.bf16.mxu0 %vm1043_vm1, %v1144_v7  ;;  %v1167_v48 = vsel %vm1043_vm1, %v1144_v7, 0 }
 0x2f4   :  { %11280 = vmatpush3.bf16.xpose.msra.mxu0 %v1167_v48 }
 0x2f5   :  { %11305 = vmatprep.subr.bf16.mxu0 %v14582_v34 }
 0x2f6   :  { %v1038_v13 = vpop.permute.xlu1 %1037 }
 0x2f7   :  { %12122 = vmatprep.subr.msk.bf16.mxu1 %vm1043_vm1, %v1038_v13  ;;  %v1060_v50 = vsel %vm1043_vm1, %v1038_v13, 0 }
 0x2f8   :  { %11260 = vmatpush3.bf16.xpose.msra.mxu1 %v1060_v50 }
 0x2f9   :  { %12123 = vmatprep.subr.msk.bf16.mxu1 %vm1043_vm1, %v1040_v20 }
 0x2fa   :  { %v1042_v32 = vpop.permute.xlu1 %1041 }
 0x2fb   :  { %11282 = vmatmul.mubr.msk.bf16.vlgmr.msra.gmra.mrb[16].mxu0 %vm1043_vm1, %v14592_v22  ;;  %v1066_v15 = vsel %vm1043_vm1, %v1042_v32, 0 }
 0x2fc   :  { %11285 = vmatprep.mubr.msk.bf16.mxu0 %vm1043_vm1, %v14604_v39  ;;  %11306 = vmatpush3.bf16.msra.mxu0 %v14582_v34 }
 0x2fd   :  { %11307 = vmatprep.subr.bf16.mxu0 %v14594_v49 }
 0x2fe   :  { %v14657_v5 = vpop.permute.xlu1 %1695 }
 0x300   :  { %11262 = vmatpush3.bf16.xpose.msra.mxu1 %v1063_v63  ;;  %11308 = vmatpush3.bf16.msra.mxu0 %v14594_v49 }
 0x301   :  { %12124 = vmatprep.subr.msk.bf16.mxu1 %vm1043_vm1, %v1042_v32  ;;  %11309 = vmatprep.subr.bf16.mxu0 %v14606_v6 }
 0x303   :  { %11286 = vmatmul.mubr.msk.bf16.gmra.mrb[20].mxu0 %vm1043_vm1, %v14616_v14 }
 0x304   :  { %11310 = vmatpush3.bf16.msra.mxu0 %v14606_v6 }
 0x305   :  { %11311 = vmatprep.subr.bf16.mxu0 %v14618_v47 }
 0x308   :  { %11264 = vmatpush3.bf16.xpose.msra.mxu1 %v1066_v15  ;;  %11312 = vmatpush3.bf16.msra.mxu0 %v14618_v47 }
 0x309   :  { %11289 = vmatprep.subr.bf16.mxu1 %v14548_v33  ;;  %12133 = vmatprep.subr.msk.bf16.mxu0 %vm1043_vm1, %v14657_v5 }
 0x30f   :  { %11266 = vmatmul.mubr.msk.bf16.vlgmr.msra.gmra.mrb[32].mxu1 %vm1043_vm1, %v14556_v31 }
 0x310   :  { %11269 = vmatprep.mubr.msk.bf16.mxu1 %vm1043_vm1, %v14564_v30  ;;  %11290 = vmatpush3.bf16.msra.mxu1 %v14548_v33 }
 0x311   :  { %11291 = vmatprep.subr.bf16.mxu1 %v14558_v41 }
 0x314   :  { %11292 = vmatpush3.bf16.msra.mxu1 %v14558_v41 }
 0x315   :  { %11293 = vmatprep.subr.bf16.mxu1 %v14566_v57 }
 0x317   :  { %11270 = vmatmul.mubr.msk.bf16.gmra.mrb[36].mxu1 %vm1043_vm1, %v14572_v21 }
 0x318   :  { %11294 = vmatpush3.bf16.msra.mxu1 %v14566_v57 }
 0x319   :  { %11295 = vmatprep.subr.bf16.mxu1 %v14574_v56 }
 0x31c   :  { %11296 = vmatpush3.bf16.msra.mxu1 %v14574_v56 }
 0x3ce   :  { %v11283_v23 = vpop.f32.mrb[16].mxu0 }
 0x3cf   :  { %v1203_v60 = vpop.f32.mrb[17].mxu0  ;;  %v1264_v7 = vsel %vm688_vm0, %v11283_v23, -inf }
 0x3d0   :  { %v11284_v48 = vpop.f32.mrb[18].mxu0  ;;  %1265 = vmax.xlane.f32.xlu0 %v1264_v7  ;;  %v1258_v20 = vsel %vm688_vm0, %v1203_v60, -inf }
 0x3d1   :  { %v1206_v13 = vpop.f32.mrb[19].mxu0  ;;  %v1267_v4 = vsel %vm688_vm0, %v11284_v48, -inf }
 0x3d2   :  { %v1261_v50 = vsel %vm688_vm0, %v1206_v13, -inf }
 0x3d3   :  { %1262 = vmax.xlane.f32.xlu1 %v1261_v50 }
 0x3d4   :  { %1259 = vmax.xlane.f32.xlu0 %v1258_v20 }
 0x3d6   :  { %v11287_v63 = vpop.f32.mrb[20].mxu0 }
 0x3d7   :  { %v1219_v32 = vpop.f32.mrb[21].mxu0  ;;  %v1276_v15 = vsel %vm688_vm0, %v11287_v63, -inf }
 0x3d8   :  { %v11288_v28 = vpop.f32.mrb[22].mxu0  ;;  %1277 = vmax.xlane.f32.xlu1 %v1276_v15  ;;  %1268 = vmax.xlane.f32.xlu0 %v1267_v4  ;;  %v1270_v19 = vsel %vm688_vm0, %v1219_v32, -inf }
 0x3d9   :  { %v1222_v12 = vpop.f32.mrb[23].mxu0  ;;  %v1279_v7 = vsel %vm688_vm0, %v11288_v28, -inf }
 0x3da   :  { %v1273_v50 = vsel %vm688_vm0, %v1222_v12, -inf }
 0x3dc   :  { %1271 = vmax.xlane.f32.xlu1 %v1270_v19  ;;  %1280 = vmax.xlane.f32.xlu0 %v1279_v7 }
 0x3e0   :  { %1274 = vmax.xlane.f32.xlu0 %v1273_v50 }
 0x3e2   :  { %v14684_v20 = vpop.f32.mrb[32].mxu1 }
 0x3e3   :  { %v14686_v3 = vpop.f32.mrb[33].mxu1 }
 0x3e4   :  { %v14688_v27 = vpop.f32.mrb[34].mxu1 }
 0x3e5   :  { %v14690_v11 = vpop.f32.mrb[35].mxu1 }
 0x3ea   :  { %v14692_v15 = vpop.f32.mrb[36].mxu1 }
 0x3eb   :  { %v14694_v4 = vpop.f32.mrb[37].mxu1 }
 0x3ec   :  { %v14696_v18 = vpop.f32.mrb[38].mxu1 }
 0x3ed   :  { %1699 = vrot.lane.b32.xlu1 %v14604_v39, %s13010_s20  ;;  %v14700_v19 = vpop.f32.mrb[39].mxu1 }
 0x3f1   :  { %1701 = vrot.lane.b32.xlu1 %v14616_v14, %s13010_s20 }
 0x3f6   :  { %1697 = vrot.lane.b32.xlu0 %v14592_v22, %s13010_s20 }
 0x45d   :  { %v1266_v7 = vpop.xlane.xlu0 %1265 }
 0x45e   :  { %v1292_v50 = vsub.f32 %v11283_v23, %v1266_v7 }
 0x460   :  { %v1318_v2 = vmul.f32 1.442695, %v1292_v50  ;;  %v1263_v26 = vpop.xlane.xlu1 %1262  ;;  %v1243_v50 = vsel %vm688_vm0, %v14688_v27, -inf }
 0x461   :  { %v1260_v10 = vpop.xlane.xlu0 %1259  ;;  %v1291_v25 = vsub.f32 %v1206_v13, %v1263_v26  ;;  %v1237_v13 = vsel %vm688_vm0, %v14690_v11, -inf }
 0x462   :  { %12342 = vpow2.f32 %v1318_v2  ;;  %v1290_v17 = vsub.f32 %v1203_v60, %v1260_v10 }
 0x463   :  { %v1316_v51 = vmul.f32 1.442695, %v1291_v25 }
 0x464   :  { %v1314_v1 = vmul.f32 1.442695, %v1290_v17 }
 0x465   :  { %v1278_v9 = vpop.xlane.xlu1 %1277  ;;  %v1269_v16 = vpop.xlane.xlu0 %1268 }
 0x466   :  { %12344 = vpow2.f32 %v1314_v1  ;;  %v1296_v0 = vsub.f32 %v11287_v63, %v1278_v9  ;;  %v1293_v24 = vsub.f32 %v11284_v48, %v1269_v16  ;;  %v1234_v63 = vsel %vm688_vm0, %v14686_v3, -inf }
 0x468   :  { %v1326_v8 = vmul.f32 1.442695, %v1296_v0  ;;  %v1320_v59 = vmul.f32 1.442695, %v1293_v24 }
 0x469   :  { %v1272_v53 = vpop.xlane.xlu1 %1271  ;;  %v1281_v44 = vpop.xlane.xlu0 %1280 }
 0x46a   :  { %12346 = vpow2.f32 %v1326_v8  ;;  %v1294_v35 = vsub.f32 %v1219_v32, %v1272_v53  ;;  %v1297_v23 = vsub.f32 %v11288_v28, %v1281_v44  ;;  %v1240_v32 = vsel %vm688_vm0, %v14684_v20, -inf }
 0x46b   :  { %12348 = vpow2.f32 %v1320_v59 }
 0x46c   :  { %v14706_v7 = vpop.eup %12342  ;;  %v1322_v2 = vmul.f32 1.442695, %v1294_v35  ;;  %12350 = vpow2.f32 %v1316_v51  ;;  %v1328_v10 = vmul.f32 1.442695, %v1297_v23  ;;  %v1246_v23 = vsel %vm688_vm0, %v14694_v4, -inf }
 0x46d   :  { %v1275_v17 = vpop.xlane.xlu0 %1274  ;;  %v1360_v1 = vsel %vm688_vm0, %v14706_v7, 0.0 }
 0x46e   :  { %12352 = vpow2.f32 %v1322_v2  ;;  %v1295_v9 = vsub.f32 %v1222_v12, %v1275_v17  ;;  %1361 = vadd.xlane.f32.xlu1 %v1360_v1  ;;  %v1252_v2 = vsel %vm688_vm0, %v14692_v15, -inf  ;;  %v1249_v17 = vsel %vm688_vm0, %v14700_v19, -inf }
 0x46f   :  { %12354 = vpow2.f32 %v1328_v10  ;;  %v1700_v10 = vpop.permute.xlu1 %1699 }
 0x470   :  { %v14710_v0 = vpop.eup %12344  ;;  %v1324_v16 = vmul.f32 1.442695, %v1295_v9  ;;  %v1255_v9 = vsel %vm688_vm0, %v14696_v18, -inf }
 0x471   :  { %v1354_v8 = vsel %vm688_vm0, %v14710_v0, 0.0 }
 0x472   :  { %1355 = vadd.xlane.f32.xlu1 %v1354_v8  ;;  %12356 = vpow2.f32 %v1324_v16  ;;  %v1698_v8 = vpop.permute.xlu0 %1697 }
 0x473   :  { %v1702_v1 = vpop.permute.xlu1 %1701 }
 0x474   :  { %v14714_v24 = vpop.eup %12346 }
 0x475   :  { %v12349_v25 = vpop.eup %12348  ;;  %v1372_v26 = vsel %vm688_vm0, %v14714_v24, 0.0 }
 0x476   :  { %1373 = vadd.xlane.f32.xlu1 %v1372_v26  ;;  %v1363_v28 = vsel %vm688_vm0, %v12349_v25, 0.0  ;;  %v12351_v12 = vpop.eup %12350 }
 0x477   :  { %1364 = vadd.xlane.f32.xlu0 %v1363_v28  ;;  %v1357_v35 = vsel %vm688_vm0, %v12351_v12, 0.0 }
 0x478   :  { %v14719_v53 = vpop.eup %12352 }
 0x479   :  { %v1366_v51 = vsel %vm688_vm0, %v14719_v53, 0.0  ;;  %v14724_v44 = vpop.eup %12354 }
 0x47a   :  { %1367 = vadd.xlane.f32.xlu1 %v1366_v51  ;;  %v1375_v59 = vsel %vm688_vm0, %v14724_v44, 0.0 }
 0x47b   :  { %1358 = vadd.xlane.f32.xlu0 %v1357_v35 }
 0x47c   :  { %v14728_v60 = vpop.eup %12356 }
 0x47d   :  { %v1369_v48 = vsel %vm688_vm0, %v14728_v60, 0.0 }
 0x47f   :  { %1376 = vadd.xlane.f32.xlu0 %v1375_v59 }
 0x483   :  { %1370 = vadd.xlane.f32.xlu0 %v1369_v48 }
 0x48b   :  { %1689 = vrot.lane.b32.xlu1 %v14592_v22, %s13011_s21 }
 0x499   :  { %1687 = vrot.lane.b32.xlu0 %v14580_v29, %s13011_s21 }
 0x4af   :  { %1238 = vmax.xlane.f32.xlu1 %v1237_v13 }
 0x4b8   :  { %1235 = vmax.xlane.f32.xlu0 %v1234_v63 }
 0x4bc   :  { %1241 = vmax.xlane.f32.xlu0 %v1240_v32 }
 0x4c0   :  { %1244 = vmax.xlane.f32.xlu0 %v1243_v50  ;;  %1691 = vrot.lane.b32.xlu1 %v14604_v39, %s13011_s21 }
 0x4d6   :  { %1693 = vrot.lane.b32.xlu0 %v14616_v14, %s13011_s21 }
 0x4e4   :  { %1247 = vmax.xlane.f32.xlu1 %v1246_v23 }
 0x4e8   :  { %1253 = vmax.xlane.f32.xlu1 %v1252_v2 }
 0x4f5   :  { %1250 = vmax.xlane.f32.xlu0 %v1249_v17 }
 0x4f9   :  { %1256 = vmax.xlane.f32.xlu0 %v1255_v9 }
 0x4fb   :  { %v1362_v16 = vpop.xlane.xlu1 %1361 }
 0x4ff   :  { %v1356_v26 = vpop.xlane.xlu1 %1355 }
 0x503   :  { %v1374_v51 = vpop.xlane.xlu1 %1373 }
 0x504   :  { %v1365_v28 = vpop.xlane.xlu0 %1364 }
 0x505   :  { %12358 = vrcp.f32 %v1365_v28 }
 0x506   :  { %12360 = vrcp.f32 %v1356_v26 }
 0x507   :  { %12362 = vrcp.f32 %v1362_v16  ;;  %v1368_v59 = vpop.xlane.xlu1 %1367 }
 0x508   :  { %v1359_v35 = vpop.xlane.xlu0 %1358 }
 0x509   :  { %12364 = vrcp.f32 %v1359_v35 }
 0x50c   :  { %v1377_v48 = vpop.xlane.xlu0 %1376 }
 0x50d   :  { %12366 = vrcp.f32 %v1377_v48 }
 0x50e   :  { %12368 = vrcp.f32 %v1368_v59 }
 0x50f   :  { %v12359_v13 = vpop.eup %12358  ;;  %12370 = vrcp.f32 %v1374_v51  ;;  %v1716_v51 = vsel %vm1043_vm1, %v14657_v5, 0  ;;  %v1719_v5 = vsel %vm1043_vm1, %v1698_v8, 0 }
 0x510   :  { %v1371_v63 = vpop.xlane.xlu0 %1370  ;;  %v12361_v32 = vpop.eup %12360  ;;  %v1405_v2 = vmul.f32 %v12359_v13, %v12349_v25 }
 0x511   :  { %12372 = vrcp.f32 %v1371_v63  ;;  %v12363_v50 = vpop.eup %12362  ;;  %v1402_v17 = vmul.f32 %v12361_v32, %v14710_v0 }
 0x512   :  { %v1404_v26 = vmul.f32 %v12363_v50, %v14706_v7 }
 0x513   :  { %v12365_v23 = vpop.eup %12364 }
 0x514   :  { %v1403_v9 = vmul.f32 %v12365_v23, %v12351_v12  ;;  %v1415_v28 = vpack.c.bf16 %v1405_v2, %v1404_v26  ;;  %v1688_v50 = vpop.permute.xlu0 %1687 }
 0x516   :  { %v1414_v16 = vpack.c.bf16 %v1403_v9, %v1402_v17 }
 0x517   :  { %v12367_v35 = vpop.eup %12366 }
 0x518   :  { %11313 = vmatprep.mubr.msk.bf16.mxu0 %vm688_vm0, %v1414_v16  ;;  %v12369_v48 = vpop.eup %12368  ;;  %v1409_v0 = vmul.f32 %v12367_v35, %v14724_v44  ;;  %v1690_v44 = vpop.permute.xlu1 %1689 }
 0x519   :  { %11314 = vmatmul.mubr.msk.bf16.vlgmr.msra.gmra.mrb[24].mxu0 %vm688_vm0, %v1415_v28  ;;  %v12371_v59 = vpop.eup %12370  ;;  %v1406_v7 = vmul.f32 %v12369_v48, %v14719_v53  ;;  %v1722_v53 = vsel %vm1043_vm1, %v1700_v10, 0 }
 0x51a   :  { %11338 = vmatpush3.bf16.xpose.msra.mxu0 %v1716_v51  ;;  %v1408_v12 = vmul.f32 %v12371_v59, %v14714_v24  ;;  %v1725_v24 = vsel %vm1043_vm1, %v1702_v1, 0 }
 0x51b   :  { %v12373_v63 = vpop.eup %12372  ;;  %12134 = vmatprep.subr.msk.bf16.mxu0 %vm1043_vm1, %v1698_v8 }
 0x51c   :  { %v1407_v25 = vmul.f32 %v12373_v63, %v14728_v60  ;;  %v1417_v32 = vpack.c.bf16 %v1409_v0, %v1408_v12 }
 0x51e   :  { %v1416_v13 = vpack.c.bf16 %v1407_v25, %v1406_v7 }
 0x520   :  { %11317 = vmatprep.mubr.msk.bf16.mxu0 %vm688_vm0, %v1416_v13 }
 0x521   :  { %11318 = vmatmul.mubr.msk.bf16.gmra.mrb[28].mxu0 %vm688_vm0, %v1417_v32 }
 0x522   :  { %11340 = vmatpush3.bf16.xpose.msra.mxu0 %v1719_v5  ;;  %11345 = vmatprep.mubr.msk.bf16.mxu0 %vm1043_vm1, %v1688_v50 }
 0x523   :  { %12135 = vmatprep.subr.msk.bf16.mxu0 %vm1043_vm1, %v1700_v10 }
 0x52a   :  { %11342 = vmatpush3.bf16.xpose.msra.mxu0 %v1722_v53 }
 0x52b   :  { %12136 = vmatprep.subr.msk.bf16.mxu0 %vm1043_vm1, %v1702_v1 }
 0x532   :  { %11344 = vmatpush3.bf16.xpose.msra.mxu0 %v1725_v24 }
 0x539   :  { %11346 = vmatmul.mubr.msk.bf16.vlgmr.msra.gmra.mrb[32].mxu0 %vm1043_vm1, %v1690_v44 }
 0x53c   :  { %v1239_v60 = vpop.xlane.xlu1 %1238 }
 0x53d   :  { %v1283_v23 = vsub.f32 %v14690_v11, %v1239_v60 }
 0x53f   :  { %v1300_v8 = vmul.f32 1.442695, %v1283_v23 }
 0x540   :  { %v1692_v2 = vpop.permute.xlu1 %1691 }
 0x541   :  { %12374 = vpow2.f32 %v1300_v8  ;;  %11349 = vmatprep.mubr.msk.bf16.mxu0 %vm1043_vm1, %v1692_v2 }
 0x545   :  { %v1236_v17 = vpop.xlane.xlu0 %1235 }
 0x546   :  { %v1282_v10 = vsub.f32 %v14686_v3, %v1236_v17 }
 0x548   :  { %v1298_v9 = vmul.f32 1.442695, %v1282_v10 }
 0x549   :  { %v1242_v26 = vpop.xlane.xlu0 %1241 }
 0x54a   :  { %12376 = vpow2.f32 %v1298_v9  ;;  %v1284_v1 = vsub.f32 %v14684_v20, %v1242_v26 }
 0x54b   :  { %v14780_v16 = vpop.eup %12374 }
 0x54c   :  { %v1302_v28 = vmul.f32 1.442695, %v1284_v1  ;;  %v1333_v35 = vsel %vm688_vm0, %v14780_v16, 0.0 }
 0x54d   :  { %v1245_v11 = vpop.xlane.xlu0 %1244  ;;  %1334 = vadd.xlane.f32.xlu0 %v1333_v35 }
 0x54e   :  { %12378 = vpow2.f32 %v1302_v28  ;;  %v1285_v48 = vsub.f32 %v14688_v27, %v1245_v11 }
 0x550   :  { %v1304_v51 = vmul.f32 1.442695, %v1285_v48 }
 0x551   :  { %v1694_v59 = vpop.permute.xlu0 %1693 }
 0x552   :  { %12380 = vpow2.f32 %v1304_v51  ;;  %11350 = vmatmul.mubr.msk.bf16.gmra.mrb[36].mxu0 %vm1043_vm1, %v1694_v59 }
 0x554   :  { %v14786_v3 = vpop.eup %12376 }
 0x555   :  { %v1330_v20 = vsel %vm688_vm0, %v14786_v3, 0.0 }
 0x556   :  { %1331 = vadd.xlane.f32.xlu1 %v1330_v20 }
 0x558   :  { %v14790_v63 = vpop.eup %12378 }
 0x559   :  { %v1336_v0 = vsel %vm688_vm0, %v14790_v63, 0.0 }
 0x55a   :  { %1337 = vadd.xlane.f32.xlu1 %v1336_v0 }
 0x55c   :  { %v14794_v7 = vpop.eup %12380 }
 0x55d   :  { %v1339_v27 = vsel %vm688_vm0, %v14794_v7, 0.0 }
 0x55e   :  { %1340 = vadd.xlane.f32.xlu0 %v1339_v27 }
 0x571   :  { %v1248_v25 = vpop.xlane.xlu1 %1247 }
 0x572   :  { %v1286_v12 = vsub.f32 %v14694_v4, %v1248_v25 }
 0x574   :  { %v1306_v13 = vmul.f32 1.442695, %v1286_v12 }
 0x575   :  { %v1254_v32 = vpop.xlane.xlu1 %1253 }
 0x576   :  { %12382 = vpow2.f32 %v1306_v13  ;;  %v1288_v50 = vsub.f32 %v14692_v15, %v1254_v32 }
 0x578   :  { %v1310_v5 = vmul.f32 1.442695, %v1288_v50 }
 0x57a   :  { %12384 = vpow2.f32 %v1310_v5 }
 0x580   :  { %v14800_v53 = vpop.eup %12382 }
 0x581   :  { %v1342_v24 = vsel %vm688_vm0, %v14800_v53, 0.0 }
 0x582   :  { %v1251_v44 = vpop.xlane.xlu0 %1250  ;;  %1343 = vadd.xlane.f32.xlu1 %v1342_v24 }
 0x583   :  { %v1287_v60 = vsub.f32 %v14700_v19, %v1251_v44 }
 0x584   :  { %v14805_v23 = vpop.eup %12384 }
 0x585   :  { %v1308_v8 = vmul.f32 1.442695, %v1287_v60  ;;  %v1348_v4 = vsel %vm688_vm0, %v14805_v23, 0.0 }
 0x586   :  { %v1257_v2 = vpop.xlane.xlu0 %1256  ;;  %1349 = vadd.xlane.f32.xlu1 %v1348_v4 }
 0x587   :  { %12386 = vpow2.f32 %v1308_v8  ;;  %v1289_v15 = vsub.f32 %v14696_v18, %v1257_v2 }
 0x589   :  { %v1312_v17 = vmul.f32 1.442695, %v1289_v15 }
 0x58b   :  { %12388 = vpow2.f32 %v1312_v17 }
 0x591   :  { %v14810_v10 = vpop.eup %12386 }
 0x592   :  { %v1345_v9 = vsel %vm688_vm0, %v14810_v10, 0.0 }
 0x593   :  { %1346 = vadd.xlane.f32.xlu0 %v1345_v9 }
 0x595   :  { %v14814_v19 = vpop.eup %12388 }
 0x596   :  { %v1351_v26 = vsel %vm688_vm0, %v14814_v19, 0.0 }
 0x597   :  { %1352 = vadd.xlane.f32.xlu0 %v1351_v26  ;;  %1590 = vrot.lane.b32.xlu1 %v14546_v40, %s13010_s20 }
 0x59b   :  { %1594 = vrot.lane.b32.xlu1 %v14564_v30, %s13010_s20 }
 0x59f   :  { %1596 = vrot.lane.b32.xlu1 %v14572_v21, %s13010_s20 }
 0x5a3   :  { %1584 = vrot.lane.b32.xlu1 %v14556_v31, %s13011_s21 }
 0x5a7   :  { %1588 = vrot.lane.b32.xlu1 %v14572_v21, %s13011_s21 }
 0x5ab   :  { %2073 = vrot.lane.b32.xlu1 %v14582_v34, %s13011_s21 }
 0x5ad   :  { %1592 = vrot.lane.b32.xlu0 %v14556_v31, %s13010_s20 }
 0x5af   :  { %2077 = vrot.lane.b32.xlu1 %v14606_v6, %s13011_s21 }
 0x5b1   :  { %1582 = vrot.lane.b32.xlu0 %v14546_v40, %s13011_s21 }
 0x5b3   :  { %2079 = vrot.lane.b32.xlu1 %v14618_v47, %s13011_s21 }
 0x5b5   :  { %1586 = vrot.lane.b32.xlu0 %v14564_v30, %s13011_s21 }
 0x5b7   :  { %2434 = vrot.lane.b32.xlu1 %v14546_v40, %s13012_s22 }
 0x5b9   :  { %2075 = vrot.lane.b32.xlu0 %v14594_v49, %s13011_s21 }
 0x5bb   :  { %2438 = vrot.lane.b32.xlu1 %v14564_v30, %s13012_s22 }
 0x5bd   :  { %2436 = vrot.lane.b32.xlu0 %v14556_v31, %s13012_s22 }
 0x5bf   :  { %2440 = vrot.lane.b32.xlu1 %v14572_v21, %s13012_s22 }
 0x5da   :  { %v1335_v18 = vpop.xlane.xlu0 %1334 }
 0x5db   :  { %12390 = vrcp.f32 %v1335_v18 }
 0x5e3   :  { %v1332_v1 = vpop.xlane.xlu1 %1331 }
 0x5e4   :  { %12392 = vrcp.f32 %v1332_v1 }
 0x5e5   :  { %v12391_v11 = vpop.eup %12390 }
 0x5e6   :  { %v1395_v12 = vmul.f32 %v12391_v11, %v14780_v16 }
 0x5e7   :  { %v1338_v28 = vpop.xlane.xlu1 %1337 }
 0x5e8   :  { %12394 = vrcp.f32 %v1338_v28 }
 0x5eb   :  { %v1341_v35 = vpop.xlane.xlu0 %1340 }
 0x5ec   :  { %12396 = vrcp.f32 %v1341_v35  ;;  %v14850_v48 = vpop.f32.mrb[24].mxu0 }
 0x5ed   :  { %19243 = vst [vmem:[#allocation285_spill] sm:$0xff] %v14850_v48  ;;  %v14852_v51 = vpop.f32.mrb[25].mxu0 }
 0x5ee   :  { %v12393_v59 = vpop.eup %12392  ;;  %v14854_v20 = vpop.f32.mrb[26].mxu0 }
 0x5ef   :  { %v14858_v27 = vpop.f32.mrb[27].mxu0  ;;  %v1394_v25 = vmul.f32 %v12393_v59, %v14786_v3 }
 0x5f1   :  { %v1410_v32 = vpack.c.bf16 %v1395_v12, %v1394_v25 }
 0x5f2   :  { %v12395_v50 = vpop.eup %12394 }
 0x5f3   :  { %11297 = vmatprep.mubr.msk.bf16.mxu1 %vm688_vm0, %v1410_v32  ;;  %v1396_v8 = vmul.f32 %v12395_v50, %v14790_v63 }
 0x5f4   :  { %v14865_v5 = vpop.f32.mrb[28].mxu0 }
 0x5f5   :  { %19244 = vst [vmem:[#allocation286_spill] sm:$0xff] %v14865_v5  ;;  %v14867_v24 = vpop.f32.mrb[29].mxu0 }
 0x5f6   :  { %19245 = vst [vmem:[#allocation287_spill] sm:$0xff] %v14867_v24  ;;  %v12397_v44 = vpop.eup %12396  ;;  %v14869_v60 = vpop.f32.mrb[30].mxu0 }
 0x5f7   :  { %19246 = vst [vmem:[#allocation288_spill] sm:$0xff] %v14869_v60  ;;  %v1397_v3 = vmul.f32 %v12397_v44, %v14794_v7  ;;  %v14875_v4 = vpop.f32.mrb[31].mxu0 }
 0x5f8   :  { %19247 = vst [vmem:[#allocation289_spill] sm:$0xff] %v14875_v4 }
 0x5f9   :  { %v1411_v15 = vpack.c.bf16 %v1397_v3, %v1396_v8 }
 0x5fb   :  { %11298 = vmatmul.mubr.msk.bf16.vlgmr.msra.gmra.mrb[40].mxu1 %vm688_vm0, %v1411_v15 }
 0x60c   :  { %v14880_v17 = vpop.f32.mrb[32].mxu0 }
 0x60d   :  { %v14882_v9 = vpop.f32.mrb[33].mxu0  ;;  %v1822_v63 = vsel %vm688_vm0, %v14880_v17, -inf }
 0x60e   :  { %v14886_v26 = vpop.f32.mrb[34].mxu0  ;;  %1823 = vmax.xlane.f32.xlu0 %v1822_v63  ;;  %v1816_v28 = vsel %vm688_vm0, %v14882_v9, -inf }
 0x60f   :  { %v14888_v7 = vpop.f32.mrb[35].mxu0  ;;  %v1344_v18 = vpop.xlane.xlu1 %1343  ;;  %v1825_v11 = vsel %vm688_vm0, %v14886_v26, -inf }
 0x610   :  { %v1819_v1 = vsel %vm688_vm0, %v14888_v7, -inf  ;;  %12398 = vrcp.f32 %v1344_v18 }
 0x611   :  { %1820 = vmax.xlane.f32.xlu1 %v1819_v1 }
 0x612   :  { %1817 = vmax.xlane.f32.xlu0 %v1816_v28 }
 0x613   :  { %v1350_v35 = vpop.xlane.xlu1 %1349 }
 0x616   :  { %1826 = vmax.xlane.f32.xlu0 %v1825_v11 }
 0x617   :  { %v1591_v59 = vpop.permute.xlu1 %1590 }
 0x618   :  { %12129 = vmatprep.subr.msk.bf16.mxu1 %vm1043_vm1, %v1591_v59  ;;  %v1611_v25 = vsel %vm1043_vm1, %v1591_v59, 0 }
 0x619   :  { %11322 = vmatpush3.bf16.xpose.msra.mxu1 %v1611_v25 }
 0x61a   :  { %v12399_v59 = vpop.eup %12398 }
 0x61b   :  { %v1595_v12 = vpop.permute.xlu1 %1594  ;;  %v1398_v16 = vmul.f32 %v12399_v59, %v14800_v53 }
 0x61c   :  { %v1617_v42 = vsel %vm1043_vm1, %v1595_v12, 0 }
 0x61f   :  { %v1597_v32 = vpop.permute.xlu1 %1596 }
 0x620   :  { %v1347_v50 = vpop.xlane.xlu0 %1346 }
 0x621   :  { %12400 = vrcp.f32 %v1347_v50 }
 0x622   :  { %12402 = vrcp.f32 %v1350_v35 }
 0x623   :  { %v1585_v44 = vpop.permute.xlu1 %1584 }
 0x624   :  { %v1353_v8 = vpop.xlane.xlu0 %1352 }
 0x625   :  { %12404 = vrcp.f32 %v1353_v8  ;;  %v14898_v3 = vpop.f32.mrb[36].mxu0 }
 0x626   :  { %v14900_v15 = vpop.f32.mrb[37].mxu0  ;;  %v1834_v63 = vsel %vm688_vm0, %v14898_v3, -inf }
 0x627   :  { %v14904_v1 = vpop.f32.mrb[38].mxu0  ;;  %1835 = vmax.xlane.f32.xlu1 %v1834_v63  ;;  %v1589_v28 = vpop.permute.xlu1 %1588  ;;  %v1828_v25 = vsel %vm688_vm0, %v14900_v15, -inf }
 0x628   :  { %v14906_v11 = vpop.f32.mrb[39].mxu0  ;;  %v1593_v18 = vpop.permute.xlu0 %1592 }
 0x629   :  { %12130 = vmatprep.subr.msk.bf16.mxu1 %vm1043_vm1, %v1593_v18  ;;  %v1614_v35 = vsel %vm1043_vm1, %v1593_v18, 0 }
 0x62a   :  { %11324 = vmatpush3.bf16.xpose.msra.mxu1 %v1614_v35 }
 0x62b   :  { %v12401_v50 = vpop.eup %12400  ;;  %1829 = vmax.xlane.f32.xlu1 %v1828_v25  ;;  %12131 = vmatprep.subr.msk.bf16.mxu1 %vm1043_vm1, %v1595_v12  ;;  %v2074_v8 = vpop.permute.xlu1 %2073 }
 0x62c   :  { %2426 = vrot.lane.b32.xlu0 %v14546_v40, %s13013_s23  ;;  %v1583_v63 = vpop.permute.xlu0 %1582  ;;  %11369 = vmatprep.subr.bf16.mxu0 %v2074_v8  ;;  %v1399_v2 = vmul.f32 %v12401_v50, %v14810_v10  ;;  %v12403_v18 = vpop.eup %12402 }
 0x62d   :  { %11370 = vmatpush3.bf16.msra.mxu0 %v2074_v8  ;;  %v1400_v13 = vmul.f32 %v12403_v18, %v14805_v23  ;;  %v1620_v23 = vsel %vm1043_vm1, %v1597_v32, 0 }
 0x62e   :  { %v1412_v35 = vpack.c.bf16 %v1399_v2, %v1398_v16 }
 0x62f   :  { %v12405_v0 = vpop.eup %12404  ;;  %v2078_v43 = vpop.permute.xlu1 %2077 }
 0x630   :  { %11301 = vmatprep.mubr.msk.bf16.mxu1 %vm688_vm0, %v1412_v35  ;;  %v1587_v25 = vpop.permute.xlu0 %1586  ;;  %v1401_v38 = vmul.f32 %v12405_v0, %v14814_v19 }
 0x632   :  { %11326 = vmatpush3.bf16.xpose.msra.mxu1 %v1617_v42  ;;  %v1413_v58 = vpack.c.bf16 %v1401_v38, %v1400_v13 }
 0x633   :  { %12132 = vmatprep.subr.msk.bf16.mxu1 %vm1043_vm1, %v1597_v32  ;;  %v2080_v10 = vpop.permute.xlu1 %2079 }
 0x634   :  { %11302 = vmatmul.mubr.msk.bf16.gmra.mrb[44].mxu1 %vm688_vm0, %v1413_v58  ;;  %v2076_v53 = vpop.permute.xlu0 %2075  ;;  %v1837_v58 = vsel %vm688_vm0, %v14904_v1, -inf }
 0x635   :  { %11329 = vmatprep.mubr.msk.bf16.mxu1 %vm1043_vm1, %v1583_v63  ;;  %11371 = vmatprep.subr.bf16.mxu0 %v2076_v53 }
 0x636   :  { %11372 = vmatpush3.bf16.msra.mxu0 %v2076_v53 }
 0x637   :  { %11373 = vmatprep.subr.bf16.mxu0 %v2078_v43  ;;  %v14927_v38 = vpop.permute.xlu1 %2434 }
 0x638   :  { %v14952_v12 = vpop.permute.xlu0 %2436 }
 0x63a   :  { %11328 = vmatpush3.bf16.xpose.msra.mxu1 %v1620_v23  ;;  %11374 = vmatpush3.bf16.msra.mxu0 %v2078_v43  ;;  %v1831_v43 = vsel %vm688_vm0, %v14906_v11, -inf }
 0x63b   :  { %11375 = vmatprep.subr.bf16.mxu0 %v2080_v10 }
 0x63c   :  { %2539 = vrot.lane.b32.xlu1 %v14580_v29, %s13012_s22 }
 0x63e   :  { %11376 = vmatpush3.bf16.msra.mxu0 %v2080_v10 }
 0x63f   :  { %12137 = vmatprep.subr.msk.bf16.mxu0 %vm1043_vm1, %v14927_v38 }
 0x641   :  { %11330 = vmatmul.mubr.msk.bf16.vlgmr.msra.gmra.mrb[48].mxu1 %vm1043_vm1, %v1585_v44  ;;  %v14954_v44 = vpop.permute.xlu1 %2438 }
 0x642   :  { %11333 = vmatprep.mubr.msk.bf16.mxu1 %vm1043_vm1, %v1587_v25 }
 0x645   :  { %v14956_v59 = vpop.permute.xlu1 %2440 }
 0x649   :  { %11334 = vmatmul.mubr.msk.bf16.gmra.mrb[52].mxu1 %vm1043_vm1, %v1589_v28 }
 0x64b   :  { %1838 = vmax.xlane.f32.xlu0 %v1837_v58 }
 0x64f   :  { %1832 = vmax.xlane.f32.xlu0 %v1831_v43 }
 0x665   :  { %2428 = vrot.lane.b32.xlu0 %v14556_v31, %s13013_s23 }
 0x69b   :  { %v1824_v32 = vpop.xlane.xlu0 %1823 }
 0x69c   :  { %v1850_v8 = vsub.f32 %v14880_v17, %v1824_v32 }
 0x69e   :  { %v1821_v63 = vpop.xlane.xlu1 %1820  ;;  %v1876_v53 = vmul.f32 1.442695, %v1850_v8 }
 0x69f   :  { %v1818_v28 = vpop.xlane.xlu0 %1817  ;;  %v1849_v17 = vsub.f32 %v14888_v7, %v1821_v63 }
 0x6a0   :  { %v1848_v10 = vsub.f32 %v14882_v9, %v1818_v28  ;;  %12406 = vpow2.f32 %v1876_v53 }
 0x6a1   :  { %v1874_v2 = vmul.f32 1.442695, %v1849_v17 }
 0x6a3   :  { %v1827_v50 = vpop.xlane.xlu0 %1826 }
 0x6a4   :  { %v1851_v18 = vsub.f32 %v14886_v26, %v1827_v50  ;;  %v1872_v50 = vmul.f32 1.442695, %v1848_v10 }
 0x6a6   :  { %v1878_v32 = vmul.f32 1.442695, %v1851_v18 }
 0x6a7   :  { %v14975_v28 = vpop.permute.xlu0 %2426 }
 0x6a8   :  { %12408 = vpow2.f32 %v1878_v32 }
 0x6a9   :  { %12410 = vpow2.f32 %v1872_v50 }
 0x6aa   :  { %12412 = vpow2.f32 %v1874_v2  ;;  %v14986_v10 = vpop.eup %12406 }
 0x6ab   :  { %v1918_v50 = vsel %vm688_vm0, %v14986_v10, 0.0 }
 0x6b2   :  { %v14993_v17 = vpop.eup %12408 }
 0x6b4   :  { %v1836_v58 = vpop.xlane.xlu1 %1835 }
 0x6b5   :  { %v1854_v9 = vsub.f32 %v14898_v3, %v1836_v58 }
 0x6b7   :  { %v1884_v43 = vmul.f32 1.442695, %v1854_v9  ;;  %v14997_v9 = vpop.eup %12410 }
 0x6b8   :  { %v1830_v8 = vpop.xlane.xlu1 %1829  ;;  %v1912_v26 = vsel %vm688_vm0, %v14997_v9, 0.0 }
 0x6b9   :  { %v1852_v55 = vsub.f32 %v14900_v15, %v1830_v8  ;;  %12414 = vpow2.f32 %v1884_v43 }
 0x6bb   :  { %v1880_v3 = vmul.f32 1.442695, %v1852_v55 }
 0x6bd   :  { %12416 = vpow2.f32 %v1880_v3 }
 0x6ce   :  { %v14940_v42 = vpop.f32.mrb[40].mxu1 }
 0x6cf   :  { %v14942_v19 = vpop.f32.mrb[41].mxu1 }
 0x6d0   :  { %v14944_v0 = vpop.f32.mrb[42].mxu1 }
 0x6d1   :  { %v14948_v16 = vpop.f32.mrb[43].mxu1 }
 0x6d8   :  { %v1839_v52 = vpop.xlane.xlu0 %1838 }
 0x6d9   :  { %v1855_v58 = vsub.f32 %v14904_v1, %v1839_v52  ;;  %v1921_v52 = vsel %vm688_vm0, %v14993_v17, 0.0  ;;  %v15003_v1 = vpop.eup %12412 }
 0x6db   :  { %v1886_v43 = vmul.f32 1.442695, %v1855_v58  ;;  %v1915_v58 = vsel %vm688_vm0, %v15003_v1, 0.0 }
 0x6dc   :  { %v1833_v32 = vpop.xlane.xlu0 %1832 }
 0x6dd   :  { %v1853_v8 = vsub.f32 %v14906_v11, %v1833_v32  ;;  %12418 = vpow2.f32 %v1886_v43 }
 0x6df   :  { %v1882_v45 = vmul.f32 1.442695, %v1853_v8 }
 0x6e1   :  { %12420 = vpow2.f32 %v1882_v45 }
 0x707   :  { %v14960_v35 = vpop.f32.mrb[44].mxu1 }
 0x708   :  { %v14962_v25 = vpop.f32.mrb[45].mxu1 }
 0x709   :  { %v14965_v23 = vpop.f32.mrb[46].mxu1 }
 0x70a   :  { %v14969_v13 = vpop.f32.mrb[47].mxu1 }
 0x714   :  { %v14978_v7 = vpop.f32.mrb[48].mxu1 }
 0x715   :  { %v14980_v63 = vpop.f32.mrb[49].mxu1  ;;  %v1798_v11 = vsel %vm688_vm0, %v14978_v7, -inf }
 0x716   :  { %v14982_v18 = vpop.f32.mrb[50].mxu1  ;;  %v1792_v53 = vsel %vm688_vm0, %v14980_v63, -inf }
 0x717   :  { %1793 = vmax.xlane.f32.xlu1 %v1792_v53  ;;  %v14989_v2 = vpop.f32.mrb[51].mxu1 }
 0x718   :  { %v1795_v15 = vsel %vm688_vm0, %v14989_v2, -inf }
 0x719   :  { %1796 = vmax.xlane.f32.xlu0 %v1795_v15 }
 0x71b   :  { %1919 = vadd.xlane.f32.xlu1 %v1918_v50  ;;  %v15016_v50 = vpop.eup %12414 }
 0x71c   :  { %v14999_v55 = vpop.f32.mrb[52].mxu1  ;;  %v1930_v32 = vsel %vm688_vm0, %v15016_v50, 0.0 }
 0x71d   :  { %v15006_v53 = vpop.f32.mrb[53].mxu1  ;;  %1922 = vadd.xlane.f32.xlu0 %v1921_v52  ;;  %v15022_v52 = vpop.eup %12416 }
 0x71e   :  { %v15008_v15 = vpop.f32.mrb[54].mxu1  ;;  %v1924_v43 = vsel %vm688_vm0, %v15022_v52, 0.0  ;;  %v15028_v8 = vpop.eup %12418 }
 0x71f   :  { %v15012_v3 = vpop.f32.mrb[55].mxu1  ;;  %1913 = vadd.xlane.f32.xlu1 %v1912_v26  ;;  %v1801_v26 = vsel %vm688_vm0, %v14982_v18, -inf }
 0x720   :  { %v1807_v45 = vsel %vm688_vm0, %v15012_v3, -inf }
 0x721   :  { %1916 = vadd.xlane.f32.xlu0 %v1915_v58  ;;  %v1804_v58 = vsel %vm688_vm0, %v15006_v53, -inf }
 0x723   :  { %1799 = vmax.xlane.f32.xlu1 %v1798_v11  ;;  %v1933_v11 = vsel %vm688_vm0, %v15028_v8, 0.0 }
 0x725   :  { %1931 = vadd.xlane.f32.xlu0 %v1930_v32  ;;  %v15036_v32 = vpop.eup %12420 }
 0x727   :  { %1802 = vmax.xlane.f32.xlu1 %v1801_v26  ;;  %v1927_v26 = vsel %vm688_vm0, %v15036_v32, 0.0 }
 0x729   :  { %1925 = vadd.xlane.f32.xlu0 %v1924_v43  ;;  %v1810_v43 = vsel %vm688_vm0, %v14999_v55, -inf }
 0x72b   :  { %1805 = vmax.xlane.f32.xlu1 %v1804_v58  ;;  %v1813_v58 = vsel %vm688_vm0, %v15008_v15, -inf }
 0x72d   :  { %1934 = vadd.xlane.f32.xlu0 %v1933_v11  ;;  %v15062_v11 = vpop.permute.xlu1 %2539 }
 0x72f   :  { %1808 = vmax.xlane.f32.xlu1 %v1807_v45  ;;  %v15064_v45 = vpop.permute.xlu0 %2428 }
 0x733   :  { %1928 = vadd.xlane.f32.xlu1 %v1927_v26 }
 0x743   :  { %2541 = vrot.lane.b32.xlu0 %v14592_v22, %s13012_s22 }
 0x744   :  { %2543 = vrot.lane.b32.xlu1 %v14604_v39, %s13012_s22 }
 0x762   :  { %1811 = vmax.xlane.f32.xlu0 %v1810_v43 }
 0x768   :  { %1814 = vmax.xlane.f32.xlu1 %v1813_v58 }
 0x778   :  { %2430 = vrot.lane.b32.xlu0 %v14564_v30, %s13013_s23 }
 0x779   :  { %2432 = vrot.lane.b32.xlu1 %v14572_v21, %s13013_s23 }
 0x77c   :  { %2545 = vrot.lane.b32.xlu0 %v14616_v14, %s13012_s22 }
 0x77d   :  { %2537 = vrot.lane.b32.xlu1 %v14616_v14, %s13013_s23 }
 0x780   :  { %2531 = vrot.lane.b32.xlu0 %v14580_v29, %s13013_s23 }
 0x784   :  { %2533 = vrot.lane.b32.xlu0 %v14592_v22, %s13013_s23 }
 0x788   :  { %2535 = vrot.lane.b32.xlu0 %v14604_v39, %s13013_s23 }
 0x7a4   :  { %v1794_v26 = vpop.xlane.xlu1 %1793 }
 0x7a5   :  { %v1840_v43 = vsub.f32 %v14980_v63, %v1794_v26 }
 0x7a6   :  { %v1797_v58 = vpop.xlane.xlu0 %1796 }
 0x7a7   :  { %v1856_v54 = vmul.f32 1.442695, %v1840_v43  ;;  %v1841_v62 = vsub.f32 %v14989_v2, %v1797_v58 }
 0x7a8   :  { %v1920_v61 = vpop.xlane.xlu1 %1919 }
 0x7a9   :  { %12422 = vpow2.f32 %v1856_v54  ;;  %v1858_v37 = vmul.f32 1.442695, %v1841_v62 }
 0x7aa   :  { %v1923_v46 = vpop.xlane.xlu0 %1922 }
 0x7ab   :  { %12424 = vpow2.f32 %v1858_v37 }
 0x7ac   :  { %12426 = vrcp.f32 %v1923_v46  ;;  %v1914_v36 = vpop.xlane.xlu1 %1913 }
 0x7ad   :  { %12428 = vrcp.f32 %v1914_v36 }
 0x7ae   :  { %12430 = vrcp.f32 %v1920_v61  ;;  %v1917_v14 = vpop.xlane.xlu0 %1916 }
 0x7af   :  { %12432 = vrcp.f32 %v1917_v14 }
 0x7b0   :  { %v1800_v5 = vpop.xlane.xlu1 %1799 }
 0x7b1   :  { %v1842_v60 = vsub.f32 %v14978_v7, %v1800_v5 }
 0x7b2   :  { %v1932_v39 = vpop.xlane.xlu0 %1931 }
 0x7b3   :  { %v15069_v63 = vpop.eup %12422  ;;  %v1860_v26 = vmul.f32 1.442695, %v1842_v60 }
 0x7b4   :  { %v1803_v43 = vpop.xlane.xlu1 %1802  ;;  %v1888_v54 = vsel %vm688_vm0, %v15069_v63, 0.0 }
 0x7b5   :  { %v15073_v62 = vpop.eup %12424  ;;  %12434 = vpow2.f32 %v1860_v26  ;;  %v1843_v37 = vsub.f32 %v14982_v18, %v1803_v43  ;;  %1889 = vadd.xlane.f32.xlu0 %v1888_v54 }
 0x7b6   :  { %v12427_v36 = vpop.eup %12426  ;;  %v1926_v61 = vpop.xlane.xlu0 %1925  ;;  %v1891_v46 = vsel %vm688_vm0, %v15073_v62, 0.0 }
 0x7b7   :  { %v12429_v14 = vpop.eup %12428  ;;  %v1862_v5 = vmul.f32 1.442695, %v1843_v37  ;;  %1892 = vadd.xlane.f32.xlu1 %v1891_v46  ;;  %v1963_v58 = vmul.f32 %v12427_v36, %v14993_v17 }
 0x7b8   :  { %v12431_v7 = vpop.eup %12430  ;;  %v1806_v60 = vpop.xlane.xlu1 %1805  ;;  %v1960_v26 = vmul.f32 %v12429_v14, %v14997_v9 }
 0x7b9   :  { %v12433_v2 = vpop.eup %12432  ;;  %12436 = vpow2.f32 %v1862_v5  ;;  %v1844_v24 = vsub.f32 %v15006_v53, %v1806_v60  ;;  %v1962_v43 = vmul.f32 %v12431_v7, %v14986_v10  ;;  %v2455_v10 = vsel %vm1043_vm1, %v14927_v38, 0 }
 0x7ba   :  { %v1961_v18 = vmul.f32 %v12433_v2, %v15003_v1  ;;  %v1935_v4 = vpop.xlane.xlu0 %1934 }
 0x7bb   :  { %v1864_v54 = vmul.f32 1.442695, %v1844_v24  ;;  %v1973_v37 = vpack.c.bf16 %v1963_v58, %v1962_v43  ;;  %v2461_v58 = vsel %vm1043_vm1, %v14954_v44, 0 }
 0x7bc   :  { %v1809_v22 = vpop.xlane.xlu1 %1808  ;;  %v1972_v48 = vpack.c.bf16 %v1961_v18, %v1960_v26 }
 0x7bd   :  { %12438 = vpow2.f32 %v1864_v54  ;;  %v1845_v46 = vsub.f32 %v15012_v3, %v1809_v22 }
 0x7be   :  { %12440 = vrcp.f32 %v1932_v39  ;;  %11377 = vmatprep.mubr.msk.bf16.mxu0 %vm688_vm0, %v1972_v48 }
 0x7bf   :  { %v15085_v17 = vpop.eup %12434  ;;  %12442 = vrcp.f32 %v1935_v4  ;;  %v1866_v53 = vmul.f32 1.442695, %v1845_v46  ;;  %11378 = vmatmul.mubr.msk.bf16.vlgmr.msra.gmra.mrb[40].mxu0 %vm688_vm0, %v1973_v37  ;;  %v2458_v4 = vsel %vm1043_vm1, %v14952_v12, 0 }
 0x7c0   :  { %12444 = vrcp.f32 %v1926_v61  ;;  %11422 = vmatpush3.bf16.xpose.msra.mxu0 %v2455_v10  ;;  %v1929_v24 = vpop.xlane.xlu1 %1928  ;;  %v1894_v9 = vsel %vm688_vm0, %v15085_v17, 0.0 }
 0x7c1   :  { %12446 = vpow2.f32 %v1866_v53  ;;  %12138 = vmatprep.subr.msk.bf16.mxu0 %vm1043_vm1, %v14952_v12  ;;  %1895 = vadd.xlane.f32.xlu0 %v1894_v9 }
 0x7c2   :  { %12448 = vrcp.f32 %v1929_v24 }
 0x7c3   :  { %v15094_v22 = vpop.eup %12436 }
 0x7c4   :  { %v1897_v39 = vsel %vm688_vm0, %v15094_v22, 0.0 }
 0x7c5   :  { %1898 = vadd.xlane.f32.xlu0 %v1897_v39 }
 0x7c7   :  { %v15098_v48 = vpop.eup %12438 }
 0x7c8   :  { %v12441_v38 = vpop.eup %12440  ;;  %11424 = vmatpush3.bf16.xpose.msra.mxu0 %v2458_v4  ;;  %v1900_v1 = vsel %vm688_vm0, %v15098_v48, 0.0 }
 0x7c9   :  { %v12443_v3 = vpop.eup %12442  ;;  %12139 = vmatprep.subr.msk.bf16.mxu0 %vm1043_vm1, %v14954_v44  ;;  %1901 = vadd.xlane.f32.xlu1 %v1900_v1  ;;  %v1966_v2 = vmul.f32 %v12441_v38, %v15016_v50  ;;  %v2560_v44 = vsel %vm1043_vm1, %v15062_v11, 0  ;;  %v2542_v50 = vpop.permute.xlu0 %2541 }
 0x7ca   :  { %v12445_v36 = vpop.eup %12444  ;;  %v1967_v7 = vmul.f32 %v12443_v3, %v15028_v8  ;;  %v2563_v8 = vsel %vm1043_vm1, %v2542_v50, 0 }
 0x7cb   :  { %v15106_v61 = vpop.eup %12446  ;;  %v1964_v12 = vmul.f32 %v12445_v36, %v15022_v52  ;;  %v2464_v52 = vsel %vm1043_vm1, %v14956_v59, 0 }
 0x7cc   :  { %v12449_v14 = vpop.eup %12448  ;;  %v1903_v5 = vsel %vm688_vm0, %v15106_v61, 0.0  ;;  %v1975_v18 = vpack.c.bf16 %v1967_v7, %v1966_v2 }
 0x7cd   :  { %1904 = vadd.xlane.f32.xlu0 %v1903_v5  ;;  %v1965_v60 = vmul.f32 %v12449_v14, %v15036_v32 }
 0x7cf   :  { %v1974_v26 = vpack.c.bf16 %v1965_v60, %v1964_v12 }
 0x7d0   :  { %11426 = vmatpush3.bf16.xpose.msra.mxu0 %v2461_v58 }
 0x7d1   :  { %11381 = vmatprep.mubr.msk.bf16.mxu0 %vm688_vm0, %v1974_v26  ;;  %12140 = vmatprep.subr.msk.bf16.mxu0 %vm1043_vm1, %v14956_v59 }
 0x7d2   :  { %11382 = vmatmul.mubr.msk.bf16.gmra.mrb[44].mxu0 %vm688_vm0, %v1975_v18 }
 0x7d3   :  { %11429 = vmatprep.mubr.msk.bf16.mxu0 %vm1043_vm1, %v14975_v28  ;;  %v2544_v28 = vpop.permute.xlu1 %2543 }
 0x7d4   :  { %v2566_v59 = vsel %vm1043_vm1, %v2544_v28, 0 }
 0x7d8   :  { %11428 = vmatpush3.bf16.xpose.msra.mxu0 %v2464_v52 }
 0x7d9   :  { %12141 = vmatprep.subr.msk.bf16.mxu0 %vm1043_vm1, %v15062_v11 }
 0x7df   :  { %11430 = vmatmul.mubr.msk.bf16.vlgmr.msra.gmra.mrb[48].mxu0 %vm1043_vm1, %v15064_v45 }
 0x7e0   :  { %11438 = vmatpush3.bf16.xpose.msra.mxu0 %v2560_v44 }
 0x7e1   :  { %12142 = vmatprep.subr.msk.bf16.mxu0 %vm1043_vm1, %v2542_v50 }
 0x7e8   :  { %11440 = vmatpush3.bf16.xpose.msra.mxu0 %v2563_v8 }
 0x7e9   :  { %12143 = vmatprep.subr.msk.bf16.mxu0 %vm1043_vm1, %v2544_v28 }
 0x7ef   :  { %v1812_v32 = vpop.xlane.xlu0 %1811 }
 0x7f0   :  { %11442 = vmatpush3.bf16.xpose.msra.mxu0 %v2566_v59  ;;  %v1846_v43 = vsub.f32 %v14999_v55, %v1812_v32 }
 0x7f2   :  { %v1868_v45 = vmul.f32 1.442695, %v1846_v43 }
 0x7f3   :  { %v2431_v54 = vpop.permute.xlu0 %2430 }
 0x7f4   :  { %12450 = vpow2.f32 %v1868_v45  ;;  %11433 = vmatprep.mubr.msk.bf16.mxu0 %vm1043_vm1, %v2431_v54 }
 0x7f5   :  { %v1815_v11 = vpop.xlane.xlu1 %1814 }
 0x7f6   :  { %v1847_v37 = vsub.f32 %v15008_v15, %v1815_v11 }
 0x7f7   :  { %v2546_v46 = vpop.permute.xlu0 %2545 }
 0x7f8   :  { %v1870_v53 = vmul.f32 1.442695, %v1847_v37  ;;  %12144 = vmatprep.subr.msk.bf16.mxu0 %vm1043_vm1, %v2546_v46  ;;  %v2569_v10 = vsel %vm1043_vm1, %v2546_v46, 0 }
 0x7f9   :  { %v2433_v24 = vpop.permute.xlu1 %2432  ;;  %11444 = vmatpush3.bf16.xpose.msra.mxu0 %v2569_v10 }
 0x7fa   :  { %12452 = vpow2.f32 %v1870_v53  ;;  %11434 = vmatmul.mubr.msk.bf16.gmra.mrb[52].mxu0 %vm1043_vm1, %v2433_v24 }
 0x7fb   :  { %v2532_v55 = vpop.permute.xlu0 %2531 }
 0x7fc   :  { %11445 = vmatprep.mubr.msk.bf16.mxu0 %vm1043_vm1, %v2532_v55 }
 0x7fd   :  { %v2538_v3 = vpop.permute.xlu1 %2537 }
 0x7fe   :  { %v15141_v9 = vpop.eup %12450 }
 0x7ff   :  { %v2534_v39 = vpop.permute.xlu0 %2533  ;;  %v1906_v15 = vsel %vm688_vm0, %v15141_v9, 0.0 }
 0x800   :  { %1907 = vadd.xlane.f32.xlu1 %v1906_v15 }
 0x802   :  { %11446 = vmatmul.mubr.msk.bf16.vlgmr.msra.gmra.mrb[56].mxu0 %vm1043_vm1, %v2534_v39 }
 0x803   :  { %v2536_v4 = vpop.permute.xlu0 %2535 }
 0x804   :  { %v15146_v38 = vpop.eup %12452  ;;  %11449 = vmatprep.mubr.msk.bf16.mxu0 %vm1043_vm1, %v2536_v4 }
 0x805   :  { %v1909_v1 = vsel %vm688_vm0, %v15146_v38, 0.0 }
 0x806   :  { %1910 = vadd.xlane.f32.xlu0 %v1909_v1 }
 0x80a   :  { %11450 = vmatmul.mubr.msk.bf16.gmra.mrb[60].mxu0 %vm1043_vm1, %v2538_v3 }
 0x811   :  { %1980 = vrot.lane.b32.xlu1 %v14548_v33, %s13011_s21 }
 0x815   :  { %1984 = vrot.lane.b32.xlu1 %v14566_v57, %s13011_s21 }
 0x819   :  { %1986 = vrot.lane.b32.xlu1 %v14574_v56, %s13011_s21 }
 0x81c   :  { %1982 = vrot.lane.b32.xlu0 %v14558_v41, %s13011_s21 }
 0x81d   :  { %2820 = vrot.lane.b32.xlu1 %v14548_v33, %s13013_s23 }
 0x821   :  { %2822 = vrot.lane.b32.xlu1 %v14558_v41, %s13013_s23 }
 0x842   :  { %v1890_v36 = vpop.xlane.xlu0 %1889 }
 0x843   :  { %12454 = vrcp.f32 %v1890_v36 }
 0x844   :  { %v1893_v14 = vpop.xlane.xlu1 %1892 }
 0x845   :  { %12456 = vrcp.f32 %v1893_v14 }
 0x84d   :  { %v12455_v5 = vpop.eup %12454 }
 0x84e   :  { %v1952_v12 = vmul.f32 %v12455_v5, %v15069_v63  ;;  %v1896_v58 = vpop.xlane.xlu0 %1895 }
 0x84f   :  { %v12457_v7 = vpop.eup %12456 }
 0x850   :  { %v1953_v60 = vmul.f32 %v12457_v7, %v15073_v62 }
 0x852   :  { %v1968_v2 = vpack.c.bf16 %v1953_v60, %v1952_v12  ;;  %v1899_v18 = vpop.xlane.xlu0 %1898 }
 0x853   :  { %12458 = vrcp.f32 %v1899_v18 }
 0x854   :  { %11361 = vmatprep.mubr.msk.bf16.mxu1 %vm688_vm0, %v1968_v2 }
 0x856   :  { %v1902_v26 = vpop.xlane.xlu1 %1901 }
 0x85a   :  { %v1905_v44 = vpop.xlane.xlu0 %1904 }
 0x85b   :  { %12460 = vrcp.f32 %v1905_v44 }
 0x85c   :  { %12462 = vrcp.f32 %v1896_v58 }
 0x85d   :  { %12464 = vrcp.f32 %v1902_v26  ;;  %v12459_v11 = vpop.eup %12458 }
 0x85e   :  { %v1955_v24 = vmul.f32 %v12459_v11, %v15094_v22 }
 0x865   :  { %v12461_v37 = vpop.eup %12460 }
 0x866   :  { %v12463_v46 = vpop.eup %12462  ;;  %v1957_v55 = vmul.f32 %v12461_v37, %v15106_v61 }
 0x867   :  { %v12465_v10 = vpop.eup %12464  ;;  %v1954_v39 = vmul.f32 %v12463_v46, %v15085_v17 }
 0x868   :  { %v1956_v15 = vmul.f32 %v12465_v10, %v15098_v48 }
 0x869   :  { %v1969_v4 = vpack.c.bf16 %v1955_v24, %v1954_v39 }
 0x86a   :  { %v1970_v3 = vpack.c.bf16 %v1957_v55, %v1956_v15 }
 0x88d   :  { %v1908_v52 = vpop.xlane.xlu1 %1907 }
 0x891   :  { %v1981_v50 = vpop.permute.xlu1 %1980 }
 0x892   :  { %11353 = vmatprep.subr.bf16.mxu1 %v1981_v50  ;;  %v15167_v8 = vpop.f32.mrb[40].mxu0 }
 0x893   :  { %11354 = vmatpush3.bf16.msra.mxu1 %v1981_v50  ;;  %v15169_v28 = vpop.f32.mrb[41].mxu0  ;;  %v1911_v63 = vpop.xlane.xlu0 %1910 }
 0x894   :  { %v15171_v62 = vpop.f32.mrb[42].mxu0  ;;  %12466 = vrcp.f32 %v1911_v63 }
 0x895   :  { %v15175_v32 = vpop.f32.mrb[43].mxu0  ;;  %v1985_v45 = vpop.permute.xlu1 %1984  ;;  %12468 = vrcp.f32 %v1908_v52 }
 0x897   :  { %v1983_v54 = vpop.permute.xlu0 %1982 }
 0x898   :  { %11355 = vmatprep.subr.bf16.mxu1 %v1983_v54 }
 0x899   :  { %11356 = vmatpush3.bf16.msra.mxu1 %v1983_v54  ;;  %v1987_v53 = vpop.permute.xlu1 %1986 }
 0x89a   :  { %11357 = vmatprep.subr.bf16.mxu1 %v1985_v45 }
 0x89d   :  { %11358 = vmatpush3.bf16.msra.mxu1 %v1985_v45 }
 0x89e   :  { %11359 = vmatprep.subr.bf16.mxu1 %v1987_v53  ;;  %v12467_v1 = vpop.eup %12466 }
 0x89f   :  { %v12469_v36 = vpop.eup %12468  ;;  %v1959_v22 = vmul.f32 %v12467_v1, %v15146_v38 }
 0x8a0   :  { %v1958_v7 = vmul.f32 %v12469_v36, %v15141_v9 }
 0x8a1   :  { %11360 = vmatpush3.bf16.msra.mxu1 %v1987_v53 }
 0x8a2   :  { %v1971_v60 = vpack.c.bf16 %v1959_v22, %v1958_v7 }
 0x8a4   :  { %11362 = vmatmul.mubr.msk.bf16.vlgmr.msra.gmra.mrb[56].mxu1 %vm688_vm0, %v1969_v4 }
 0x8a5   :  { %v15184_v14 = vpop.f32.mrb[44].mxu0  ;;  %11365 = vmatprep.mubr.msk.bf16.mxu1 %vm688_vm0, %v1970_v3 }
 0x8a6   :  { %v15187_v5 = vpop.f32.mrb[45].mxu0 }
 0x8a7   :  { %v15190_v61 = vpop.f32.mrb[46].mxu0 }
 0x8a8   :  { %v15194_v48 = vpop.f32.mrb[47].mxu0 }
 0x8ac   :  { %11366 = vmatmul.mubr.msk.bf16.gmra.mrb[60].mxu1 %vm688_vm0, %v1971_v60 }
 0x8b2   :  { %v11431_v2 = vpop.f32.mrb[48].mxu0 }
 0x8b3   :  { %v15200_v58 = vpop.f32.mrb[49].mxu0  ;;  %v2642_v38 = vsel %vm688_vm0, %v11431_v2, -inf }
 0x8b4   :  { %2643 = vmax.xlane.f32.xlu0 %v2642_v38  ;;  %v15203_v26 = vpop.f32.mrb[50].mxu0  ;;  %v2636_v9 = vsel %vm688_vm0, %v15200_v58, -inf }
 0x8b5   :  { %v15205_v18 = vpop.f32.mrb[51].mxu0  ;;  %v2645_v44 = vsel %vm688_vm0, %v15203_v26, -inf }
 0x8b6   :  { %v2639_v52 = vsel %vm688_vm0, %v15205_v18, -inf }
 0x8b7   :  { %2640 = vmax.xlane.f32.xlu1 %v2639_v52 }
 0x8b8   :  { %2637 = vmax.xlane.f32.xlu0 %v2636_v9 }
 0x8bc   :  { %2646 = vmax.xlane.f32.xlu0 %v2645_v44 }
 0x8cd   :  { %v15213_v50 = vpop.f32.mrb[52].mxu0 }
 0x8ce   :  { %v15215_v63 = vpop.f32.mrb[53].mxu0  ;;  %v2654_v45 = vsel %vm688_vm0, %v15213_v50, -inf }
 0x8cf   :  { %2655 = vmax.xlane.f32.xlu1 %v2654_v45  ;;  %v15219_v54 = vpop.f32.mrb[54].mxu0  ;;  %v2648_v46 = vsel %vm688_vm0, %v15215_v63, -inf  ;;  %v12298_v45 = vld [vmem:[%s18900_s4 + $0x8] sm:$0xff]  }
 0x8d0   :  { %v15221_v11 = vpop.f32.mrb[55].mxu0  ;;  %v2657_v37 = vsel %vm688_vm0, %v15219_v54, -inf  ;;  %11385 = vmatprep.subr.bf16.mxu1 %v12298_v45 }
 0x8d1   :  { %2658 = vmax.xlane.f32.xlu0 %v2657_v37  ;;  %v2651_v53 = vsel %vm688_vm0, %v15221_v11, -inf  ;;  %11386 = vmatpush3.bf16.msra.mxu1 %v12298_v45  ;;  %v15271_v37 = vld [vmem:[%s18900_s4] sm:$0xff]  }
 0x8d2   :  { %11403 = vmatprep.subr.bf16.mxu1 %v15271_v37 }
 0x8d3   :  { %2649 = vmax.xlane.f32.xlu1 %v2648_v46  ;;  %v15274_v46 = vpop.permute.xlu1 %2820 }
 0x8d5   :  { %2652 = vmax.xlane.f32.xlu0 %v2651_v53  ;;  %v15229_v10 = vpop.f32.mrb[56].mxu0 }
 0x8d6   :  { %v15231_v24 = vpop.f32.mrb[57].mxu0  ;;  %v2666_v55 = vsel %vm688_vm0, %v15229_v10, -inf }
 0x8d7   :  { %2667 = vmax.xlane.f32.xlu1 %v2666_v55  ;;  %v15235_v39 = vpop.f32.mrb[58].mxu0  ;;  %v2660_v1 = vsel %vm688_vm0, %v15231_v24, -inf  ;;  %v15276_v53 = vpop.permute.xlu1 %2822 }
 0x8d8   :  { %v15237_v15 = vpop.f32.mrb[59].mxu0  ;;  %v2669_v4 = vsel %vm688_vm0, %v15235_v39, -inf }
 0x8d9   :  { %2670 = vmax.xlane.f32.xlu0 %v2669_v4  ;;  %v2663_v3 = vsel %vm688_vm0, %v15237_v15, -inf }
 0x8db   :  { %2661 = vmax.xlane.f32.xlu1 %v2660_v1 }
 0x8dd   :  { %2664 = vmax.xlane.f32.xlu0 %v2663_v3  ;;  %v15245_v36 = vpop.f32.mrb[60].mxu0 }
 0x8de   :  { %v15247_v22 = vpop.f32.mrb[61].mxu0  ;;  %v2678_v7 = vsel %vm688_vm0, %v15245_v36, -inf }
 0x8df   :  { %2679 = vmax.xlane.f32.xlu1 %v2678_v7  ;;  %v15251_v60 = vpop.f32.mrb[62].mxu0  ;;  %v2672_v9 = vsel %vm688_vm0, %v15247_v22, -inf }
 0x8e0   :  { %v15253_v38 = vpop.f32.mrb[63].mxu0  ;;  %v2681_v52 = vsel %vm688_vm0, %v15251_v60, -inf }
 0x8e1   :  { %2682 = vmax.xlane.f32.xlu0 %v2681_v52  ;;  %v2675_v44 = vsel %vm688_vm0, %v15253_v38, -inf }
 0x8e3   :  { %2673 = vmax.xlane.f32.xlu1 %v2672_v9 }
 0x8e5   :  { %2676 = vmax.xlane.f32.xlu0 %v2675_v44 }
 0x8f4   :  { %2826 = vrot.lane.b32.xlu1 %v14574_v56, %s13013_s23 }
 0x8fb   :  { %2824 = vrot.lane.b32.xlu0 %v14566_v57, %s13013_s23 }
 0x941   :  { %v2644_v55 = vpop.xlane.xlu0 %2643 }
 0x942   :  { %v2686_v4 = vsub.f32 %v11431_v2, %v2644_v55 }
 0x944   :  { %v2704_v1 = vmul.f32 1.442695, %v2686_v4  ;;  %v2641_v3 = vpop.xlane.xlu1 %2640 }
 0x945   :  { %v2638_v7 = vpop.xlane.xlu0 %2637  ;;  %v2685_v9 = vsub.f32 %v15205_v18, %v2641_v3 }
 0x946   :  { %12470 = vpow2.f32 %v2704_v1  ;;  %v2684_v52 = vsub.f32 %v15200_v58, %v2638_v7 }
 0x947   :  { %v2702_v12 = vmul.f32 1.442695, %v2685_v9 }
 0x948   :  { %v2700_v44 = vmul.f32 1.442695, %v2684_v52 }
 0x949   :  { %v2647_v45 = vpop.xlane.xlu0 %2646 }
 0x94a   :  { %12472 = vpow2.f32 %v2700_v44  ;;  %v2687_v17 = vsub.f32 %v15203_v26, %v2647_v45 }
 0x94c   :  { %v2706_v59 = vmul.f32 1.442695, %v2687_v17 }
 0x94e   :  { %12474 = vpow2.f32 %v2706_v59 }
 0x94f   :  { %12476 = vpow2.f32 %v2702_v12 }
 0x950   :  { %v15281_v43 = vpop.eup %12470 }
 0x951   :  { %v2738_v2 = vsel %vm688_vm0, %v15281_v43, 0.0 }
 0x952   :  { %2739 = vadd.xlane.f32.xlu1 %v2738_v2 }
 0x954   :  { %v15285_v55 = vpop.eup %12472 }
 0x955   :  { %v2732_v58 = vsel %vm688_vm0, %v15285_v55, 0.0 }
 0x956   :  { %2733 = vadd.xlane.f32.xlu1 %v2732_v58 }
 0x958   :  { %v15289_v18 = vpop.eup %12474 }
 0x959   :  { %v2741_v26 = vsel %vm688_vm0, %v15289_v18, 0.0  ;;  %v15293_v17 = vpop.eup %12476 }
 0x95a   :  { %2742 = vadd.xlane.f32.xlu0 %v2741_v26  ;;  %v2735_v4 = vsel %vm688_vm0, %v15293_v17, 0.0 }
 0x95c   :  { %v2656_v59 = vpop.xlane.xlu1 %2655 }
 0x95d   :  { %v2690_v12 = vsub.f32 %v15213_v50, %v2656_v59 }
 0x95e   :  { %2736 = vadd.xlane.f32.xlu0 %v2735_v4  ;;  %v2659_v1 = vpop.xlane.xlu0 %2658 }
 0x95f   :  { %v2712_v3 = vmul.f32 1.442695, %v2690_v12  ;;  %v2691_v7 = vsub.f32 %v15219_v54, %v2659_v1 }
 0x960   :  { %v2650_v52 = vpop.xlane.xlu1 %2649 }
 0x961   :  { %12478 = vpow2.f32 %v2712_v3  ;;  %v2714_v9 = vmul.f32 1.442695, %v2691_v7  ;;  %v2688_v44 = vsub.f32 %v15215_v63, %v2650_v52 }
 0x962   :  { %v2653_v45 = vpop.xlane.xlu0 %2652 }
 0x963   :  { %12480 = vpow2.f32 %v2714_v9  ;;  %v2708_v2 = vmul.f32 1.442695, %v2688_v44  ;;  %v2689_v58 = vsub.f32 %v15221_v11, %v2653_v45 }
 0x964   :  { %v2668_v26 = vpop.xlane.xlu1 %2667 }
 0x965   :  { %12482 = vpow2.f32 %v2708_v2  ;;  %v2710_v50 = vmul.f32 1.442695, %v2689_v58  ;;  %v2694_v59 = vsub.f32 %v15229_v10, %v2668_v26 }
 0x966   :  { %v2671_v4 = vpop.xlane.xlu0 %2670 }
 0x967   :  { %12484 = vpow2.f32 %v2710_v50  ;;  %v2720_v12 = vmul.f32 1.442695, %v2694_v59  ;;  %v2695_v54 = vsub.f32 %v15235_v39, %v2671_v4 }
 0x968   :  { %v2662_v1 = vpop.xlane.xlu1 %2661 }
 0x969   :  { %12486 = vpow2.f32 %v2720_v12  ;;  %v2692_v3 = vsub.f32 %v15231_v24, %v2662_v1  ;;  %v2722_v9 = vmul.f32 1.442695, %v2695_v54 }
 0x96a   :  { %v2665_v63 = vpop.xlane.xlu0 %2664 }
 0x96b   :  { %v15304_v7 = vpop.eup %12478  ;;  %v2716_v52 = vmul.f32 1.442695, %v2692_v3  ;;  %v2693_v11 = vsub.f32 %v15237_v15, %v2665_v63 }
 0x96c   :  { %v2680_v44 = vpop.xlane.xlu1 %2679  ;;  %v2750_v10 = vsel %vm688_vm0, %v15304_v7, 0.0 }
 0x96d   :  { %v15309_v45 = vpop.eup %12480  ;;  %12488 = vpow2.f32 %v2716_v52  ;;  %v2698_v39 = vsub.f32 %v15245_v36, %v2680_v44  ;;  %2751 = vadd.xlane.f32.xlu1 %v2750_v10  ;;  %v2718_v15 = vmul.f32 1.442695, %v2693_v11 }
 0x96e   :  { %v2683_v2 = vpop.xlane.xlu0 %2682  ;;  %v2753_v24 = vsel %vm688_vm0, %v15309_v45, 0.0  ;;  %12490 = vpow2.f32 %v2722_v9 }
 0x96f   :  { %v15314_v58 = vpop.eup %12482  ;;  %v2728_v26 = vmul.f32 1.442695, %v2698_v39  ;;  %v2699_v50 = vsub.f32 %v15251_v60, %v2683_v2  ;;  %2754 = vadd.xlane.f32.xlu0 %v2753_v24 }
 0x970   :  { %v2674_v59 = vpop.xlane.xlu1 %2673  ;;  %v2744_v4 = vsel %vm688_vm0, %v15314_v58, 0.0 }
 0x971   :  { %v15319_v12 = vpop.eup %12484  ;;  %12492 = vpow2.f32 %v2728_v26  ;;  %v2696_v36 = vsub.f32 %v15247_v22, %v2674_v59  ;;  %2745 = vadd.xlane.f32.xlu1 %v2744_v4  ;;  %v2730_v60 = vmul.f32 1.442695, %v2699_v50 }
 0x972   :  { %v2677_v54 = vpop.xlane.xlu0 %2676  ;;  %v2747_v1 = vsel %vm688_vm0, %v15319_v12, 0.0  ;;  %12494 = vpow2.f32 %v2718_v15 }
 0x973   :  { %v15324_v3 = vpop.eup %12486  ;;  %v2724_v63 = vmul.f32 1.442695, %v2696_v36  ;;  %v2697_v52 = vsub.f32 %v15253_v38, %v2677_v54  ;;  %2748 = vadd.xlane.f32.xlu0 %v2747_v1 }
 0x974   :  { %v2762_v11 = vsel %vm688_vm0, %v15324_v3, 0.0 }
 0x975   :  { %12496 = vpow2.f32 %v2724_v63  ;;  %v2726_v9 = vmul.f32 1.442695, %v2697_v52 }
 0x976   :  { %12498 = vpow2.f32 %v2730_v60 }
 0x977   :  { %v15329_v44 = vpop.eup %12488  ;;  %v11363_v22 = vpop.f32.mrb[56].mxu1  ;;  %2763 = vadd.xlane.f32.xlu0 %v2762_v11  ;;  %12500 = vpow2.f32 %v2726_v9 }
 0x978   :  { %v2038_v10 = vpop.f32.mrb[57].mxu1  ;;  %v15331_v2 = vpop.eup %12490  ;;  %v2756_v38 = vsel %vm688_vm0, %v15329_v44, 0.0 }
 0x979   :  { %v11364_v39 = vpop.f32.mrb[58].mxu1  ;;  %v2765_v36 = vsel %vm688_vm0, %v15331_v2, 0.0 }
 0x97a   :  { %v2163_v24 = vpack.c.bf16 %v11364_v39, %v11363_v22  ;;  %v2041_v26 = vpop.f32.mrb[59].mxu1 }
 0x97b   :  { %v15335_v50 = vpop.eup %12492  ;;  %v2162_v15 = vpack.c.bf16 %v2041_v26, %v2038_v10  ;;  %2757 = vadd.xlane.f32.xlu0 %v2756_v38  ;;  %v19248_v38 = vpack.c.bf16 %v15175_v32, %v15169_v28  ;;  %v19252_v28 = vpack.c.bf16 %v14948_v16, %v14942_v19  ;;  %v19254_v19 = vpack.c.bf16 %v14969_v13, %v14962_v25  ;;  %v2827_v13 = vpop.permute.xlu1 %2826  ;;  %v12300_v25 = vld [vmem:[%s18900_s4 + $0x10] sm:$0xff]  }
 0x97c   :  { %v2774_v59 = vsel %vm688_vm0, %v15335_v50, 0.0  ;;  %v15340_v4 = vpop.eup %12494  ;;  %v19256_v16 = vpack.c.bf16 %v14858_v27, %v14852_v51  ;;  %v19257_v51 = vld [vmem:[#allocation285_spill] sm:$0xff] }
 0x97d   :  { %11387 = vmatprep.mubr.msk.bf16.mxu1 %vm1043_vm1, %v2162_v15  ;;  %2775 = vadd.xlane.f32.xlu1 %v2774_v59  ;;  %v2759_v10 = vsel %vm688_vm0, %v15340_v4, 0.0  ;;  %v19249_v15 = vpack.c.bf16 %v15171_v62, %v15167_v8  ;;  %v19250_v59 = vpack.c.bf16 %v15194_v48, %v15187_v5  ;;  %v19253_v8 = vpack.c.bf16 %v14944_v0, %v14940_v42  ;;  %v2825_v42 = vpop.permute.xlu0 %2824  ;;  %v19261_v62 = vld [vmem:[#allocation287_spill] sm:$0xff]  ;;  %v19267_v5 = vld [vmem:[#allocation284_spill] sm:$0xff] }
 0x97e   :  { %11388 = vmatmul.mubr.msk.bf16.vlgmr.msra.gmra.mrb[64].mxu1 %vm1043_vm1, %v2163_v24  ;;  %v19255_v0 = vpack.c.bf16 %v14965_v23, %v14960_v35  ;;  %v19258_v27 = vpack.c.bf16 %v14854_v20, %v19257_v51  ;;  %v19259_v35 = vld [vmem:[#allocation282_spill] sm:$0xff]  ;;  %v19260_v23 = vld [vmem:[#allocation289_spill] sm:$0xff] }
 0x97f   :  { %v15345_v54 = vpop.eup %12496  ;;  %11404 = vmatpush3.bf16.msra.mxu1 %v15271_v37  ;;  %v11367_v1 = vpop.f32.mrb[60].mxu1  ;;  %2766 = vadd.xlane.f32.xlu0 %v2765_v36  ;;  %v19251_v36 = vpack.c.bf16 %v15190_v61, %v15184_v14  ;;  %v19262_v32 = vpack.c.bf16 %v19260_v23, %v19261_v62  ;;  %v19265_v20 = vld [vmem:[#allocation286_spill] sm:$0xff] }
 0x980   :  { %11453 = vmatprep.subr.bf16.mxu1 %v15274_v46  ;;  %v2054_v60 = vpop.f32.mrb[61].mxu1  ;;  %v2768_v63 = vsel %vm688_vm0, %v15345_v54, 0.0  ;;  %v15351_v52 = vpop.eup %12498 }
 0x981   :  { %v11368_v9 = vpop.f32.mrb[62].mxu1  ;;  %2769 = vadd.xlane.f32.xlu1 %v2768_v63  ;;  %v15355_v39 = vpop.eup %12500  ;;  %v2777_v24 = vsel %vm688_vm0, %v15351_v52, 0.0 }
 0x982   :  { %v2165_v11 = vpack.c.bf16 %v11368_v9, %v11367_v1  ;;  %v2057_v22 = vpop.f32.mrb[63].mxu1  ;;  %v2771_v26 = vsel %vm688_vm0, %v15355_v39, 0.0 }
 0x983   :  { %v2164_v37 = vpack.c.bf16 %v2057_v22, %v2054_v60  ;;  %2760 = vadd.xlane.f32.xlu0 %v2759_v10 }
 0x985   :  { %11391 = vmatprep.mubr.msk.bf16.mxu1 %vm1043_vm1, %v2164_v37  ;;  %2778 = vadd.xlane.f32.xlu1 %v2777_v24 }
 0x986   :  { %11392 = vmatmul.mubr.msk.bf16.gmra.mrb[68].mxu1 %vm1043_vm1, %v2165_v11 }
 0x987   :  { %11395 = vmatprep.mubr.msk.bf16.mxu1 %vm1043_vm1, %v19248_v38  ;;  %2772 = vadd.xlane.f32.xlu0 %v2771_v26 }
 0x98e   :  { %11396 = vmatmul.mubr.msk.bf16.gmra.mrb[72].mxu1 %vm1043_vm1, %v19249_v15 }
 0x98f   :  { %11399 = vmatprep.mubr.msk.bf16.mxu1 %vm1043_vm1, %v19250_v59 }
 0x996   :  { %11400 = vmatmul.mubr.msk.bf16.gmra.mrb[76].mxu1 %vm1043_vm1, %v19251_v36  ;;  %2911 = vrot.lane.b32.xlu1 %v14594_v49, %s13013_s23 }
 0x997   :  { %11405 = vmatprep.mubr.msk.bf16.mxu1 %vm1043_vm1, %v19252_v28 }
 0x99a   :  { %2913 = vrot.lane.b32.xlu1 %v14606_v6, %s13013_s23 }
 0x99d   :  { %2909 = vrot.lane.b32.xlu0 %v14582_v34, %s13013_s23 }
 0x99e   :  { %11406 = vmatmul.mubr.msk.bf16.vlgmr.msra.gmra.mrb[64].mxu1 %vm1043_vm1, %v19253_v8  ;;  %2915 = vrot.lane.b32.xlu1 %v14618_v47, %s13013_s23 }
 0x99f   :  { %11454 = vmatpush3.bf16.msra.mxu1 %v15274_v46  ;;  %11409 = vmatprep.mubr.msk.bf16.mxu1 %vm1043_vm1, %v19254_v19 }
 0x9a0   :  { %11455 = vmatprep.subr.bf16.mxu1 %v15276_v53 }
 0x9a1   :  { %3159 = vrot.lane.b32.xlu0 %v14546_v40, %s13014_s27 }
 0x9a2   :  { %3161 = vrot.lane.b32.xlu1 %v14556_v31, %s13014_s27 }
 0x9a3   :  { %11456 = vmatpush3.bf16.msra.mxu1 %v15276_v53 }
 0x9a4   :  { %11457 = vmatprep.subr.bf16.mxu1 %v2825_v42 }
 0x9a5   :  { %3163 = vrot.lane.b32.xlu0 %v14564_v30, %s13014_s27 }
 0x9a6   :  { %11410 = vmatmul.mubr.msk.bf16.gmra.mrb[68].mxu1 %vm1043_vm1, %v19255_v0  ;;  %3165 = vrot.lane.b32.xlu1 %v14572_v21, %s13014_s27 }
 0x9a7   :  { %11458 = vmatpush3.bf16.msra.mxu1 %v2825_v42  ;;  %11413 = vmatprep.mubr.msk.bf16.mxu1 %vm1043_vm1, %v19256_v16 }
 0x9a8   :  { %11459 = vmatprep.subr.bf16.mxu1 %v2827_v13 }
 0x9a9   :  { %3151 = vrot.lane.b32.xlu0 %v14546_v40, %s13015_s30  ;;  %v19264_v40 = vld [vmem:[#allocation288_spill] sm:$0xff] }
 0x9aa   :  { %3153 = vrot.lane.b32.xlu1 %v14556_v31, %s13015_s30  ;;  %v19263_v31 = vld [vmem:[#allocation283_spill] sm:$0xff]  ;;  %v19266_v14 = vpack.c.bf16 %v19264_v40, %v19265_v20 }
 0x9ab   :  { %11460 = vmatpush3.bf16.msra.mxu1 %v2827_v13 }
 0x9ac   :  { %11485 = vmatprep.subr.bf16.mxu1 %v12300_v25 }
 0x9ad   :  { %3264 = vrot.lane.b32.xlu0 %v14580_v29, %s13014_s27 }
 0x9ae   :  { %11414 = vmatmul.mubr.msk.bf16.gmra.mrb[72].mxu1 %vm1043_vm1, %v19258_v27  ;;  %3266 = vrot.lane.b32.xlu1 %v19259_v35, %s13014_s27 }
 0x9af   :  { %11417 = vmatprep.mubr.msk.bf16.mxu1 %vm1043_vm1, %v19262_v32 }
 0x9b1   :  { %3155 = vrot.lane.b32.xlu0 %v14564_v30, %s13015_s30 }
 0x9b2   :  { %3157 = vrot.lane.b32.xlu1 %v14572_v21, %s13015_s30 }
 0x9b5   :  { %3268 = vrot.lane.b32.xlu0 %v19263_v31, %s13014_s27 }
 0x9b6   :  { %11418 = vmatmul.mubr.msk.bf16.gmra.mrb[76].mxu1 %vm1043_vm1, %v19266_v14  ;;  %3270 = vrot.lane.b32.xlu1 %v19267_v5, %s13014_s27 }
 0x9b9   :  { %3256 = vrot.lane.b32.xlu0 %v14580_v29, %s13015_s30 }
 0x9ba   :  { %3258 = vrot.lane.b32.xlu1 %v19259_v35, %s13015_s30 }
 0x9bd   :  { %3260 = vrot.lane.b32.xlu0 %v19263_v31, %s13015_s30 }
 0x9be   :  { %3262 = vrot.lane.b32.xlu1 %v19267_v5, %s13015_s30 }
 0x9c2   :  { %3545 = vrot.lane.b32.xlu1 %v14548_v33, %s13015_s30 }
 0x9df   :  { %v2740_v21 = vpop.xlane.xlu1 %2739 }
 0x9e3   :  { %v2734_v30 = vpop.xlane.xlu1 %2733 }
 0x9e7   :  { %v2743_v61 = vpop.xlane.xlu0 %2742 }
 0x9e8   :  { %12502 = vrcp.f32 %v2743_v61 }
 0x9e9   :  { %12504 = vrcp.f32 %v2734_v30 }
 0x9ea   :  { %12506 = vrcp.f32 %v2740_v21 }
 0x9eb   :  { %v2737_v48 = vpop.xlane.xlu0 %2736 }
 0x9ec   :  { %12508 = vrcp.f32 %v2737_v48 }
 0x9f2   :  { %v12503_v29 = vpop.eup %12502 }
 0x9f3   :  { %v12505_v46 = vpop.eup %12504  ;;  %v2799_v60 = vmul.f32 %v12503_v29, %v15289_v18 }
 0x9f4   :  { %v12507_v53 = vpop.eup %12506  ;;  %v2796_v63 = vmul.f32 %v12505_v46, %v15285_v55 }
 0x9f5   :  { %v2798_v33 = vmul.f32 %v12507_v53, %v15281_v43 }
 0x9f6   :  { %v12509_v1 = vpop.eup %12508 }
 0x9f7   :  { %v2797_v9 = vmul.f32 %v12509_v1, %v15293_v17  ;;  %v2813_v22 = vpack.c.bf16 %v2799_v60, %v2798_v33 }
 0x9f9   :  { %v2812_v11 = vpack.c.bf16 %v2797_v9, %v2796_v63 }
 0x9fa   :  { %v2752_v10 = vpop.xlane.xlu1 %2751 }
 0x9fb   :  { %11461 = vmatprep.mubr.msk.bf16.mxu1 %vm688_vm0, %v2812_v11 }
 0x9fc   :  { %11462 = vmatmul.mubr.msk.bf16.vlgmr.msra.gmra.mrb[80].mxu1 %vm688_vm0, %v2813_v22  ;;  %v2755_v37 = vpop.xlane.xlu0 %2754 }
 0x9fd   :  { %11486 = vmatpush3.bf16.msra.mxu1 %v12300_v25  ;;  %12510 = vrcp.f32 %v2755_v37 }
 0x9fe   :  { %v2746_v24 = vpop.xlane.xlu1 %2745 }
 0x9ff   :  { %12512 = vrcp.f32 %v2746_v24 }
 0xa00   :  { %12514 = vrcp.f32 %v2752_v10  ;;  %v2749_v18 = vpop.xlane.xlu0 %2748 }
 0xa01   :  { %12516 = vrcp.f32 %v2749_v18 }
 0xa04   :  { %v2764_v55 = vpop.xlane.xlu0 %2763 }
 0xa07   :  { %v12511_v26 = vpop.eup %12510 }
 0xa08   :  { %v2758_v17 = vpop.xlane.xlu0 %2757  ;;  %v2803_v36 = vmul.f32 %v12511_v26, %v15309_v45 }
 0xa09   :  { %v12513_v38 = vpop.eup %12512  ;;  %12518 = vrcp.f32 %v2758_v17 }
 0xa0a   :  { %v12515_v43 = vpop.eup %12514  ;;  %v2776_v15 = vpop.xlane.xlu1 %2775  ;;  %v2800_v8 = vmul.f32 %v12513_v38, %v15314_v58 }
 0xa0b   :  { %v12517_v59 = vpop.eup %12516  ;;  %v2802_v42 = vmul.f32 %v12515_v43, %v15304_v7 }
 0xa0c   :  { %v2767_v28 = vpop.xlane.xlu0 %2766  ;;  %v2801_v19 = vmul.f32 %v12517_v59, %v15319_v12 }
 0xa0d   :  { %v2815_v16 = vpack.c.bf16 %v2803_v36, %v2802_v42 }
 0xa0e   :  { %v2770_v0 = vpop.xlane.xlu1 %2769  ;;  %v2814_v13 = vpack.c.bf16 %v2801_v19, %v2800_v8 }
 0xa10   :  { %11465 = vmatprep.mubr.msk.bf16.mxu1 %vm688_vm0, %v2814_v13  ;;  %v2761_v25 = vpop.xlane.xlu0 %2760 }
 0xa11   :  { %12520 = vrcp.f32 %v2761_v25  ;;  %11466 = vmatmul.mubr.msk.bf16.gmra.mrb[84].mxu1 %vm688_vm0, %v2815_v16 }
 0xa12   :  { %v2779_v51 = vpop.xlane.xlu1 %2778  ;;  %12522 = vrcp.f32 %v2767_v28 }
 0xa13   :  { %v12519_v12 = vpop.eup %12518 }
 0xa14   :  { %v2773_v27 = vpop.xlane.xlu0 %2772  ;;  %v2804_v62 = vmul.f32 %v12519_v12, %v15329_v44 }
 0xa15   :  { %12524 = vrcp.f32 %v2773_v27 }
 0xa16   :  { %v2912_v45 = vpop.permute.xlu1 %2911  ;;  %12526 = vrcp.f32 %v2764_v55 }
 0xa17   :  { %12528 = vrcp.f32 %v2770_v0 }
 0xa18   :  { %v2910_v58 = vpop.permute.xlu0 %2909  ;;  %12530 = vrcp.f32 %v2779_v51 }
 0xa19   :  { %11469 = vmatprep.subr.bf16.mxu0 %v2910_v58  ;;  %12532 = vrcp.f32 %v2776_v15 }
 0xa1a   :  { %v2914_v7 = vpop.permute.xlu1 %2913  ;;  %11470 = vmatpush3.bf16.msra.mxu0 %v2910_v58 }
 0xa1b   :  { %v12521_v35 = vpop.eup %12520  ;;  %11471 = vmatprep.subr.bf16.mxu0 %v2912_v45 }
 0xa1c   :  { %v3160_v23 = vpop.permute.xlu0 %3159  ;;  %v2805_v32 = vmul.f32 %v12521_v35, %v15340_v4  ;;  %v12523_v20 = vpop.eup %12522 }
 0xa1d   :  { %v2807_v48 = vmul.f32 %v12523_v20, %v15331_v2 }
 0xa1e   :  { %v2916_v31 = vpop.permute.xlu1 %2915  ;;  %11472 = vmatpush3.bf16.msra.mxu0 %v2912_v45  ;;  %v2816_v40 = vpack.c.bf16 %v2805_v32, %v2804_v62 }
 0xa1f   :  { %11473 = vmatprep.subr.bf16.mxu0 %v2914_v7  ;;  %v12525_v5 = vpop.eup %12524 }
 0xa20   :  { %11477 = vmatprep.mubr.msk.bf16.mxu0 %vm688_vm0, %v2816_v40  ;;  %v3164_v14 = vpop.permute.xlu0 %3163  ;;  %v12527_v21 = vpop.eup %12526  ;;  %v2809_v4 = vmul.f32 %v12525_v5, %v15355_v39 }
 0xa21   :  { %v12529_v61 = vpop.eup %12528  ;;  %v2806_v29 = vmul.f32 %v12527_v21, %v15324_v3 }
 0xa22   :  { %v3162_v30 = vpop.permute.xlu1 %3161  ;;  %11474 = vmatpush3.bf16.msra.mxu0 %v2914_v7  ;;  %v2808_v53 = vmul.f32 %v12529_v61, %v15345_v54  ;;  %v12531_v60 = vpop.eup %12530  ;;  %v3180_v54 = vsel %vm1043_vm1, %v3160_v23, 0 }
 0xa23   :  { %11475 = vmatprep.subr.bf16.mxu0 %v2916_v31  ;;  %v2817_v1 = vpack.c.bf16 %v2807_v48, %v2806_v29  ;;  %v12533_v2 = vpop.eup %12532  ;;  %v2811_v3 = vmul.f32 %v12531_v60, %v15351_v52  ;;  %v3183_v24 = vsel %vm1043_vm1, %v3162_v30, 0 }
 0xa24   :  { %v3152_v44 = vpop.permute.xlu0 %3151  ;;  %v2818_v9 = vpack.c.bf16 %v2809_v4, %v2808_v53  ;;  %v2810_v39 = vmul.f32 %v12533_v2, %v15335_v50  ;;  %v3186_v50 = vsel %vm1043_vm1, %v3164_v14, 0 }
 0xa26   :  { %v3166_v46 = vpop.permute.xlu1 %3165  ;;  %11476 = vmatpush3.bf16.msra.mxu0 %v2916_v31  ;;  %v2819_v22 = vpack.c.bf16 %v2811_v3, %v2810_v39 }
 0xa27   :  { %12145 = vmatprep.subr.msk.bf16.mxu0 %vm1043_vm1, %v3160_v23  ;;  %v3189_v55 = vsel %vm1043_vm1, %v3166_v46, 0 }
 0xa28   :  { %v3265_v63 = vpop.permute.xlu0 %3264 }
 0xa29   :  { %11478 = vmatmul.mubr.msk.bf16.vlgmr.msra.gmra.mrb[64].mxu0 %vm688_vm0, %v2817_v1  ;;  %12149 = vmatprep.subr.msk.bf16.mxu1 %vm1043_vm1, %v3265_v63  ;;  %v3285_v8 = vsel %vm1043_vm1, %v3265_v63, 0 }
 0xa2a   :  { %v3154_v33 = vpop.permute.xlu1 %3153  ;;  %11481 = vmatprep.mubr.msk.bf16.mxu0 %vm688_vm0, %v2818_v9 }
 0xa2c   :  { %v3156_v17 = vpop.permute.xlu0 %3155 }
 0xa2e   :  { %v3267_v11 = vpop.permute.xlu1 %3266 }
 0xa2f   :  { %11504 = vmatpush3.bf16.xpose.msra.mxu0 %v3180_v54  ;;  %v3288_v19 = vsel %vm1043_vm1, %v3267_v11, 0 }
 0xa30   :  { %12146 = vmatprep.subr.msk.bf16.mxu0 %vm1043_vm1, %v3162_v30  ;;  %v3269_v42 = vpop.permute.xlu0 %3268 }
 0xa31   :  { %11482 = vmatmul.mubr.msk.bf16.gmra.mrb[68].mxu0 %vm688_vm0, %v2819_v22  ;;  %v3291_v16 = vsel %vm1043_vm1, %v3269_v42, 0 }
 0xa32   :  { %v3158_v10 = vpop.permute.xlu1 %3157  ;;  %11511 = vmatprep.mubr.msk.bf16.mxu0 %vm1043_vm1, %v3152_v44 }
 0xa34   :  { %v3257_v30 = vpop.permute.xlu0 %3256 }
 0xa36   :  { %v3271_v37 = vpop.permute.xlu1 %3270 }
 0xa37   :  { %11506 = vmatpush3.bf16.xpose.msra.mxu0 %v3183_v24  ;;  %v3294_v58 = vsel %vm1043_vm1, %v3271_v37, 0 }
 0xa38   :  { %12147 = vmatprep.subr.msk.bf16.mxu0 %vm1043_vm1, %v3164_v14  ;;  %v3261_v61 = vpop.permute.xlu0 %3260 }
 0xa3a   :  { %v3259_v52 = vpop.permute.xlu1 %3258 }
 0xa3e   :  { %v3263_v18 = vpop.permute.xlu1 %3262 }
 0xa3f   :  { %11508 = vmatpush3.bf16.xpose.msra.mxu0 %v3186_v50 }
 0xa40   :  { %12148 = vmatprep.subr.msk.bf16.mxu0 %vm1043_vm1, %v3166_v46 }
 0xa42   :  { %v3546_v26 = vpop.permute.xlu1 %3545 }
 0xa47   :  { %11510 = vmatpush3.bf16.xpose.msra.mxu0 %v3189_v55 }
 0xa48   :  { %11535 = vmatprep.subr.bf16.mxu0 %v3546_v26 }
 0xa4e   :  { %11512 = vmatmul.mubr.msk.bf16.vlgmr.msra.gmra.mrb[72].mxu0 %vm1043_vm1, %v3154_v33 }
 0xa4f   :  { %11515 = vmatprep.mubr.msk.bf16.mxu0 %vm1043_vm1, %v3156_v17  ;;  %11536 = vmatpush3.bf16.msra.mxu0 %v3546_v26 }
 0xa56   :  { %11516 = vmatmul.mubr.msk.bf16.gmra.mrb[76].mxu0 %vm1043_vm1, %v3158_v10 }
 0xacf   :  { %v11463_v38 = vpop.f32.mrb[80].mxu1 }
 0xad0   :  { %v2878_v43 = vpop.f32.mrb[81].mxu1 }
 0xad1   :  { %v11464_v15 = vpop.f32.mrb[82].mxu1 }
 0xad2   :  { %v2999_v59 = vpack.c.bf16 %v11464_v15, %v11463_v38  ;;  %v2881_v36 = vpop.f32.mrb[83].mxu1 }
 0xad3   :  { %v2998_v28 = vpack.c.bf16 %v2881_v36, %v2878_v43 }
 0xad5   :  { %11487 = vmatprep.mubr.msk.bf16.mxu1 %vm1043_vm1, %v2998_v28 }
 0xad6   :  { %11488 = vmatmul.mubr.msk.bf16.vlgmr.msra.gmra.mrb[64].mxu1 %vm1043_vm1, %v2999_v59 }
 0xad7   :  { %11520 = vmatpush3.bf16.xpose.msra.mxu1 %v3285_v8 }
 0xad8   :  { %12150 = vmatprep.subr.msk.bf16.mxu1 %vm1043_vm1, %v3267_v11 }
 0xadf   :  { %11522 = vmatpush3.bf16.xpose.msra.mxu1 %v3288_v19 }
 0xae0   :  { %12151 = vmatprep.subr.msk.bf16.mxu1 %vm1043_vm1, %v3269_v42 }
 0xae4   :  { %v11467_v0 = vpop.f32.mrb[84].mxu1 }
 0xae5   :  { %v2894_v13 = vpop.f32.mrb[85].mxu1 }
 0xae6   :  { %v11468_v25 = vpop.f32.mrb[86].mxu1 }
 0xae7   :  { %11524 = vmatpush3.bf16.xpose.msra.mxu1 %v3291_v16  ;;  %v3001_v51 = vpack.c.bf16 %v11468_v25, %v11467_v0  ;;  %v2897_v27 = vpop.f32.mrb[87].mxu1 }
 0xae8   :  { %12152 = vmatprep.subr.msk.bf16.mxu1 %vm1043_vm1, %v3271_v37  ;;  %v3000_v45 = vpack.c.bf16 %v2897_v27, %v2894_v13 }
 0xaea   :  { %11491 = vmatprep.mubr.msk.bf16.mxu1 %vm1043_vm1, %v3000_v45 }
 0xaeb   :  { %11492 = vmatmul.mubr.msk.bf16.gmra.mrb[68].mxu1 %vm1043_vm1, %v3001_v51 }
 0xaef   :  { %11526 = vmatpush3.bf16.xpose.msra.mxu1 %v3294_v58 }
 0xafc   :  { %v11479_v12 = vpop.f32.mrb[64].mxu0 }
 0xafd   :  { %v2967_v7 = vpop.f32.mrb[65].mxu0 }
 0xafe   :  { %v11480_v35 = vpop.f32.mrb[66].mxu0 }
 0xaff   :  { %v3003_v23 = vpack.c.bf16 %v11480_v35, %v11479_v12  ;;  %v2970_v62 = vpop.f32.mrb[67].mxu0 }
 0xb00   :  { %v3002_v32 = vpack.c.bf16 %v2970_v62, %v2967_v7 }
 0xb02   :  { %11495 = vmatprep.mubr.msk.bf16.mxu1 %vm1043_vm1, %v3002_v32 }
 0xb03   :  { %11496 = vmatmul.mubr.msk.bf16.gmra.mrb[72].mxu1 %vm1043_vm1, %v3003_v23 }
 0xb04   :  { %v11483_v31 = vpop.f32.mrb[68].mxu0 }
 0xb05   :  { %v2983_v40 = vpop.f32.mrb[69].mxu0 }
 0xb06   :  { %v11484_v20 = vpop.f32.mrb[70].mxu0 }
 0xb07   :  { %v3005_v14 = vpack.c.bf16 %v11484_v20, %v11483_v31  ;;  %v2986_v5 = vpop.f32.mrb[71].mxu0 }
 0xb08   :  { %v3004_v21 = vpack.c.bf16 %v2986_v5, %v2983_v40 }
 0xb0a   :  { %11499 = vmatprep.mubr.msk.bf16.mxu1 %vm1043_vm1, %v3004_v21 }
 0xb0b   :  { %11500 = vmatmul.mubr.msk.bf16.gmra.mrb[76].mxu1 %vm1043_vm1, %v3005_v14 }
 0xb0c   :  { %11527 = vmatprep.mubr.msk.bf16.mxu1 %vm1043_vm1, %v3257_v30 }
 0xb13   :  { %11528 = vmatmul.mubr.msk.bf16.vlgmr.msra.gmra.mrb[88].mxu1 %vm1043_vm1, %v3259_v52 }
 0xb14   :  { %11531 = vmatprep.mubr.msk.bf16.mxu1 %vm1043_vm1, %v3261_v61 }
 0xb1b   :  { %11532 = vmatmul.mubr.msk.bf16.gmra.mrb[92].mxu1 %vm1043_vm1, %v3263_v18 }
 0xb21   :  { %v11513_v48 = vpop.f32.mrb[72].mxu0 }
 0xb22   :  { %v3225_v44 = vpop.f32.mrb[73].mxu0  ;;  %v3367_v4 = vsel %vm688_vm0, %v11513_v48, -inf }
 0xb23   :  { %3368 = vmax.xlane.f32.xlu0 %v3367_v4  ;;  %v11514_v29 = vpop.f32.mrb[74].mxu0  ;;  %v3361_v1 = vsel %vm688_vm0, %v3225_v44, -inf }
 0xb24   :  { %v3228_v46 = vpop.f32.mrb[75].mxu0  ;;  %v3370_v9 = vsel %vm688_vm0, %v11514_v29, -inf }
 0xb25   :  { %v3364_v53 = vsel %vm688_vm0, %v3228_v46, -inf }
 0xb26   :  { %3365 = vmax.xlane.f32.xlu1 %v3364_v53 }
 0xb27   :  { %3362 = vmax.xlane.f32.xlu0 %v3361_v1 }
 0xb29   :  { %v11517_v60 = vpop.f32.mrb[76].mxu0 }
 0xb2a   :  { %v3241_v63 = vpop.f32.mrb[77].mxu0  ;;  %v3379_v2 = vsel %vm688_vm0, %v11517_v60, -inf }
 0xb2b   :  { %3371 = vmax.xlane.f32.xlu0 %v3370_v9  ;;  %3380 = vmax.xlane.f32.xlu1 %v3379_v2  ;;  %v11518_v33 = vpop.f32.mrb[78].mxu0  ;;  %v3373_v39 = vsel %vm688_vm0, %v3241_v63, -inf }
 0xb2c   :  { %v3244_v3 = vpop.f32.mrb[79].mxu0  ;;  %v3382_v11 = vsel %vm688_vm0, %v11518_v33, -inf }
 0xb2d   :  { %v3376_v54 = vsel %vm688_vm0, %v3244_v3, -inf }
 0xb2f   :  { %3374 = vmax.xlane.f32.xlu1 %v3373_v39  ;;  %3383 = vmax.xlane.f32.xlu0 %v3382_v11 }
 0xb33   :  { %3377 = vmax.xlane.f32.xlu0 %v3376_v54 }
 0xbb0   :  { %v3369_v22 = vpop.xlane.xlu0 %3368 }
 0xbb1   :  { %v3411_v10 = vsub.f32 %v11513_v48, %v3369_v22 }
 0xbb3   :  { %v3429_v37 = vmul.f32 1.442695, %v3411_v10  ;;  %v3366_v24 = vpop.xlane.xlu1 %3365 }
 0xbb4   :  { %v3363_v52 = vpop.xlane.xlu0 %3362  ;;  %v3410_v55 = vsub.f32 %v3228_v46, %v3366_v24 }
 0xbb5   :  { %12534 = vpow2.f32 %v3429_v37  ;;  %v3409_v50 = vsub.f32 %v3225_v44, %v3363_v52 }
 0xbb6   :  { %v3427_v15 = vmul.f32 1.442695, %v3410_v55 }
 0xbb7   :  { %v3425_v18 = vmul.f32 1.442695, %v3409_v50 }
 0xbb8   :  { %v3381_v26 = vpop.xlane.xlu1 %3380  ;;  %v3372_v17 = vpop.xlane.xlu0 %3371 }
 0xbb9   :  { %12536 = vpow2.f32 %v3425_v18  ;;  %v3412_v38 = vsub.f32 %v11514_v29, %v3372_v17  ;;  %v3415_v59 = vsub.f32 %v11517_v60, %v3381_v26 }
 0xbbb   :  { %v3431_v43 = vmul.f32 1.442695, %v3412_v38  ;;  %v3437_v19 = vmul.f32 1.442695, %v3415_v59 }
 0xbbc   :  { %v3384_v36 = vpop.xlane.xlu0 %3383  ;;  %v3375_v28 = vpop.xlane.xlu1 %3374 }
 0xbbd   :  { %12538 = vpow2.f32 %v3431_v43  ;;  %v3413_v42 = vsub.f32 %v3241_v63, %v3375_v28  ;;  %v3416_v14 = vsub.f32 %v11518_v33, %v3384_v36 }
 0xbbe   :  { %12540 = vpow2.f32 %v3427_v15 }
 0xbbf   :  { %v15523_v8 = vpop.eup %12534  ;;  %12542 = vpow2.f32 %v3437_v19  ;;  %v3433_v25 = vmul.f32 1.442695, %v3413_v42  ;;  %v3439_v5 = vmul.f32 1.442695, %v3416_v14 }
 0xbc0   :  { %v3463_v0 = vsel %vm688_vm0, %v15523_v8, 0.0  ;;  %v3378_v13 = vpop.xlane.xlu0 %3377 }
 0xbc1   :  { %3464 = vadd.xlane.f32.xlu1 %v3463_v0  ;;  %v3414_v51 = vsub.f32 %v3244_v3, %v3378_v13  ;;  %12544 = vpow2.f32 %v3433_v25 }
 0xbc3   :  { %v15527_v16 = vpop.eup %12536  ;;  %v3435_v58 = vmul.f32 1.442695, %v3414_v51 }
 0xbc4   :  { %v3457_v27 = vsel %vm688_vm0, %v15527_v16, 0.0 }
 0xbc5   :  { %3458 = vadd.xlane.f32.xlu1 %v3457_v27  ;;  %12546 = vpow2.f32 %v3435_v58 }
 0xbc6   :  { %12548 = vpow2.f32 %v3439_v5 }
 0xbc7   :  { %v15531_v45 = vpop.eup %12538 }
 0xbc8   :  { %v3466_v12 = vsel %vm688_vm0, %v15531_v45, 0.0  ;;  %v12541_v7 = vpop.eup %12540 }
 0xbc9   :  { %3467 = vadd.xlane.f32.xlu0 %v3466_v12  ;;  %v3460_v35 = vsel %vm688_vm0, %v12541_v7, 0.0  ;;  %v15536_v23 = vpop.eup %12542 }
 0xbca   :  { %v3475_v62 = vsel %vm688_vm0, %v15536_v23, 0.0 }
 0xbcb   :  { %v15540_v32 = vpop.eup %12544 }
 0xbcc   :  { %v3469_v31 = vsel %vm688_vm0, %v15540_v32, 0.0 }
 0xbcd   :  { %3461 = vadd.xlane.f32.xlu0 %v3460_v35 }
 0xbcf   :  { %v15544_v40 = vpop.eup %12546 }
 0xbd0   :  { %v3472_v20 = vsel %vm688_vm0, %v15544_v40, 0.0  ;;  %v15552_v53 = vpop.eup %12548 }
 0xbd1   :  { %3476 = vadd.xlane.f32.xlu0 %v3475_v62  ;;  %v3478_v2 = vsel %vm688_vm0, %v15552_v53, 0.0 }
 0xbd5   :  { %3470 = vadd.xlane.f32.xlu0 %v3469_v31 }
 0xbd9   :  { %3473 = vadd.xlane.f32.xlu0 %v3472_v20 }
 0xbe6   :  { %v11529_v21 = vpop.f32.mrb[88].mxu1 }
 0xbe7   :  { %v3330_v30 = vpop.f32.mrb[89].mxu1  ;;  %v3391_v61 = vsel %vm688_vm0, %v11529_v21, -inf }
 0xbe8   :  { %v11530_v48 = vpop.f32.mrb[90].mxu1  ;;  %3392 = vmax.xlane.f32.xlu1 %v3391_v61  ;;  %v3385_v29 = vsel %vm688_vm0, %v3330_v30, -inf }
 0xbe9   :  { %v3333_v44 = vpop.f32.mrb[91].mxu1  ;;  %v3394_v4 = vsel %vm688_vm0, %v11530_v48, -inf }
 0xbea   :  { %3395 = vmax.xlane.f32.xlu0 %v3394_v4  ;;  %v3388_v46 = vsel %vm688_vm0, %v3333_v44, -inf }
 0xbec   :  { %3386 = vmax.xlane.f32.xlu1 %v3385_v29 }
 0xbee   :  { %v15554_v1 = vpop.f32.mrb[92].mxu1  ;;  %3389 = vmax.xlane.f32.xlu0 %v3388_v46 }
 0xbef   :  { %v15556_v60 = vpop.f32.mrb[93].mxu1  ;;  %v3403_v39 = vsel %vm688_vm0, %v15554_v1, -inf }
 0xbf0   :  { %v15558_v63 = vpop.f32.mrb[94].mxu1  ;;  %v3397_v11 = vsel %vm688_vm0, %v15556_v60, -inf }
 0xbf1   :  { %v15560_v9 = vpop.f32.mrb[95].mxu1  ;;  %v3406_v33 = vsel %vm688_vm0, %v15558_v63, -inf }
 0xbf2   :  { %3479 = vadd.xlane.f32.xlu0 %v3478_v2  ;;  %v3400_v3 = vsel %vm688_vm0, %v15560_v9, -inf }
 0xbf6   :  { %3407 = vmax.xlane.f32.xlu0 %v3406_v33 }
 0xbfa   :  { %3401 = vmax.xlane.f32.xlu0 %v3400_v3 }
 0xbfd   :  { %3547 = vrot.lane.b32.xlu1 %v14558_v41, %s13015_s30 }
 0xc10   :  { %3549 = vrot.lane.b32.xlu0 %v14566_v57, %s13015_s30 }
 0xc21   :  { %3404 = vmax.xlane.f32.xlu1 %v3403_v39 }
 0xc25   :  { %3398 = vmax.xlane.f32.xlu1 %v3397_v11 }
 0xc36   :  { %3551 = vrot.lane.b32.xlu1 %v14574_v56, %s13015_s30 }
 0xc3a   :  { %3634 = vrot.lane.b32.xlu1 %v14582_v34, %s13015_s30 }
 0xc3e   :  { %3636 = vrot.lane.b32.xlu1 %v14594_v49, %s13015_s30 }
 0xc4e   :  { %v3465_v41 = vpop.xlane.xlu1 %3464 }
 0xc52   :  { %v3459_v54 = vpop.xlane.xlu1 %3458 }
 0xc53   :  { %12550 = vrcp.f32 %v3459_v54 }
 0xc56   :  { %v3468_v57 = vpop.xlane.xlu0 %3467 }
 0xc5a   :  { %v3462_v22 = vpop.xlane.xlu0 %3461 }
 0xc5b   :  { %12552 = vrcp.f32 %v3462_v22 }
 0xc5d   :  { %v12551_v10 = vpop.eup %12550 }
 0xc5e   :  { %v3477_v24 = vpop.xlane.xlu0 %3476  ;;  %v3521_v52 = vmul.f32 %v12551_v10, %v15527_v16 }
 0xc62   :  { %v3471_v56 = vpop.xlane.xlu0 %3470 }
 0xc65   :  { %v12553_v37 = vpop.eup %12552 }
 0xc66   :  { %v3522_v50 = vmul.f32 %v12553_v37, %v12541_v7  ;;  %v3474_v34 = vpop.xlane.xlu0 %3473 }
 0xc68   :  { %v3537_v18 = vpack.c.bf16 %v3522_v50, %v3521_v52 }
 0xc6a   :  { %11543 = vmatprep.mubr.msk.bf16.mxu0 %vm688_vm0, %v3537_v18 }
 0xc75   :  { %v3393_v55 = vpop.xlane.xlu1 %3392 }
 0xc76   :  { %v3419_v26 = vsub.f32 %v11529_v21, %v3393_v55 }
 0xc77   :  { %v3396_v49 = vpop.xlane.xlu0 %3395 }
 0xc78   :  { %v3445_v17 = vmul.f32 1.442695, %v3419_v26  ;;  %v3420_v38 = vsub.f32 %v11530_v48, %v3396_v49 }
 0xc79   :  { %v3387_v43 = vpop.xlane.xlu1 %3386 }
 0xc7a   :  { %12554 = vpow2.f32 %v3445_v17  ;;  %v3417_v15 = vsub.f32 %v3330_v30, %v3387_v43  ;;  %v3447_v59 = vmul.f32 1.442695, %v3420_v38 }
 0xc7b   :  { %v3390_v36 = vpop.xlane.xlu0 %3389 }
 0xc7c   :  { %v3441_v28 = vmul.f32 1.442695, %v3417_v15  ;;  %v3418_v19 = vsub.f32 %v3333_v44, %v3390_v36 }
 0xc7d   :  { %v3548_v42 = vpop.permute.xlu1 %3547 }
 0xc7e   :  { %12556 = vpow2.f32 %v3441_v28  ;;  %v3443_v0 = vmul.f32 1.442695, %v3418_v19  ;;  %11537 = vmatprep.subr.bf16.mxu0 %v3548_v42 }
 0xc7f   :  { %12558 = vpow2.f32 %v3447_v59  ;;  %11538 = vmatpush3.bf16.msra.mxu0 %v3548_v42  ;;  %v3480_v13 = vpop.xlane.xlu0 %3479 }
 0xc80   :  { %12560 = vpow2.f32 %v3443_v0 }
 0xc81   :  { %12562 = vrcp.f32 %v3468_v57 }
 0xc82   :  { %12564 = vrcp.f32 %v3474_v34 }
 0xc83   :  { %v3408_v16 = vpop.xlane.xlu0 %3407  ;;  %12566 = vrcp.f32 %v3465_v41 }
 0xc84   :  { %v15584_v25 = vpop.eup %12554  ;;  %12568 = vrcp.f32 %v3471_v56  ;;  %v3424_v21 = vsub.f32 %v15558_v63, %v3408_v16 }
 0xc85   :  { %v3487_v51 = vsel %vm688_vm0, %v15584_v25, 0.0  ;;  %12570 = vrcp.f32 %v3480_v13 }
 0xc86   :  { %3488 = vadd.xlane.f32.xlu1 %v3487_v51  ;;  %12572 = vrcp.f32 %v3477_v24  ;;  %v3455_v2 = vmul.f32 1.442695, %v3424_v21  ;;  %v12301_v51 = vld [vmem:[%s18900_s4 + $0x18] sm:$0xff]  }
 0xc87   :  { %v3402_v27 = vpop.xlane.xlu0 %3401 }
 0xc88   :  { %v15588_v58 = vpop.eup %12556  ;;  %v3422_v33 = vsub.f32 %v15560_v9, %v3402_v27 }
 0xc89   :  { %v15590_v12 = vpop.eup %12558  ;;  %v3481_v7 = vsel %vm688_vm0, %v15588_v58, 0.0 }
 0xc8a   :  { %v15594_v35 = vpop.eup %12560  ;;  %3482 = vadd.xlane.f32.xlu1 %v3481_v7  ;;  %v3490_v20 = vsel %vm688_vm0, %v15590_v12, 0.0 }
 0xc8b   :  { %v3550_v62 = vpop.permute.xlu0 %3549  ;;  %v3484_v31 = vsel %vm688_vm0, %v15594_v35, 0.0  ;;  %v12563_v61 = vpop.eup %12562 }
 0xc8c   :  { %3485 = vadd.xlane.f32.xlu0 %v3484_v31  ;;  %11539 = vmatprep.subr.bf16.mxu0 %v3550_v62  ;;  %v12565_v44 = vpop.eup %12564  ;;  %v3524_v46 = vmul.f32 %v12563_v61, %v15531_v45 }
 0xc8d   :  { %11540 = vmatpush3.bf16.msra.mxu0 %v3550_v62  ;;  %v12567_v29 = vpop.eup %12566  ;;  %v3526_v39 = vmul.f32 %v12565_v44, %v15544_v40 }
 0xc8e   :  { %3491 = vadd.xlane.f32.xlu1 %v3490_v20  ;;  %v3523_v63 = vmul.f32 %v12567_v29, %v15523_v8 }
 0xc90   :  { %v3538_v41 = vpack.c.bf16 %v3524_v46, %v3523_v63 }
 0xc9f   :  { %3640 = vrot.lane.b32.xlu1 %v14618_v47, %s13015_s30  ;;  %v12569_v47 = vpop.eup %12568 }
 0xca0   :  { %v3525_v11 = vmul.f32 %v12569_v47, %v15540_v32  ;;  %v12571_v54 = vpop.eup %12570 }
 0xca1   :  { %v12573_v9 = vpop.eup %12572  ;;  %v3528_v8 = vmul.f32 %v12571_v54, %v15552_v53 }
 0xca2   :  { %v3539_v45 = vpack.c.bf16 %v3526_v39, %v3525_v11  ;;  %v3527_v10 = vmul.f32 %v12573_v9, %v15536_v23 }
 0xca4   :  { %v3540_v24 = vpack.c.bf16 %v3528_v8, %v3527_v10  ;;  %v15648_v10 = vld [vmem:[%s18903_s7 + $0x1] ss:$0 sm:$0xff] }
 0xcae   :  { %v3405_v14 = vpop.xlane.xlu1 %3404 }
 0xcaf   :  { %v3423_v5 = vsub.f32 %v15554_v1, %v3405_v14 }
 0xcb1   :  { %v3453_v30 = vmul.f32 1.442695, %v3423_v5 }
 0xcb2   :  { %v3399_v48 = vpop.xlane.xlu1 %3398 }
 0xcb3   :  { %12574 = vpow2.f32 %v3453_v30  ;;  %v3421_v4 = vsub.f32 %v15556_v60, %v3399_v48  ;;  %v3451_v60 = vmul.f32 1.442695, %v3422_v33 }
 0xcb5   :  { %v3449_v3 = vmul.f32 1.442695, %v3421_v4 }
 0xcb6   :  { %v3552_v1 = vpop.permute.xlu1 %3551 }
 0xcb7   :  { %12576 = vpow2.f32 %v3449_v3  ;;  %11541 = vmatprep.subr.bf16.mxu0 %v3552_v1 }
 0xcb8   :  { %11542 = vmatpush3.bf16.msra.mxu0 %v3552_v1  ;;  %12578 = vpow2.f32 %v3455_v2 }
 0xcb9   :  { %12580 = vpow2.f32 %v3451_v60 }
 0xcba   :  { %v3635_v57 = vpop.permute.xlu1 %3634 }
 0xcbb   :  { %11544 = vmatmul.mubr.msk.bf16.vlgmr.msra.gmra.mrb[80].mxu0 %vm688_vm0, %v3538_v41  ;;  %11551 = vmatprep.subr.bf16.mxu1 %v3635_v57 }
 0xcbc   :  { %11547 = vmatprep.mubr.msk.bf16.mxu0 %vm688_vm0, %v3539_v45  ;;  %11552 = vmatpush3.bf16.msra.mxu1 %v3635_v57 }
 0xcbd   :  { %v15612_v40 = vpop.eup %12574 }
 0xcbe   :  { %v3637_v22 = vpop.permute.xlu1 %3636  ;;  %v3499_v32 = vsel %vm688_vm0, %v15612_v40, 0.0 }
 0xcbf   :  { %11553 = vmatprep.subr.bf16.mxu1 %v3637_v22  ;;  %3500 = vadd.xlane.f32.xlu0 %v3499_v32  ;;  %v19268_v32 = vmov 0  }
 0xcc0   :  { %11554 = vmatpush3.bf16.msra.mxu1 %v3637_v22 }
 0xcc1   :  { %v12577_v37 = vpop.eup %12576 }
 0xcc2   :  { %v3493_v52 = vsel %vm688_vm0, %v12577_v37, 0.0  ;;  %v12579_v50 = vpop.eup %12578 }
 0xcc3   :  { %3494 = vadd.xlane.f32.xlu0 %v3493_v52  ;;  %11548 = vmatmul.mubr.msk.bf16.gmra.mrb[84].mxu0 %vm688_vm0, %v3540_v24  ;;  %v3502_v18 = vsel %vm688_vm0, %v12579_v50, 0.0  ;;  %v12581_v53 = vpop.eup %12580 }
 0xcc4   :  { %v3496_v56 = vsel %vm688_vm0, %v12581_v53, 0.0 }
 0xcc7   :  { %3503 = vadd.xlane.f32.xlu0 %v3502_v18 }
 0xccb   :  { %3497 = vadd.xlane.f32.xlu0 %v3496_v56 }
 0xce1   :  { %3638 = vrot.lane.b32.xlu0 %v14606_v6, %s13015_s30 }
 0xd13   :  { %v3489_v23 = vpop.xlane.xlu1 %3488 }
 0xd17   :  { %v3483_v34 = vpop.xlane.xlu1 %3482 }
 0xd18   :  { %12582 = vrcp.f32 %v3483_v34 }
 0xd19   :  { %v3486_v55 = vpop.xlane.xlu0 %3485 }
 0xd1a   :  { %12584 = vrcp.f32 %v3486_v55 }
 0xd1b   :  { %v3492_v59 = vpop.xlane.xlu1 %3491 }
 0xd1c   :  { %12586 = vrcp.f32 %v3492_v59 }
 0xd1d   :  { %12588 = vrcp.f32 %v3489_v23 }
 0xd1f   :  { %v3641_v13 = vpop.permute.xlu1 %3640 }
 0xd22   :  { %v12583_v26 = vpop.eup %12582 }
 0xd23   :  { %v3529_v17 = vmul.f32 %v12583_v26, %v15588_v58  ;;  %v19270_v26 = vld [vmem:[#allocation265_spill] sm:$0xff] }
 0xd24   :  { %v12585_v49 = vpop.eup %12584 }
 0xd25   :  { %v3530_v38 = vmul.f32 %v12585_v49, %v15594_v35 }
 0xd26   :  { %v12587_v19 = vpop.eup %12586 }
 0xd27   :  { %v3541_v43 = vpack.c.bf16 %v3530_v38, %v3529_v17  ;;  %v12589_v0 = vpop.eup %12588  ;;  %v3532_v16 = vmul.f32 %v12587_v19, %v15590_v12  ;;  %v19271_v38 = vld [vmem:[#allocation266_spill] sm:$0xff] }
 0xd28   :  { %v3531_v58 = vmul.f32 %v12589_v0, %v15584_v25 }
 0xd29   :  { %11559 = vmatprep.mubr.msk.bf16.mxu1 %vm688_vm0, %v3541_v43 }
 0xd2a   :  { %v3542_v35 = vpack.c.bf16 %v3532_v16, %v3531_v58 }
 0xd4c   :  { %v3501_v15 = vpop.xlane.xlu0 %3500 }
 0xd50   :  { %v3495_v36 = vpop.xlane.xlu0 %3494 }
 0xd51   :  { %12590 = vrcp.f32 %v3495_v36 }
 0xd54   :  { %v3504_v6 = vpop.xlane.xlu0 %3503 }
 0xd58   :  { %v3498_v28 = vpop.xlane.xlu0 %3497 }
 0xd59   :  { %12592 = vrcp.f32 %v3498_v28 }
 0xd5a   :  { %12594 = vrcp.f32 %v3504_v6 }
 0xd5b   :  { %12596 = vrcp.f32 %v3501_v15  ;;  %v12591_v27 = vpop.eup %12590  ;;  %v19272_v15 = vld [vmem:[#allocation267_spill] sm:$0xff] }
 0xd5c   :  { %v3639_v42 = vpop.permute.xlu0 %3638  ;;  %v3533_v31 = vmul.f32 %v12591_v27, %v12577_v37 }
 0xd5d   :  { %11555 = vmatprep.subr.bf16.mxu1 %v3639_v42 }
 0xd5e   :  { %11556 = vmatpush3.bf16.msra.mxu1 %v3639_v42 }
 0xd5f   :  { %11557 = vmatprep.subr.bf16.mxu1 %v3641_v13 }
 0xd62   :  { %11558 = vmatpush3.bf16.msra.mxu1 %v3641_v13 }
 0xd63   :  { %v12593_v7 = vpop.eup %12592  ;;  %11567 = vmatprep.subr.bf16.mxu1 %v12301_v51 }
 0xd64   :  { %v12595_v62 = vpop.eup %12594  ;;  %v3534_v20 = vmul.f32 %v12593_v7, %v12581_v53  ;;  %v19269_v53 = vld [vmem:[#allocation268_spill] sm:$0xff] }
 0xd65   :  { %11560 = vmatmul.mubr.msk.bf16.vlgmr.msra.gmra.mrb[96].mxu1 %vm688_vm0, %v3542_v35  ;;  %v12597_v14 = vpop.eup %12596  ;;  %v3536_v12 = vmul.f32 %v12595_v62, %v12579_v50  ;;  %v19273_v35 = vld [vmem:[#allocation272_spill] sm:$0xff] }
 0xd66   :  { %v3543_v5 = vpack.c.bf16 %v3534_v20, %v3533_v31  ;;  %11568 = vmatpush3.bf16.msra.mxu1 %v12301_v51  ;;  %v3535_v21 = vmul.f32 %v12597_v14, %v15612_v40 }
 0xd68   :  { %11563 = vmatprep.mubr.msk.bf16.mxu1 %vm688_vm0, %v3543_v5  ;;  %v3544_v30 = vpack.c.bf16 %v3536_v12, %v3535_v21  ;;  %v19274_v21 = vld [vmem:[#allocation270_spill] sm:$0xff] }
 0xd6d   :  { %11564 = vmatmul.mubr.msk.bf16.gmra.mrb[100].mxu1 %vm688_vm0, %v3544_v30 }
 0xd8e   :  { %v11545_v25 = vpop.f32.mrb[80].mxu0 }
 0xd8f   :  { %v3603_v61 = vpop.f32.mrb[81].mxu0 }
 0xd90   :  { %v11546_v48 = vpop.f32.mrb[82].mxu0 }
 0xd91   :  { %v3724_v44 = vpack.c.bf16 %v11546_v48, %v11545_v25  ;;  %v3606_v4 = vpop.f32.mrb[83].mxu0 }
 0xd92   :  { %v3723_v29 = vpack.c.bf16 %v3606_v4, %v3603_v61  ;;  %v19275_v61 = vld [vmem:[#allocation271_spill] sm:$0xff] }
 0xd94   :  { %11569 = vmatprep.mubr.msk.bf16.mxu1 %vm1043_vm1, %v3723_v29 }
 0xd95   :  { %11570 = vmatmul.mubr.msk.bf16.vlgmr.msra.gmra.mrb[64].mxu1 %vm1043_vm1, %v3724_v44 }
 0xd96   :  { %v11549_v47 = vpop.f32.mrb[84].mxu0 }
 0xd97   :  { %v3619_v46 = vpop.f32.mrb[85].mxu0 }
 0xd98   :  { %v11550_v2 = vpop.f32.mrb[86].mxu0 }
 0xd99   :  { %v3726_v33 = vpack.c.bf16 %v11550_v2, %v11549_v47  ;;  %v3622_v3 = vpop.f32.mrb[87].mxu0 }
 0xd9a   :  { %v3725_v1 = vpack.c.bf16 %v3622_v3, %v3619_v46  ;;  %v19276_v46 = vld [vmem:[#allocation269_spill] sm:$0xff] }
 0xd9c   :  { %11573 = vmatprep.mubr.msk.bf16.mxu1 %vm1043_vm1, %v3725_v1 }
 0xd9d   :  { %11574 = vmatmul.mubr.msk.bf16.gmra.mrb[68].mxu1 %vm1043_vm1, %v3726_v33 }
 0xe38   :  { %v11561_v39 = vpop.f32.mrb[96].mxu1 }
 0xe39   :  { %v3692_v63 = vpop.f32.mrb[97].mxu1 }
 0xe3a   :  { %v11562_v11 = vpop.f32.mrb[98].mxu1 }
 0xe3b   :  { %v3728_v41 = vpack.c.bf16 %v11562_v11, %v11561_v39  ;;  %v3695_v60 = vpop.f32.mrb[99].mxu1 }
 0xe3c   :  { %v3727_v54 = vpack.c.bf16 %v3695_v60, %v3692_v63 }
 0xe3e   :  { %11577 = vmatprep.mubr.msk.bf16.mxu1 %vm1043_vm1, %v3727_v54 }
 0xe3f   :  { %11578 = vmatmul.mubr.msk.bf16.gmra.mrb[72].mxu1 %vm1043_vm1, %v3728_v41 }
 0xe40   :  { %v11565_v57 = vpop.f32.mrb[100].mxu1 }
 0xe41   :  { %v3708_v45 = vpop.f32.mrb[101].mxu1 }
 0xe42   :  { %v11566_v9 = vpop.f32.mrb[102].mxu1 }
 0xe43   :  { %v3730_v40 = vpack.c.bf16 %v11566_v9, %v11565_v57  ;;  %v3711_v8 = vpop.f32.mrb[103].mxu1  ;;  %v12302_v57 = vld [vmem:[%s18901_s5] sm:$0xff]   ;;  %v12304_v9 = vld [vmem:[%s18901_s5 + $0x10] sm:$0xff]  }
 0xe44   :  { %v3729_v22 = vpack.c.bf16 %v3711_v8, %v3708_v45  ;;  %11585 = vmatprep.subr.bf16.mxu0 %v12302_v57  ;;  %v12303_v45 = vld [vmem:[%s18901_s5 + $0x8] sm:$0xff]  }
 0xe45   :  { %11586 = vmatpush3.bf16.msra.mxu0 %v12302_v57 }
 0xe46   :  { %11581 = vmatprep.mubr.msk.bf16.mxu1 %vm1043_vm1, %v3729_v22  ;;  %11587 = vmatprep.subr.bf16.mxu0 %v12303_v45 }
 0xe47   :  { %11582 = vmatmul.mubr.msk.bf16.gmra.mrb[76].mxu1 %vm1043_vm1, %v3730_v40  ;;  %v12305_v40 = vld [vmem:[%s18901_s5 + $0x18] sm:$0xff]  }
 0xe48   :  { %4947 = vmatprep.mubr.bf16.mxu1 %v19268_v32 }
 0xe49   :  { %11588 = vmatpush3.bf16.msra.mxu0 %v12303_v45 }
 0xe4a   :  { %11589 = vmatprep.subr.bf16.mxu0 %v12304_v9 }
 0xe4d   :  { %11590 = vmatpush3.bf16.msra.mxu0 %v12304_v9  ;;  %v19278_v9 = vld [vmem:[#allocation273_spill] sm:$0xff] }
 0xe4e   :  { %11591 = vmatprep.subr.bf16.mxu0 %v12305_v40 }
 0xe51   :  { %11592 = vmatpush3.bf16.msra.mxu0 %v12305_v40 }
 0xe68   :  { %v11571_v37 = vpop.f32.mrb[64].mxu1 }
 0xe69   :  { %v3879_v24 = vadd.f32 %v11571_v37, %v15648_v10  ;;  %v3797_v52 = vpop.f32.mrb[65].mxu1 }
 0xe6a   :  { %v3877_v50 = vadd.f32 %v15648_v10, %v3797_v52  ;;  %v11572_v18 = vpop.f32.mrb[66].mxu1 }
 0xe6b   :  { %v15653_v56 = vadd.f32 %v3879_v24, %v19269_v53  ;;  %v3800_v23 = vpop.f32.mrb[67].mxu1  ;;  %v3880_v34 = vadd.f32 %v11572_v18, %v15648_v10 }
 0xe6c   :  { %v3878_v55 = vadd.f32 %v15648_v10, %v3800_v23  ;;  %v15658_v49 = vadd.f32 %v3877_v50, %v19270_v26 }
 0xe6d   :  { %v3917_v17 = vsel %vm688_vm0, %v15653_v56, 0.0  ;;  %v15666_v59 = vadd.f32 %v3880_v34, %v19272_v15  ;;  %v3961_v12 = vmul.f32 %v15653_v56, %v15653_v56 }
 0xe6e   :  { %v15663_v43 = vadd.f32 %v3878_v55, %v19271_v38  ;;  %3918 = vadd.xlane.f32.xlu1 %v3917_v17  ;;  %v3911_v42 = vsel %vm688_vm0, %v15658_v49, 0.0  ;;  %v3959_v7 = vmul.f32 %v15658_v49, %v15658_v49 }
 0xe6f   :  { %v3962_v27 = vmul.f32 %v15666_v59, %v15666_v59  ;;  %v3920_v58 = vsel %vm688_vm0, %v15666_v59, 0.0  ;;  %v3981_v4 = vsel %vm688_vm0, %v3961_v12, 0.0 }
 0xe70   :  { %v11575_v36 = vpop.f32.mrb[68].mxu1  ;;  %v3914_v6 = vsel %vm688_vm0, %v15663_v43, 0.0  ;;  %v3960_v28 = vmul.f32 %v15663_v43, %v15663_v43  ;;  %v3975_v5 = vsel %vm688_vm0, %v3959_v7, 0.0 }
 0xe71   :  { %3915 = vadd.xlane.f32.xlu0 %v3914_v6  ;;  %v3813_v19 = vpop.f32.mrb[69].mxu1  ;;  %v3984_v20 = vsel %vm688_vm0, %v3962_v27, 0.0  ;;  %v3883_v14 = vadd.f32 %v11575_v36, %v15648_v10 }
 0xe72   :  { %3912 = vadd.xlane.f32.xlu1 %v3911_v42  ;;  %v11576_v0 = vpop.f32.mrb[70].mxu1  ;;  %v3978_v51 = vsel %vm688_vm0, %v3960_v28, 0.0  ;;  %v3881_v44 = vadd.f32 %v15648_v10, %v3813_v19 }
 0xe73   :  { %v3816_v13 = vpop.f32.mrb[71].mxu1  ;;  %v3884_v16 = vadd.f32 %v11576_v0, %v15648_v10  ;;  %v15697_v48 = vadd.f32 %v3883_v14, %v19275_v61 }
 0xe74   :  { %v3882_v31 = vadd.f32 %v15648_v10, %v3816_v13  ;;  %v15706_v2 = vadd.f32 %v3881_v44, %v19276_v46 }
 0xe75   :  { %3979 = vadd.xlane.f32.xlu0 %v3978_v51  ;;  %v15683_v62 = vadd.f32 %v3884_v16, %v19273_v35  ;;  %v3929_v33 = vsel %vm688_vm0, %v15697_v48, 0.0  ;;  %v3965_v60 = vmul.f32 %v15697_v48, %v15697_v48 }
 0xe76   :  { %3921 = vadd.xlane.f32.xlu1 %v3920_v58  ;;  %v15692_v30 = vadd.f32 %v3882_v31, %v19274_v21  ;;  %v3923_v39 = vsel %vm688_vm0, %v15706_v2, 0.0  ;;  %v3963_v63 = vmul.f32 %v15706_v2, %v15706_v2 }
 0xe77   :  { %v3932_v25 = vsel %vm688_vm0, %v15683_v62, 0.0  ;;  %v3966_v1 = vmul.f32 %v15683_v62, %v15683_v62  ;;  %v3993_v54 = vsel %vm688_vm0, %v3965_v60, 0.0  ;;  %v19277_v60 = vld [vmem:[#allocation275_spill] sm:$0xff] }
 0xe78   :  { %v3926_v29 = vsel %vm688_vm0, %v15692_v30, 0.0  ;;  %v3964_v47 = vmul.f32 %v15692_v30, %v15692_v30  ;;  %v3987_v41 = vsel %vm688_vm0, %v3963_v63, 0.0 }
 0xe79   :  { %3985 = vadd.xlane.f32.xlu0 %v3984_v20  ;;  %v3996_v11 = vsel %vm688_vm0, %v3966_v1, 0.0 }
 0xe7a   :  { %3976 = vadd.xlane.f32.xlu1 %v3975_v5  ;;  %v3990_v3 = vsel %vm688_vm0, %v3964_v47, 0.0 }
 0xe7d   :  { %3933 = vadd.xlane.f32.xlu0 %v3932_v25 }
 0xe7e   :  { %3982 = vadd.xlane.f32.xlu1 %v3981_v4 }
 0xe81   :  { %3927 = vadd.xlane.f32.xlu0 %v3926_v29 }
 0xe82   :  { %3930 = vadd.xlane.f32.xlu1 %v3929_v33 }
 0xe85   :  { %3991 = vadd.xlane.f32.xlu0 %v3990_v3 }
 0xe86   :  { %3924 = vadd.xlane.f32.xlu1 %v3923_v39 }
 0xe89   :  { %3997 = vadd.xlane.f32.xlu0 %v3996_v11 }
 0xe8a   :  { %3988 = vadd.xlane.f32.xlu1 %v3987_v41 }
 0xe8e   :  { %3994 = vadd.xlane.f32.xlu1 %v3993_v54 }
 0xefb   :  { %v3919_v8 = vpop.xlane.xlu1 %3918 }
 0xefc   :  { %v15736_v6 = vmul.f32 0.015625, %v3919_v8 }
 0xefe   :  { %v3916_v22 = vpop.xlane.xlu0 %3915  ;;  %v4057_v27 = vmul.f32 %v15736_v6, %v15736_v6 }
 0xeff   :  { %v4024_v37 = vmul.f32 0.015625, %v3916_v22  ;;  %v3913_v24 = vpop.xlane.xlu1 %3912 }
 0xf00   :  { %v15734_v23 = vmul.f32 0.015625, %v3913_v24 }
 0xf01   :  { %v4056_v50 = vmul.f32 %v4024_v37, %v4024_v37  ;;  %v4088_v33 = vsub.f32 %v15663_v43, %v4024_v37 }
 0xf02   :  { %v3980_v52 = vpop.xlane.xlu0 %3979  ;;  %v4055_v28 = vmul.f32 %v15734_v23, %v15734_v23  ;;  %v4087_v3 = vsub.f32 %v15658_v49, %v15734_v23 }
 0xf03   :  { %v4040_v18 = vmul.f32 0.015625, %v3980_v52  ;;  %v3922_v53 = vpop.xlane.xlu1 %3921 }
 0xf04   :  { %v4026_v34 = vmul.f32 0.015625, %v3922_v53 }
 0xf05   :  { %v4072_v55 = vsub.f32 %v4040_v18, %v4056_v50 }
 0xf06   :  { %v4058_v26 = vmul.f32 %v4026_v34, %v4026_v34  ;;  %v3986_v17 = vpop.xlane.xlu0 %3985  ;;  %v4090_v11 = vsub.f32 %v15666_v59, %v4026_v34  ;;  %v19279_v59 = vld [vmem:[#allocation276_spill] sm:$0xff]  ;;  %v15774_v34 = vld [vmem:[%s18903_s7 + $0x2] ss:$0 sm:$0xff] }
 0xf07   :  { %v4104_v38 = vadd.f32 1e-05, %v4072_v55  ;;  %v4042_v15 = vmul.f32 0.015625, %v3986_v17  ;;  %v3977_v36 = vpop.xlane.xlu1 %3976 }
 0xf08   :  { %v4039_v19 = vmul.f32 0.015625, %v3977_v36 }
 0xf09   :  { %12598 = vrsqrt.f32 %v4104_v38  ;;  %v4074_v42 = vsub.f32 %v4042_v15, %v4058_v26  ;;  %v19280_v15 = vld [vmem:[#allocation274_spill] sm:$0xff] }
 0xf0a   :  { %v4071_v0 = vsub.f32 %v4039_v19, %v4055_v28  ;;  %v3934_v13 = vpop.xlane.xlu0 %3933 }
 0xf0b   :  { %v4106_v16 = vadd.f32 1e-05, %v4074_v42  ;;  %v3983_v51 = vpop.xlane.xlu1 %3982  ;;  %v15744_v12 = vmul.f32 0.015625, %v3934_v13  ;;  %v4089_v42 = vsub.f32 %v15653_v56, %v15736_v6 }
 0xf0c   :  { %v4103_v58 = vadd.f32 1e-05, %v4071_v0  ;;  %v4041_v7 = vmul.f32 0.015625, %v3983_v51 }
 0xf0d   :  { %12600 = vrsqrt.f32 %v4106_v16  ;;  %v4062_v43 = vmul.f32 %v15744_v12, %v15744_v12 }
 0xf0e   :  { %12602 = vrsqrt.f32 %v4103_v58  ;;  %v4073_v35 = vsub.f32 %v4041_v7, %v4057_v27  ;;  %v3928_v31 = vpop.xlane.xlu0 %3927 }
 0xf0f   :  { %v15742_v20 = vmul.f32 0.015625, %v3928_v31  ;;  %v3931_v14 = vpop.xlane.xlu1 %3930 }
 0xf10   :  { %v4105_v5 = vadd.f32 1e-05, %v4073_v35  ;;  %v15776_v26 = vmul.f32 0.015625, %v3931_v14 }
 0xf11   :  { %v4060_v44 = vmul.f32 %v15742_v20, %v15742_v20 }
 0xf12   :  { %12604 = vrsqrt.f32 %v4105_v5  ;;  %v3992_v21 = vpop.xlane.xlu0 %3991  ;;  %v11579_v25 = vpop.f32.mrb[72].mxu1  ;;  %v4061_v5 = vmul.f32 %v15776_v26, %v15776_v26 }
 0xf13   :  { %v12599_v61 = vpop.eup %12598  ;;  %v4044_v4 = vmul.f32 0.015625, %v3992_v21  ;;  %v3887_v29 = vadd.f32 %v11579_v25, %v15648_v10  ;;  %v3925_v47 = vpop.xlane.xlu1 %3924  ;;  %v15797_v25 = vld [vmem:[%s18903_s7 + $0x3] ss:$0 sm:$0xff] }
 0xf14   :  { %v3829_v46 = vpop.f32.mrb[73].mxu1  ;;  %v15752_v1 = vmul.f32 0.015625, %v3925_v47  ;;  %v4136_v22 = vmul.f32 %v12599_v61, %v4088_v33 }
 0xf15   :  { %v3885_v39 = vadd.f32 %v15648_v10, %v3829_v46  ;;  %v11580_v63 = vpop.f32.mrb[74].mxu1  ;;  %v4076_v41 = vsub.f32 %v4044_v4, %v4060_v44  ;;  %v15757_v54 = vadd.f32 %v3887_v29, %v19277_v60 }
 0xf16   :  { %v3888_v57 = vadd.f32 %v11580_v63, %v15648_v10  ;;  %v3832_v45 = vpop.f32.mrb[75].mxu1  ;;  %v3998_v8 = vpop.xlane.xlu0 %3997  ;;  %v4059_v17 = vmul.f32 %v15752_v1, %v15752_v1  ;;  %v4152_v31 = vmul.f32 %v4136_v22, %v15774_v34 }
 0xf17   :  { %v15763_v40 = vadd.f32 %v3885_v39, %v19278_v9  ;;  %v3886_v49 = vadd.f32 %v15648_v10, %v3832_v45  ;;  %v12601_v37 = vpop.eup %12600  ;;  %v4108_v24 = vadd.f32 1e-05, %v4076_v41  ;;  %v4046_v50 = vmul.f32 0.015625, %v3998_v8  ;;  %v3989_v18 = vpop.xlane.xlu1 %3988 }
 0xf18   :  { %v15767_v52 = vadd.f32 %v3888_v57, %v19279_v59  ;;  %v3941_v53 = vsel %vm688_vm0, %v15757_v54, 0.0  ;;  %v12603_v23 = vpop.eup %12602  ;;  %v4138_v55 = vmul.f32 %v12601_v37, %v4090_v11  ;;  %v4043_v38 = vmul.f32 0.015625, %v3989_v18  ;;  %v19281_v59 = vld [vmem:[#allocation279_spill] sm:$0xff] }
 0xf19   :  { %3942 = vadd.xlane.f32.xlu1 %v3941_v53  ;;  %12606 = vrsqrt.f32 %v4108_v24  ;;  %v15781_v36 = vadd.f32 %v3886_v49, %v19280_v15  ;;  %v4078_v28 = vsub.f32 %v4046_v50, %v4062_v43  ;;  %v4135_v16 = vmul.f32 %v12603_v23, %v4087_v3  ;;  %v19282_v23 = vld [vmem:[#allocation280_spill] sm:$0xff] }
 0xf1a   :  { %v3944_v19 = vsel %vm688_vm0, %v15767_v52, 0.0  ;;  %v4075_v0 = vsub.f32 %v4043_v38, %v4059_v17  ;;  %v11583_v13 = vpop.f32.mrb[76].mxu1  ;;  %v3935_v7 = vsel %vm688_vm0, %v15763_v40, 0.0  ;;  %v3967_v35 = vmul.f32 %v15763_v40, %v15763_v40 }
 0xf1b   :  { %3945 = vadd.xlane.f32.xlu0 %v3944_v19  ;;  %v4110_v51 = vadd.f32 1e-05, %v4078_v28  ;;  %v3995_v27 = vpop.xlane.xlu1 %3994  ;;  %v3845_v58 = vpop.f32.mrb[77].mxu1  ;;  %v4151_v61 = vmul.f32 %v4135_v16, %v15774_v34  ;;  %v4154_v44 = vmul.f32 %v4138_v55, %v15774_v34  ;;  %v3938_v47 = vsel %vm688_vm0, %v15781_v36, 0.0 }
 0xf1c   :  { %v12605_v14 = vpop.eup %12604  ;;  %v4107_v56 = vadd.f32 1e-05, %v4075_v0  ;;  %v4045_v6 = vmul.f32 0.015625, %v3995_v27  ;;  %v11584_v21 = vpop.f32.mrb[78].mxu1  ;;  %v3891_v46 = vadd.f32 %v11583_v13, %v15648_v10  ;;  %v3999_v39 = vsel %vm688_vm0, %v3967_v35, 0.0 }
 0xf1d   :  { %3936 = vadd.xlane.f32.xlu1 %v3935_v7  ;;  %v4137_v4 = vmul.f32 %v12605_v14, %v4089_v42  ;;  %12608 = vrsqrt.f32 %v4110_v51  ;;  %v3848_v29 = vpop.f32.mrb[79].mxu1  ;;  %v15807_v63 = vadd.f32 %v4151_v61, %v15797_v25  ;;  %v15810_v11 = vadd.f32 %v4152_v31, %v15797_v25  ;;  %v19283_v42 = vld [vmem:[#allocation277_spill] sm:$0xff] }
 0xf1e   :  { %12610 = vrsqrt.f32 %v4107_v56  ;;  %v4077_v33 = vsub.f32 %v4045_v6, %v4061_v5  ;;  %v3968_v60 = vmul.f32 %v15781_v36, %v15781_v36  ;;  %v3969_v57 = vmul.f32 %v15757_v54, %v15757_v54 }
 0xf1f   :  { %3939 = vadd.xlane.f32.xlu0 %v3938_v47  ;;  %v4153_v3 = vmul.f32 %v4137_v4, %v15774_v34  ;;  %v4092_v45 = vsub.f32 %v15692_v30, %v15742_v20  ;;  %v4183_v43 = vpack.c.bf16 %v15810_v11, %v15807_v63  ;;  %v15824_v49 = vadd.f32 %v4154_v44, %v15797_v25 }
 0xf20   :  { %v4109_v41 = vadd.f32 1e-05, %v4077_v33  ;;  %v3892_v8 = vadd.f32 %v11584_v21, %v15648_v10  ;;  %v4002_v22 = vsel %vm688_vm0, %v3968_v60, 0.0  ;;  %v3970_v37 = vmul.f32 %v15767_v52, %v15767_v52  ;;  %v12306_v60 = vld [vmem:[%s18902_s6] sm:$0xff]  }
 0xf21   :  { %4000 = vadd.xlane.f32.xlu1 %v3999_v39  ;;  %v15821_v9 = vadd.f32 %v4153_v3, %v15797_v25  ;;  %v15831_v30 = vadd.f32 %v3891_v46, %v19281_v59  ;;  %v3889_v20 = vadd.f32 %v15648_v10, %v3845_v58  ;;  %11593 = vmatprep.mubr.msk.bf16.mxu0 %vm688_vm0, %v4183_v43  ;;  %v4005_v50 = vsel %vm688_vm0, %v3969_v57, 0.0  ;;  %v19284_v58 = vld [vmem:[#allocation278_spill] sm:$0xff]  ;;  %v12309_v43 = vld [vmem:[%s18902_s6 + $0x18] sm:$0xff]  }
 0xf22   :  { %12612 = vrsqrt.f32 %v4109_v41  ;;  %v15840_v55 = vadd.f32 %v3892_v8, %v19282_v23  ;;  %v3890_v17 = vadd.f32 %v15648_v10, %v3848_v29  ;;  %v4008_v38 = vsel %vm688_vm0, %v3970_v37, 0.0  ;;  %v12307_v57 = vld [vmem:[%s18902_s6 + $0x8] sm:$0xff]   ;;  %11609 = vmatprep.subr.bf16.mxu0 %v12306_v60  ;;  %v12310_v8 = vld [vmem:[%s18902_s6 + $0x20] sm:$0xff]   ;;  %v12312_v37 = vld [vmem:[%s18902_s6 + $0x30] sm:$0xff]  }
 0xf23   :  { %v12607_v24 = vpop.eup %12606  ;;  %4003 = vadd.xlane.f32.xlu0 %v4002_v22  ;;  %v4184_v18 = vpack.c.bf16 %v15824_v49, %v15821_v9  ;;  %v4094_v28 = vsub.f32 %v15683_v62, %v15744_v12  ;;  %v4091_v19 = vsub.f32 %v15706_v2, %v15752_v1  ;;  %v15849_v0 = vadd.f32 %v3889_v20, %v19283_v42  ;;  %v12311_v22 = vld [vmem:[%s18902_s6 + $0x28] sm:$0xff]  }
 0xf24   :  { %v4140_v53 = vmul.f32 %v12607_v24, %v4092_v45  ;;  %v3953_v13 = vsel %vm688_vm0, %v15831_v30, 0.0  ;;  %v15855_v7 = vadd.f32 %v3890_v17, %v19284_v58  ;;  %v3956_v62 = vsel %vm688_vm0, %v15840_v55, 0.0  ;;  %v12308_v45 = vld [vmem:[%s18902_s6 + $0x10] sm:$0xff]   ;;  %v12313_v24 = vld [vmem:[%s18902_s6 + $0x38] sm:$0xff]  }
 0xf25   :  { %4006 = vadd.xlane.f32.xlu1 %v4005_v50  ;;  %11594 = vmatmul.mubr.msk.bf16.vlgmr.msra.gmra.mrb[88].mxu0 %vm688_vm0, %v4184_v18  ;;  %v4093_v2 = vsub.f32 %v15697_v48, %v15776_v26  ;;  %v3947_v12 = vsel %vm688_vm0, %v15849_v0, 0.0  ;;  %v3971_v1 = vmul.f32 %v15849_v0, %v15849_v0  ;;  %v3973_v44 = vmul.f32 %v15831_v30, %v15831_v30 }
 0xf26   :  { %v4156_v10 = vmul.f32 %v4140_v53, %v15774_v34  ;;  %v3950_v26 = vsel %vm688_vm0, %v15855_v7, 0.0  ;;  %v3972_v6 = vmul.f32 %v15855_v7, %v15855_v7  ;;  %v3974_v33 = vmul.f32 %v15840_v55, %v15840_v55  ;;  %11610 = vmatpush3.bf16.msra.mxu0 %v12306_v60 }
 0xf27   :  { %v12609_v15 = vpop.eup %12608  ;;  %4009 = vadd.xlane.f32.xlu0 %v4008_v38  ;;  %v4011_v21 = vsel %vm688_vm0, %v3971_v1, 0.0  ;;  %v4017_v3 = vsel %vm688_vm0, %v3973_v44, 0.0  ;;  %11611 = vmatprep.subr.bf16.mxu0 %v12307_v57 }
 0xf28   :  { %v12611_v16 = vpop.eup %12610  ;;  %v4142_v27 = vmul.f32 %v12609_v15, %v4094_v28  ;;  %v15870_v5 = vadd.f32 %v4156_v10, %v15797_v25  ;;  %v4014_v46 = vsel %vm688_vm0, %v3972_v6, 0.0  ;;  %v4020_v41 = vsel %vm688_vm0, %v3974_v33, 0.0 }
 0xf29   :  { %3954 = vadd.xlane.f32.xlu1 %v3953_v13  ;;  %v4139_v51 = vmul.f32 %v12611_v16, %v4091_v19 }
 0xf2a   :  { %v4158_v48 = vmul.f32 %v4142_v27, %v15774_v34  ;;  %11612 = vmatpush3.bf16.msra.mxu0 %v12307_v57 }
 0xf2b   :  { %3957 = vadd.xlane.f32.xlu0 %v3956_v62  ;;  %v4155_v35 = vmul.f32 %v4139_v51, %v15774_v34  ;;  %11613 = vmatprep.subr.bf16.mxu0 %v12308_v45 }
 0xf2c   :  { %v12613_v31 = vpop.eup %12612  ;;  %v15888_v47 = vadd.f32 %v4158_v48, %v15797_v25 }
 0xf2d   :  { %3948 = vadd.xlane.f32.xlu1 %v3947_v12  ;;  %v15867_v14 = vadd.f32 %v4155_v35, %v15797_v25  ;;  %v4141_v56 = vmul.f32 %v12613_v31, %v4093_v2 }
 0xf2e   :  { %11614 = vmatpush3.bf16.msra.mxu0 %v12308_v45 }
 0xf2f   :  { %3951 = vadd.xlane.f32.xlu0 %v3950_v26  ;;  %v4185_v61 = vpack.c.bf16 %v15870_v5, %v15867_v14  ;;  %v4157_v4 = vmul.f32 %v4141_v56, %v15774_v34  ;;  %11615 = vmatprep.subr.bf16.mxu0 %v12309_v43 }
 0xf31   :  { %4012 = vadd.xlane.f32.xlu1 %v4011_v21  ;;  %11597 = vmatprep.mubr.msk.bf16.mxu0 %vm688_vm0, %v4185_v61  ;;  %v15885_v29 = vadd.f32 %v4157_v4, %v15797_v25 }
 0xf32   :  { %11616 = vmatpush3.bf16.msra.mxu0 %v12309_v43 }
 0xf33   :  { %4015 = vadd.xlane.f32.xlu0 %v4014_v46  ;;  %v4186_v39 = vpack.c.bf16 %v15888_v47, %v15885_v29  ;;  %11617 = vmatprep.subr.bf16.mxu0 %v12310_v8 }
 0xf35   :  { %4018 = vadd.xlane.f32.xlu1 %v4017_v3  ;;  %11598 = vmatmul.mubr.msk.bf16.gmra.mrb[92].mxu0 %vm688_vm0, %v4186_v39 }
 0xf36   :  { %11618 = vmatpush3.bf16.msra.mxu0 %v12310_v8 }
 0xf37   :  { %4021 = vadd.xlane.f32.xlu0 %v4020_v41  ;;  %11619 = vmatprep.subr.bf16.mxu0 %v12311_v22 }
 0xf3a   :  { %11620 = vmatpush3.bf16.msra.mxu0 %v12311_v22 }
 0xf3b   :  { %11621 = vmatprep.subr.bf16.mxu0 %v12312_v37 }
 0xf3e   :  { %11622 = vmatpush3.bf16.msra.mxu0 %v12312_v37 }
 0xf3f   :  { %11623 = vmatprep.subr.bf16.mxu0 %v12313_v24 }
 0xf42   :  { %11624 = vmatpush3.bf16.msra.mxu0 %v12313_v24 }
 0xfa6   :  { %v3943_v59 = vpop.xlane.xlu1 %3942 }
 0xfa7   :  { %v4033_v38 = vmul.f32 0.015625, %v3943_v59 }
 0xfa8   :  { %v3946_v20 = vpop.xlane.xlu0 %3945 }
 0xfa9   :  { %v15922_v13 = vmul.f32 0.015625, %v3946_v20  ;;  %v4065_v27 = vmul.f32 %v4033_v38, %v4033_v38  ;;  %v4097_v8 = vsub.f32 %v15757_v54, %v4033_v38 }
 0xfaa   :  { %v3937_v50 = vpop.xlane.xlu1 %3936 }
 0xfab   :  { %v4031_v18 = vmul.f32 0.015625, %v3937_v50  ;;  %v4066_v35 = vmul.f32 %v15922_v13, %v15922_v13  ;;  %v4098_v54 = vsub.f32 %v15767_v52, %v15922_v13 }
 0xfac   :  { %v3940_v53 = vpop.xlane.xlu0 %3939 }
 0xfad   :  { %v4032_v23 = vmul.f32 0.015625, %v3940_v53  ;;  %v4063_v15 = vmul.f32 %v4031_v18, %v4031_v18  ;;  %v4095_v33 = vsub.f32 %v15763_v40, %v4031_v18 }
 0xfae   :  { %v4001_v17 = vpop.xlane.xlu1 %4000 }
 0xfaf   :  { %v4047_v28 = vmul.f32 0.015625, %v4001_v17  ;;  %v4064_v16 = vmul.f32 %v4032_v23, %v4032_v23  ;;  %v4096_v22 = vsub.f32 %v15781_v36, %v4032_v23 }
 0xfb0   :  { %v4004_v42 = vpop.xlane.xlu0 %4003 }
 0xfb1   :  { %v4079_v19 = vsub.f32 %v4047_v28, %v4063_v15  ;;  %v4048_v51 = vmul.f32 0.015625, %v4004_v42 }
 0xfb2   :  { %v4007_v10 = vpop.xlane.xlu1 %4006 }
 0xfb3   :  { %v4111_v58 = vadd.f32 1e-05, %v4079_v19  ;;  %v4049_v62 = vmul.f32 0.015625, %v4007_v10  ;;  %v4080_v2 = vsub.f32 %v4048_v51, %v4064_v16 }
 0xfb4   :  { %v4010_v1 = vpop.xlane.xlu0 %4009 }
 0xfb5   :  { %12614 = vrsqrt.f32 %v4111_v58  ;;  %v4081_v12 = vsub.f32 %v4049_v62, %v4065_v27  ;;  %v4112_v31 = vadd.f32 1e-05, %v4080_v2  ;;  %v4050_v56 = vmul.f32 0.015625, %v4010_v1 }
 0xfb6   :  { %v3955_v48 = vpop.xlane.xlu1 %3954 }
 0xfb7   :  { %v4113_v26 = vadd.f32 1e-05, %v4081_v12  ;;  %12616 = vrsqrt.f32 %v4112_v31  ;;  %v4082_v6 = vsub.f32 %v4050_v56, %v4066_v35  ;;  %v4037_v60 = vmul.f32 0.015625, %v3955_v48 }
 0xfb8   :  { %v3958_v21 = vpop.xlane.xlu0 %3957 }
 0xfb9   :  { %12618 = vrsqrt.f32 %v4113_v26  ;;  %v4114_v61 = vadd.f32 1e-05, %v4082_v6  ;;  %v4038_v20 = vmul.f32 0.015625, %v3958_v21  ;;  %v4069_v15 = vmul.f32 %v4037_v60, %v4037_v60 }
 0xfba   :  { %v3949_v44 = vpop.xlane.xlu1 %3948 }
 0xfbb   :  { %v4035_v4 = vmul.f32 0.015625, %v3949_v44  ;;  %12620 = vrsqrt.f32 %v4114_v61  ;;  %v4070_v27 = vmul.f32 %v4038_v20, %v4038_v20 }
 0xfbc   :  { %v3952_v46 = vpop.xlane.xlu0 %3951 }
 0xfbd   :  { %v4036_v3 = vmul.f32 0.015625, %v3952_v46  ;;  %v4067_v57 = vmul.f32 %v4035_v4, %v4035_v4  ;;  %v4099_v61 = vsub.f32 %v15849_v0, %v4035_v4 }
 0xfbe   :  { %v4013_v39 = vpop.xlane.xlu1 %4012 }
 0xfbf   :  { %v12615_v41 = vpop.eup %12614  ;;  %v4051_v45 = vmul.f32 0.015625, %v4013_v39  ;;  %v4068_v50 = vmul.f32 %v4036_v3, %v4036_v3 }
 0xfc0   :  { %v4143_v43 = vmul.f32 %v12615_v41, %v4095_v33  ;;  %v4016_v24 = vpop.xlane.xlu0 %4015  ;;  %v4100_v33 = vsub.f32 %v15855_v7, %v4036_v3  ;;  %v4101_v41 = vsub.f32 %v15831_v30, %v4037_v60 }
 0xfc1   :  { %v4083_v37 = vsub.f32 %v4051_v45, %v4067_v57  ;;  %v12617_v59 = vpop.eup %12616  ;;  %v4052_v53 = vmul.f32 0.015625, %v4016_v24 }
 0xfc2   :  { %v4019_v17 = vpop.xlane.xlu1 %4018  ;;  %v4159_v40 = vmul.f32 %v4143_v43, %v15774_v34  ;;  %v4144_v42 = vmul.f32 %v12617_v59, %v4096_v22  ;;  %v4102_v22 = vsub.f32 %v15840_v55, %v4038_v20 }
 0xfc3   :  { %v12619_v18 = vpop.eup %12618  ;;  %v4115_v28 = vadd.f32 1e-05, %v4083_v37  ;;  %v4053_v19 = vmul.f32 0.015625, %v4019_v17  ;;  %v4084_v16 = vsub.f32 %v4052_v53, %v4068_v50  ;;  %v4199_v50 = vld [vmem:[%s18903_s7 + $0x4] ss:$0 sm:$0xff] }
 0xfc4   :  { %v4145_v51 = vmul.f32 %v12619_v18, %v4097_v8  ;;  %v4022_v23 = vpop.xlane.xlu0 %4021  ;;  %v4160_v38 = vmul.f32 %v4144_v42, %v15774_v34  ;;  %v15934_v2 = vadd.f32 %v4159_v40, %v15797_v25 }
 0xfc5   :  { %12622 = vrsqrt.f32 %v4115_v28  ;;  %v4085_v36 = vsub.f32 %v4053_v19, %v4069_v15  ;;  %v12621_v10 = vpop.eup %12620  ;;  %v4116_v58 = vadd.f32 1e-05, %v4084_v16  ;;  %v4054_v62 = vmul.f32 0.015625, %v4022_v23 }
 0xfc6   :  { %v15937_v1 = vadd.f32 %v4160_v38, %v15797_v25  ;;  %v4146_v35 = vmul.f32 %v12621_v10, %v4098_v54  ;;  %v4161_v31 = vmul.f32 %v4145_v51, %v15774_v34 }
 0xfc7   :  { %v4117_v12 = vadd.f32 1e-05, %v4085_v36  ;;  %12624 = vrsqrt.f32 %v4116_v58  ;;  %v4086_v52 = vsub.f32 %v4054_v62, %v4070_v27 }
 0xfc8   :  { %v4187_v13 = vpack.c.bf16 %v15937_v1, %v15934_v2  ;;  %v4162_v56 = vmul.f32 %v4146_v35, %v15774_v34  ;;  %v15945_v26 = vadd.f32 %v4161_v31, %v15797_v25 }
 0xfc9   :  { %12626 = vrsqrt.f32 %v4117_v12  ;;  %v4118_v48 = vadd.f32 1e-05, %v4086_v52 }
 0xfca   :  { %11601 = vmatprep.mubr.msk.bf16.mxu0 %vm688_vm0, %v4187_v13  ;;  %v15948_v6 = vadd.f32 %v4162_v56, %v15797_v25 }
 0xfcb   :  { %12628 = vrsqrt.f32 %v4118_v48 }
 0xfcc   :  { %v4188_v21 = vpack.c.bf16 %v15948_v6, %v15945_v26 }
 0xfce   :  { %11602 = vmatmul.mubr.msk.bf16.gmra.mrb[96].mxu0 %vm688_vm0, %v4188_v21 }
 0xfcf   :  { %v12623_v44 = vpop.eup %12622 }
 0xfd0   :  { %v4147_v46 = vmul.f32 %v12623_v44, %v4099_v61 }
 0xfd1   :  { %v12625_v39 = vpop.eup %12624 }
 0xfd2   :  { %v4148_v45 = vmul.f32 %v12625_v39, %v4100_v33  ;;  %v4163_v43 = vmul.f32 %v4147_v46, %v15774_v34 }
 0xfd3   :  { %v12627_v57 = vpop.eup %12626 }
 0xfd4   :  { %v4149_v8 = vmul.f32 %v12627_v57, %v4101_v41  ;;  %v4164_v37 = vmul.f32 %v4148_v45, %v15774_v34  ;;  %v15960_v0 = vadd.f32 %v4163_v43, %v15797_v25 }
 0xfd5   :  { %v12629_v24 = vpop.eup %12628 }
 0xfd6   :  { %v15963_v4 = vadd.f32 %v4164_v37, %v15797_v25  ;;  %v4150_v7 = vmul.f32 %v12629_v24, %v4102_v22  ;;  %v4165_v3 = vmul.f32 %v4149_v8, %v15774_v34 }
 0xfd8   :  { %v4189_v30 = vpack.c.bf16 %v15963_v4, %v15960_v0  ;;  %v4166_v60 = vmul.f32 %v4150_v7, %v15774_v34  ;;  %v15971_v55 = vadd.f32 %v4165_v3, %v15797_v25 }
 0xfda   :  { %11605 = vmatprep.mubr.msk.bf16.mxu0 %vm688_vm0, %v4189_v30  ;;  %v15974_v59 = vadd.f32 %v4166_v60, %v15797_v25 }
 0xfdc   :  { %v4190_v20 = vpack.c.bf16 %v15974_v59, %v15971_v55 }
 0xfde   :  { %11606 = vmatmul.mubr.msk.bf16.gmra.mrb[100].mxu0 %vm688_vm0, %v4190_v20 }
 0xff8   :  { %v11595_v53 = vpop.f32.mrb[88].mxu0 }
 0xff9   :  { %v4291_v17 = vadd.f32 %v11595_v53, %v4199_v50  ;;  %v4282_v34 = vpop.f32.mrb[89].mxu0 }
 0xffa   :  { %v4283_v40 = vadd.f32 %v4282_v34, %v4199_v50  ;;  %v11596_v18 = vpop.f32.mrb[90].mxu0 }
 0xffb   :  { %v4294_v15 = vadd.f32 %v11596_v18, %v4199_v50  ;;  %v4285_v28 = vpop.f32.mrb[91].mxu0  ;;  %v4347_v42 = vmax.f32 %v4291_v17, 0.0 }
 0xffc   :  { %v4286_v19 = vadd.f32 %v4285_v28, %v4199_v50  ;;  %v4345_v16 = vmax.f32 %v4283_v40, 0.0 }
 0xffd   :  { %v4348_v25 = vmax.f32 %v4294_v15, 0.0 }
 0xffe   :  { %v4346_v51 = vmax.f32 %v4286_v19, 0.0 }
 0xfff   :  { %v4362_v54 = vpack.c.bf16 %v4348_v25, %v4347_v42 }
0x1000   :  { %v4361_v36 = vpack.c.bf16 %v4346_v51, %v4345_v16  ;;  %v15985_v16 = vld [vmem:[%s18903_s7 + $0x5] ss:$0 sm:$0xff] }
0x1002   :  { %11625 = vmatprep.mubr.bf16.mxu0 %v4361_v36 }
0x1003   :  { %11626 = vmatmul.mubr.bf16.vlgmr.msra.gmra.mrb[104].mxu0 %v4362_v54 }
0x1008   :  { %v11599_v23 = vpop.f32.mrb[92].mxu0 }
0x1009   :  { %v4307_v38 = vadd.f32 %v11599_v23, %v4199_v50  ;;  %v4298_v10 = vpop.f32.mrb[93].mxu0 }
0x100a   :  { %v4299_v27 = vadd.f32 %v4298_v10, %v4199_v50  ;;  %v11600_v58 = vpop.f32.mrb[94].mxu0 }
0x100b   :  { %v4310_v62 = vadd.f32 %v11600_v58, %v4199_v50  ;;  %v4301_v12 = vpop.f32.mrb[95].mxu0  ;;  %v4351_v31 = vmax.f32 %v4307_v38, 0.0 }
0x100c   :  { %v4302_v35 = vadd.f32 %v4301_v12, %v4199_v50  ;;  %v4349_v13 = vmax.f32 %v4299_v27, 0.0 }
0x100d   :  { %v4352_v52 = vmax.f32 %v4310_v62, 0.0 }
0x100e   :  { %v4350_v56 = vmax.f32 %v4302_v35, 0.0 }
0x100f   :  { %v4364_v48 = vpack.c.bf16 %v4352_v52, %v4351_v31 }
0x1010   :  { %v4363_v21 = vpack.c.bf16 %v4350_v56, %v4349_v13 }
0x1012   :  { %11629 = vmatprep.mubr.bf16.mxu0 %v4363_v21 }
0x1013   :  { %11630 = vmatmul.mubr.bf16.gmra.mrb[108].mxu0 %v4364_v48 }
0x10a1   :  { %v11603_v61 = vpop.f32.mrb[96].mxu0 }
0x10a2   :  { %v4323_v44 = vadd.f32 %v11603_v61, %v4199_v50  ;;  %v4314_v46 = vpop.f32.mrb[97].mxu0 }
0x10a3   :  { %v4315_v33 = vadd.f32 %v4314_v46, %v4199_v50  ;;  %v11604_v39 = vpop.f32.mrb[98].mxu0 }
0x10a4   :  { %v4326_v41 = vadd.f32 %v11604_v39, %v4199_v50  ;;  %v4317_v57 = vpop.f32.mrb[99].mxu0  ;;  %v4355_v43 = vmax.f32 %v4323_v44, 0.0 }
0x10a5   :  { %v4318_v45 = vadd.f32 %v4317_v57, %v4199_v50  ;;  %v4353_v22 = vmax.f32 %v4315_v33, 0.0 }
0x10a6   :  { %v4356_v8 = vmax.f32 %v4326_v41, 0.0 }
0x10a7   :  { %v4354_v37 = vmax.f32 %v4318_v45, 0.0 }
0x10a8   :  { %v4366_v24 = vpack.c.bf16 %v4356_v8, %v4355_v43 }
0x10a9   :  { %v4365_v7 = vpack.c.bf16 %v4354_v37, %v4353_v22 }
0x10ab   :  { %11633 = vmatprep.mubr.bf16.mxu0 %v4365_v7 }
0x10ac   :  { %11634 = vmatmul.mubr.bf16.gmra.mrb[112].mxu0 %v4366_v24 }
0x10b1   :  { %v11607_v3 = vpop.f32.mrb[100].mxu0 }
0x10b2   :  { %v4339_v30 = vadd.f32 %v11607_v3, %v4199_v50  ;;  %v4330_v60 = vpop.f32.mrb[101].mxu0 }
0x10b3   :  { %v4331_v20 = vadd.f32 %v4330_v60, %v4199_v50  ;;  %v11608_v53 = vpop.f32.mrb[102].mxu0 }
0x10b4   :  { %v4342_v17 = vadd.f32 %v11608_v53, %v4199_v50  ;;  %v4333_v34 = vpop.f32.mrb[103].mxu0  ;;  %v4359_v18 = vmax.f32 %v4339_v30, 0.0 }
0x10b5   :  { %v4334_v40 = vadd.f32 %v4333_v34, %v4199_v50  ;;  %v4357_v28 = vmax.f32 %v4331_v20, 0.0 }
0x10b6   :  { %v4360_v15 = vmax.f32 %v4342_v17, 0.0 }
0x10b7   :  { %v4358_v19 = vmax.f32 %v4334_v40, 0.0 }
0x10b8   :  { %v4368_v42 = vpack.c.bf16 %v4360_v15, %v4359_v18  ;;  %v12316_v18 = vld [vmem:[%s18899_s3 + $0x44] ss:$8 sps:$4 sm:$0xff]   ;;  %v12314_v15 = vld [vmem:[%s18899_s3 + $0x40] ss:$8 sps:$4 sm:$0xff]  }
0x10b9   :  { %v4367_v25 = vpack.c.bf16 %v4358_v19, %v4357_v28  ;;  %4915 = vmatprep.subr.bf16.mxu1 %v12316_v18  ;;  %v12317_v28 = vld [vmem:[%s18899_s3 + $0x50] ss:$8 sps:$4 sm:$0xff]   ;;  %v12319_v19 = vld [vmem:[%s18899_s3 + $0x54] ss:$8 sps:$4 sm:$0xff]  }
0x10ba   :  { %4916 = vmatpush1.bf16.msra.mxu1 %v12314_v15 }
0x10bb   :  { %11637 = vmatprep.mubr.bf16.mxu0 %v4367_v25  ;;  %4917 = vmatprep.subr.bf16.mxu1 %v12319_v19  ;;  %v12320_v25 = vld [vmem:[%s18899_s3 + $0x60] ss:$8 sps:$4 sm:$0xff]  }
0x10bc   :  { %11638 = vmatmul.mubr.bf16.gmra.mrb[116].mxu0 %v4368_v42  ;;  %v12322_v42 = vld [vmem:[%s18899_s3 + $0x64] ss:$8 sps:$4 sm:$0xff]  }
0x10be   :  { %4918 = vmatpush1.bf16.msra.mxu1 %v12317_v28 }
0x10bf   :  { %4919 = vmatprep.subr.bf16.mxu1 %v12322_v42 }
0x10c2   :  { %4920 = vmatpush1.bf16.msra.mxu1 %v12320_v25 }
0x10d6   :  { %v11627_v51 = vpop.f32.mrb[104].mxu0 }
0x10d7   :  { %v4468_v54 = vpop.f32.mrb[105].mxu0  ;;  %v4477_v27 = vadd.f32 %v11627_v51, %v15985_v16  ;;  %v12325_v51 = vld [vmem:[%s18899_s3 + $0x74] ss:$8 sps:$4 sm:$0xff]  }
0x10d8   :  { %v4469_v36 = vadd.f32 %v4468_v54, %v15985_v16  ;;  %v11628_v23 = vpop.f32.mrb[106].mxu0  ;;  %v12323_v54 = vld [vmem:[%s18899_s3 + $0x70] ss:$8 sps:$4 sm:$0xff]   ;;  %4921 = vmatprep.subr.bf16.mxu1 %v12325_v51 }
0x10d9   :  { %v4471_v38 = vpop.f32.mrb[107].mxu0  ;;  %v4480_v35 = vadd.f32 %v11628_v23, %v15985_v16  ;;  %v16006_v52 = vadd.f32 %v4477_v27, %v15821_v9  ;;  %4922 = vmatpush1.bf16.msra.mxu1 %v12323_v54 }
0x10da   :  { %v15989_v50 = vadd.f32 %v4469_v36, %v15807_v63  ;;  %v4472_v10 = vadd.f32 %v4471_v38, %v15985_v16 }
0x10db   :  { %v16010_v13 = vadd.f32 %v4480_v35, %v15824_v49  ;;  %v4555_v48 = vsel %vm688_vm0, %v16006_v52, 0.0  ;;  %v4599_v21 = vmul.f32 %v16006_v52, %v16006_v52 }
0x10dc   :  { %v15994_v58 = vadd.f32 %v4472_v10, %v15810_v11  ;;  %v4549_v62 = vsel %vm688_vm0, %v15989_v50, 0.0  ;;  %v4597_v12 = vmul.f32 %v15989_v50, %v15989_v50 }
0x10dd   :  { %4550 = vadd.xlane.f32.xlu1 %v4549_v62  ;;  %v4558_v9 = vsel %vm688_vm0, %v16010_v13, 0.0  ;;  %v4600_v44 = vmul.f32 %v16010_v13, %v16010_v13  ;;  %v4619_v39 = vsel %vm688_vm0, %v4599_v21, 0.0 }
0x10de   :  { %v4552_v63 = vsel %vm688_vm0, %v15994_v58, 0.0  ;;  %v4598_v31 = vmul.f32 %v15994_v58, %v15994_v58  ;;  %v4613_v11 = vsel %vm688_vm0, %v4597_v12, 0.0 }
0x10df   :  { %4553 = vadd.xlane.f32.xlu0 %v4552_v63  ;;  %v4622_v43 = vsel %vm688_vm0, %v4600_v44, 0.0 }
0x10e0   :  { %v4616_v56 = vsel %vm688_vm0, %v4598_v31, 0.0 }
0x10e1   :  { %4614 = vadd.xlane.f32.xlu1 %v4613_v11 }
0x10e3   :  { %4617 = vadd.xlane.f32.xlu0 %v4616_v56 }
0x10e5   :  { %4556 = vadd.xlane.f32.xlu1 %v4555_v48 }
0x10e6   :  { %v11631_v61 = vpop.f32.mrb[108].mxu0 }
0x10e7   :  { %v4484_v46 = vpop.f32.mrb[109].mxu0  ;;  %4559 = vadd.xlane.f32.xlu0 %v4558_v9  ;;  %v4493_v8 = vadd.f32 %v11631_v61, %v15985_v16 }
0x10e8   :  { %v4485_v49 = vadd.f32 %v4484_v46, %v15985_v16  ;;  %v11632_v33 = vpop.f32.mrb[110].mxu0 }
0x10e9   :  { %v4487_v41 = vpop.f32.mrb[111].mxu0  ;;  %4620 = vadd.xlane.f32.xlu1 %v4619_v39  ;;  %v16042_v30 = vadd.f32 %v4493_v8, %v15885_v29 }
0x10ea   :  { %v16024_v57 = vadd.f32 %v4485_v49, %v15867_v14  ;;  %v4488_v45 = vadd.f32 %v4487_v41, %v15985_v16  ;;  %v4496_v14 = vadd.f32 %v11632_v33, %v15985_v16 }
0x10eb   :  { %4623 = vadd.xlane.f32.xlu0 %v4622_v43  ;;  %v4567_v53 = vsel %vm688_vm0, %v16042_v30, 0.0  ;;  %v4603_v17 = vmul.f32 %v16042_v30, %v16042_v30 }
0x10ec   :  { %v16030_v22 = vadd.f32 %v4488_v45, %v15870_v5  ;;  %v4561_v37 = vsel %vm688_vm0, %v16024_v57, 0.0  ;;  %v4601_v24 = vmul.f32 %v16024_v57, %v16024_v57  ;;  %v16046_v60 = vadd.f32 %v4496_v14, %v15888_v47 }
0x10ed   :  { %4562 = vadd.xlane.f32.xlu1 %v4561_v37  ;;  %v4631_v47 = vsel %vm688_vm0, %v4603_v17, 0.0 }
0x10ee   :  { %v4564_v7 = vsel %vm688_vm0, %v16030_v22, 0.0  ;;  %v4602_v3 = vmul.f32 %v16030_v22, %v16030_v22  ;;  %v4625_v5 = vsel %vm688_vm0, %v4601_v24, 0.0  ;;  %v4570_v29 = vsel %vm688_vm0, %v16046_v60, 0.0 }
0x10ef   :  { %4565 = vadd.xlane.f32.xlu0 %v4564_v7  ;;  %v4604_v34 = vmul.f32 %v16046_v60, %v16046_v60 }
0x10f0   :  { %v4628_v20 = vsel %vm688_vm0, %v4602_v3, 0.0 }
0x10f1   :  { %4626 = vadd.xlane.f32.xlu1 %v4625_v5  ;;  %v4634_v40 = vsel %vm688_vm0, %v4604_v34, 0.0 }
0x10f3   :  { %4629 = vadd.xlane.f32.xlu0 %v4628_v20 }
0x10f5   :  { %4568 = vadd.xlane.f32.xlu1 %v4567_v53 }
0x10f7   :  { %4571 = vadd.xlane.f32.xlu0 %v4570_v29 }
0x10f9   :  { %4632 = vadd.xlane.f32.xlu1 %v4631_v47 }
0x10fb   :  { %4635 = vadd.xlane.f32.xlu0 %v4634_v40 }
0x116a   :  { %v4551_v36 = vpop.xlane.xlu1 %4550 }
0x116b   :  { %v4661_v23 = vmul.f32 0.015625, %v4551_v36 }
0x116c   :  { %v4554_v38 = vpop.xlane.xlu0 %4553 }
0x116d   :  { %v4662_v10 = vmul.f32 0.015625, %v4554_v38  ;;  %v4693_v62 = vmul.f32 %v4661_v23, %v4661_v23  ;;  %v4725_v20 = vsub.f32 %v15989_v50, %v4661_v23  ;;  %v16102_v50 = vld [vmem:[%s18903_s7 + $0x6] ss:$0 sm:$0xff] }
0x116e   :  { %v4615_v27 = vpop.xlane.xlu1 %4614 }
0x116f   :  { %v4677_v12 = vmul.f32 0.015625, %v4615_v27  ;;  %v4694_v63 = vmul.f32 %v4662_v10, %v4662_v10  ;;  %v4726_v18 = vsub.f32 %v15994_v58, %v4662_v10 }
0x1170   :  { %v4618_v35 = vpop.xlane.xlu0 %4617 }
0x1171   :  { %v4709_v31 = vsub.f32 %v4677_v12, %v4693_v62  ;;  %v4678_v11 = vmul.f32 0.015625, %v4618_v35 }
0x1172   :  { %v4557_v56 = vpop.xlane.xlu1 %4556 }
0x1173   :  { %v4741_v48 = vadd.f32 1e-05, %v4709_v31  ;;  %v4710_v21 = vsub.f32 %v4678_v11, %v4694_v63  ;;  %v16083_v61 = vmul.f32 0.015625, %v4557_v56 }
0x1174   :  { %v4560_v9 = vpop.xlane.xlu0 %4559 }
0x1175   :  { %12630 = vrsqrt.f32 %v4741_v48  ;;  %v4742_v44 = vadd.f32 1e-05, %v4710_v21  ;;  %v16085_v46 = vmul.f32 0.015625, %v4560_v9  ;;  %v4695_v33 = vmul.f32 %v16083_v61, %v16083_v61 }
0x1176   :  { %v4621_v49 = vpop.xlane.xlu1 %4620 }
0x1177   :  { %12632 = vrsqrt.f32 %v4742_v44  ;;  %v4679_v39 = vmul.f32 0.015625, %v4621_v49  ;;  %v4696_v45 = vmul.f32 %v16085_v46, %v16085_v46  ;;  %v4727_v44 = vsub.f32 %v16006_v52, %v16083_v61 }
0x1178   :  { %v4624_v41 = vpop.xlane.xlu0 %4623 }
0x1179   :  { %v4711_v43 = vsub.f32 %v4679_v39, %v4695_v33  ;;  %v4680_v8 = vmul.f32 0.015625, %v4624_v41 }
0x117a   :  { %v4563_v37 = vpop.xlane.xlu1 %4562 }
0x117b   :  { %v4743_v24 = vadd.f32 1e-05, %v4711_v43  ;;  %v4712_v14 = vsub.f32 %v4680_v8, %v4696_v45  ;;  %v16091_v7 = vmul.f32 0.015625, %v4563_v37 }
0x117c   :  { %v4566_v3 = vpop.xlane.xlu0 %4565 }
0x117d   :  { %12634 = vrsqrt.f32 %v4743_v24  ;;  %v4744_v5 = vadd.f32 1e-05, %v4712_v14  ;;  %v16094_v53 = vmul.f32 0.015625, %v4566_v3  ;;  %v4697_v34 = vmul.f32 %v16091_v7, %v16091_v7 }
0x117e   :  { %v4627_v17 = vpop.xlane.xlu1 %4626 }
0x117f   :  { %v12631_v29 = vpop.eup %12630  ;;  %12636 = vrsqrt.f32 %v4744_v5  ;;  %v11635_v47 = vpop.f32.mrb[112].mxu0  ;;  %v4681_v40 = vmul.f32 0.015625, %v4627_v17  ;;  %v4698_v25 = vmul.f32 %v16094_v53, %v16094_v53  ;;  %v4728_v5 = vsub.f32 %v16010_v13, %v16085_v46 }
0x1180   :  { %v4773_v15 = vmul.f32 %v12631_v29, %v4725_v20  ;;  %v4500_v28 = vpop.f32.mrb[113].mxu0  ;;  %v4630_v19 = vpop.xlane.xlu0 %4629  ;;  %v4509_v49 = vadd.f32 %v11635_v47, %v15985_v16 }
0x1181   :  { %v12633_v42 = vpop.eup %12632  ;;  %v4713_v51 = vsub.f32 %v4681_v40, %v4697_v34  ;;  %v4501_v54 = vadd.f32 %v4500_v28, %v15985_v16  ;;  %v11636_v36 = vpop.f32.mrb[114].mxu0  ;;  %v4682_v23 = vmul.f32 0.015625, %v4630_v19 }
0x1182   :  { %v4774_v38 = vmul.f32 %v12633_v42, %v4726_v18  ;;  %v4503_v27 = vpop.f32.mrb[115].mxu0  ;;  %v4569_v58 = vpop.xlane.xlu1 %4568  ;;  %v4789_v63 = vmul.f32 %v4773_v15, %v16102_v50  ;;  %v4512_v45 = vadd.f32 %v11636_v36, %v15985_v16  ;;  %v16150_v34 = vadd.f32 %v4509_v49, %v15945_v26 }
0x1183   :  { %v4745_v10 = vadd.f32 1e-05, %v4713_v51  ;;  %v16108_v62 = vadd.f32 %v4501_v54, %v15934_v2  ;;  %v4714_v12 = vsub.f32 %v4682_v23, %v4698_v25  ;;  %v4504_v35 = vadd.f32 %v4503_v27, %v15985_v16  ;;  %v16123_v2 = vld [vmem:[%s18903_s7 + $0x7] ss:$0 sm:$0xff] }
0x1184   :  { %v4790_v31 = vmul.f32 %v4774_v38, %v16102_v50  ;;  %v16113_v11 = vmul.f32 0.015625, %v4569_v58  ;;  %v4572_v56 = vpop.xlane.xlu0 %4571  ;;  %v16138_v37 = vadd.f32 %v4789_v63, %v16123_v2  ;;  %v16156_v13 = vadd.f32 %v4512_v45, %v15948_v6 }
0x1185   :  { %12638 = vrsqrt.f32 %v4745_v10  ;;  %v4746_v48 = vadd.f32 1e-05, %v4714_v12  ;;  %v16116_v21 = vadd.f32 %v4504_v35, %v15937_v1  ;;  %v16118_v9 = vmul.f32 0.015625, %v4572_v56 }
0x1186   :  { %v4573_v33 = vsel %vm688_vm0, %v16108_v62, 0.0  ;;  %v4633_v39 = vpop.xlane.xlu1 %4632  ;;  %v4605_v1 = vmul.f32 %v16108_v62, %v16108_v62  ;;  %v4699_v43 = vmul.f32 %v16113_v11, %v16113_v11  ;;  %19285 = vst [vmem:[#allocation285_spill] sm:$0xff] %v16138_v37  ;;  %v16141_v24 = vadd.f32 %v4790_v31, %v16123_v2 }
0x1187   :  { %v12635_v41 = vpop.eup %12634  ;;  %12640 = vrsqrt.f32 %v4746_v48  ;;  %4574 = vadd.xlane.f32.xlu1 %v4573_v33  ;;  %v4683_v8 = vmul.f32 0.015625, %v4633_v39  ;;  %v4576_v52 = vsel %vm688_vm0, %v16116_v21, 0.0  ;;  %v4606_v14 = vmul.f32 %v16116_v21, %v16116_v21 }
0x1188   :  { %v4636_v61 = vpop.xlane.xlu0 %4635  ;;  %19286 = vst [vmem:[#allocation282_spill] sm:$0xff] %v16141_v24  ;;  %v4700_v20 = vmul.f32 %v16118_v9, %v16118_v9  ;;  %4577 = vadd.xlane.f32.xlu0 %v4576_v52  ;;  %v4637_v47 = vsel %vm688_vm0, %v4605_v1, 0.0  ;;  %v4821_v40 = vpack.c.bf16 %v16141_v24, %v16138_v37  ;;  %v4775_v18 = vmul.f32 %v12635_v41, %v4727_v44 }
0x1189   :  { %v12637_v3 = vpop.eup %12636  ;;  %v4715_v17 = vsub.f32 %v4683_v8, %v4699_v43  ;;  %v4684_v29 = vmul.f32 0.015625, %v4636_v61  ;;  %v4640_v46 = vsel %vm688_vm0, %v4606_v14, 0.0  ;;  %v4729_v51 = vsub.f32 %v16024_v57, %v16091_v7 }
0x118a   :  { %v4776_v19 = vmul.f32 %v12637_v3, %v4728_v5  ;;  %10324 = vmatmul.mubr.msk.bf16.vlgmr.msra.gmra.mrb[104].mxu1 %vm688_vm0, %v4821_v40  ;;  %v4791_v26 = vmul.f32 %v4775_v18, %v16102_v50  ;;  %v4579_v6 = vsel %vm688_vm0, %v16150_v34, 0.0  ;;  %v4607_v54 = vmul.f32 %v16150_v34, %v16150_v34 }
0x118b   :  { %v4747_v15 = vadd.f32 1e-05, %v4715_v17  ;;  %v4716_v28 = vsub.f32 %v4684_v29, %v4700_v20  ;;  %4638 = vadd.xlane.f32.xlu1 %v4637_v47  ;;  %4957 = vmatprep.mubr.bf16.mxu1 %v19268_v32  ;;  %v4730_v58 = vsub.f32 %v16030_v22, %v16094_v53  ;;  %v4582_v57 = vsel %vm688_vm0, %v16156_v13, 0.0 }
0x118c   :  { %4641 = vadd.xlane.f32.xlu0 %v4640_v46  ;;  %v4792_v25 = vmul.f32 %v4776_v19, %v16102_v50  ;;  %v16170_v38 = vadd.f32 %v4791_v26, %v16123_v2  ;;  %v4608_v10 = vmul.f32 %v16156_v13, %v16156_v13  ;;  %v4643_v48 = vsel %vm688_vm0, %v4607_v54, 0.0 }
0x118d   :  { %12642 = vrsqrt.f32 %v4747_v15  ;;  %v4748_v42 = vadd.f32 1e-05, %v4716_v28  ;;  %v4731_v41 = vsub.f32 %v16042_v30, %v16113_v11 }
0x118e   :  { %19287 = vst [vmem:[#allocation289_spill] sm:$0xff] %v16170_v38  ;;  %v16173_v27 = vadd.f32 %v4792_v25, %v16123_v2  ;;  %v4646_v39 = vsel %vm688_vm0, %v4608_v10, 0.0 }
0x118f   :  { %v12639_v36 = vpop.eup %12638  ;;  %12644 = vrsqrt.f32 %v4748_v42  ;;  %4580 = vadd.xlane.f32.xlu1 %v4579_v6  ;;  %v11639_v23 = vpop.f32.mrb[116].mxu0 }
0x1190   :  { %19288 = vst [vmem:[#allocation287_spill] sm:$0xff] %v16173_v27  ;;  %v4516_v7 = vpop.f32.mrb[117].mxu0  ;;  %v4777_v12 = vmul.f32 %v12639_v36, %v4729_v51  ;;  %4583 = vadd.xlane.f32.xlu0 %v4582_v57  ;;  %v4822_v56 = vpack.c.bf16 %v16173_v27, %v16170_v38  ;;  %v4525_v43 = vadd.f32 %v11639_v23, %v15985_v16 }
0x1191   :  { %v12641_v35 = vpop.eup %12640  ;;  %v4517_v63 = vadd.f32 %v4516_v7, %v15985_v16  ;;  %v11640_v31 = vpop.f32.mrb[118].mxu0 }
0x1192   :  { %v4519_v44 = vpop.f32.mrb[119].mxu0  ;;  %v4778_v22 = vmul.f32 %v12641_v35, %v4730_v58  ;;  %v4793_v53 = vmul.f32 %v4777_v12, %v16102_v50  ;;  %10325 = vmatmul.mubr.msk.bf16.gmra.mrb[108].mxu1 %vm688_vm0, %v4822_v56  ;;  %v4528_v14 = vadd.f32 %v11640_v31, %v15985_v16  ;;  %v16220_v29 = vadd.f32 %v4525_v43, %v15971_v55 }
0x1193   :  { %v16187_v49 = vadd.f32 %v4517_v63, %v15960_v0  ;;  %4644 = vadd.xlane.f32.xlu1 %v4643_v48  ;;  %v4520_v33 = vadd.f32 %v4519_v44, %v15985_v16  ;;  %4967 = vmatprep.mubr.bf16.mxu1 %v19268_v32 }
0x1194   :  { %v4794_v1 = vmul.f32 %v4778_v22, %v16102_v50  ;;  %4647 = vadd.xlane.f32.xlu0 %v4646_v39  ;;  %v16205_v52 = vadd.f32 %v4793_v53, %v16123_v2  ;;  %v16225_v16 = vadd.f32 %v4528_v14, %v15974_v59  ;;  %v4591_v55 = vsel %vm688_vm0, %v16220_v29, 0.0 }
0x1195   :  { %v16196_v45 = vadd.f32 %v4520_v33, %v15963_v4  ;;  %v4585_v0 = vsel %vm688_vm0, %v16187_v49, 0.0  ;;  %v4609_v8 = vmul.f32 %v16187_v49, %v16187_v49  ;;  %v4732_v4 = vsub.f32 %v16046_v60, %v16118_v9 }
0x1196   :  { %19289 = vst [vmem:[#allocation283_spill] sm:$0xff] %v16205_v52  ;;  %v16208_v61 = vadd.f32 %v4794_v1, %v16123_v2  ;;  %v4611_v15 = vmul.f32 %v16220_v29, %v16220_v29  ;;  %v4594_v19 = vsel %vm688_vm0, %v16225_v16, 0.0  ;;  %v4612_v26 = vmul.f32 %v16225_v16, %v16225_v16 }
0x1197   :  { %v12643_v30 = vpop.eup %12642  ;;  %4586 = vadd.xlane.f32.xlu1 %v4585_v0  ;;  %v4588_v11 = vsel %vm688_vm0, %v16196_v45, 0.0  ;;  %v4610_v5 = vmul.f32 %v16196_v45, %v16196_v45  ;;  %v4649_v60 = vsel %vm688_vm0, %v4609_v8, 0.0 }
0x1198   :  { %19290 = vst [vmem:[#allocation288_spill] sm:$0xff] %v16208_v61  ;;  %v4823_v3 = vpack.c.bf16 %v16208_v61, %v16205_v52  ;;  %v4779_v20 = vmul.f32 %v12643_v30, %v4731_v41  ;;  %4589 = vadd.xlane.f32.xlu0 %v4588_v11  ;;  %v4655_v42 = vsel %vm688_vm0, %v4611_v15, 0.0  ;;  %v4658_v25 = vsel %vm688_vm0, %v4612_v26, 0.0 }
0x1199   :  { %v12645_v17 = vpop.eup %12644  ;;  %v4652_v40 = vsel %vm688_vm0, %v4610_v5, 0.0 }
0x119a   :  { %v4780_v9 = vmul.f32 %v12645_v17, %v4732_v4  ;;  %v4795_v47 = vmul.f32 %v4779_v20, %v16102_v50  ;;  %10326 = vmatmul.mubr.msk.bf16.gmra.mrb[112].mxu1 %vm688_vm0, %v4823_v3 }
0x119b   :  { %4650 = vadd.xlane.f32.xlu1 %v4649_v60  ;;  %4977 = vmatprep.mubr.bf16.mxu1 %v19268_v32 }
0x119c   :  { %v4796_v18 = vmul.f32 %v4780_v9, %v16102_v50  ;;  %4653 = vadd.xlane.f32.xlu0 %v4652_v40  ;;  %v16236_v28 = vadd.f32 %v4795_v47, %v16123_v2 }
0x119e   :  { %19291 = vst [vmem:[#allocation286_spill] sm:$0xff] %v16236_v28  ;;  %v16239_v59 = vadd.f32 %v4796_v18, %v16123_v2 }
0x119f   :  { %4592 = vadd.xlane.f32.xlu1 %v4591_v55 }
0x11a0   :  { %19292 = vst [vmem:[#allocation284_spill] sm:$0xff] %v16239_v59  ;;  %v4824_v46 = vpack.c.bf16 %v16239_v59, %v16236_v28  ;;  %4595 = vadd.xlane.f32.xlu0 %v4594_v19 }
0x11a2   :  { %10327 = vmatmul.mubr.msk.bf16.gmra.mrb[116].mxu1 %vm688_vm0, %v4824_v46 }
0x11a3   :  { %4656 = vadd.xlane.f32.xlu1 %v4655_v42  ;;  %4987 = vmatprep.mubr.bf16.mxu1 %v19268_v32 }
0x11a4   :  { %4659 = vadd.xlane.f32.xlu0 %v4658_v25 }
0x1214   :  { %v4575_v51 = vpop.xlane.xlu1 %4574 }
0x1215   :  { %v4669_v6 = vmul.f32 0.015625, %v4575_v51  ;;  %v4578_v54 = vpop.xlane.xlu0 %4577 }
0x1216   :  { %v4670_v36 = vmul.f32 0.015625, %v4578_v54 }
0x1217   :  { %v4701_v58 = vmul.f32 %v4669_v6, %v4669_v6  ;;  %v4733_v20 = vsub.f32 %v16108_v62, %v4669_v6 }
0x1218   :  { %v4639_v23 = vpop.xlane.xlu1 %4638  ;;  %v4702_v10 = vmul.f32 %v4670_v36, %v4670_v36  ;;  %v4734_v18 = vsub.f32 %v16116_v21, %v4670_v36 }
0x1219   :  { %v4685_v57 = vmul.f32 0.015625, %v4639_v23  ;;  %v4642_v7 = vpop.xlane.xlu0 %4641 }
0x121a   :  { %v4686_v35 = vmul.f32 0.015625, %v4642_v7 }
0x121b   :  { %v4717_v12 = vsub.f32 %v4685_v57, %v4701_v58 }
0x121c   :  { %v4581_v63 = vpop.xlane.xlu1 %4580  ;;  %v4718_v56 = vsub.f32 %v4686_v35, %v4702_v10 }
0x121d   :  { %v4749_v31 = vadd.f32 1e-05, %v4717_v12  ;;  %v4671_v48 = vmul.f32 0.015625, %v4581_v63  ;;  %v4584_v44 = vpop.xlane.xlu0 %4583 }
0x121e   :  { %v4750_v22 = vadd.f32 1e-05, %v4718_v56  ;;  %v4672_v53 = vmul.f32 0.015625, %v4584_v44 }
0x121f   :  { %12646 = vrsqrt.f32 %v4749_v31  ;;  %v4703_v39 = vmul.f32 %v4671_v48, %v4671_v48  ;;  %v4735_v21 = vsub.f32 %v16150_v34, %v4671_v48 }
0x1220   :  { %v4645_v33 = vpop.xlane.xlu1 %4644  ;;  %12648 = vrsqrt.f32 %v4750_v22  ;;  %v4704_v0 = vmul.f32 %v4672_v53, %v4672_v53  ;;  %v4736_v44 = vsub.f32 %v16156_v13, %v4672_v53 }
0x1221   :  { %v4687_v1 = vmul.f32 0.015625, %v4645_v33  ;;  %v4648_v41 = vpop.xlane.xlu0 %4647 }
0x1222   :  { %v4688_v8 = vmul.f32 0.015625, %v4648_v41 }
0x1223   :  { %v4719_v43 = vsub.f32 %v4687_v1, %v4703_v39 }
0x1224   :  { %v4587_v30 = vpop.xlane.xlu1 %4586  ;;  %v4720_v11 = vsub.f32 %v4688_v8, %v4704_v0 }
0x1225   :  { %v4751_v4 = vadd.f32 1e-05, %v4719_v43  ;;  %v4673_v14 = vmul.f32 0.015625, %v4587_v30  ;;  %v4590_v3 = vpop.xlane.xlu0 %4589 }
0x1226   :  { %v4752_v5 = vadd.f32 1e-05, %v4720_v11  ;;  %v4674_v17 = vmul.f32 0.015625, %v4590_v3 }
0x1227   :  { %12650 = vrsqrt.f32 %v4751_v4  ;;  %v4705_v47 = vmul.f32 %v4673_v14, %v4673_v14  ;;  %v4737_v4 = vsub.f32 %v16187_v49, %v4673_v14 }
0x1228   :  { %v4651_v60 = vpop.xlane.xlu1 %4650  ;;  %12652 = vrsqrt.f32 %v4752_v5  ;;  %v4706_v46 = vmul.f32 %v4674_v17, %v4674_v17 }
0x1229   :  { %v12647_v9 = vpop.eup %12646  ;;  %v4689_v40 = vmul.f32 0.015625, %v4651_v60  ;;  %v4654_v55 = vpop.xlane.xlu0 %4653 }
0x122a   :  { %v4781_v15 = vmul.f32 %v12647_v9, %v4733_v20  ;;  %v12649_v19 = vpop.eup %12648  ;;  %v4690_v42 = vmul.f32 0.015625, %v4654_v55  ;;  %v4738_v20 = vsub.f32 %v16196_v45, %v4674_v17 }
0x122b   :  { %v4721_v26 = vsub.f32 %v4689_v40, %v4705_v47  ;;  %v4782_v51 = vmul.f32 %v12649_v19, %v4734_v18 }
0x122c   :  { %v4593_v25 = vpop.xlane.xlu1 %4592  ;;  %v4797_v54 = vmul.f32 %v4781_v15, %v16102_v50  ;;  %v4722_v62 = vsub.f32 %v4690_v42, %v4706_v46 }
0x122d   :  { %v4753_v23 = vadd.f32 1e-05, %v4721_v26  ;;  %v4675_v6 = vmul.f32 0.015625, %v4593_v25  ;;  %v4596_v58 = vpop.xlane.xlu0 %4595  ;;  %v4798_v57 = vmul.f32 %v4782_v51, %v16102_v50 }
0x122e   :  { %v4754_v7 = vadd.f32 1e-05, %v4722_v62  ;;  %v4676_v36 = vmul.f32 0.015625, %v4596_v58  ;;  %v16257_v12 = vadd.f32 %v4797_v54, %v16123_v2  ;;  %v19301_v62 = vld [vmem:[#allocation281_spill] sm:$0xff] }
0x122f   :  { %12654 = vrsqrt.f32 %v4753_v23  ;;  %v16260_v35 = vadd.f32 %v4798_v57, %v16123_v2  ;;  %v4707_v31 = vmul.f32 %v4675_v6, %v4675_v6  ;;  %v4739_v18 = vsub.f32 %v16220_v29, %v4675_v6  ;;  %v10315_v23 = vld [vmem:[%s18903_s7 + $0x10] ss:$8 sm:$0x3] }
0x1230   :  { %v4657_v10 = vpop.xlane.xlu1 %4656  ;;  %19293 = vst [vmem:[#allocation268_spill] sm:$0xff] %v16257_v12  ;;  %12656 = vrsqrt.f32 %v4754_v7  ;;  %v4708_v48 = vmul.f32 %v4676_v36, %v4676_v36  ;;  %v4740_v15 = vsub.f32 %v16225_v16, %v4676_v36  ;;  %v19302_v6 = vsub.s32 0, %v19301_v62 }
0x1231   :  { %19294 = vst [vmem:[#allocation265_spill] sm:$0xff] %v16260_v35  ;;  %v12651_v63 = vpop.eup %12650  ;;  %v4691_v56 = vmul.f32 0.015625, %v4657_v10  ;;  %v4660_v22 = vpop.xlane.xlu0 %4659  ;;  %v4825_v33 = vpack.c.bf16 %v16260_v35, %v16257_v12  ;;  %v19303_v58 = vsub.s32 1, %v19301_v62 }
0x1232   :  { %v4783_v39 = vmul.f32 %v12651_v63, %v4735_v21  ;;  %v12653_v34 = vpop.eup %12652  ;;  %v4692_v41 = vmul.f32 0.015625, %v4660_v22 }
0x1233   :  { %v4723_v1 = vsub.f32 %v4691_v56, %v4707_v31  ;;  %10328 = vmatmul.mubr.msk.bf16.gmra.mrb[120].mxu1 %vm688_vm0, %v4825_v33  ;;  %v4784_v0 = vmul.f32 %v12653_v34, %v4736_v44  ;;  %v16315_v57 = vrot.slane %v10315_v23, %v19303_v58 }
0x1234   :  { %v4799_v43 = vmul.f32 %v4783_v39, %v16102_v50  ;;  %v4724_v30 = vsub.f32 %v4692_v41, %v4708_v48  ;;  %4997 = vmatprep.mubr.bf16.mxu1 %v19268_v32 }
0x1235   :  { %v4755_v8 = vadd.f32 1e-05, %v4723_v1  ;;  %v4800_v13 = vmul.f32 %v4784_v0, %v16102_v50 }
0x1236   :  { %v4756_v53 = vadd.f32 1e-05, %v4724_v30  ;;  %v16271_v11 = vadd.f32 %v4799_v43, %v16123_v2 }
0x1237   :  { %12658 = vrsqrt.f32 %v4755_v8  ;;  %v16274_v3 = vadd.f32 %v4800_v13, %v16123_v2 }
0x1238   :  { %19295 = vst [vmem:[#allocation266_spill] sm:$0xff] %v16271_v11  ;;  %12660 = vrsqrt.f32 %v4756_v53 }
0x1239   :  { %19296 = vst [vmem:[#allocation267_spill] sm:$0xff] %v16274_v3  ;;  %v12655_v5 = vpop.eup %12654  ;;  %v4826_v60 = vpack.c.bf16 %v16274_v3, %v16271_v11 }
0x123a   :  { %v4785_v9 = vmul.f32 %v12655_v5, %v4737_v4  ;;  %v12657_v47 = vpop.eup %12656 }
0x123b   :  { %10329 = vmatmul.mubr.msk.bf16.gmra.mrb[124].mxu1 %vm688_vm0, %v4826_v60  ;;  %v4786_v40 = vmul.f32 %v12657_v47, %v4738_v20 }
0x123c   :  { %v4801_v49 = vmul.f32 %v4785_v9, %v16102_v50  ;;  %5007 = vmatprep.mubr.bf16.mxu1 %v19268_v32 }
0x123d   :  { %v4802_v14 = vmul.f32 %v4786_v40, %v16102_v50 }
0x123e   :  { %v16285_v55 = vadd.f32 %v4801_v49, %v16123_v2 }
0x123f   :  { %v16288_v45 = vadd.f32 %v4802_v14, %v16123_v2 }
0x1240   :  { %19297 = vst [vmem:[#allocation272_spill] sm:$0xff] %v16285_v55 }
0x1241   :  { %19298 = vst [vmem:[#allocation270_spill] sm:$0xff] %v16288_v45  ;;  %v12659_v17 = vpop.eup %12658  ;;  %v4827_v19 = vpack.c.bf16 %v16288_v45, %v16285_v55 }
0x1242   :  { %v4787_v46 = vmul.f32 %v12659_v17, %v4739_v18  ;;  %v12661_v26 = vpop.eup %12660 }
0x1243   :  { %10330 = vmatmul.mubr.msk.bf16.gmra.mrb[128].mxu1 %vm688_vm0, %v4827_v19  ;;  %v4788_v42 = vmul.f32 %v12661_v26, %v4740_v15 }
0x1244   :  { %v4803_v25 = vmul.f32 %v4787_v46, %v16102_v50  ;;  %5017 = vmatprep.mubr.bf16.mxu1 %v19268_v32  ;;  %v16311_v32 = vrot.slane %v10315_v23, %v19302_v6 }
0x1245   :  { %v4804_v29 = vmul.f32 %v4788_v42, %v16102_v50 }
0x1246   :  { %v16298_v51 = vadd.f32 %v4803_v25, %v16123_v2 }
0x1247   :  { %v16301_v54 = vadd.f32 %v4804_v29, %v16123_v2 }
0x1248   :  { %19299 = vst [vmem:[#allocation271_spill] sm:$0xff] %v16298_v51 }
0x1249   :  { %19300 = vst [vmem:[#allocation269_spill] sm:$0xff] %v16301_v54  ;;  %v4828_v16 = vpack.c.bf16 %v16301_v54, %v16298_v51 }
0x124b   :  { %10331 = vmatmul.mubr.msk.bf16.gmra.mrb[132].mxu1 %vm688_vm0, %v4828_v16 }
0x125d   :  { %v4949_v50 = vpop.f32.mrb[104].mxu1 }
0x125e   :  { %v4951_v2 = vpop.f32.mrb[105].mxu1  ;;  %v4950_v21 = vadd.f32 %v4949_v50, %v16311_v32 }
0x125f   :  { %v4953_v7 = vpop.f32.mrb[106].mxu1  ;;  %v4952_v63 = vadd.f32 %v4951_v2, %v16315_v57 }
0x1260   :  { %v4954_v36 = vadd.f32 %v4953_v7, %v16311_v32  ;;  %v4955_v10 = vpop.f32.mrb[107].mxu1 }
0x1261   :  { %v4956_v31 = vadd.f32 %v4955_v10, %v16315_v57 }
0x1262   :  { %v16321_v56 = vpack.c.bf16 %v4954_v36, %v4950_v21 }
0x1263   :  { %v16323_v44 = vpack.c.bf16 %v4956_v31, %v4952_v63 }
0x1264   :  { %11649 = vmatprep.mubr.msk.bf16.mxu0 %vm1043_vm1, %v16321_v56  ;;  %5048 = vrot.lane.b32.xlu1 %v16321_v56, %s13009_s19 }
0x1265   :  { %v4959_v22 = vpop.f32.mrb[108].mxu1  ;;  %11673 = vmatprep.subr.bf16.mxu1 %v16323_v44 }
0x1266   :  { %v4961_v33 = vpop.f32.mrb[109].mxu1  ;;  %11674 = vmatpush3.bf16.msra.mxu1 %v16323_v44  ;;  %v4960_v34 = vadd.f32 %v4959_v22, %v16311_v32 }
0x1267   :  { %v4963_v39 = vpop.f32.mrb[110].mxu1  ;;  %v4962_v41 = vadd.f32 %v4961_v33, %v16315_v57 }
0x1268   :  { %v4964_v48 = vadd.f32 %v4963_v39, %v16311_v32  ;;  %v4965_v1 = vpop.f32.mrb[111].mxu1 }
0x1269   :  { %v4966_v0 = vadd.f32 %v4965_v1, %v16315_v57 }
0x126a   :  { %v16335_v43 = vpack.c.bf16 %v4964_v48, %v4960_v34 }
0x126b   :  { %v16337_v8 = vpack.c.bf16 %v4966_v0, %v4962_v41 }
0x126c   :  { %5050 = vrot.lane.b32.xlu0 %v16335_v43, %s13009_s19 }
0x126d   :  { %v4969_v30 = vpop.f32.mrb[112].mxu1  ;;  %11675 = vmatprep.subr.bf16.mxu1 %v16337_v8 }
0x126e   :  { %v4971_v13 = vpop.f32.mrb[113].mxu1  ;;  %11676 = vmatpush3.bf16.msra.mxu1 %v16337_v8  ;;  %v4970_v4 = vadd.f32 %v4969_v30, %v16311_v32 }
0x126f   :  { %v4973_v53 = vpop.f32.mrb[114].mxu1  ;;  %v4972_v60 = vadd.f32 %v4971_v13, %v16315_v57 }
0x1270   :  { %v4974_v5 = vadd.f32 %v4973_v53, %v16311_v32  ;;  %v4975_v20 = vpop.f32.mrb[115].mxu1 }
0x1271   :  { %v4976_v9 = vadd.f32 %v4975_v20, %v16315_v57 }
0x1272   :  { %v16347_v47 = vpack.c.bf16 %v4974_v5, %v4970_v4 }
0x1273   :  { %v16349_v40 = vpack.c.bf16 %v4976_v9, %v4972_v60 }
0x1274   :  { %5052 = vrot.lane.b32.xlu1 %v16347_v47, %s13009_s19 }
0x1275   :  { %v4979_v49 = vpop.f32.mrb[116].mxu1  ;;  %11677 = vmatprep.subr.bf16.mxu1 %v16349_v40 }
0x1276   :  { %v4981_v14 = vpop.f32.mrb[117].mxu1  ;;  %11678 = vmatpush3.bf16.msra.mxu1 %v16349_v40  ;;  %v4980_v17 = vadd.f32 %v4979_v49, %v16311_v32 }
0x1277   :  { %v4983_v18 = vpop.f32.mrb[118].mxu1  ;;  %v4982_v46 = vadd.f32 %v4981_v14, %v16315_v57 }
0x1278   :  { %v4984_v15 = vadd.f32 %v4983_v18, %v16311_v32  ;;  %v4985_v19 = vpop.f32.mrb[119].mxu1 }
0x1279   :  { %v4986_v26 = vadd.f32 %v4985_v19, %v16315_v57 }
0x127a   :  { %v16359_v42 = vpack.c.bf16 %v4984_v15, %v4980_v17 }
0x127b   :  { %v16361_v25 = vpack.c.bf16 %v4986_v26, %v4982_v46 }
0x127c   :  { %5054 = vrot.lane.b32.xlu1 %v16359_v42, %s13009_s19 }
0x127d   :  { %11679 = vmatprep.subr.bf16.mxu1 %v16361_v25 }
0x127e   :  { %11680 = vmatpush3.bf16.msra.mxu1 %v16361_v25 }
0x12d6   :  { %v5049_v29 = vpop.permute.xlu1 %5048 }
0x12d7   :  { %12153 = vmatprep.subr.msk.bf16.mxu0 %vm1043_vm1, %v5049_v29  ;;  %v5069_v16 = vsel %vm1043_vm1, %v5049_v29, 0 }
0x12d8   :  { %11642 = vmatpush3.bf16.xpose.msra.mxu0 %v5069_v16 }
0x12de   :  { %v5051_v23 = vpop.permute.xlu0 %5050 }
0x12df   :  { %12154 = vmatprep.subr.msk.bf16.mxu0 %vm1043_vm1, %v5051_v23  ;;  %v5072_v62 = vsel %vm1043_vm1, %v5051_v23, 0 }
0x12e0   :  { %11644 = vmatpush3.bf16.xpose.msra.mxu0 %v5072_v62 }
0x12e6   :  { %v5053_v6 = vpop.permute.xlu1 %5052 }
0x12e7   :  { %12155 = vmatprep.subr.msk.bf16.mxu0 %vm1043_vm1, %v5053_v6  ;;  %v5075_v50 = vsel %vm1043_vm1, %v5053_v6, 0 }
0x12e8   :  { %11646 = vmatpush3.bf16.xpose.msra.mxu0 %v5075_v50 }
0x12ee   :  { %v5055_v58 = vpop.permute.xlu1 %5054 }
0x12ef   :  { %12156 = vmatprep.subr.msk.bf16.mxu0 %vm1043_vm1, %v5055_v58  ;;  %v5078_v2 = vsel %vm1043_vm1, %v5055_v58, 0 }
0x12f0   :  { %11648 = vmatpush3.bf16.xpose.msra.mxu0 %v5078_v2 }
0x12f7   :  { %11650 = vmatmul.mubr.msk.bf16.vlgmr.msra.gmra.mrb[120].mxu0 %vm1043_vm1, %v16335_v43 }
0x12f8   :  { %11653 = vmatprep.mubr.msk.bf16.mxu0 %vm1043_vm1, %v16347_v47 }
0x12ff   :  { %11654 = vmatmul.mubr.msk.bf16.gmra.mrb[124].mxu0 %vm1043_vm1, %v16359_v42 }
0x1306   :  { %v4989_v7 = vpop.f32.mrb[120].mxu1 }
0x1307   :  { %v4991_v21 = vpop.f32.mrb[121].mxu1  ;;  %v4990_v10 = vadd.f32 %v4989_v7, %v16311_v32 }
0x1308   :  { %v4993_v36 = vpop.f32.mrb[122].mxu1  ;;  %v4992_v22 = vadd.f32 %v4991_v21, %v16315_v57 }
0x1309   :  { %v4994_v63 = vadd.f32 %v4993_v36, %v16311_v32  ;;  %v4995_v31 = vpop.f32.mrb[123].mxu1 }
0x130a   :  { %v4996_v33 = vadd.f32 %v4995_v31, %v16315_v57 }
0x130b   :  { %v16385_v39 = vpack.c.bf16 %v4994_v63, %v4990_v10 }
0x130c   :  { %v16387_v34 = vpack.c.bf16 %v4996_v33, %v4992_v22 }
0x130d   :  { %5149 = vrot.lane.b32.xlu0 %v16385_v39, %s13009_s19  ;;  %11665 = vmatprep.mubr.msk.bf16.mxu0 %vm1043_vm1, %v16385_v39 }
0x130e   :  { %v4999_v48 = vpop.f32.mrb[124].mxu1 }
0x130f   :  { %v5001_v1 = vpop.f32.mrb[125].mxu1  ;;  %v5000_v0 = vadd.f32 %v4999_v48, %v16311_v32 }
0x1310   :  { %v5003_v41 = vpop.f32.mrb[126].mxu1  ;;  %v5002_v53 = vadd.f32 %v5001_v1, %v16315_v57 }
0x1311   :  { %v5004_v30 = vadd.f32 %v5003_v41, %v16311_v32  ;;  %v5005_v13 = vpop.f32.mrb[127].mxu1 }
0x1312   :  { %v5006_v4 = vadd.f32 %v5005_v13, %v16315_v57 }
0x1313   :  { %v16397_v5 = vpack.c.bf16 %v5004_v30, %v5000_v0 }
0x1314   :  { %v16399_v20 = vpack.c.bf16 %v5006_v4, %v5002_v53 }
0x1315   :  { %5151 = vrot.lane.b32.xlu1 %v16397_v5, %s13009_s19 }
0x1316   :  { %v5009_v60 = vpop.f32.mrb[128].mxu1 }
0x1317   :  { %v5011_v9 = vpop.f32.mrb[129].mxu1  ;;  %v5010_v14 = vadd.f32 %v5009_v60, %v16311_v32 }
0x1318   :  { %v5013_v49 = vpop.f32.mrb[130].mxu1  ;;  %v5012_v15 = vadd.f32 %v5011_v9, %v16315_v57 }
0x1319   :  { %v5014_v18 = vadd.f32 %v5013_v49, %v16311_v32  ;;  %v5015_v17 = vpop.f32.mrb[131].mxu1 }
0x131a   :  { %v5016_v19 = vadd.f32 %v5015_v17, %v16315_v57 }
0x131b   :  { %v16407_v46 = vpack.c.bf16 %v5014_v18, %v5010_v14 }
0x131c   :  { %v16409_v26 = vpack.c.bf16 %v5016_v19, %v5012_v15 }
0x131d   :  { %19304 = vst [vmem:[#allocation275_spill] sm:$0xff] %v16407_v46  ;;  %5153 = vrot.lane.b32.xlu0 %v16407_v46, %s13009_s19 }
0x131e   :  { %v5019_v29 = vpop.f32.mrb[132].mxu1 }
0x131f   :  { %v5021_v16 = vpop.f32.mrb[133].mxu1  ;;  %v5020_v62 = vadd.f32 %v5019_v29, %v16311_v32 }
0x1320   :  { %v5023_v23 = vpop.f32.mrb[134].mxu1  ;;  %v5022_v58 = vadd.f32 %v5021_v16, %v16315_v57 }
0x1321   :  { %v5024_v6 = vadd.f32 %v5023_v23, %v16311_v32  ;;  %v5025_v50 = vpop.f32.mrb[135].mxu1 }
0x1322   :  { %v5026_v2 = vadd.f32 %v5025_v50, %v16315_v57 }
0x1323   :  { %v16417_v7 = vpack.c.bf16 %v5024_v6, %v5020_v62 }
0x1324   :  { %v16419_v21 = vpack.c.bf16 %v5026_v2, %v5022_v58 }
0x1325   :  { %19305 = vst [vmem:[#allocation273_spill] sm:$0xff] %v16417_v7  ;;  %5155 = vrot.lane.b32.xlu1 %v16417_v7, %s13009_s19 }
0x1329   :  { %5708 = vrot.lane.b32.xlu1 %v16385_v39, %s13010_s20 }
0x137f   :  { %v5150_v36 = vpop.permute.xlu0 %5149 }
0x1380   :  { %12157 = vmatprep.subr.msk.bf16.mxu0 %vm1043_vm1, %v5150_v36  ;;  %v5170_v32 = vsel %vm1043_vm1, %v5150_v36, 0 }
0x1381   :  { %11658 = vmatpush3.bf16.xpose.msra.mxu0 %v5170_v32 }
0x1387   :  { %v5152_v10 = vpop.permute.xlu1 %5151 }
0x1388   :  { %12158 = vmatprep.subr.msk.bf16.mxu0 %vm1043_vm1, %v5152_v10  ;;  %v5173_v57 = vsel %vm1043_vm1, %v5152_v10, 0 }
0x1389   :  { %11660 = vmatpush3.bf16.xpose.msra.mxu0 %v5173_v57 }
0x138f   :  { %v5154_v63 = vpop.permute.xlu0 %5153 }
0x1390   :  { %12159 = vmatprep.subr.msk.bf16.mxu0 %vm1043_vm1, %v5154_v63  ;;  %v5176_v31 = vsel %vm1043_vm1, %v5154_v63, 0 }
0x1391   :  { %11662 = vmatpush3.bf16.xpose.msra.mxu0 %v5176_v31 }
0x1397   :  { %v5156_v22 = vpop.permute.xlu1 %5155 }
0x1398   :  { %12160 = vmatprep.subr.msk.bf16.mxu0 %vm1043_vm1, %v5156_v22  ;;  %v5179_v33 = vsel %vm1043_vm1, %v5156_v22, 0 }
0x1399   :  { %11664 = vmatpush3.bf16.xpose.msra.mxu0 %v5179_v33 }
0x139a   :  { %11689 = vmatprep.subr.bf16.mxu0 %v16387_v34 }
0x139b   :  { %v16446_v48 = vpop.permute.xlu1 %5708 }
0x13a0   :  { %11666 = vmatmul.mubr.msk.bf16.vlgmr.msra.gmra.mrb[128].mxu0 %vm1043_vm1, %v16397_v5 }
0x13a1   :  { %11669 = vmatprep.mubr.msk.bf16.mxu0 %vm1043_vm1, %v16407_v46  ;;  %11690 = vmatpush3.bf16.msra.mxu0 %v16387_v34 }
0x13a2   :  { %11691 = vmatprep.subr.bf16.mxu0 %v16399_v20 }
0x13a5   :  { %11692 = vmatpush3.bf16.msra.mxu0 %v16399_v20 }
0x13a6   :  { %11693 = vmatprep.subr.bf16.mxu0 %v16409_v26 }
0x13a8   :  { %11670 = vmatmul.mubr.msk.bf16.gmra.mrb[132].mxu0 %vm1043_vm1, %v16417_v7 }
0x13a9   :  { %11694 = vmatpush3.bf16.msra.mxu0 %v16409_v26 }
0x13aa   :  { %11695 = vmatprep.subr.bf16.mxu0 %v16419_v21 }
0x13ad   :  { %11696 = vmatpush3.bf16.msra.mxu0 %v16419_v21 }
0x13ae   :  { %12165 = vmatprep.subr.msk.bf16.mxu0 %vm1043_vm1, %v16446_v48 }
0x13ca   :  { %v16451_v1 = vpop.f32.mrb[120].mxu0 }
0x13cb   :  { %v16453_v41 = vpop.f32.mrb[121].mxu0 }
0x13cc   :  { %v16455_v0 = vpop.f32.mrb[122].mxu0 }
0x13cd   :  { %v16457_v30 = vpop.f32.mrb[123].mxu0 }
0x13d2   :  { %v16459_v13 = vpop.f32.mrb[124].mxu0 }
0x13d3   :  { %v16461_v53 = vpop.f32.mrb[125].mxu0 }
0x13d4   :  { %v16463_v4 = vpop.f32.mrb[126].mxu0 }
0x13d5   :  { %v16465_v60 = vpop.f32.mrb[127].mxu0 }
0x1473   :  { %v11667_v9 = vpop.f32.mrb[128].mxu0 }
0x1474   :  { %v5215_v49 = vpop.f32.mrb[129].mxu0  ;;  %v5276_v14 = vsel %vm688_vm0, %v11667_v9, -inf }
0x1475   :  { %5277 = vmax.xlane.f32.xlu0 %v5276_v14  ;;  %v11668_v18 = vpop.f32.mrb[130].mxu0  ;;  %v5270_v19 = vsel %vm688_vm0, %v5215_v49, -inf }
0x1476   :  { %v5218_v17 = vpop.f32.mrb[131].mxu0  ;;  %v5279_v23 = vsel %vm688_vm0, %v11668_v18, -inf }
0x1477   :  { %v5273_v15 = vsel %vm688_vm0, %v5218_v17, -inf }
0x1478   :  { %5274 = vmax.xlane.f32.xlu1 %v5273_v15 }
0x1479   :  { %5271 = vmax.xlane.f32.xlu0 %v5270_v19 }
0x147b   :  { %v11671_v29 = vpop.f32.mrb[132].mxu0 }
0x147c   :  { %v5231_v16 = vpop.f32.mrb[133].mxu0  ;;  %v5288_v62 = vsel %vm688_vm0, %v11671_v29, -inf }
0x147d   :  { %5280 = vmax.xlane.f32.xlu0 %v5279_v23  ;;  %5289 = vmax.xlane.f32.xlu1 %v5288_v62  ;;  %v11672_v6 = vpop.f32.mrb[134].mxu0  ;;  %v5282_v58 = vsel %vm688_vm0, %v5231_v16, -inf }
0x147e   :  { %v5234_v50 = vpop.f32.mrb[135].mxu0  ;;  %v5291_v2 = vsel %vm688_vm0, %v11672_v6, -inf }
0x147f   :  { %v5285_v36 = vsel %vm688_vm0, %v5234_v50, -inf }
0x1481   :  { %5283 = vmax.xlane.f32.xlu1 %v5282_v58  ;;  %5292 = vmax.xlane.f32.xlu0 %v5291_v2 }
0x1485   :  { %5286 = vmax.xlane.f32.xlu0 %v5285_v36 }
0x1492   :  { %5712 = vrot.lane.b32.xlu1 %v16407_v46, %s13010_s20 }
0x1496   :  { %5714 = vrot.lane.b32.xlu1 %v16417_v7, %s13010_s20 }
0x149b   :  { %5710 = vrot.lane.b32.xlu0 %v16397_v5, %s13010_s20 }
0x1502   :  { %v5278_v32 = vpop.xlane.xlu0 %5277 }
0x1503   :  { %v5304_v10 = vsub.f32 %v11667_v9, %v5278_v32 }
0x1505   :  { %v5330_v57 = vmul.f32 1.442695, %v5304_v10  ;;  %v5275_v63 = vpop.xlane.xlu1 %5274 }
0x1506   :  { %v5272_v31 = vpop.xlane.xlu0 %5271  ;;  %v5303_v33 = vsub.f32 %v5218_v17, %v5275_v63 }
0x1507   :  { %12662 = vpow2.f32 %v5330_v57  ;;  %v5302_v22 = vsub.f32 %v5215_v49, %v5272_v31 }
0x1508   :  { %v5328_v58 = vmul.f32 1.442695, %v5303_v33 }
0x1509   :  { %v5326_v14 = vmul.f32 1.442695, %v5302_v22 }
0x150a   :  { %v5281_v15 = vpop.xlane.xlu0 %5280  ;;  %v5290_v19 = vpop.xlane.xlu1 %5289 }
0x150b   :  { %12664 = vpow2.f32 %v5326_v14  ;;  %v5305_v23 = vsub.f32 %v11668_v18, %v5281_v15  ;;  %v5308_v62 = vsub.f32 %v11671_v29, %v5290_v19 }
0x150d   :  { %v5332_v2 = vmul.f32 1.442695, %v5305_v23  ;;  %v5338_v36 = vmul.f32 1.442695, %v5308_v62  ;;  %v5249_v62 = vsel %vm688_vm0, %v16457_v30, -inf }
0x150e   :  { %v5293_v45 = vpop.xlane.xlu0 %5292  ;;  %v5284_v55 = vpop.xlane.xlu1 %5283 }
0x150f   :  { %12666 = vpow2.f32 %v5332_v2  ;;  %v5309_v54 = vsub.f32 %v11672_v6, %v5293_v45  ;;  %v5306_v9 = vsub.f32 %v5231_v16, %v5284_v55  ;;  %v5252_v2 = vsel %vm688_vm0, %v16451_v1, -inf }
0x1510   :  { %12668 = vpow2.f32 %v5338_v36  ;;  %v5255_v36 = vsel %vm688_vm0, %v16455_v0, -inf }
0x1511   :  { %v16481_v32 = vpop.eup %12662  ;;  %12670 = vpow2.f32 %v5328_v58  ;;  %v5340_v49 = vmul.f32 1.442695, %v5309_v54  ;;  %v5334_v17 = vmul.f32 1.442695, %v5306_v9  ;;  %v5246_v58 = vsel %vm688_vm0, %v16453_v41, -inf }
0x1512   :  { %v5287_v10 = vpop.xlane.xlu0 %5286  ;;  %v5372_v57 = vsel %vm688_vm0, %v16481_v32, 0.0  ;;  %v5258_v9 = vsel %vm688_vm0, %v16461_v53, -inf }
0x1513   :  { %v5307_v18 = vsub.f32 %v5234_v50, %v5287_v10  ;;  %5373 = vadd.xlane.f32.xlu1 %v5372_v57  ;;  %12672 = vpow2.f32 %v5334_v17  ;;  %v5713_v17 = vpop.permute.xlu1 %5712  ;;  %v5261_v10 = vsel %vm688_vm0, %v16465_v60, -inf }
0x1514   :  { %12674 = vpow2.f32 %v5340_v49  ;;  %v5264_v49 = vsel %vm688_vm0, %v16459_v13, -inf }
0x1515   :  { %v16485_v29 = vpop.eup %12664  ;;  %v5336_v63 = vmul.f32 1.442695, %v5307_v18  ;;  %v5267_v18 = vsel %vm688_vm0, %v16463_v4, -inf }
0x1516   :  { %v5366_v55 = vsel %vm688_vm0, %v16485_v29, 0.0 }
0x1517   :  { %5367 = vadd.xlane.f32.xlu1 %v5366_v55  ;;  %12676 = vpow2.f32 %v5336_v63  ;;  %v5715_v57 = vpop.permute.xlu1 %5714  ;;  %v5711_v55 = vpop.permute.xlu0 %5710 }
0x1519   :  { %v12667_v45 = vpop.eup %12666 }
0x151a   :  { %v16489_v16 = vpop.eup %12668  ;;  %v5375_v54 = vsel %vm688_vm0, %v12667_v45, 0.0 }
0x151b   :  { %v12671_v6 = vpop.eup %12670  ;;  %5376 = vadd.xlane.f32.xlu0 %v5375_v54  ;;  %v5384_v50 = vsel %vm688_vm0, %v16489_v16, 0.0 }
0x151c   :  { %5385 = vadd.xlane.f32.xlu1 %v5384_v50  ;;  %v5369_v22 = vsel %vm688_vm0, %v12671_v6, 0.0 }
0x151d   :  { %v16494_v31 = vpop.eup %12672 }
0x151e   :  { %v16497_v33 = vpop.eup %12674  ;;  %v5378_v14 = vsel %vm688_vm0, %v16494_v31, 0.0 }
0x151f   :  { %5370 = vadd.xlane.f32.xlu0 %v5369_v22  ;;  %v5387_v15 = vsel %vm688_vm0, %v16497_v33, 0.0 }
0x1520   :  { %5379 = vadd.xlane.f32.xlu1 %v5378_v14 }
0x1521   :  { %v16503_v19 = vpop.eup %12676 }
0x1522   :  { %v5381_v23 = vsel %vm688_vm0, %v16503_v19, 0.0 }
0x1523   :  { %5388 = vadd.xlane.f32.xlu0 %v5387_v15 }
0x1527   :  { %5382 = vadd.xlane.f32.xlu0 %v5381_v23 }
0x1531   :  { %5702 = vrot.lane.b32.xlu1 %v16397_v5, %s13011_s21 }
0x153d   :  { %5700 = vrot.lane.b32.xlu0 %v16385_v39, %s13011_s21 }
0x1555   :  { %5250 = vmax.xlane.f32.xlu1 %v5249_v62 }
0x155c   :  { %5247 = vmax.xlane.f32.xlu0 %v5246_v58 }
0x1560   :  { %5253 = vmax.xlane.f32.xlu0 %v5252_v2 }
0x1564   :  { %5256 = vmax.xlane.f32.xlu0 %v5255_v36 }
0x1566   :  { %5704 = vrot.lane.b32.xlu1 %v16407_v46, %s13011_s21 }
0x157a   :  { %5706 = vrot.lane.b32.xlu0 %v16417_v7, %s13011_s21 }
0x158a   :  { %5259 = vmax.xlane.f32.xlu1 %v5258_v9 }
0x158e   :  { %5265 = vmax.xlane.f32.xlu1 %v5264_v49 }
0x1599   :  { %5262 = vmax.xlane.f32.xlu0 %v5261_v10 }
0x159d   :  { %5268 = vmax.xlane.f32.xlu0 %v5267_v18 }
0x15a0   :  { %v5374_v63 = vpop.xlane.xlu1 %5373 }
0x15a4   :  { %v5368_v54 = vpop.xlane.xlu1 %5367 }
0x15a8   :  { %v5377_v50 = vpop.xlane.xlu0 %5376 }
0x15a9   :  { %12678 = vrcp.f32 %v5377_v50  ;;  %v5386_v22 = vpop.xlane.xlu1 %5385 }
0x15aa   :  { %12680 = vrcp.f32 %v5368_v54 }
0x15ab   :  { %12682 = vrcp.f32 %v5374_v63 }
0x15ac   :  { %v5371_v14 = vpop.xlane.xlu0 %5370 }
0x15ad   :  { %12684 = vrcp.f32 %v5371_v14  ;;  %v5380_v15 = vpop.xlane.xlu1 %5379 }
0x15b0   :  { %v5389_v23 = vpop.xlane.xlu0 %5388 }
0x15b1   :  { %12686 = vrcp.f32 %v5389_v23 }
0x15b2   :  { %12688 = vrcp.f32 %v5380_v15 }
0x15b3   :  { %v12679_v62 = vpop.eup %12678  ;;  %12690 = vrcp.f32 %v5386_v22  ;;  %v5729_v22 = vsel %vm1043_vm1, %v16446_v48, 0  ;;  %v5732_v48 = vsel %vm1043_vm1, %v5711_v55, 0 }
0x15b4   :  { %v5383_v58 = vpop.xlane.xlu0 %5382  ;;  %v12681_v2 = vpop.eup %12680  ;;  %v5417_v49 = vmul.f32 %v12679_v62, %v12667_v45 }
0x15b5   :  { %12692 = vrcp.f32 %v5383_v58  ;;  %v12683_v36 = vpop.eup %12682  ;;  %v5414_v10 = vmul.f32 %v12681_v2, %v16485_v29 }
0x15b6   :  { %v5416_v54 = vmul.f32 %v12683_v36, %v16481_v32 }
0x15b7   :  { %v12685_v9 = vpop.eup %12684 }
0x15b8   :  { %v5415_v18 = vmul.f32 %v12685_v9, %v12671_v6  ;;  %v5427_v50 = vpack.c.bf16 %v5417_v49, %v5416_v54  ;;  %v5701_v36 = vpop.permute.xlu0 %5700 }
0x15ba   :  { %v5426_v63 = vpack.c.bf16 %v5415_v18, %v5414_v10 }
0x15bb   :  { %v12687_v14 = vpop.eup %12686 }
0x15bc   :  { %11697 = vmatprep.mubr.msk.bf16.mxu0 %vm688_vm0, %v5426_v63  ;;  %v12689_v23 = vpop.eup %12688  ;;  %v5421_v29 = vmul.f32 %v12687_v14, %v16497_v33  ;;  %v5703_v33 = vpop.permute.xlu1 %5702 }
0x15bd   :  { %11698 = vmatmul.mubr.msk.bf16.vlgmr.msra.gmra.mrb[136].mxu0 %vm688_vm0, %v5427_v50  ;;  %v12691_v15 = vpop.eup %12690  ;;  %v5418_v32 = vmul.f32 %v12689_v23, %v16494_v31  ;;  %v5735_v31 = vsel %vm1043_vm1, %v5713_v17, 0 }
0x15be   :  { %11722 = vmatpush3.bf16.xpose.msra.mxu0 %v5729_v22  ;;  %v5420_v6 = vmul.f32 %v12691_v15, %v16489_v16  ;;  %v5738_v16 = vsel %vm1043_vm1, %v5715_v57, 0 }
0x15bf   :  { %v12693_v58 = vpop.eup %12692  ;;  %12166 = vmatprep.subr.msk.bf16.mxu0 %vm1043_vm1, %v5711_v55 }
0x15c0   :  { %v5419_v45 = vmul.f32 %v12693_v58, %v16503_v19  ;;  %v5429_v2 = vpack.c.bf16 %v5421_v29, %v5420_v6 }
0x15c2   :  { %v5428_v62 = vpack.c.bf16 %v5419_v45, %v5418_v32 }
0x15c4   :  { %11701 = vmatprep.mubr.msk.bf16.mxu0 %vm688_vm0, %v5428_v62 }
0x15c5   :  { %11702 = vmatmul.mubr.msk.bf16.gmra.mrb[140].mxu0 %vm688_vm0, %v5429_v2 }
0x15c6   :  { %11724 = vmatpush3.bf16.xpose.msra.mxu0 %v5732_v48  ;;  %11729 = vmatprep.mubr.msk.bf16.mxu0 %vm1043_vm1, %v5701_v36 }
0x15c7   :  { %12167 = vmatprep.subr.msk.bf16.mxu0 %vm1043_vm1, %v5713_v17 }
0x15ce   :  { %11726 = vmatpush3.bf16.xpose.msra.mxu0 %v5735_v31 }
0x15cf   :  { %12168 = vmatprep.subr.msk.bf16.mxu0 %vm1043_vm1, %v5715_v57 }
0x15d6   :  { %11728 = vmatpush3.bf16.xpose.msra.mxu0 %v5738_v16 }
0x15dd   :  { %11730 = vmatmul.mubr.msk.bf16.vlgmr.msra.gmra.mrb[144].mxu0 %vm1043_vm1, %v5703_v33 }
0x15e2   :  { %v5251_v19 = vpop.xlane.xlu1 %5250 }
0x15e3   :  { %v5295_v9 = vsub.f32 %v16457_v30, %v5251_v19 }
0x15e5   :  { %v5312_v55 = vmul.f32 1.442695, %v5295_v9 }
0x15e6   :  { %v5705_v49 = vpop.permute.xlu1 %5704 }
0x15e7   :  { %12694 = vpow2.f32 %v5312_v55  ;;  %11733 = vmatprep.mubr.msk.bf16.mxu0 %vm1043_vm1, %v5705_v49 }
0x15e9   :  { %v5248_v10 = vpop.xlane.xlu0 %5247 }
0x15ea   :  { %v5294_v17 = vsub.f32 %v16453_v41, %v5248_v10 }
0x15ec   :  { %v5310_v18 = vmul.f32 1.442695, %v5294_v17 }
0x15ed   :  { %v5254_v54 = vpop.xlane.xlu0 %5253 }
0x15ee   :  { %12696 = vpow2.f32 %v5310_v18  ;;  %v5296_v57 = vsub.f32 %v16451_v1, %v5254_v54 }
0x15f0   :  { %v5314_v63 = vmul.f32 1.442695, %v5296_v57 }
0x15f1   :  { %v16555_v50 = vpop.eup %12694  ;;  %v5257_v14 = vpop.xlane.xlu0 %5256 }
0x15f2   :  { %12698 = vpow2.f32 %v5314_v63  ;;  %v5297_v30 = vsub.f32 %v16455_v0, %v5257_v14  ;;  %v5345_v23 = vsel %vm688_vm0, %v16555_v50, 0.0 }
0x15f3   :  { %5346 = vadd.xlane.f32.xlu0 %v5345_v23 }
0x15f4   :  { %v5316_v22 = vmul.f32 1.442695, %v5297_v30 }
0x15f5   :  { %v5707_v15 = vpop.permute.xlu0 %5706 }
0x15f6   :  { %12700 = vpow2.f32 %v5316_v22  ;;  %11734 = vmatmul.mubr.msk.bf16.gmra.mrb[148].mxu0 %vm1043_vm1, %v5707_v15 }
0x15f8   :  { %v16561_v41 = vpop.eup %12696 }
0x15f9   :  { %v5342_v1 = vsel %vm688_vm0, %v16561_v41, 0.0 }
0x15fa   :  { %5343 = vadd.xlane.f32.xlu1 %v5342_v1 }
0x15fc   :  { %v16565_v58 = vpop.eup %12698 }
0x15fd   :  { %v5348_v0 = vsel %vm688_vm0, %v16565_v58, 0.0 }
0x15fe   :  { %5349 = vadd.xlane.f32.xlu1 %v5348_v0 }
0x1600   :  { %v16569_v29 = vpop.eup %12700 }
0x1601   :  { %v5351_v32 = vsel %vm688_vm0, %v16569_v29, 0.0 }
0x1602   :  { %5352 = vadd.xlane.f32.xlu0 %v5351_v32 }
0x1617   :  { %v5260_v45 = vpop.xlane.xlu1 %5259 }
0x1618   :  { %v5298_v6 = vsub.f32 %v16461_v53, %v5260_v45 }
0x161a   :  { %v5318_v62 = vmul.f32 1.442695, %v5298_v6 }
0x161b   :  { %v5266_v2 = vpop.xlane.xlu1 %5265 }
0x161c   :  { %12702 = vpow2.f32 %v5318_v62  ;;  %v5300_v36 = vsub.f32 %v16459_v13, %v5266_v2 }
0x161e   :  { %v5322_v48 = vmul.f32 1.442695, %v5300_v36 }
0x1620   :  { %12704 = vpow2.f32 %v5322_v48 }
0x1626   :  { %v16575_v31 = vpop.eup %12702  ;;  %v5263_v16 = vpop.xlane.xlu0 %5262 }
0x1627   :  { %v5299_v33 = vsub.f32 %v16465_v60, %v5263_v16  ;;  %v5354_v19 = vsel %vm688_vm0, %v16575_v31, 0.0 }
0x1628   :  { %5355 = vadd.xlane.f32.xlu1 %v5354_v19 }
0x1629   :  { %v5320_v9 = vmul.f32 1.442695, %v5299_v33 }
0x162a   :  { %v16580_v55 = vpop.eup %12704  ;;  %v5269_v53 = vpop.xlane.xlu0 %5268 }
0x162b   :  { %12706 = vpow2.f32 %v5320_v9  ;;  %v5301_v49 = vsub.f32 %v16463_v4, %v5269_v53  ;;  %v5360_v13 = vsel %vm688_vm0, %v16580_v55, 0.0 }
0x162c   :  { %5361 = vadd.xlane.f32.xlu1 %v5360_v13 }
0x162d   :  { %v5324_v10 = vmul.f32 1.442695, %v5301_v49 }
0x162f   :  { %12708 = vpow2.f32 %v5324_v10 }
0x1635   :  { %v16585_v17 = vpop.eup %12706 }
0x1636   :  { %v5357_v60 = vsel %vm688_vm0, %v16585_v17, 0.0 }
0x1637   :  { %5358 = vadd.xlane.f32.xlu0 %v5357_v60 }
0x1639   :  { %v16589_v18 = vpop.eup %12708 }
0x163a   :  { %v5363_v54 = vsel %vm688_vm0, %v16589_v18, 0.0 }
0x163b   :  { %5364 = vadd.xlane.f32.xlu0 %v5363_v54 }
0x163d   :  { %5603 = vrot.lane.b32.xlu1 %v16321_v56, %s13010_s20 }
0x1641   :  { %5607 = vrot.lane.b32.xlu1 %v16347_v47, %s13010_s20 }
0x1645   :  { %5609 = vrot.lane.b32.xlu1 %v16359_v42, %s13010_s20 }
0x1649   :  { %5597 = vrot.lane.b32.xlu1 %v16335_v43, %s13011_s21 }
0x164d   :  { %5601 = vrot.lane.b32.xlu1 %v16359_v42, %s13011_s21 }
0x1651   :  { %6086 = vrot.lane.b32.xlu1 %v16387_v34, %s13011_s21  ;;  %5605 = vrot.lane.b32.xlu0 %v16335_v43, %s13010_s20 }
0x1655   :  { %6090 = vrot.lane.b32.xlu1 %v16409_v26, %s13011_s21  ;;  %5595 = vrot.lane.b32.xlu0 %v16321_v56, %s13011_s21 }
0x1659   :  { %6092 = vrot.lane.b32.xlu1 %v16419_v21, %s13011_s21  ;;  %5599 = vrot.lane.b32.xlu0 %v16347_v47, %s13011_s21 }
0x165d   :  { %6447 = vrot.lane.b32.xlu1 %v16321_v56, %s13012_s22  ;;  %6088 = vrot.lane.b32.xlu0 %v16399_v20, %s13011_s21 }
0x1661   :  { %6451 = vrot.lane.b32.xlu1 %v16347_v47, %s13012_s22  ;;  %6449 = vrot.lane.b32.xlu0 %v16335_v43, %s13012_s22 }
0x1665   :  { %6453 = vrot.lane.b32.xlu1 %v16359_v42, %s13012_s22 }
0x1680   :  { %v5347_v4 = vpop.xlane.xlu0 %5346 }
0x1681   :  { %12710 = vrcp.f32 %v5347_v4 }
0x1687   :  { %v5344_v57 = vpop.xlane.xlu1 %5343 }
0x1688   :  { %12712 = vrcp.f32 %v5344_v57 }
0x168b   :  { %v5350_v63 = vpop.xlane.xlu1 %5349  ;;  %v12711_v30 = vpop.eup %12710 }
0x168c   :  { %12714 = vrcp.f32 %v5350_v63  ;;  %v5407_v6 = vmul.f32 %v12711_v30, %v16555_v50 }
0x168f   :  { %v5353_v14 = vpop.xlane.xlu0 %5352 }
0x1690   :  { %12716 = vrcp.f32 %v5353_v14  ;;  %v16625_v23 = vpop.f32.mrb[136].mxu0 }
0x1691   :  { %19306 = vst [vmem:[#allocation276_spill] sm:$0xff] %v16625_v23  ;;  %v16627_v22 = vpop.f32.mrb[137].mxu0 }
0x1692   :  { %v12713_v15 = vpop.eup %12712  ;;  %v16629_v1 = vpop.f32.mrb[138].mxu0 }
0x1693   :  { %19307 = vst [vmem:[#allocation274_spill] sm:$0xff] %v16629_v1  ;;  %v16633_v32 = vpop.f32.mrb[139].mxu0  ;;  %v5406_v45 = vmul.f32 %v12713_v15, %v16561_v41 }
0x1695   :  { %v5422_v2 = vpack.c.bf16 %v5407_v6, %v5406_v45 }
0x1696   :  { %v12715_v36 = vpop.eup %12714 }
0x1697   :  { %11681 = vmatprep.mubr.msk.bf16.mxu1 %vm688_vm0, %v5422_v2  ;;  %v5408_v9 = vmul.f32 %v12715_v36, %v16565_v58 }
0x1698   :  { %v16640_v48 = vpop.f32.mrb[140].mxu0 }
0x1699   :  { %19308 = vst [vmem:[#allocation279_spill] sm:$0xff] %v16640_v48  ;;  %v16642_v16 = vpop.f32.mrb[141].mxu0 }
0x169a   :  { %19309 = vst [vmem:[#allocation280_spill] sm:$0xff] %v16642_v16  ;;  %v12717_v33 = vpop.eup %12716  ;;  %v16644_v19 = vpop.f32.mrb[142].mxu0 }
0x169b   :  { %19310 = vst [vmem:[#allocation277_spill] sm:$0xff] %v16644_v19  ;;  %v5409_v41 = vmul.f32 %v12717_v33, %v16569_v29  ;;  %v16650_v53 = vpop.f32.mrb[143].mxu0 }
0x169c   :  { %19311 = vst [vmem:[#allocation278_spill] sm:$0xff] %v16650_v53 }
0x169d   :  { %v5423_v13 = vpack.c.bf16 %v5409_v41, %v5408_v9 }
0x169f   :  { %11682 = vmatmul.mubr.msk.bf16.vlgmr.msra.gmra.mrb[136].mxu1 %vm688_vm0, %v5423_v13 }
0x16b0   :  { %v16655_v10 = vpop.f32.mrb[144].mxu0 }
0x16b1   :  { %v16657_v60 = vpop.f32.mrb[145].mxu0  ;;  %v5835_v58 = vsel %vm688_vm0, %v16655_v10, -inf }
0x16b2   :  { %v16661_v54 = vpop.f32.mrb[146].mxu0  ;;  %5836 = vmax.xlane.f32.xlu0 %v5835_v58  ;;  %v5829_v63 = vsel %vm688_vm0, %v16657_v60, -inf }
0x16b3   :  { %v16663_v29 = vpop.f32.mrb[147].mxu0  ;;  %v5838_v30 = vsel %vm688_vm0, %v16661_v54, -inf }
0x16b4   :  { %v5832_v4 = vsel %vm688_vm0, %v16663_v29, -inf }
0x16b5   :  { %5833 = vmax.xlane.f32.xlu1 %v5832_v4  ;;  %v5356_v57 = vpop.xlane.xlu1 %5355 }
0x16b6   :  { %5830 = vmax.xlane.f32.xlu0 %v5829_v63  ;;  %12718 = vrcp.f32 %v5356_v57 }
0x16b9   :  { %v5362_v14 = vpop.xlane.xlu1 %5361 }
0x16ba   :  { %5839 = vmax.xlane.f32.xlu0 %v5838_v30 }
0x16bd   :  { %v5604_v15 = vpop.permute.xlu1 %5603 }
0x16be   :  { %12161 = vmatprep.subr.msk.bf16.mxu1 %vm1043_vm1, %v5604_v15  ;;  %v5624_v45 = vsel %vm1043_vm1, %v5604_v15, 0 }
0x16bf   :  { %11706 = vmatpush3.bf16.xpose.msra.mxu1 %v5624_v45 }
0x16c0   :  { %v12719_v57 = vpop.eup %12718 }
0x16c1   :  { %v5608_v6 = vpop.permute.xlu1 %5607 }
0x16c2   :  { %v5630_v35 = vsel %vm1043_vm1, %v5608_v6, 0 }
0x16c4   :  { %v5359_v2 = vpop.xlane.xlu0 %5358 }
0x16c5   :  { %12720 = vrcp.f32 %v5359_v2  ;;  %v5610_v36 = vpop.permute.xlu1 %5609 }
0x16c6   :  { %12722 = vrcp.f32 %v5362_v14 }
0x16c8   :  { %v5365_v33 = vpop.xlane.xlu0 %5364 }
0x16c9   :  { %12724 = vrcp.f32 %v5365_v33  ;;  %v5598_v9 = vpop.permute.xlu1 %5597  ;;  %v16673_v41 = vpop.f32.mrb[148].mxu0 }
0x16ca   :  { %v16675_v13 = vpop.f32.mrb[149].mxu0  ;;  %v5847_v58 = vsel %vm688_vm0, %v16673_v41, -inf }
0x16cb   :  { %v16679_v4 = vpop.f32.mrb[150].mxu0  ;;  %5848 = vmax.xlane.f32.xlu1 %v5847_v58  ;;  %v5841_v45 = vsel %vm688_vm0, %v16675_v13, -inf  ;;  %v5410_v58 = vmul.f32 %v12719_v57, %v16575_v31 }
0x16cc   :  { %v5606_v63 = vpop.permute.xlu0 %5605  ;;  %v16681_v30 = vpop.f32.mrb[151].mxu0 }
0x16cd   :  { %v5602_v15 = vpop.permute.xlu1 %5601  ;;  %12162 = vmatprep.subr.msk.bf16.mxu1 %vm1043_vm1, %v5606_v63  ;;  %v5627_v14 = vsel %vm1043_vm1, %v5606_v63, 0 }
0x16ce   :  { %11708 = vmatpush3.bf16.xpose.msra.mxu1 %v5627_v14 }
0x16cf   :  { %v12721_v2 = vpop.eup %12720  ;;  %5842 = vmax.xlane.f32.xlu1 %v5841_v45  ;;  %12163 = vmatprep.subr.msk.bf16.mxu1 %vm1043_vm1, %v5608_v6 }
0x16d0   :  { %6439 = vrot.lane.b32.xlu0 %v16321_v56, %s13013_s23  ;;  %v5596_v33 = vpop.permute.xlu0 %5595  ;;  %v5411_v50 = vmul.f32 %v12721_v2, %v16585_v17  ;;  %v12723_v49 = vpop.eup %12722 }
0x16d1   :  { %v6087_v0 = vpop.permute.xlu1 %6086  ;;  %v5412_v45 = vmul.f32 %v12723_v49, %v16580_v55  ;;  %v5633_v55 = vsel %vm1043_vm1, %v5610_v36, 0 }
0x16d2   :  { %11753 = vmatprep.subr.bf16.mxu0 %v6087_v0  ;;  %v5424_v63 = vpack.c.bf16 %v5411_v50, %v5410_v58 }
0x16d3   :  { %v12725_v14 = vpop.eup %12724  ;;  %11754 = vmatpush3.bf16.msra.mxu0 %v6087_v0 }
0x16d4   :  { %v5600_v62 = vpop.permute.xlu0 %5599  ;;  %11685 = vmatprep.mubr.msk.bf16.mxu1 %vm688_vm0, %v5424_v63  ;;  %v5413_v51 = vmul.f32 %v12725_v14, %v16589_v18 }
0x16d5   :  { %v6091_v3 = vpop.permute.xlu1 %6090 }
0x16d6   :  { %11710 = vmatpush3.bf16.xpose.msra.mxu1 %v5630_v35  ;;  %v5425_v31 = vpack.c.bf16 %v5413_v51, %v5412_v45  ;;  %v5850_v51 = vsel %vm688_vm0, %v16679_v4, -inf }
0x16d7   :  { %12164 = vmatprep.subr.msk.bf16.mxu1 %vm1043_vm1, %v5610_v36 }
0x16d8   :  { %v6089_v17 = vpop.permute.xlu0 %6088  ;;  %11686 = vmatmul.mubr.msk.bf16.gmra.mrb[140].mxu1 %vm688_vm0, %v5425_v31 }
0x16d9   :  { %11713 = vmatprep.mubr.msk.bf16.mxu1 %vm1043_vm1, %v5596_v33  ;;  %11755 = vmatprep.subr.bf16.mxu0 %v6089_v17  ;;  %v6093_v0 = vpop.permute.xlu1 %6092 }
0x16da   :  { %11756 = vmatpush3.bf16.msra.mxu0 %v6089_v17 }
0x16db   :  { %11757 = vmatprep.subr.bf16.mxu0 %v6091_v3 }
0x16dd   :  { %v16702_v35 = vpop.permute.xlu1 %6447 }
0x16de   :  { %11712 = vmatpush3.bf16.xpose.msra.mxu1 %v5633_v55  ;;  %11758 = vmatpush3.bf16.msra.mxu0 %v6091_v3  ;;  %v5844_v3 = vsel %vm688_vm0, %v16681_v30, -inf }
0x16df   :  { %11759 = vmatprep.subr.bf16.mxu0 %v6093_v0 }
0x16e0   :  { %6552 = vrot.lane.b32.xlu1 %v16385_v39, %s13012_s22 }
0x16e2   :  { %11760 = vmatpush3.bf16.msra.mxu0 %v6093_v0 }
0x16e3   :  { %12169 = vmatprep.subr.msk.bf16.mxu0 %vm1043_vm1, %v16702_v35 }
0x16e5   :  { %11714 = vmatmul.mubr.msk.bf16.vlgmr.msra.gmra.mrb[144].mxu1 %vm1043_vm1, %v5598_v9  ;;  %v16727_v9 = vpop.permute.xlu0 %6449 }
0x16e6   :  { %11717 = vmatprep.mubr.msk.bf16.mxu1 %vm1043_vm1, %v5600_v62 }
0x16ed   :  { %11718 = vmatmul.mubr.msk.bf16.gmra.mrb[148].mxu1 %vm1043_vm1, %v5602_v15  ;;  %v16729_v15 = vpop.permute.xlu1 %6451 }
0x16ef   :  { %5851 = vmax.xlane.f32.xlu0 %v5850_v51 }
0x16f1   :  { %v16731_v33 = vpop.permute.xlu1 %6453 }
0x16f3   :  { %5845 = vmax.xlane.f32.xlu0 %v5844_v3 }
0x1709   :  { %6441 = vrot.lane.b32.xlu0 %v16335_v43, %s13013_s23 }
0x173f   :  { %v5837_v57 = vpop.xlane.xlu0 %5836 }
0x1740   :  { %v5863_v63 = vsub.f32 %v16655_v10, %v5837_v57 }
0x1742   :  { %v5834_v14 = vpop.xlane.xlu1 %5833  ;;  %v5889_v0 = vmul.f32 1.442695, %v5863_v63 }
0x1743   :  { %v5831_v2 = vpop.xlane.xlu0 %5830  ;;  %v5862_v10 = vsub.f32 %v16663_v29, %v5834_v14 }
0x1744   :  { %v5861_v55 = vsub.f32 %v16657_v60, %v5831_v2  ;;  %12726 = vpow2.f32 %v5889_v0 }
0x1745   :  { %v5887_v12 = vmul.f32 1.442695, %v5862_v10 }
0x1747   :  { %v5840_v58 = vpop.xlane.xlu0 %5839 }
0x1748   :  { %v5864_v45 = vsub.f32 %v16661_v54, %v5840_v58  ;;  %v5885_v58 = vmul.f32 1.442695, %v5861_v55 }
0x174a   :  { %v5891_v57 = vmul.f32 1.442695, %v5864_v45 }
0x174b   :  { %v16750_v2 = vpop.permute.xlu0 %6439 }
0x174c   :  { %12728 = vpow2.f32 %v5891_v57 }
0x174d   :  { %12730 = vpow2.f32 %v5885_v58 }
0x174e   :  { %12732 = vpow2.f32 %v5887_v12  ;;  %v16761_v55 = vpop.eup %12726 }
0x174f   :  { %v5931_v58 = vsel %vm688_vm0, %v16761_v55, 0.0 }
0x1756   :  { %v16768_v10 = vpop.eup %12728 }
0x1758   :  { %v5849_v3 = vpop.xlane.xlu1 %5848 }
0x1759   :  { %v5867_v60 = vsub.f32 %v16673_v41, %v5849_v3 }
0x175b   :  { %v5897_v62 = vmul.f32 1.442695, %v5867_v60  ;;  %v16772_v60 = vpop.eup %12730 }
0x175c   :  { %v5843_v63 = vpop.xlane.xlu1 %5842  ;;  %v5925_v54 = vsel %vm688_vm0, %v16772_v60, 0.0 }
0x175d   :  { %v5865_v11 = vsub.f32 %v16675_v13, %v5843_v63  ;;  %12734 = vpow2.f32 %v5897_v62 }
0x175f   :  { %v5893_v41 = vmul.f32 1.442695, %v5865_v11 }
0x1761   :  { %12736 = vpow2.f32 %v5893_v41 }
0x1772   :  { %v16715_v18 = vpop.f32.mrb[136].mxu1 }
0x1773   :  { %v16717_v50 = vpop.f32.mrb[137].mxu1 }
0x1774   :  { %v16719_v49 = vpop.f32.mrb[138].mxu1 }
0x1775   :  { %v16723_v6 = vpop.f32.mrb[139].mxu1 }
0x177c   :  { %v5852_v61 = vpop.xlane.xlu0 %5851 }
0x177d   :  { %v5868_v3 = vsub.f32 %v16679_v4, %v5852_v61  ;;  %v5934_v61 = vsel %vm688_vm0, %v16768_v10, 0.0  ;;  %v16778_v4 = vpop.eup %12732 }
0x177f   :  { %v5899_v62 = vmul.f32 1.442695, %v5868_v3  ;;  %v5928_v3 = vsel %vm688_vm0, %v16778_v4, 0.0 }
0x1780   :  { %v5846_v57 = vpop.xlane.xlu0 %5845 }
0x1781   :  { %v5866_v63 = vsub.f32 %v16681_v30, %v5846_v57  ;;  %12738 = vpow2.f32 %v5899_v62 }
0x1783   :  { %v5895_v59 = vmul.f32 1.442695, %v5866_v63 }
0x1785   :  { %12740 = vpow2.f32 %v5895_v59 }
0x17ab   :  { %v16735_v31 = vpop.f32.mrb[140].mxu1 }
0x17ac   :  { %v16737_v17 = vpop.f32.mrb[141].mxu1 }
0x17ad   :  { %v16740_v51 = vpop.f32.mrb[142].mxu1 }
0x17ae   :  { %v16744_v36 = vpop.f32.mrb[143].mxu1 }
0x17b8   :  { %v16753_v29 = vpop.f32.mrb[144].mxu1 }
0x17b9   :  { %v16755_v14 = vpop.f32.mrb[145].mxu1  ;;  %v5811_v30 = vsel %vm688_vm0, %v16753_v29, -inf }
0x17ba   :  { %v16757_v45 = vpop.f32.mrb[146].mxu1  ;;  %v5805_v0 = vsel %vm688_vm0, %v16755_v14, -inf }
0x17bb   :  { %5806 = vmax.xlane.f32.xlu1 %v5805_v0  ;;  %v16764_v12 = vpop.f32.mrb[147].mxu1 }
0x17bc   :  { %v5808_v13 = vsel %vm688_vm0, %v16764_v12, -inf }
0x17bd   :  { %5809 = vmax.xlane.f32.xlu0 %v5808_v13 }
0x17bf   :  { %5932 = vadd.xlane.f32.xlu1 %v5931_v58  ;;  %v16791_v58 = vpop.eup %12734 }
0x17c0   :  { %v16774_v11 = vpop.f32.mrb[148].mxu1  ;;  %v5943_v57 = vsel %vm688_vm0, %v16791_v58, 0.0 }
0x17c1   :  { %5935 = vadd.xlane.f32.xlu0 %v5934_v61  ;;  %v16781_v0 = vpop.f32.mrb[149].mxu1  ;;  %v16797_v61 = vpop.eup %12736 }
0x17c2   :  { %v16783_v13 = vpop.f32.mrb[150].mxu1  ;;  %v5937_v62 = vsel %vm688_vm0, %v16797_v61, 0.0  ;;  %v16803_v63 = vpop.eup %12738 }
0x17c3   :  { %5926 = vadd.xlane.f32.xlu1 %v5925_v54  ;;  %v16787_v41 = vpop.f32.mrb[151].mxu1  ;;  %v5814_v54 = vsel %vm688_vm0, %v16757_v45, -inf }
0x17c4   :  { %v5820_v59 = vsel %vm688_vm0, %v16787_v41, -inf }
0x17c5   :  { %5929 = vadd.xlane.f32.xlu0 %v5928_v3  ;;  %v5817_v3 = vsel %vm688_vm0, %v16781_v0, -inf }
0x17c7   :  { %5812 = vmax.xlane.f32.xlu1 %v5811_v30  ;;  %v5946_v30 = vsel %vm688_vm0, %v16803_v63, 0.0 }
0x17c9   :  { %5944 = vadd.xlane.f32.xlu0 %v5943_v57  ;;  %v16811_v57 = vpop.eup %12740 }
0x17cb   :  { %5815 = vmax.xlane.f32.xlu1 %v5814_v54  ;;  %v5940_v54 = vsel %vm688_vm0, %v16811_v57, 0.0 }
0x17cd   :  { %5938 = vadd.xlane.f32.xlu0 %v5937_v62  ;;  %v5823_v62 = vsel %vm688_vm0, %v16774_v11, -inf }
0x17cf   :  { %5818 = vmax.xlane.f32.xlu1 %v5817_v3  ;;  %v5826_v3 = vsel %vm688_vm0, %v16783_v13, -inf }
0x17d1   :  { %5947 = vadd.xlane.f32.xlu0 %v5946_v30  ;;  %v16837_v30 = vpop.permute.xlu1 %6552 }
0x17d3   :  { %5821 = vmax.xlane.f32.xlu1 %v5820_v59  ;;  %v16839_v59 = vpop.permute.xlu0 %6441 }
0x17d7   :  { %5941 = vadd.xlane.f32.xlu1 %v5940_v54 }
0x17e7   :  { %6554 = vrot.lane.b32.xlu0 %v16397_v5, %s13012_s22 }
0x17e8   :  { %6556 = vrot.lane.b32.xlu1 %v16407_v46, %s13012_s22 }
0x1806   :  { %5824 = vmax.xlane.f32.xlu0 %v5823_v62 }
0x180c   :  { %5827 = vmax.xlane.f32.xlu1 %v5826_v3 }
0x181c   :  { %6443 = vrot.lane.b32.xlu0 %v16347_v47, %s13013_s23 }
0x181d   :  { %6445 = vrot.lane.b32.xlu1 %v16359_v42, %s13013_s23 }
0x1820   :  { %6558 = vrot.lane.b32.xlu0 %v16417_v7, %s13012_s22 }
0x1821   :  { %6550 = vrot.lane.b32.xlu1 %v16417_v7, %s13013_s23 }
0x1824   :  { %6544 = vrot.lane.b32.xlu0 %v16385_v39, %s13013_s23 }
0x1828   :  { %6546 = vrot.lane.b32.xlu0 %v16397_v5, %s13013_s23 }
0x182c   :  { %6548 = vrot.lane.b32.xlu0 %v16407_v46, %s13013_s23 }
0x1848   :  { %v5807_v54 = vpop.xlane.xlu1 %5806 }
0x1849   :  { %v5853_v62 = vsub.f32 %v16755_v14, %v5807_v54 }
0x184a   :  { %v5810_v3 = vpop.xlane.xlu0 %5809 }
0x184b   :  { %v5869_v52 = vmul.f32 1.442695, %v5853_v62  ;;  %v5854_v28 = vsub.f32 %v16764_v12, %v5810_v3 }
0x184c   :  { %v5933_v27 = vpop.xlane.xlu1 %5932 }
0x184d   :  { %12742 = vpow2.f32 %v5869_v52  ;;  %v5871_v24 = vmul.f32 1.442695, %v5854_v28 }
0x184e   :  { %v5936_v37 = vpop.xlane.xlu0 %5935 }
0x184f   :  { %12744 = vpow2.f32 %v5871_v24 }
0x1850   :  { %12746 = vrcp.f32 %v5936_v37  ;;  %v5927_v38 = vpop.xlane.xlu1 %5926 }
0x1851   :  { %12748 = vrcp.f32 %v5927_v38 }
0x1852   :  { %12750 = vrcp.f32 %v5933_v27  ;;  %v5930_v7 = vpop.xlane.xlu0 %5929 }
0x1853   :  { %12752 = vrcp.f32 %v5930_v7 }
0x1854   :  { %v5813_v48 = vpop.xlane.xlu1 %5812 }
0x1855   :  { %v5855_v19 = vsub.f32 %v16753_v29, %v5813_v48 }
0x1856   :  { %v5945_v46 = vpop.xlane.xlu0 %5944 }
0x1857   :  { %v16844_v14 = vpop.eup %12742  ;;  %v5873_v54 = vmul.f32 1.442695, %v5855_v19 }
0x1858   :  { %v5816_v62 = vpop.xlane.xlu1 %5815  ;;  %v5901_v52 = vsel %vm688_vm0, %v16844_v14, 0.0 }
0x1859   :  { %v16848_v28 = vpop.eup %12744  ;;  %12754 = vpow2.f32 %v5873_v54  ;;  %v5856_v37 = vsub.f32 %v16757_v45, %v5816_v62  ;;  %5902 = vadd.xlane.f32.xlu0 %v5901_v52 }
0x185a   :  { %v12747_v24 = vpop.eup %12746  ;;  %v5939_v38 = vpop.xlane.xlu0 %5938  ;;  %v5904_v27 = vsel %vm688_vm0, %v16848_v28, 0.0 }
0x185b   :  { %v12749_v7 = vpop.eup %12748  ;;  %v5875_v48 = vmul.f32 1.442695, %v5856_v37  ;;  %5905 = vadd.xlane.f32.xlu1 %v5904_v27  ;;  %v5976_v3 = vmul.f32 %v12747_v24, %v16768_v10 }
0x185c   :  { %v12751_v29 = vpop.eup %12750  ;;  %v5819_v19 = vpop.xlane.xlu1 %5818  ;;  %v5973_v54 = vmul.f32 %v12749_v7, %v16772_v60 }
0x185d   :  { %v12753_v12 = vpop.eup %12752  ;;  %12756 = vpow2.f32 %v5875_v48  ;;  %v5857_v16 = vsub.f32 %v16781_v0, %v5819_v19  ;;  %v5975_v62 = vmul.f32 %v12751_v29, %v16761_v55  ;;  %v6468_v55 = vsel %vm1043_vm1, %v16702_v35, 0 }
0x185e   :  { %v5974_v45 = vmul.f32 %v12753_v12, %v16778_v4  ;;  %v5948_v53 = vpop.xlane.xlu0 %5947 }
0x185f   :  { %v5877_v52 = vmul.f32 1.442695, %v5857_v16  ;;  %v5986_v37 = vpack.c.bf16 %v5976_v3, %v5975_v62  ;;  %v6474_v3 = vsel %vm1043_vm1, %v16729_v15, 0 }
0x1860   :  { %v5822_v23 = vpop.xlane.xlu1 %5821  ;;  %v5985_v1 = vpack.c.bf16 %v5974_v45, %v5973_v54 }
0x1861   :  { %12758 = vpow2.f32 %v5877_v52  ;;  %v5858_v27 = vsub.f32 %v16787_v41, %v5822_v23 }
0x1862   :  { %12760 = vrcp.f32 %v5945_v46  ;;  %11761 = vmatprep.mubr.msk.bf16.mxu0 %vm688_vm0, %v5985_v1 }
0x1863   :  { %v16860_v10 = vpop.eup %12754  ;;  %12762 = vrcp.f32 %v5948_v53  ;;  %v5879_v0 = vmul.f32 1.442695, %v5858_v27  ;;  %11762 = vmatmul.mubr.msk.bf16.vlgmr.msra.gmra.mrb[152].mxu0 %vm688_vm0, %v5986_v37  ;;  %v6471_v53 = vsel %vm1043_vm1, %v16727_v9, 0 }
0x1864   :  { %12764 = vrcp.f32 %v5939_v38  ;;  %11806 = vmatpush3.bf16.xpose.msra.mxu0 %v6468_v55  ;;  %v5942_v16 = vpop.xlane.xlu1 %5941  ;;  %v5907_v60 = vsel %vm688_vm0, %v16860_v10, 0.0 }
0x1865   :  { %12766 = vpow2.f32 %v5879_v0  ;;  %12170 = vmatprep.subr.msk.bf16.mxu0 %vm1043_vm1, %v16727_v9  ;;  %5908 = vadd.xlane.f32.xlu0 %v5907_v60 }
0x1866   :  { %12768 = vrcp.f32 %v5942_v16 }
0x1867   :  { %v16869_v46 = vpop.eup %12756 }
0x1868   :  { %v5910_v23 = vsel %vm688_vm0, %v16869_v46, 0.0 }
0x1869   :  { %5911 = vadd.xlane.f32.xlu0 %v5910_v23 }
0x186b   :  { %v16873_v1 = vpop.eup %12758 }
0x186c   :  { %v12761_v35 = vpop.eup %12760  ;;  %11808 = vmatpush3.bf16.xpose.msra.mxu0 %v6471_v53  ;;  %v5913_v4 = vsel %vm688_vm0, %v16873_v1, 0.0 }
0x186d   :  { %v12763_v41 = vpop.eup %12762  ;;  %12171 = vmatprep.subr.msk.bf16.mxu0 %vm1043_vm1, %v16729_v15  ;;  %5914 = vadd.xlane.f32.xlu1 %v5913_v4  ;;  %v5979_v12 = vmul.f32 %v12761_v35, %v16791_v58  ;;  %v6573_v15 = vsel %vm1043_vm1, %v16837_v30, 0  ;;  %v6555_v58 = vpop.permute.xlu0 %6554 }
0x186e   :  { %v12765_v24 = vpop.eup %12764  ;;  %v5980_v29 = vmul.f32 %v12763_v41, %v16803_v63  ;;  %v6576_v63 = vsel %vm1043_vm1, %v6555_v58, 0 }
0x186f   :  { %v16881_v38 = vpop.eup %12766  ;;  %v5977_v9 = vmul.f32 %v12765_v24, %v16797_v61  ;;  %v6477_v61 = vsel %vm1043_vm1, %v16731_v33, 0 }
0x1870   :  { %v12769_v7 = vpop.eup %12768  ;;  %v5916_v48 = vsel %vm688_vm0, %v16881_v38, 0.0  ;;  %v5988_v45 = vpack.c.bf16 %v5980_v29, %v5979_v12 }
0x1871   :  { %5917 = vadd.xlane.f32.xlu0 %v5916_v48  ;;  %v5978_v19 = vmul.f32 %v12769_v7, %v16811_v57 }
0x1873   :  { %v5987_v54 = vpack.c.bf16 %v5978_v19, %v5977_v9 }
0x1874   :  { %11810 = vmatpush3.bf16.xpose.msra.mxu0 %v6474_v3 }
0x1875   :  { %11765 = vmatprep.mubr.msk.bf16.mxu0 %vm688_vm0, %v5987_v54  ;;  %12172 = vmatprep.subr.msk.bf16.mxu0 %vm1043_vm1, %v16731_v33 }
0x1876   :  { %11766 = vmatmul.mubr.msk.bf16.gmra.mrb[156].mxu0 %vm688_vm0, %v5988_v45 }
0x1877   :  { %11813 = vmatprep.mubr.msk.bf16.mxu0 %vm1043_vm1, %v16750_v2  ;;  %v6557_v2 = vpop.permute.xlu1 %6556 }
0x1878   :  { %v6579_v57 = vsel %vm1043_vm1, %v6557_v2, 0 }
0x187c   :  { %11812 = vmatpush3.bf16.xpose.msra.mxu0 %v6477_v61 }
0x187d   :  { %12173 = vmatprep.subr.msk.bf16.mxu0 %vm1043_vm1, %v16837_v30 }
0x1883   :  { %11814 = vmatmul.mubr.msk.bf16.vlgmr.msra.gmra.mrb[160].mxu0 %vm1043_vm1, %v16839_v59 }
0x1884   :  { %11822 = vmatpush3.bf16.xpose.msra.mxu0 %v6573_v15 }
0x1885   :  { %12174 = vmatprep.subr.msk.bf16.mxu0 %vm1043_vm1, %v6555_v58 }
0x188c   :  { %11824 = vmatpush3.bf16.xpose.msra.mxu0 %v6576_v63 }
0x188d   :  { %12175 = vmatprep.subr.msk.bf16.mxu0 %vm1043_vm1, %v6557_v2 }
0x1893   :  { %v5825_v33 = vpop.xlane.xlu0 %5824 }
0x1894   :  { %v5859_v62 = vsub.f32 %v16774_v11, %v5825_v33  ;;  %11826 = vmatpush3.bf16.xpose.msra.mxu0 %v6579_v57 }
0x1896   :  { %v5881_v59 = vmul.f32 1.442695, %v5859_v62 }
0x1897   :  { %v6444_v52 = vpop.permute.xlu0 %6443 }
0x1898   :  { %12770 = vpow2.f32 %v5881_v59  ;;  %11817 = vmatprep.mubr.msk.bf16.mxu0 %vm1043_vm1, %v6444_v52 }
0x1899   :  { %v5828_v30 = vpop.xlane.xlu1 %5827 }
0x189a   :  { %v5860_v37 = vsub.f32 %v16783_v13, %v5828_v30 }
0x189b   :  { %v6559_v27 = vpop.permute.xlu0 %6558 }
0x189c   :  { %v5883_v0 = vmul.f32 1.442695, %v5860_v37  ;;  %12176 = vmatprep.subr.msk.bf16.mxu0 %vm1043_vm1, %v6559_v27  ;;  %v6582_v55 = vsel %vm1043_vm1, %v6559_v27, 0 }
0x189d   :  { %11828 = vmatpush3.bf16.xpose.msra.mxu0 %v6582_v55  ;;  %v6446_v16 = vpop.permute.xlu1 %6445 }
0x189e   :  { %12772 = vpow2.f32 %v5883_v0  ;;  %11818 = vmatmul.mubr.msk.bf16.gmra.mrb[164].mxu0 %vm1043_vm1, %v6446_v16 }
0x189f   :  { %v6545_v11 = vpop.permute.xlu0 %6544 }
0x18a0   :  { %11829 = vmatprep.mubr.msk.bf16.mxu0 %vm1043_vm1, %v6545_v11 }
0x18a1   :  { %v6551_v41 = vpop.permute.xlu1 %6550 }
0x18a2   :  { %v16916_v60 = vpop.eup %12770 }
0x18a3   :  { %v6547_v23 = vpop.permute.xlu0 %6546  ;;  %v5919_v13 = vsel %vm688_vm0, %v16916_v60, 0.0 }
0x18a4   :  { %5920 = vadd.xlane.f32.xlu1 %v5919_v13 }
0x18a6   :  { %11830 = vmatmul.mubr.msk.bf16.vlgmr.msra.gmra.mrb[168].mxu0 %vm1043_vm1, %v6547_v23 }
0x18a7   :  { %v6549_v53 = vpop.permute.xlu0 %6548 }
0x18a8   :  { %v16921_v35 = vpop.eup %12772  ;;  %11833 = vmatprep.mubr.msk.bf16.mxu0 %vm1043_vm1, %v6549_v53 }
0x18a9   :  { %v5922_v4 = vsel %vm688_vm0, %v16921_v35, 0.0 }
0x18aa   :  { %5923 = vadd.xlane.f32.xlu0 %v5922_v4 }
0x18ae   :  { %11834 = vmatmul.mubr.msk.bf16.gmra.mrb[172].mxu0 %vm1043_vm1, %v6551_v41 }
0x18b5   :  { %5993 = vrot.lane.b32.xlu1 %v16323_v44, %s13011_s21 }
0x18b9   :  { %5997 = vrot.lane.b32.xlu1 %v16349_v40, %s13011_s21 }
0x18bd   :  { %5999 = vrot.lane.b32.xlu1 %v16361_v25, %s13011_s21 }
0x18c0   :  { %5995 = vrot.lane.b32.xlu0 %v16337_v8, %s13011_s21 }
0x18c1   :  { %6833 = vrot.lane.b32.xlu1 %v16323_v44, %s13013_s23 }
0x18c5   :  { %6835 = vrot.lane.b32.xlu1 %v16337_v8, %s13013_s23 }
0x18e6   :  { %v5903_v24 = vpop.xlane.xlu0 %5902 }
0x18e7   :  { %12774 = vrcp.f32 %v5903_v24 }
0x18e8   :  { %v5906_v7 = vpop.xlane.xlu1 %5905 }
0x18e9   :  { %12776 = vrcp.f32 %v5906_v7 }
0x18f1   :  { %v12775_v48 = vpop.eup %12774 }
0x18f2   :  { %v5965_v9 = vmul.f32 %v12775_v48, %v16844_v14  ;;  %v5909_v3 = vpop.xlane.xlu0 %5908 }
0x18f3   :  { %v12777_v29 = vpop.eup %12776 }
0x18f4   :  { %v5966_v19 = vmul.f32 %v12777_v29, %v16848_v28 }
0x18f6   :  { %v5981_v12 = vpack.c.bf16 %v5966_v19, %v5965_v9  ;;  %v5912_v45 = vpop.xlane.xlu0 %5911 }
0x18f7   :  { %12778 = vrcp.f32 %v5912_v45 }
0x18f8   :  { %11745 = vmatprep.mubr.msk.bf16.mxu1 %vm688_vm0, %v5981_v12 }
0x18fa   :  { %v5915_v54 = vpop.xlane.xlu1 %5914 }
0x18fe   :  { %v5918_v15 = vpop.xlane.xlu0 %5917 }
0x18ff   :  { %12780 = vrcp.f32 %v5918_v15 }
0x1900   :  { %12782 = vrcp.f32 %v5909_v3 }
0x1901   :  { %12784 = vrcp.f32 %v5915_v54  ;;  %v12779_v30 = vpop.eup %12778 }
0x1902   :  { %v5968_v16 = vmul.f32 %v12779_v30, %v16869_v46 }
0x1909   :  { %v12781_v37 = vpop.eup %12780 }
0x190a   :  { %v12783_v27 = vpop.eup %12782  ;;  %v5970_v11 = vmul.f32 %v12781_v37, %v16881_v38 }
0x190b   :  { %v12785_v55 = vpop.eup %12784  ;;  %v5967_v23 = vmul.f32 %v12783_v27, %v16860_v10 }
0x190c   :  { %v5969_v13 = vmul.f32 %v12785_v55, %v16873_v1 }
0x190d   :  { %v5982_v53 = vpack.c.bf16 %v5968_v16, %v5967_v23 }
0x190e   :  { %v5983_v41 = vpack.c.bf16 %v5970_v11, %v5969_v13 }
0x1931   :  { %v5921_v61 = vpop.xlane.xlu1 %5920 }
0x1935   :  { %v5994_v58 = vpop.permute.xlu1 %5993 }
0x1936   :  { %11737 = vmatprep.subr.bf16.mxu1 %v5994_v58  ;;  %v16942_v63 = vpop.f32.mrb[152].mxu0 }
0x1937   :  { %v16944_v2 = vpop.f32.mrb[153].mxu0  ;;  %v5924_v14 = vpop.xlane.xlu0 %5923  ;;  %11738 = vmatpush3.bf16.msra.mxu1 %v5994_v58 }
0x1938   :  { %v16946_v28 = vpop.f32.mrb[154].mxu0  ;;  %12786 = vrcp.f32 %v5924_v14 }
0x1939   :  { %v16950_v57 = vpop.f32.mrb[155].mxu0  ;;  %v5998_v59 = vpop.permute.xlu1 %5997  ;;  %12788 = vrcp.f32 %v5921_v61 }
0x193b   :  { %v5996_v52 = vpop.permute.xlu0 %5995 }
0x193c   :  { %11739 = vmatprep.subr.bf16.mxu1 %v5996_v52 }
0x193d   :  { %11740 = vmatpush3.bf16.msra.mxu1 %v5996_v52  ;;  %v6000_v0 = vpop.permute.xlu1 %5999 }
0x193e   :  { %11741 = vmatprep.subr.bf16.mxu1 %v5998_v59 }
0x1941   :  { %11742 = vmatpush3.bf16.msra.mxu1 %v5998_v59 }
0x1942   :  { %11743 = vmatprep.subr.bf16.mxu1 %v6000_v0  ;;  %v12787_v4 = vpop.eup %12786 }
0x1943   :  { %v12789_v24 = vpop.eup %12788  ;;  %v5972_v46 = vmul.f32 %v12787_v4, %v16921_v35 }
0x1944   :  { %v5971_v29 = vmul.f32 %v12789_v24, %v16916_v60 }
0x1945   :  { %11744 = vmatpush3.bf16.msra.mxu1 %v6000_v0 }
0x1946   :  { %v5984_v19 = vpack.c.bf16 %v5972_v46, %v5971_v29 }
0x1948   :  { %11746 = vmatmul.mubr.msk.bf16.vlgmr.msra.gmra.mrb[152].mxu1 %vm688_vm0, %v5982_v53 }
0x1949   :  { %v16959_v7 = vpop.f32.mrb[156].mxu0  ;;  %11749 = vmatprep.mubr.msk.bf16.mxu1 %vm688_vm0, %v5983_v41 }
0x194a   :  { %v16962_v48 = vpop.f32.mrb[157].mxu0 }
0x194b   :  { %v16965_v38 = vpop.f32.mrb[158].mxu0 }
0x194c   :  { %v16969_v1 = vpop.f32.mrb[159].mxu0 }
0x1950   :  { %11750 = vmatmul.mubr.msk.bf16.gmra.mrb[156].mxu1 %vm688_vm0, %v5984_v19 }
0x1956   :  { %v11815_v12 = vpop.f32.mrb[160].mxu0 }
0x1957   :  { %v16975_v3 = vpop.f32.mrb[161].mxu0  ;;  %v6655_v35 = vsel %vm688_vm0, %v11815_v12, -inf }
0x1958   :  { %v16978_v54 = vpop.f32.mrb[162].mxu0  ;;  %6656 = vmax.xlane.f32.xlu0 %v6655_v35  ;;  %v6649_v60 = vsel %vm688_vm0, %v16975_v3, -inf }
0x1959   :  { %v16980_v45 = vpop.f32.mrb[163].mxu0  ;;  %v6658_v15 = vsel %vm688_vm0, %v16978_v54, -inf }
0x195a   :  { %v6652_v61 = vsel %vm688_vm0, %v16980_v45, -inf }
0x195b   :  { %6653 = vmax.xlane.f32.xlu1 %v6652_v61 }
0x195c   :  { %6650 = vmax.xlane.f32.xlu0 %v6649_v60 }
0x1960   :  { %6659 = vmax.xlane.f32.xlu0 %v6658_v15 }
0x1971   :  { %v16988_v58 = vpop.f32.mrb[164].mxu0 }
0x1972   :  { %v16990_v14 = vpop.f32.mrb[165].mxu0  ;;  %v6667_v59 = vsel %vm688_vm0, %v16988_v58, -inf }
0x1973   :  { %6668 = vmax.xlane.f32.xlu1 %v6667_v59  ;;  %v16994_v52 = vpop.f32.mrb[166].mxu0  ;;  %v6661_v27 = vsel %vm688_vm0, %v16990_v14, -inf  ;;  %v12326_v59 = vld [vmem:[%s18900_s4 + $0x28] sm:$0xff]  }
0x1974   :  { %v16996_v30 = vpop.f32.mrb[167].mxu0  ;;  %v6670_v37 = vsel %vm688_vm0, %v16994_v52, -inf  ;;  %11769 = vmatprep.subr.bf16.mxu1 %v12326_v59 }
0x1975   :  { %6671 = vmax.xlane.f32.xlu0 %v6670_v37  ;;  %v6664_v0 = vsel %vm688_vm0, %v16996_v30, -inf  ;;  %11770 = vmatpush3.bf16.msra.mxu1 %v12326_v59  ;;  %v17046_v37 = vld [vmem:[%s18900_s4 + $0x20] sm:$0xff]  }
0x1976   :  { %11787 = vmatprep.subr.bf16.mxu1 %v17046_v37 }
0x1977   :  { %6662 = vmax.xlane.f32.xlu1 %v6661_v27  ;;  %v17049_v27 = vpop.permute.xlu1 %6833 }
0x1979   :  { %6665 = vmax.xlane.f32.xlu0 %v6664_v0  ;;  %v17004_v55 = vpop.f32.mrb[168].mxu0 }
0x197a   :  { %v17006_v16 = vpop.f32.mrb[169].mxu0  ;;  %v6679_v11 = vsel %vm688_vm0, %v17004_v55, -inf }
0x197b   :  { %6680 = vmax.xlane.f32.xlu1 %v6679_v11  ;;  %v17010_v23 = vpop.f32.mrb[170].mxu0  ;;  %v6673_v4 = vsel %vm688_vm0, %v17006_v16, -inf  ;;  %v17051_v0 = vpop.permute.xlu1 %6835 }
0x197c   :  { %v17012_v13 = vpop.f32.mrb[171].mxu0  ;;  %v6682_v53 = vsel %vm688_vm0, %v17010_v23, -inf }
0x197d   :  { %6683 = vmax.xlane.f32.xlu0 %v6682_v53  ;;  %v6676_v41 = vsel %vm688_vm0, %v17012_v13, -inf }
0x197f   :  { %6674 = vmax.xlane.f32.xlu1 %v6673_v4 }
0x1981   :  { %6677 = vmax.xlane.f32.xlu0 %v6676_v41  ;;  %v17020_v24 = vpop.f32.mrb[172].mxu0 }
0x1982   :  { %v17022_v46 = vpop.f32.mrb[173].mxu0  ;;  %v6691_v29 = vsel %vm688_vm0, %v17020_v24, -inf }
0x1983   :  { %6692 = vmax.xlane.f32.xlu1 %v6691_v29  ;;  %v17026_v19 = vpop.f32.mrb[174].mxu0  ;;  %v6685_v60 = vsel %vm688_vm0, %v17022_v46, -inf }
0x1984   :  { %v17028_v35 = vpop.f32.mrb[175].mxu0  ;;  %v6694_v61 = vsel %vm688_vm0, %v17026_v19, -inf }
0x1985   :  { %6695 = vmax.xlane.f32.xlu0 %v6694_v61  ;;  %v6688_v15 = vsel %vm688_vm0, %v17028_v35, -inf }
0x1987   :  { %6686 = vmax.xlane.f32.xlu1 %v6685_v60 }
0x1989   :  { %6689 = vmax.xlane.f32.xlu0 %v6688_v15 }
0x1998   :  { %6839 = vrot.lane.b32.xlu1 %v16361_v25, %s13013_s23 }
0x199f   :  { %6837 = vrot.lane.b32.xlu0 %v16349_v40, %s13013_s23 }
0x19e5   :  { %v6657_v11 = vpop.xlane.xlu0 %6656 }
0x19e6   :  { %v6699_v53 = vsub.f32 %v11815_v12, %v6657_v11 }
0x19e8   :  { %v6717_v4 = vmul.f32 1.442695, %v6699_v53  ;;  %v6654_v41 = vpop.xlane.xlu1 %6653 }
0x19e9   :  { %v6651_v29 = vpop.xlane.xlu0 %6650  ;;  %v6698_v60 = vsub.f32 %v16980_v45, %v6654_v41 }
0x19ea   :  { %12790 = vpow2.f32 %v6717_v4  ;;  %v6697_v61 = vsub.f32 %v16975_v3, %v6651_v29 }
0x19eb   :  { %v6715_v9 = vmul.f32 1.442695, %v6698_v60 }
0x19ec   :  { %v6713_v15 = vmul.f32 1.442695, %v6697_v61 }
0x19ed   :  { %v6660_v59 = vpop.xlane.xlu0 %6659 }
0x19ee   :  { %12792 = vpow2.f32 %v6713_v15  ;;  %v6700_v10 = vsub.f32 %v16978_v54, %v6660_v59 }
0x19f0   :  { %v6719_v33 = vmul.f32 1.442695, %v6700_v10 }
0x19f2   :  { %12794 = vpow2.f32 %v6719_v33 }
0x19f3   :  { %12796 = vpow2.f32 %v6715_v9 }
0x19f4   :  { %v17056_v62 = vpop.eup %12790 }
0x19f5   :  { %v6751_v12 = vsel %vm688_vm0, %v17056_v62, 0.0 }
0x19f6   :  { %6752 = vadd.xlane.f32.xlu1 %v6751_v12 }
0x19f8   :  { %v17060_v11 = vpop.eup %12792 }
0x19f9   :  { %v6745_v3 = vsel %vm688_vm0, %v17060_v11, 0.0 }
0x19fa   :  { %6746 = vadd.xlane.f32.xlu1 %v6745_v3 }
0x19fc   :  { %v17064_v45 = vpop.eup %12794 }
0x19fd   :  { %v6754_v54 = vsel %vm688_vm0, %v17064_v45, 0.0  ;;  %v17068_v10 = vpop.eup %12796 }
0x19fe   :  { %6755 = vadd.xlane.f32.xlu0 %v6754_v54  ;;  %v6748_v53 = vsel %vm688_vm0, %v17068_v10, 0.0 }
0x1a00   :  { %v6669_v33 = vpop.xlane.xlu1 %6668 }
0x1a01   :  { %v6703_v9 = vsub.f32 %v16988_v58, %v6669_v33 }
0x1a02   :  { %6749 = vadd.xlane.f32.xlu0 %v6748_v53  ;;  %v6672_v4 = vpop.xlane.xlu0 %6671 }
0x1a03   :  { %v6725_v41 = vmul.f32 1.442695, %v6703_v9  ;;  %v6704_v29 = vsub.f32 %v16994_v52, %v6672_v4 }
0x1a04   :  { %v6663_v61 = vpop.xlane.xlu1 %6662 }
0x1a05   :  { %12798 = vpow2.f32 %v6725_v41  ;;  %v6727_v60 = vmul.f32 1.442695, %v6704_v29  ;;  %v6701_v15 = vsub.f32 %v16990_v14, %v6663_v61 }
0x1a06   :  { %v6666_v59 = vpop.xlane.xlu0 %6665 }
0x1a07   :  { %12800 = vpow2.f32 %v6727_v60  ;;  %v6721_v12 = vmul.f32 1.442695, %v6701_v15  ;;  %v6702_v3 = vsub.f32 %v16996_v30, %v6666_v59 }
0x1a08   :  { %v6681_v54 = vpop.xlane.xlu1 %6680 }
0x1a09   :  { %12802 = vpow2.f32 %v6721_v12  ;;  %v6723_v58 = vmul.f32 1.442695, %v6702_v3  ;;  %v6707_v33 = vsub.f32 %v17004_v55, %v6681_v54 }
0x1a0a   :  { %v6684_v53 = vpop.xlane.xlu0 %6683 }
0x1a0b   :  { %12804 = vpow2.f32 %v6723_v58  ;;  %v6733_v9 = vmul.f32 1.442695, %v6707_v33  ;;  %v6708_v52 = vsub.f32 %v17010_v23, %v6684_v53 }
0x1a0c   :  { %v6675_v4 = vpop.xlane.xlu1 %6674 }
0x1a0d   :  { %12806 = vpow2.f32 %v6733_v9  ;;  %v6705_v41 = vsub.f32 %v17006_v16, %v6675_v4  ;;  %v6735_v60 = vmul.f32 1.442695, %v6708_v52 }
0x1a0e   :  { %v6678_v14 = vpop.xlane.xlu0 %6677 }
0x1a0f   :  { %v17079_v29 = vpop.eup %12798  ;;  %v6729_v61 = vmul.f32 1.442695, %v6705_v41  ;;  %v6706_v30 = vsub.f32 %v17012_v13, %v6678_v14 }
0x1a10   :  { %v6693_v15 = vpop.xlane.xlu1 %6692  ;;  %v6763_v55 = vsel %vm688_vm0, %v17079_v29, 0.0 }
0x1a11   :  { %v17084_v59 = vpop.eup %12800  ;;  %12808 = vpow2.f32 %v6729_v61  ;;  %v6711_v23 = vsub.f32 %v17020_v24, %v6693_v15  ;;  %6764 = vadd.xlane.f32.xlu1 %v6763_v55  ;;  %v6731_v13 = vmul.f32 1.442695, %v6706_v30 }
0x1a12   :  { %v6696_v12 = vpop.xlane.xlu0 %6695  ;;  %v6766_v16 = vsel %vm688_vm0, %v17084_v59, 0.0  ;;  %12810 = vpow2.f32 %v6735_v60 }
0x1a13   :  { %v17089_v3 = vpop.eup %12802  ;;  %v6741_v54 = vmul.f32 1.442695, %v6711_v23  ;;  %v6712_v58 = vsub.f32 %v17026_v19, %v6696_v12  ;;  %6767 = vadd.xlane.f32.xlu0 %v6766_v16 }
0x1a14   :  { %v6687_v33 = vpop.xlane.xlu1 %6686  ;;  %v6757_v53 = vsel %vm688_vm0, %v17089_v3, 0.0 }
0x1a15   :  { %v17094_v9 = vpop.eup %12804  ;;  %12812 = vpow2.f32 %v6741_v54  ;;  %v6709_v24 = vsub.f32 %v17022_v46, %v6687_v33  ;;  %6758 = vadd.xlane.f32.xlu1 %v6757_v53  ;;  %v6743_v19 = vmul.f32 1.442695, %v6712_v58 }
0x1a16   :  { %v6690_v52 = vpop.xlane.xlu0 %6689  ;;  %v6760_v4 = vsel %vm688_vm0, %v17094_v9, 0.0  ;;  %12814 = vpow2.f32 %v6731_v13 }
0x1a17   :  { %v17099_v41 = vpop.eup %12806  ;;  %v6737_v14 = vmul.f32 1.442695, %v6709_v24  ;;  %v6710_v61 = vsub.f32 %v17028_v35, %v6690_v52  ;;  %6761 = vadd.xlane.f32.xlu0 %v6760_v4 }
0x1a18   :  { %v6775_v30 = vsel %vm688_vm0, %v17099_v41, 0.0 }
0x1a19   :  { %12816 = vpow2.f32 %v6737_v14  ;;  %v6739_v60 = vmul.f32 1.442695, %v6710_v61 }
0x1a1a   :  { %12818 = vpow2.f32 %v6743_v19 }
0x1a1b   :  { %v17104_v15 = vpop.eup %12808  ;;  %v11747_v46 = vpop.f32.mrb[152].mxu1  ;;  %6776 = vadd.xlane.f32.xlu0 %v6775_v30  ;;  %12820 = vpow2.f32 %v6739_v60 }
0x1a1c   :  { %v6051_v55 = vpop.f32.mrb[153].mxu1  ;;  %v17106_v12 = vpop.eup %12810  ;;  %v6769_v35 = vsel %vm688_vm0, %v17104_v15, 0.0 }
0x1a1d   :  { %v11748_v23 = vpop.f32.mrb[154].mxu1  ;;  %v6778_v24 = vsel %vm688_vm0, %v17106_v12, 0.0 }
0x1a1e   :  { %v6176_v16 = vpack.c.bf16 %v11748_v23, %v11747_v46  ;;  %v6054_v54 = vpop.f32.mrb[155].mxu1 }
0x1a1f   :  { %v17110_v58 = vpop.eup %12812  ;;  %v6175_v13 = vpack.c.bf16 %v6054_v54, %v6051_v55  ;;  %6770 = vadd.xlane.f32.xlu0 %v6769_v35  ;;  %v19312_v35 = vpack.c.bf16 %v16950_v57, %v16944_v2  ;;  %v19316_v2 = vpack.c.bf16 %v16723_v6, %v16717_v50  ;;  %v19318_v50 = vpack.c.bf16 %v16744_v36, %v16737_v17  ;;  %v6840_v6 = vpop.permute.xlu1 %6839  ;;  %v12328_v17 = vld [vmem:[%s18900_s4 + $0x30] sm:$0xff]  }
0x1a20   :  { %v6787_v33 = vsel %vm688_vm0, %v17110_v58, 0.0  ;;  %v17115_v53 = vpop.eup %12814  ;;  %v19320_v36 = vpack.c.bf16 %v16633_v32, %v16627_v22  ;;  %v19322_v22 = vld [vmem:[#allocation276_spill] sm:$0xff] }
0x1a21   :  { %11771 = vmatprep.mubr.msk.bf16.mxu1 %vm1043_vm1, %v6175_v13  ;;  %6788 = vadd.xlane.f32.xlu1 %v6787_v33  ;;  %v6772_v55 = vsel %vm688_vm0, %v17115_v53, 0.0  ;;  %v19313_v13 = vpack.c.bf16 %v16946_v28, %v16942_v63  ;;  %v19314_v33 = vpack.c.bf16 %v16969_v1, %v16962_v48  ;;  %v19317_v63 = vpack.c.bf16 %v16719_v49, %v16715_v18  ;;  %v6838_v18 = vpop.permute.xlu0 %6837  ;;  %v19325_v28 = vld [vmem:[#allocation280_spill] sm:$0xff]  ;;  %v19329_v48 = vld [vmem:[#allocation279_spill] sm:$0xff] }
0x1a22   :  { %11772 = vmatmul.mubr.msk.bf16.vlgmr.msra.gmra.mrb[160].mxu1 %vm1043_vm1, %v6176_v16  ;;  %v19319_v49 = vpack.c.bf16 %v16740_v51, %v16735_v31  ;;  %v19321_v31 = vld [vmem:[#allocation274_spill] sm:$0xff] }
0x1a23   :  { %v17120_v52 = vpop.eup %12816  ;;  %11788 = vmatpush3.bf16.msra.mxu1 %v17046_v37  ;;  %v11751_v4 = vpop.f32.mrb[156].mxu1  ;;  %6779 = vadd.xlane.f32.xlu0 %v6778_v24  ;;  %v19315_v24 = vpack.c.bf16 %v16965_v38, %v16959_v7  ;;  %v19323_v32 = vpack.c.bf16 %v19321_v31, %v19322_v22  ;;  %v19324_v51 = vld [vmem:[#allocation278_spill] sm:$0xff]  ;;  %v19327_v7 = vld [vmem:[#allocation275_spill] sm:$0xff] }
0x1a24   :  { %11837 = vmatprep.subr.bf16.mxu1 %v17049_v27  ;;  %v6067_v19 = vpop.f32.mrb[157].mxu1  ;;  %v6781_v14 = vsel %vm688_vm0, %v17120_v52, 0.0  ;;  %v17126_v61 = vpop.eup %12818  ;;  %v19326_v57 = vpack.c.bf16 %v19324_v51, %v19325_v28 }
0x1a25   :  { %v11752_v60 = vpop.f32.mrb[158].mxu1  ;;  %6782 = vadd.xlane.f32.xlu1 %v6781_v14  ;;  %v17130_v23 = vpop.eup %12820  ;;  %v6790_v16 = vsel %vm688_vm0, %v17126_v61, 0.0 }
0x1a26   :  { %v6178_v30 = vpack.c.bf16 %v11752_v60, %v11751_v4  ;;  %v6070_v46 = vpop.f32.mrb[159].mxu1  ;;  %v6784_v54 = vsel %vm688_vm0, %v17130_v23, 0.0 }
0x1a27   :  { %v6177_v37 = vpack.c.bf16 %v6070_v46, %v6067_v19  ;;  %6773 = vadd.xlane.f32.xlu0 %v6772_v55 }
0x1a29   :  { %11775 = vmatprep.mubr.msk.bf16.mxu1 %vm1043_vm1, %v6177_v37  ;;  %6791 = vadd.xlane.f32.xlu1 %v6790_v16 }
0x1a2a   :  { %11776 = vmatmul.mubr.msk.bf16.gmra.mrb[164].mxu1 %vm1043_vm1, %v6178_v30 }
0x1a2b   :  { %11779 = vmatprep.mubr.msk.bf16.mxu1 %vm1043_vm1, %v19312_v35  ;;  %6785 = vadd.xlane.f32.xlu0 %v6784_v54 }
0x1a32   :  { %11780 = vmatmul.mubr.msk.bf16.gmra.mrb[168].mxu1 %vm1043_vm1, %v19313_v13 }
0x1a33   :  { %11783 = vmatprep.mubr.msk.bf16.mxu1 %vm1043_vm1, %v19314_v33 }
0x1a3a   :  { %11784 = vmatmul.mubr.msk.bf16.gmra.mrb[172].mxu1 %vm1043_vm1, %v19315_v24  ;;  %6924 = vrot.lane.b32.xlu1 %v16399_v20, %s13013_s23 }
0x1a3b   :  { %11789 = vmatprep.mubr.msk.bf16.mxu1 %vm1043_vm1, %v19316_v2 }
0x1a3e   :  { %6926 = vrot.lane.b32.xlu1 %v16409_v26, %s13013_s23 }
0x1a41   :  { %6922 = vrot.lane.b32.xlu0 %v16387_v34, %s13013_s23 }
0x1a42   :  { %11790 = vmatmul.mubr.msk.bf16.vlgmr.msra.gmra.mrb[160].mxu1 %vm1043_vm1, %v19317_v63  ;;  %6928 = vrot.lane.b32.xlu1 %v16419_v21, %s13013_s23 }
0x1a43   :  { %11838 = vmatpush3.bf16.msra.mxu1 %v17049_v27  ;;  %11793 = vmatprep.mubr.msk.bf16.mxu1 %vm1043_vm1, %v19318_v50 }
0x1a44   :  { %11839 = vmatprep.subr.bf16.mxu1 %v17051_v0 }
0x1a45   :  { %7172 = vrot.lane.b32.xlu0 %v16321_v56, %s13014_s27 }
0x1a46   :  { %7174 = vrot.lane.b32.xlu1 %v16335_v43, %s13014_s27 }
0x1a47   :  { %11840 = vmatpush3.bf16.msra.mxu1 %v17051_v0 }
0x1a48   :  { %11841 = vmatprep.subr.bf16.mxu1 %v6838_v18 }
0x1a49   :  { %7176 = vrot.lane.b32.xlu0 %v16347_v47, %s13014_s27 }
0x1a4a   :  { %11794 = vmatmul.mubr.msk.bf16.gmra.mrb[164].mxu1 %vm1043_vm1, %v19319_v49  ;;  %7277 = vrot.lane.b32.xlu1 %v16385_v39, %s13014_s27 }
0x1a4b   :  { %11842 = vmatpush3.bf16.msra.mxu1 %v6838_v18  ;;  %11797 = vmatprep.mubr.msk.bf16.mxu1 %vm1043_vm1, %v19320_v36 }
0x1a4c   :  { %11843 = vmatprep.subr.bf16.mxu1 %v6840_v6 }
0x1a4d   :  { %7178 = vrot.lane.b32.xlu0 %v16359_v42, %s13014_s27 }
0x1a4e   :  { %7279 = vrot.lane.b32.xlu1 %v16397_v5, %s13014_s27 }
0x1a4f   :  { %11844 = vmatpush3.bf16.msra.mxu1 %v6840_v6 }
0x1a50   :  { %11869 = vmatprep.subr.bf16.mxu1 %v12328_v17 }
0x1a51   :  { %7164 = vrot.lane.b32.xlu0 %v16321_v56, %s13015_s30  ;;  %v19328_v56 = vld [vmem:[#allocation277_spill] sm:$0xff] }
0x1a52   :  { %11798 = vmatmul.mubr.msk.bf16.gmra.mrb[168].mxu1 %vm1043_vm1, %v19323_v32  ;;  %7166 = vrot.lane.b32.xlu1 %v16335_v43, %s13015_s30  ;;  %v19330_v38 = vpack.c.bf16 %v19328_v56, %v19329_v48  ;;  %v19331_v43 = vld [vmem:[#allocation273_spill] sm:$0xff] }
0x1a53   :  { %11801 = vmatprep.mubr.msk.bf16.mxu1 %vm1043_vm1, %v19326_v57 }
0x1a55   :  { %7281 = vrot.lane.b32.xlu0 %v19327_v7, %s13014_s27 }
0x1a56   :  { %7168 = vrot.lane.b32.xlu1 %v16347_v47, %s13015_s30 }
0x1a59   :  { %7170 = vrot.lane.b32.xlu0 %v16359_v42, %s13015_s30 }
0x1a5a   :  { %11802 = vmatmul.mubr.msk.bf16.gmra.mrb[172].mxu1 %vm1043_vm1, %v19330_v38  ;;  %7283 = vrot.lane.b32.xlu1 %v19331_v43, %s13014_s27 }
0x1a5d   :  { %7269 = vrot.lane.b32.xlu0 %v16385_v39, %s13015_s30 }
0x1a5e   :  { %7271 = vrot.lane.b32.xlu1 %v16397_v5, %s13015_s30 }
0x1a61   :  { %7273 = vrot.lane.b32.xlu0 %v19327_v7, %s13015_s30 }
0x1a62   :  { %7275 = vrot.lane.b32.xlu1 %v19331_v43, %s13015_s30 }
0x1a66   :  { %7558 = vrot.lane.b32.xlu1 %v16323_v44, %s13015_s30 }
0x1a83   :  { %v6753_v47 = vpop.xlane.xlu1 %6752 }
0x1a87   :  { %v6747_v42 = vpop.xlane.xlu1 %6746 }
0x1a8b   :  { %v6756_v1 = vpop.xlane.xlu0 %6755 }
0x1a8c   :  { %12822 = vrcp.f32 %v6756_v1 }
0x1a8d   :  { %12824 = vrcp.f32 %v6747_v42 }
0x1a8e   :  { %12826 = vrcp.f32 %v6753_v47 }
0x1a8f   :  { %v6750_v27 = vpop.xlane.xlu0 %6749 }
0x1a90   :  { %12828 = vrcp.f32 %v6750_v27 }
0x1a96   :  { %v12823_v39 = vpop.eup %12822 }
0x1a97   :  { %v12825_v0 = vpop.eup %12824  ;;  %v6812_v19 = vmul.f32 %v12823_v39, %v17064_v45 }
0x1a98   :  { %v12827_v5 = vpop.eup %12826  ;;  %v6809_v14 = vmul.f32 %v12825_v0, %v17060_v11 }
0x1a99   :  { %v6811_v44 = vmul.f32 %v12827_v5, %v17056_v62 }
0x1a9a   :  { %v12829_v4 = vpop.eup %12828 }
0x1a9b   :  { %v6810_v60 = vmul.f32 %v12829_v4, %v17068_v10  ;;  %v6826_v46 = vpack.c.bf16 %v6812_v19, %v6811_v44 }
0x1a9d   :  { %v6825_v30 = vpack.c.bf16 %v6810_v60, %v6809_v14 }
0x1a9e   :  { %v6765_v55 = vpop.xlane.xlu1 %6764 }
0x1a9f   :  { %11845 = vmatprep.mubr.msk.bf16.mxu1 %vm688_vm0, %v6825_v30 }
0x1aa0   :  { %11846 = vmatmul.mubr.msk.bf16.vlgmr.msra.gmra.mrb[176].mxu1 %vm688_vm0, %v6826_v46  ;;  %v6768_v37 = vpop.xlane.xlu0 %6767 }
0x1aa1   :  { %11870 = vmatpush3.bf16.msra.mxu1 %v12328_v17  ;;  %12830 = vrcp.f32 %v6768_v37 }
0x1aa2   :  { %v6759_v16 = vpop.xlane.xlu1 %6758 }
0x1aa3   :  { %12832 = vrcp.f32 %v6759_v16 }
0x1aa4   :  { %12834 = vrcp.f32 %v6765_v55  ;;  %v6762_v45 = vpop.xlane.xlu0 %6761 }
0x1aa5   :  { %12836 = vrcp.f32 %v6762_v45 }
0x1aa8   :  { %v6777_v11 = vpop.xlane.xlu0 %6776 }
0x1aab   :  { %v12831_v54 = vpop.eup %12830 }
0x1aac   :  { %v6771_v10 = vpop.xlane.xlu0 %6770  ;;  %v6816_v24 = vmul.f32 %v12831_v54, %v17084_v59 }
0x1aad   :  { %v12833_v35 = vpop.eup %12832  ;;  %12838 = vrcp.f32 %v6771_v10 }
0x1aae   :  { %v12835_v62 = vpop.eup %12834  ;;  %v6789_v13 = vpop.xlane.xlu1 %6788  ;;  %v6813_v63 = vmul.f32 %v12833_v35, %v17089_v3 }
0x1aaf   :  { %v12837_v33 = vpop.eup %12836  ;;  %v6815_v18 = vmul.f32 %v12835_v62, %v17079_v29 }
0x1ab0   :  { %v6780_v2 = vpop.xlane.xlu0 %6779  ;;  %v6814_v50 = vmul.f32 %v12837_v33, %v17094_v9 }
0x1ab1   :  { %v6828_v36 = vpack.c.bf16 %v6816_v24, %v6815_v18 }
0x1ab2   :  { %v6783_v49 = vpop.xlane.xlu1 %6782  ;;  %v6827_v6 = vpack.c.bf16 %v6814_v50, %v6813_v63 }
0x1ab4   :  { %v6774_v17 = vpop.xlane.xlu0 %6773  ;;  %11849 = vmatprep.mubr.msk.bf16.mxu1 %vm688_vm0, %v6827_v6 }
0x1ab5   :  { %12840 = vrcp.f32 %v6774_v17  ;;  %11850 = vmatmul.mubr.msk.bf16.gmra.mrb[180].mxu1 %vm688_vm0, %v6828_v36 }
0x1ab6   :  { %v6792_v31 = vpop.xlane.xlu1 %6791  ;;  %12842 = vrcp.f32 %v6780_v2 }
0x1ab7   :  { %v12839_v9 = vpop.eup %12838 }
0x1ab8   :  { %v6786_v22 = vpop.xlane.xlu0 %6785  ;;  %v6817_v51 = vmul.f32 %v12839_v9, %v17104_v15 }
0x1ab9   :  { %12844 = vrcp.f32 %v6786_v22 }
0x1aba   :  { %v6925_v59 = vpop.permute.xlu1 %6924  ;;  %12846 = vrcp.f32 %v6777_v11 }
0x1abb   :  { %12848 = vrcp.f32 %v6783_v49 }
0x1abc   :  { %v6923_v3 = vpop.permute.xlu0 %6922  ;;  %12850 = vrcp.f32 %v6792_v31 }
0x1abd   :  { %11853 = vmatprep.subr.bf16.mxu0 %v6923_v3  ;;  %12852 = vrcp.f32 %v6789_v13 }
0x1abe   :  { %11854 = vmatpush3.bf16.msra.mxu0 %v6923_v3  ;;  %v6927_v29 = vpop.permute.xlu1 %6926 }
0x1abf   :  { %v12841_v32 = vpop.eup %12840  ;;  %11855 = vmatprep.subr.bf16.mxu0 %v6925_v59 }
0x1ac0   :  { %v6818_v28 = vmul.f32 %v12841_v32, %v17115_v53  ;;  %v7173_v56 = vpop.permute.xlu0 %7172  ;;  %v12843_v48 = vpop.eup %12842 }
0x1ac1   :  { %v6820_v1 = vmul.f32 %v12843_v48, %v17106_v12 }
0x1ac2   :  { %11856 = vmatpush3.bf16.msra.mxu0 %v6925_v59  ;;  %v6929_v57 = vpop.permute.xlu1 %6928  ;;  %v6829_v7 = vpack.c.bf16 %v6818_v28, %v6817_v51 }
0x1ac3   :  { %11857 = vmatprep.subr.bf16.mxu0 %v6927_v29  ;;  %v12845_v38 = vpop.eup %12844 }
0x1ac4   :  { %11861 = vmatprep.mubr.msk.bf16.mxu0 %vm688_vm0, %v6829_v7  ;;  %v12847_v43 = vpop.eup %12846  ;;  %v6822_v15 = vmul.f32 %v12845_v38, %v17130_v23  ;;  %v7177_v27 = vpop.permute.xlu0 %7176 }
0x1ac5   :  { %v12849_v42 = vpop.eup %12848  ;;  %v6819_v53 = vmul.f32 %v12847_v43, %v17099_v41 }
0x1ac6   :  { %11858 = vmatpush3.bf16.msra.mxu0 %v6927_v29  ;;  %v7175_v47 = vpop.permute.xlu1 %7174  ;;  %v6821_v0 = vmul.f32 %v12849_v42, %v17120_v52  ;;  %v12851_v4 = vpop.eup %12850  ;;  %v7193_v52 = vsel %vm1043_vm1, %v7173_v56, 0 }
0x1ac7   :  { %11859 = vmatprep.subr.bf16.mxu0 %v6929_v57  ;;  %v6830_v5 = vpack.c.bf16 %v6820_v1, %v6819_v53  ;;  %v12853_v12 = vpop.eup %12852  ;;  %v6824_v41 = vmul.f32 %v12851_v4, %v17126_v61  ;;  %v7196_v16 = vsel %vm1043_vm1, %v7175_v47, 0  ;;  %v7199_v61 = vsel %vm1043_vm1, %v7177_v27, 0 }
0x1ac8   :  { %v6831_v19 = vpack.c.bf16 %v6822_v15, %v6821_v0  ;;  %v7179_v14 = vpop.permute.xlu0 %7178  ;;  %v6823_v60 = vmul.f32 %v12853_v12, %v17110_v58 }
0x1ac9   :  { %v7202_v11 = vsel %vm1043_vm1, %v7179_v14, 0 }
0x1aca   :  { %11860 = vmatpush3.bf16.msra.mxu0 %v6929_v57  ;;  %v7278_v39 = vpop.permute.xlu1 %7277  ;;  %v6832_v30 = vpack.c.bf16 %v6824_v41, %v6823_v60 }
0x1acb   :  { %12177 = vmatprep.subr.msk.bf16.mxu0 %vm1043_vm1, %v7173_v56  ;;  %12181 = vmatprep.subr.msk.bf16.mxu1 %vm1043_vm1, %v7278_v39  ;;  %v7298_v50 = vsel %vm1043_vm1, %v7278_v39, 0 }
0x1acc   :  { %v7165_v46 = vpop.permute.xlu0 %7164 }
0x1acd   :  { %11862 = vmatmul.mubr.msk.bf16.vlgmr.msra.gmra.mrb[176].mxu0 %vm688_vm0, %v6830_v5 }
0x1ace   :  { %11865 = vmatprep.mubr.msk.bf16.mxu0 %vm688_vm0, %v6831_v19  ;;  %v7280_v23 = vpop.permute.xlu1 %7279 }
0x1acf   :  { %v7301_v18 = vsel %vm1043_vm1, %v7280_v23, 0 }
0x1ad0   :  { %v7282_v10 = vpop.permute.xlu0 %7281 }
0x1ad1   :  { %v7304_v36 = vsel %vm1043_vm1, %v7282_v10, 0 }
0x1ad2   :  { %v7167_v44 = vpop.permute.xlu1 %7166 }
0x1ad3   :  { %11888 = vmatpush3.bf16.xpose.msra.mxu0 %v7193_v52 }
0x1ad4   :  { %12178 = vmatprep.subr.msk.bf16.mxu0 %vm1043_vm1, %v7175_v47  ;;  %v7171_v35 = vpop.permute.xlu0 %7170 }
0x1ad5   :  { %11866 = vmatmul.mubr.msk.bf16.gmra.mrb[180].mxu0 %vm688_vm0, %v6832_v30 }
0x1ad6   :  { %11895 = vmatprep.mubr.msk.bf16.mxu0 %vm1043_vm1, %v7165_v46  ;;  %v7169_v55 = vpop.permute.xlu1 %7168 }
0x1ad8   :  { %v7270_v42 = vpop.permute.xlu0 %7269 }
0x1ada   :  { %v7284_v37 = vpop.permute.xlu1 %7283 }
0x1adb   :  { %11890 = vmatpush3.bf16.xpose.msra.mxu0 %v7196_v16  ;;  %v7307_v3 = vsel %vm1043_vm1, %v7284_v37, 0 }
0x1adc   :  { %12179 = vmatprep.subr.msk.bf16.mxu0 %vm1043_vm1, %v7177_v27  ;;  %v7274_v1 = vpop.permute.xlu0 %7273 }
0x1ade   :  { %v7272_v58 = vpop.permute.xlu1 %7271 }
0x1ae2   :  { %v7276_v45 = vpop.permute.xlu1 %7275 }
0x1ae3   :  { %11892 = vmatpush3.bf16.xpose.msra.mxu0 %v7199_v61 }
0x1ae4   :  { %12180 = vmatprep.subr.msk.bf16.mxu0 %vm1043_vm1, %v7179_v14 }
0x1ae6   :  { %v7559_v54 = vpop.permute.xlu1 %7558 }
0x1aeb   :  { %11894 = vmatpush3.bf16.xpose.msra.mxu0 %v7202_v11 }
0x1aec   :  { %11919 = vmatprep.subr.bf16.mxu0 %v7559_v54 }
0x1af2   :  { %11896 = vmatmul.mubr.msk.bf16.vlgmr.msra.gmra.mrb[184].mxu0 %vm1043_vm1, %v7167_v44 }
0x1af3   :  { %11899 = vmatprep.mubr.msk.bf16.mxu0 %vm1043_vm1, %v7169_v55  ;;  %11920 = vmatpush3.bf16.msra.mxu0 %v7559_v54 }
0x1afa   :  { %11900 = vmatmul.mubr.msk.bf16.gmra.mrb[188].mxu0 %vm1043_vm1, %v7171_v35 }
0x1b73   :  { %v11847_v62 = vpop.f32.mrb[176].mxu1 }
0x1b74   :  { %v6891_v13 = vpop.f32.mrb[177].mxu1 }
0x1b75   :  { %v11848_v33 = vpop.f32.mrb[178].mxu1 }
0x1b76   :  { %v7012_v24 = vpack.c.bf16 %v11848_v33, %v11847_v62  ;;  %v6894_v2 = vpop.f32.mrb[179].mxu1 }
0x1b77   :  { %v7011_v63 = vpack.c.bf16 %v6894_v2, %v6891_v13 }
0x1b79   :  { %11871 = vmatprep.mubr.msk.bf16.mxu1 %vm1043_vm1, %v7011_v63 }
0x1b7a   :  { %11872 = vmatmul.mubr.msk.bf16.vlgmr.msra.gmra.mrb[160].mxu1 %vm1043_vm1, %v7012_v24 }
0x1b7b   :  { %11904 = vmatpush3.bf16.xpose.msra.mxu1 %v7298_v50 }
0x1b7c   :  { %12182 = vmatprep.subr.msk.bf16.mxu1 %vm1043_vm1, %v7280_v23 }
0x1b83   :  { %11906 = vmatpush3.bf16.xpose.msra.mxu1 %v7301_v18 }
0x1b84   :  { %12183 = vmatprep.subr.msk.bf16.mxu1 %vm1043_vm1, %v7282_v10 }
0x1b88   :  { %v11851_v49 = vpop.f32.mrb[180].mxu1 }
0x1b89   :  { %v6907_v6 = vpop.f32.mrb[181].mxu1 }
0x1b8a   :  { %v11852_v17 = vpop.f32.mrb[182].mxu1 }
0x1b8b   :  { %11908 = vmatpush3.bf16.xpose.msra.mxu1 %v7304_v36  ;;  %v7014_v31 = vpack.c.bf16 %v11852_v17, %v11851_v49  ;;  %v6910_v22 = vpop.f32.mrb[183].mxu1 }
0x1b8c   :  { %12184 = vmatprep.subr.msk.bf16.mxu1 %vm1043_vm1, %v7284_v37  ;;  %v7013_v59 = vpack.c.bf16 %v6910_v22, %v6907_v6 }
0x1b8e   :  { %11875 = vmatprep.mubr.msk.bf16.mxu1 %vm1043_vm1, %v7013_v59 }
0x1b8f   :  { %11876 = vmatmul.mubr.msk.bf16.gmra.mrb[164].mxu1 %vm1043_vm1, %v7014_v31 }
0x1b93   :  { %11910 = vmatpush3.bf16.xpose.msra.mxu1 %v7307_v3 }
0x1ba0   :  { %v11863_v9 = vpop.f32.mrb[176].mxu0 }
0x1ba1   :  { %v6980_v29 = vpop.f32.mrb[177].mxu0 }
0x1ba2   :  { %v11864_v32 = vpop.f32.mrb[178].mxu0 }
0x1ba3   :  { %v7016_v51 = vpack.c.bf16 %v11864_v32, %v11863_v9  ;;  %v6983_v28 = vpop.f32.mrb[179].mxu0 }
0x1ba4   :  { %v7015_v57 = vpack.c.bf16 %v6983_v28, %v6980_v29 }
0x1ba6   :  { %11879 = vmatprep.mubr.msk.bf16.mxu1 %vm1043_vm1, %v7015_v57 }
0x1ba7   :  { %11880 = vmatmul.mubr.msk.bf16.gmra.mrb[168].mxu1 %vm1043_vm1, %v7016_v51 }
0x1ba8   :  { %v11867_v7 = vpop.f32.mrb[180].mxu0 }
0x1ba9   :  { %v6996_v56 = vpop.f32.mrb[181].mxu0 }
0x1baa   :  { %v11868_v48 = vpop.f32.mrb[182].mxu0 }
0x1bab   :  { %v7018_v38 = vpack.c.bf16 %v11868_v48, %v11867_v7  ;;  %v6999_v43 = vpop.f32.mrb[183].mxu0 }
0x1bac   :  { %v7017_v47 = vpack.c.bf16 %v6999_v43, %v6996_v56 }
0x1bae   :  { %11883 = vmatprep.mubr.msk.bf16.mxu1 %vm1043_vm1, %v7017_v47 }
0x1baf   :  { %11884 = vmatmul.mubr.msk.bf16.gmra.mrb[172].mxu1 %vm1043_vm1, %v7018_v38 }
0x1bb0   :  { %11911 = vmatprep.mubr.msk.bf16.mxu1 %vm1043_vm1, %v7270_v42 }
0x1bb7   :  { %11912 = vmatmul.mubr.msk.bf16.vlgmr.msra.gmra.mrb[184].mxu1 %vm1043_vm1, %v7272_v58 }
0x1bb8   :  { %11915 = vmatprep.mubr.msk.bf16.mxu1 %vm1043_vm1, %v7274_v1 }
0x1bbf   :  { %11916 = vmatmul.mubr.msk.bf16.gmra.mrb[188].mxu1 %vm1043_vm1, %v7276_v45 }
0x1bc5   :  { %v11897_v15 = vpop.f32.mrb[184].mxu0 }
0x1bc6   :  { %v7238_v53 = vpop.f32.mrb[185].mxu0  ;;  %v7380_v27 = vsel %vm688_vm0, %v11897_v15, -inf }
0x1bc7   :  { %7381 = vmax.xlane.f32.xlu0 %v7380_v27  ;;  %v11898_v39 = vpop.f32.mrb[186].mxu0  ;;  %v7374_v4 = vsel %vm688_vm0, %v7238_v53, -inf }
0x1bc8   :  { %v7241_v0 = vpop.f32.mrb[187].mxu0  ;;  %v7383_v23 = vsel %vm688_vm0, %v11898_v39, -inf }
0x1bc9   :  { %v7377_v5 = vsel %vm688_vm0, %v7241_v0, -inf }
0x1bca   :  { %7378 = vmax.xlane.f32.xlu1 %v7377_v5 }
0x1bcb   :  { %7375 = vmax.xlane.f32.xlu0 %v7374_v4 }
0x1bcd   :  { %v11901_v19 = vpop.f32.mrb[188].mxu0 }
0x1bce   :  { %v7254_v12 = vpop.f32.mrb[189].mxu0  ;;  %v7392_v14 = vsel %vm688_vm0, %v11901_v19, -inf }
0x1bcf   :  { %7384 = vmax.xlane.f32.xlu0 %v7383_v23  ;;  %7393 = vmax.xlane.f32.xlu1 %v7392_v14  ;;  %v11902_v41 = vpop.f32.mrb[190].mxu0  ;;  %v7386_v44 = vsel %vm688_vm0, %v7254_v12, -inf }
0x1bd0   :  { %v7257_v60 = vpop.f32.mrb[191].mxu0  ;;  %v7395_v52 = vsel %vm688_vm0, %v11902_v41, -inf }
0x1bd1   :  { %v7389_v30 = vsel %vm688_vm0, %v7257_v60, -inf }
0x1bd3   :  { %7387 = vmax.xlane.f32.xlu1 %v7386_v44  ;;  %7396 = vmax.xlane.f32.xlu0 %v7395_v52 }
0x1bd7   :  { %7390 = vmax.xlane.f32.xlu0 %v7389_v30 }
0x1c54   :  { %v7382_v46 = vpop.xlane.xlu0 %7381 }
0x1c55   :  { %v7424_v55 = vsub.f32 %v11897_v15, %v7382_v46 }
0x1c57   :  { %v7442_v37 = vmul.f32 1.442695, %v7424_v55  ;;  %v7379_v16 = vpop.xlane.xlu1 %7378 }
0x1c58   :  { %v7376_v58 = vpop.xlane.xlu0 %7375  ;;  %v7423_v45 = vsub.f32 %v7241_v0, %v7379_v16 }
0x1c59   :  { %12854 = vpow2.f32 %v7442_v37  ;;  %v7422_v61 = vsub.f32 %v7238_v53, %v7376_v58 }
0x1c5a   :  { %v7440_v13 = vmul.f32 1.442695, %v7423_v45 }
0x1c5b   :  { %v7438_v11 = vmul.f32 1.442695, %v7422_v61 }
0x1c5c   :  { %v7385_v54 = vpop.xlane.xlu0 %7384  ;;  %v7394_v10 = vpop.xlane.xlu1 %7393 }
0x1c5d   :  { %12856 = vpow2.f32 %v7438_v11  ;;  %v7425_v35 = vsub.f32 %v11898_v39, %v7385_v54  ;;  %v7428_v62 = vsub.f32 %v11901_v19, %v7394_v10 }
0x1c5f   :  { %v7444_v33 = vmul.f32 1.442695, %v7425_v35  ;;  %v7450_v24 = vmul.f32 1.442695, %v7428_v62 }
0x1c60   :  { %v7397_v2 = vpop.xlane.xlu0 %7396  ;;  %v7388_v63 = vpop.xlane.xlu1 %7387 }
0x1c61   :  { %12858 = vpow2.f32 %v7444_v33  ;;  %v7429_v50 = vsub.f32 %v11902_v41, %v7397_v2  ;;  %v7426_v18 = vsub.f32 %v7254_v12, %v7388_v63 }
0x1c62   :  { %12860 = vpow2.f32 %v7450_v24 }
0x1c63   :  { %v17298_v49 = vpop.eup %12854  ;;  %12862 = vpow2.f32 %v7440_v13  ;;  %v7452_v6 = vmul.f32 1.442695, %v7429_v50  ;;  %v7446_v36 = vmul.f32 1.442695, %v7426_v18 }
0x1c64   :  { %v7391_v17 = vpop.xlane.xlu0 %7390  ;;  %v7476_v31 = vsel %vm688_vm0, %v17298_v49, 0.0 }
0x1c65   :  { %v7427_v22 = vsub.f32 %v7257_v60, %v7391_v17  ;;  %7477 = vadd.xlane.f32.xlu1 %v7476_v31  ;;  %12864 = vpow2.f32 %v7446_v36 }
0x1c66   :  { %12866 = vpow2.f32 %v7452_v6 }
0x1c67   :  { %v12857_v59 = vpop.eup %12856  ;;  %v7448_v3 = vmul.f32 1.442695, %v7427_v22 }
0x1c68   :  { %v7470_v9 = vsel %vm688_vm0, %v12857_v59, 0.0 }
0x1c69   :  { %7471 = vadd.xlane.f32.xlu1 %v7470_v9  ;;  %12868 = vpow2.f32 %v7448_v3 }
0x1c6b   :  { %v17303_v29 = vpop.eup %12858 }
0x1c6c   :  { %v17305_v32 = vpop.eup %12860  ;;  %v7479_v51 = vsel %vm688_vm0, %v17303_v29, 0.0 }
0x1c6d   :  { %v12863_v28 = vpop.eup %12862  ;;  %7480 = vadd.xlane.f32.xlu0 %v7479_v51  ;;  %v7488_v57 = vsel %vm688_vm0, %v17305_v32, 0.0 }
0x1c6e   :  { %7489 = vadd.xlane.f32.xlu1 %v7488_v57  ;;  %v7473_v56 = vsel %vm688_vm0, %v12863_v28, 0.0 }
0x1c6f   :  { %v17311_v7 = vpop.eup %12864 }
0x1c70   :  { %v17314_v48 = vpop.eup %12866  ;;  %v7482_v38 = vsel %vm688_vm0, %v17311_v7, 0.0 }
0x1c71   :  { %7474 = vadd.xlane.f32.xlu0 %v7473_v56  ;;  %v7491_v43 = vsel %vm688_vm0, %v17314_v48, 0.0 }
0x1c72   :  { %7483 = vadd.xlane.f32.xlu1 %v7482_v38 }
0x1c73   :  { %v17320_v47 = vpop.eup %12868 }
0x1c74   :  { %v7485_v42 = vsel %vm688_vm0, %v17320_v47, 0.0 }
0x1c75   :  { %7492 = vadd.xlane.f32.xlu0 %v7491_v43 }
0x1c79   :  { %7486 = vadd.xlane.f32.xlu0 %v7485_v42 }
0x1c8a   :  { %v11913_v1 = vpop.f32.mrb[184].mxu1 }
0x1c8b   :  { %v7343_v15 = vpop.f32.mrb[185].mxu1  ;;  %v7404_v53 = vsel %vm688_vm0, %v11913_v1, -inf }
0x1c8c   :  { %v11914_v27 = vpop.f32.mrb[186].mxu1  ;;  %7405 = vmax.xlane.f32.xlu1 %v7404_v53  ;;  %v7398_v5 = vsel %vm688_vm0, %v7343_v15, -inf }
0x1c8d   :  { %v7346_v39 = vpop.f32.mrb[187].mxu1  ;;  %v7407_v0 = vsel %vm688_vm0, %v11914_v27, -inf }
0x1c8e   :  { %7408 = vmax.xlane.f32.xlu0 %v7407_v0  ;;  %v7401_v4 = vsel %vm688_vm0, %v7346_v39, -inf }
0x1c90   :  { %7399 = vmax.xlane.f32.xlu1 %v7398_v5 }
0x1c92   :  { %v11917_v19 = vpop.f32.mrb[188].mxu1  ;;  %7402 = vmax.xlane.f32.xlu0 %v7401_v4 }
0x1c93   :  { %v7359_v12 = vpop.f32.mrb[189].mxu1  ;;  %v7416_v23 = vsel %vm688_vm0, %v11917_v19, -inf }
0x1c94   :  { %v11918_v14 = vpop.f32.mrb[190].mxu1  ;;  %7417 = vmax.xlane.f32.xlu1 %v7416_v23  ;;  %v7410_v44 = vsel %vm688_vm0, %v7359_v12, -inf }
0x1c95   :  { %v17329_v41 = vpop.f32.mrb[191].mxu1  ;;  %v7419_v60 = vsel %vm688_vm0, %v11918_v14, -inf }
0x1c96   :  { %7420 = vmax.xlane.f32.xlu0 %v7419_v60  ;;  %v7413_v52 = vsel %vm688_vm0, %v17329_v41, -inf }
0x1c98   :  { %7411 = vmax.xlane.f32.xlu1 %v7410_v44 }
0x1c9a   :  { %7414 = vmax.xlane.f32.xlu0 %v7413_v52 }
0x1ca9   :  { %7560 = vrot.lane.b32.xlu1 %v16337_v8, %s13015_s30 }
0x1cad   :  { %7564 = vrot.lane.b32.xlu1 %v16361_v25, %s13015_s30 }
0x1cb0   :  { %7562 = vrot.lane.b32.xlu0 %v16349_v40, %s13015_s30 }
0x1cf2   :  { %v7478_v30 = vpop.xlane.xlu1 %7477 }
0x1cf6   :  { %v7472_v46 = vpop.xlane.xlu1 %7471 }
0x1cf7   :  { %12870 = vrcp.f32 %v7472_v46 }
0x1cfa   :  { %v7481_v55 = vpop.xlane.xlu0 %7480 }
0x1cfb   :  { %v7490_v8 = vpop.xlane.xlu1 %7489 }
0x1cfe   :  { %v7475_v37 = vpop.xlane.xlu0 %7474 }
0x1cff   :  { %12872 = vrcp.f32 %v7475_v37  ;;  %v7484_v10 = vpop.xlane.xlu1 %7483 }
0x1d01   :  { %v12871_v16 = vpop.eup %12870 }
0x1d02   :  { %v7534_v61 = vmul.f32 %v12871_v16, %v12857_v59  ;;  %v7493_v54 = vpop.xlane.xlu0 %7492 }
0x1d06   :  { %v7487_v25 = vpop.xlane.xlu0 %7486 }
0x1d09   :  { %v12873_v58 = vpop.eup %12872 }
0x1d0a   :  { %v7535_v45 = vmul.f32 %v12873_v58, %v12863_v28 }
0x1d0c   :  { %v7550_v11 = vpack.c.bf16 %v7535_v45, %v7534_v61 }
0x1d0e   :  { %11927 = vmatprep.mubr.msk.bf16.mxu0 %vm688_vm0, %v7550_v11 }
0x1d19   :  { %v7406_v35 = vpop.xlane.xlu1 %7405 }
0x1d1a   :  { %v7432_v62 = vsub.f32 %v11913_v1, %v7406_v35 }
0x1d1b   :  { %v7409_v40 = vpop.xlane.xlu0 %7408 }
0x1d1c   :  { %v7458_v13 = vmul.f32 1.442695, %v7432_v62  ;;  %v7433_v33 = vsub.f32 %v11914_v27, %v7409_v40 }
0x1d1d   :  { %v7400_v24 = vpop.xlane.xlu1 %7399 }
0x1d1e   :  { %12874 = vpow2.f32 %v7458_v13  ;;  %v7430_v2 = vsub.f32 %v7343_v15, %v7400_v24  ;;  %v7460_v50 = vmul.f32 1.442695, %v7433_v33 }
0x1d1f   :  { %v7403_v63 = vpop.xlane.xlu0 %7402  ;;  %12876 = vrcp.f32 %v7478_v30 }
0x1d20   :  { %v7454_v18 = vmul.f32 1.442695, %v7430_v2  ;;  %v7431_v6 = vsub.f32 %v7346_v39, %v7403_v63 }
0x1d21   :  { %v7418_v36 = vpop.xlane.xlu1 %7417 }
0x1d22   :  { %12878 = vpow2.f32 %v7454_v18  ;;  %v7436_v17 = vsub.f32 %v11917_v19, %v7418_v36  ;;  %v7456_v22 = vmul.f32 1.442695, %v7431_v6 }
0x1d23   :  { %12880 = vrcp.f32 %v7481_v55  ;;  %v7421_v31 = vpop.xlane.xlu0 %7420 }
0x1d24   :  { %12882 = vpow2.f32 %v7460_v50  ;;  %v7466_v59 = vmul.f32 1.442695, %v7436_v17  ;;  %v7437_v3 = vsub.f32 %v11918_v14, %v7421_v31 }
0x1d25   :  { %12884 = vrcp.f32 %v7487_v25  ;;  %v7412_v9 = vpop.xlane.xlu1 %7411 }
0x1d26   :  { %12886 = vpow2.f32 %v7466_v59  ;;  %v7434_v51 = vsub.f32 %v7359_v12, %v7412_v9  ;;  %v7468_v28 = vmul.f32 1.442695, %v7437_v3  ;;  %v12329_v3 = vld [vmem:[%s18900_s4 + $0x38] sm:$0xff]  }
0x1d27   :  { %12888 = vrcp.f32 %v7484_v10  ;;  %v7415_v57 = vpop.xlane.xlu0 %7414 }
0x1d28   :  { %v17342_v56 = vpop.eup %12874  ;;  %12890 = vpow2.f32 %v7456_v22  ;;  %v7462_v38 = vmul.f32 1.442695, %v7434_v51  ;;  %v7435_v43 = vsub.f32 %v17329_v41, %v7415_v57 }
0x1d29   :  { %12892 = vrcp.f32 %v7493_v54  ;;  %v7561_v42 = vpop.permute.xlu1 %7560  ;;  %v7500_v1 = vsel %vm688_vm0, %v17342_v56, 0.0  ;;  %v12877_v53 = vpop.eup %12876 }
0x1d2a   :  { %12894 = vpow2.f32 %v7462_v38  ;;  %v7464_v15 = vmul.f32 1.442695, %v7435_v43  ;;  %7501 = vadd.xlane.f32.xlu0 %v7500_v1  ;;  %11921 = vmatprep.subr.bf16.mxu0 %v7561_v42  ;;  %v7536_v55 = vmul.f32 %v12877_v53, %v17298_v49 }
0x1d2b   :  { %12896 = vpow2.f32 %v7468_v28  ;;  %v7563_v27 = vpop.permute.xlu0 %7562  ;;  %11922 = vmatpush3.bf16.msra.mxu0 %v7561_v42 }
0x1d2c   :  { %v17347_v39 = vpop.eup %12878  ;;  %12898 = vpow2.f32 %v7464_v15  ;;  %11923 = vmatprep.subr.bf16.mxu0 %v7563_v27 }
0x1d2d   :  { %v12881_v0 = vpop.eup %12880  ;;  %v7494_v5 = vsel %vm688_vm0, %v17347_v39, 0.0  ;;  %12900 = vrcp.f32 %v7490_v8  ;;  %v7565_v12 = vpop.permute.xlu1 %7564 }
0x1d2e   :  { %v17351_v4 = vpop.eup %12882  ;;  %7495 = vadd.xlane.f32.xlu0 %v7494_v5  ;;  %v7537_v41 = vmul.f32 %v12881_v0, %v17303_v29 }
0x1d2f   :  { %v12885_v19 = vpop.eup %12884  ;;  %11924 = vmatpush3.bf16.msra.mxu0 %v7563_v27  ;;  %v7503_v60 = vsel %vm688_vm0, %v17351_v4, 0.0 }
0x1d30   :  { %v17353_v23 = vpop.eup %12886  ;;  %11925 = vmatprep.subr.bf16.mxu0 %v7565_v12  ;;  %v7539_v30 = vmul.f32 %v12885_v19, %v17320_v47  ;;  %v7551_v58 = vpack.c.bf16 %v7537_v41, %v7536_v55 }
0x1d31   :  { %v12889_v14 = vpop.eup %12888  ;;  %v7512_v44 = vsel %vm688_vm0, %v17353_v23, 0.0 }
0x1d32   :  { %v12891_v52 = vpop.eup %12890  ;;  %7504 = vadd.xlane.f32.xlu0 %v7503_v60  ;;  %7513 = vadd.xlane.f32.xlu1 %v7512_v44  ;;  %v7538_v16 = vmul.f32 %v12889_v14, %v17311_v7 }
0x1d33   :  { %v12893_v46 = vpop.eup %12892  ;;  %11926 = vmatpush3.bf16.msra.mxu0 %v7565_v12  ;;  %v7497_v61 = vsel %vm688_vm0, %v12891_v52, 0.0 }
0x1d34   :  { %v17362_v37 = vpop.eup %12894  ;;  %v7552_v47 = vpack.c.bf16 %v7539_v30, %v7538_v16  ;;  %v7541_v54 = vmul.f32 %v12893_v46, %v17314_v48 }
0x1d35   :  { %v17365_v29 = vpop.eup %12896  ;;  %v7506_v45 = vsel %vm688_vm0, %v17362_v37, 0.0 }
0x1d36   :  { %v12899_v11 = vpop.eup %12898  ;;  %7498 = vadd.xlane.f32.xlu0 %v7497_v61  ;;  %7507 = vadd.xlane.f32.xlu1 %v7506_v45  ;;  %v7515_v7 = vsel %vm688_vm0, %v17365_v29, 0.0 }
0x1d37   :  { %11928 = vmatmul.mubr.msk.bf16.vlgmr.msra.gmra.mrb[192].mxu0 %vm688_vm0, %v7551_v58  ;;  %v12901_v49 = vpop.eup %12900  ;;  %v7509_v8 = vsel %vm688_vm0, %v12899_v11, 0.0 }
0x1d38   :  { %11931 = vmatprep.mubr.msk.bf16.mxu0 %vm688_vm0, %v7552_v47  ;;  %v7540_v10 = vmul.f32 %v12901_v49, %v17305_v32  ;;  %v17410_v47 = vld [vmem:[%s18903_s7 + $0x11] ss:$0 sm:$0xff] }
0x1d3a   :  { %7510 = vadd.xlane.f32.xlu0 %v7509_v8  ;;  %7516 = vadd.xlane.f32.xlu1 %v7515_v7  ;;  %v7553_v25 = vpack.c.bf16 %v7541_v54, %v7540_v10 }
0x1d3f   :  { %11932 = vmatmul.mubr.msk.bf16.gmra.mrb[196].mxu0 %vm688_vm0, %v7553_v25  ;;  %v19332_v25 = vld [vmem:[#allocation289_spill] sm:$0xff] }
0x1d4b   :  { %7649 = vrot.lane.b32.xlu1 %v16399_v20, %s13015_s30 }
0x1d4f   :  { %7651 = vrot.lane.b32.xlu1 %v16409_v26, %s13015_s30 }
0x1d50   :  { %7647 = vrot.lane.b32.xlu0 %v16387_v34, %s13015_s30 }
0x1d53   :  { %7653 = vrot.lane.b32.xlu1 %v16419_v21, %s13015_s30 }
0x1db7   :  { %v7502_v48 = vpop.xlane.xlu0 %7501 }
0x1dbb   :  { %v7496_v35 = vpop.xlane.xlu0 %7495 }
0x1dbc   :  { %12902 = vrcp.f32 %v7496_v35 }
0x1dbf   :  { %v7505_v62 = vpop.xlane.xlu0 %7504  ;;  %v7514_v40 = vpop.xlane.xlu1 %7513 }
0x1dc3   :  { %v7499_v32 = vpop.xlane.xlu0 %7498  ;;  %v7508_v13 = vpop.xlane.xlu1 %7507 }
0x1dc4   :  { %12904 = vrcp.f32 %v7499_v32 }
0x1dc5   :  { %12906 = vrcp.f32 %v7505_v62 }
0x1dc6   :  { %v12903_v2 = vpop.eup %12902 }
0x1dc7   :  { %v7511_v33 = vpop.xlane.xlu0 %7510  ;;  %v7517_v24 = vpop.xlane.xlu1 %7516  ;;  %v7542_v63 = vmul.f32 %v12903_v2, %v17347_v39 }
0x1dc8   :  { %12908 = vrcp.f32 %v7511_v33 }
0x1dc9   :  { %12910 = vrcp.f32 %v7502_v48 }
0x1dca   :  { %12912 = vrcp.f32 %v7508_v13 }
0x1dcb   :  { %v7648_v20 = vpop.permute.xlu0 %7647  ;;  %v7650_v26 = vpop.permute.xlu1 %7649  ;;  %12914 = vrcp.f32 %v7517_v24 }
0x1dcc   :  { %11935 = vmatprep.subr.bf16.mxu1 %v7648_v20  ;;  %12916 = vrcp.f32 %v7514_v40  ;;  %v19333_v40 = vld [vmem:[#allocation285_spill] sm:$0xff] }
0x1dcd   :  { %11936 = vmatpush3.bf16.msra.mxu1 %v7648_v20  ;;  %v19334_v20 = vld [vmem:[#allocation282_spill] sm:$0xff] }
0x1dce   :  { %v12905_v34 = vpop.eup %12904  ;;  %11937 = vmatprep.subr.bf16.mxu1 %v7650_v26 }
0x1dcf   :  { %v7652_v21 = vpop.permute.xlu1 %7651  ;;  %v7543_v50 = vmul.f32 %v12905_v34, %v12891_v52  ;;  %v12907_v6 = vpop.eup %12906 }
0x1dd0   :  { %v7545_v59 = vmul.f32 %v12907_v6, %v17351_v4 }
0x1dd1   :  { %11938 = vmatpush3.bf16.msra.mxu1 %v7650_v26  ;;  %v7554_v18 = vpack.c.bf16 %v7543_v50, %v7542_v63 }
0x1dd2   :  { %11939 = vmatprep.subr.bf16.mxu1 %v7652_v21  ;;  %v12909_v36 = vpop.eup %12908 }
0x1dd3   :  { %11943 = vmatprep.mubr.msk.bf16.mxu1 %vm688_vm0, %v7554_v18  ;;  %v12911_v17 = vpop.eup %12910  ;;  %v7654_v31 = vpop.permute.xlu1 %7653  ;;  %v7547_v9 = vmul.f32 %v12909_v36, %v12899_v11 }
0x1dd4   :  { %v12913_v22 = vpop.eup %12912  ;;  %v7544_v51 = vmul.f32 %v12911_v17, %v17342_v56 }
0x1dd5   :  { %11940 = vmatpush3.bf16.msra.mxu1 %v7652_v21  ;;  %v7546_v28 = vmul.f32 %v12913_v22, %v17362_v37  ;;  %v12915_v38 = vpop.eup %12914  ;;  %v19335_v21 = vld [vmem:[#allocation287_spill] sm:$0xff] }
0x1dd6   :  { %11941 = vmatprep.subr.bf16.mxu1 %v7654_v31  ;;  %v7555_v57 = vpack.c.bf16 %v7545_v59, %v7544_v51  ;;  %v12917_v42 = vpop.eup %12916  ;;  %v7549_v1 = vmul.f32 %v12915_v38, %v17365_v29 }
0x1dd7   :  { %v7556_v43 = vpack.c.bf16 %v7547_v9, %v7546_v28  ;;  %v7548_v15 = vmul.f32 %v12917_v42, %v17353_v23  ;;  %v19336_v9 = vld [vmem:[#allocation286_spill] sm:$0xff] }
0x1dd9   :  { %11942 = vmatpush3.bf16.msra.mxu1 %v7654_v31  ;;  %v7557_v53 = vpack.c.bf16 %v7549_v1, %v7548_v15  ;;  %v19337_v1 = vld [vmem:[#allocation283_spill] sm:$0xff] }
0x1dda   :  { %11951 = vmatprep.subr.bf16.mxu1 %v12329_v3 }
0x1ddc   :  { %11944 = vmatmul.mubr.msk.bf16.vlgmr.msra.gmra.mrb[192].mxu1 %vm688_vm0, %v7555_v57 }
0x1ddd   :  { %11947 = vmatprep.mubr.msk.bf16.mxu1 %vm688_vm0, %v7556_v43  ;;  %11952 = vmatpush3.bf16.msra.mxu1 %v12329_v3 }
0x1de4   :  { %11948 = vmatmul.mubr.msk.bf16.gmra.mrb[196].mxu1 %vm688_vm0, %v7557_v53 }
0x1e0a   :  { %v11929_v56 = vpop.f32.mrb[192].mxu0 }
0x1e0b   :  { %v7616_v27 = vpop.f32.mrb[193].mxu0 }
0x1e0c   :  { %v11930_v39 = vpop.f32.mrb[194].mxu0 }
0x1e0d   :  { %v7737_v0 = vpack.c.bf16 %v11930_v39, %v11929_v56  ;;  %v7619_v5 = vpop.f32.mrb[195].mxu0  ;;  %v19338_v56 = vld [vmem:[#allocation284_spill] sm:$0xff] }
0x1e0e   :  { %v7736_v4 = vpack.c.bf16 %v7619_v5, %v7616_v27 }
0x1e10   :  { %11953 = vmatprep.mubr.msk.bf16.mxu1 %vm1043_vm1, %v7736_v4 }
0x1e11   :  { %11954 = vmatmul.mubr.msk.bf16.vlgmr.msra.gmra.mrb[160].mxu1 %vm1043_vm1, %v7737_v0 }
0x1e12   :  { %v11933_v19 = vpop.f32.mrb[196].mxu0 }
0x1e13   :  { %v7632_v12 = vpop.f32.mrb[197].mxu0 }
0x1e14   :  { %v11934_v14 = vpop.f32.mrb[198].mxu0 }
0x1e15   :  { %v7739_v41 = vpack.c.bf16 %v11934_v14, %v11933_v19  ;;  %v7635_v60 = vpop.f32.mrb[199].mxu0  ;;  %v19339_v19 = vld [vmem:[#allocation288_spill] sm:$0xff] }
0x1e16   :  { %v7738_v44 = vpack.c.bf16 %v7635_v60, %v7632_v12 }
0x1e18   :  { %11957 = vmatprep.mubr.msk.bf16.mxu1 %vm1043_vm1, %v7738_v44 }
0x1e19   :  { %11958 = vmatmul.mubr.msk.bf16.gmra.mrb[164].mxu1 %vm1043_vm1, %v7739_v41 }
0x1eaf   :  { %v11945_v23 = vpop.f32.mrb[192].mxu1 }
0x1eb0   :  { %v7705_v52 = vpop.f32.mrb[193].mxu1 }
0x1eb1   :  { %v11946_v30 = vpop.f32.mrb[194].mxu1 }
0x1eb2   :  { %v7741_v46 = vpack.c.bf16 %v11946_v30, %v11945_v23  ;;  %v7708_v55 = vpop.f32.mrb[195].mxu1 }
0x1eb3   :  { %v7740_v37 = vpack.c.bf16 %v7708_v55, %v7705_v52 }
0x1eb5   :  { %11961 = vmatprep.mubr.msk.bf16.mxu1 %vm1043_vm1, %v7740_v37  ;;  %v12330_v37 = vld [vmem:[%s18901_s5 + $0x20] sm:$0xff]  }
0x1eb6   :  { %11962 = vmatmul.mubr.msk.bf16.gmra.mrb[168].mxu1 %vm1043_vm1, %v7741_v46  ;;  %11969 = vmatprep.subr.bf16.mxu0 %v12330_v37 }
0x1eb7   :  { %v11949_v16 = vpop.f32.mrb[196].mxu1  ;;  %11970 = vmatpush3.bf16.msra.mxu0 %v12330_v37 }
0x1eb8   :  { %v7721_v29 = vpop.f32.mrb[197].mxu1 }
0x1eb9   :  { %v11950_v58 = vpop.f32.mrb[198].mxu1 }
0x1eba   :  { %v7743_v61 = vpack.c.bf16 %v11950_v58, %v11949_v16  ;;  %v7724_v45 = vpop.f32.mrb[199].mxu1  ;;  %v12331_v16 = vld [vmem:[%s18901_s5 + $0x28] sm:$0xff]   ;;  %v12333_v58 = vld [vmem:[%s18901_s5 + $0x38] sm:$0xff]  }
0x1ebb   :  { %v7742_v11 = vpack.c.bf16 %v7724_v45, %v7721_v29  ;;  %11971 = vmatprep.subr.bf16.mxu0 %v12331_v16  ;;  %v12332_v29 = vld [vmem:[%s18901_s5 + $0x30] sm:$0xff]  }
0x1ebc   :  { %11972 = vmatpush3.bf16.msra.mxu0 %v12331_v16 }
0x1ebd   :  { %11965 = vmatprep.mubr.msk.bf16.mxu1 %vm1043_vm1, %v7742_v11  ;;  %11973 = vmatprep.subr.bf16.mxu0 %v12332_v29 }
0x1ebe   :  { %11966 = vmatmul.mubr.msk.bf16.gmra.mrb[172].mxu1 %vm1043_vm1, %v7743_v61 }
0x1ec0   :  { %11974 = vmatpush3.bf16.msra.mxu0 %v12332_v29 }
0x1ec1   :  { %11975 = vmatprep.subr.bf16.mxu0 %v12333_v58 }
0x1ec4   :  { %11976 = vmatpush3.bf16.msra.mxu0 %v12333_v58  ;;  %v19343_v58 = vld [vmem:[#allocation265_spill] sm:$0xff] }
0x1ee4   :  { %v11955_v49 = vpop.f32.mrb[160].mxu1 }
0x1ee5   :  { %v7892_v8 = vadd.f32 %v11955_v49, %v17410_v47  ;;  %v7810_v7 = vpop.f32.mrb[161].mxu1 }
0x1ee6   :  { %v7890_v54 = vadd.f32 %v17410_v47, %v7810_v7  ;;  %v11956_v10 = vpop.f32.mrb[162].mxu1 }
0x1ee7   :  { %v17415_v48 = vadd.f32 %v7892_v8, %v19332_v25  ;;  %v7813_v35 = vpop.f32.mrb[163].mxu1  ;;  %v7893_v13 = vadd.f32 %v11956_v10, %v17410_v47 }
0x1ee8   :  { %v7891_v62 = vadd.f32 %v17410_v47, %v7813_v35  ;;  %v17419_v32 = vadd.f32 %v7890_v54, %v19333_v40 }
0x1ee9   :  { %v7930_v33 = vsel %vm688_vm0, %v17415_v48, 0.0  ;;  %v7974_v24 = vmul.f32 %v17415_v48, %v17415_v48  ;;  %v17431_v63 = vadd.f32 %v7893_v13, %v19335_v21 }
0x1eea   :  { %7931 = vadd.xlane.f32.xlu0 %v7930_v33  ;;  %v17427_v26 = vadd.f32 %v7891_v62, %v19334_v20  ;;  %v7924_v18 = vsel %vm688_vm0, %v17419_v32, 0.0  ;;  %v7972_v22 = vmul.f32 %v17419_v32, %v17419_v32 }
0x1eeb   :  { %v7994_v2 = vsel %vm688_vm0, %v7974_v24, 0.0  ;;  %v7933_v59 = vsel %vm688_vm0, %v17431_v63, 0.0  ;;  %v7975_v3 = vmul.f32 %v17431_v63, %v17431_v63 }
0x1eec   :  { %7995 = vadd.xlane.f32.xlu1 %v7994_v2  ;;  %v11959_v34 = vpop.f32.mrb[164].mxu1  ;;  %v7927_v31 = vsel %vm688_vm0, %v17427_v26, 0.0  ;;  %v7988_v57 = vsel %vm688_vm0, %v7972_v22, 0.0  ;;  %v7973_v42 = vmul.f32 %v17427_v26, %v17427_v26 }
0x1eed   :  { %v7826_v50 = vpop.f32.mrb[165].mxu1  ;;  %v7896_v36 = vadd.f32 %v11959_v34, %v17410_v47  ;;  %v7997_v43 = vsel %vm688_vm0, %v7975_v3, 0.0 }
0x1eee   :  { %7925 = vadd.xlane.f32.xlu0 %v7924_v18  ;;  %v11960_v6 = vpop.f32.mrb[166].mxu1  ;;  %v7894_v28 = vadd.f32 %v17410_v47, %v7826_v50  ;;  %v7991_v0 = vsel %vm688_vm0, %v7973_v42, 0.0 }
0x1eef   :  { %v7829_v17 = vpop.f32.mrb[167].mxu1  ;;  %v17445_v51 = vadd.f32 %v7896_v36, %v19336_v9  ;;  %v7897_v38 = vadd.f32 %v11960_v6, %v17410_v47 }
0x1ef0   :  { %7928 = vadd.xlane.f32.xlu1 %v7927_v31  ;;  %v17454_v15 = vadd.f32 %v7894_v28, %v19337_v1  ;;  %v7895_v39 = vadd.f32 %v17410_v47, %v7829_v17 }
0x1ef1   :  { %v7942_v53 = vsel %vm688_vm0, %v17445_v51, 0.0  ;;  %v17459_v27 = vadd.f32 %v7897_v38, %v19338_v56  ;;  %v7978_v4 = vmul.f32 %v17445_v51, %v17445_v51  ;;  %v19340_v56 = vld [vmem:[#allocation266_spill] sm:$0xff] }
0x1ef2   :  { %7934 = vadd.xlane.f32.xlu0 %v7933_v59  ;;  %v7936_v5 = vsel %vm688_vm0, %v17454_v15, 0.0  ;;  %v17468_v12 = vadd.f32 %v7895_v39, %v19339_v19  ;;  %v7976_v60 = vmul.f32 %v17454_v15, %v17454_v15 }
0x1ef3   :  { %v7945_v14 = vsel %vm688_vm0, %v17459_v27, 0.0  ;;  %v8006_v41 = vsel %vm688_vm0, %v7978_v4, 0.0  ;;  %v7979_v23 = vmul.f32 %v17459_v27, %v17459_v27 }
0x1ef4   :  { %7989 = vadd.xlane.f32.xlu1 %v7988_v57  ;;  %v7939_v44 = vsel %vm688_vm0, %v17468_v12, 0.0  ;;  %v8000_v52 = vsel %vm688_vm0, %v7976_v60, 0.0  ;;  %v7977_v46 = vmul.f32 %v17468_v12, %v17468_v12 }
0x1ef5   :  { %v8009_v30 = vsel %vm688_vm0, %v7979_v23, 0.0  ;;  %v19341_v23 = vld [vmem:[#allocation268_spill] sm:$0xff] }
0x1ef6   :  { %7998 = vadd.xlane.f32.xlu0 %v7997_v43  ;;  %v8003_v55 = vsel %vm688_vm0, %v7977_v46, 0.0 }
0x1ef8   :  { %7943 = vadd.xlane.f32.xlu1 %v7942_v53 }
0x1efa   :  { %7992 = vadd.xlane.f32.xlu0 %v7991_v0 }
0x1efc   :  { %7937 = vadd.xlane.f32.xlu1 %v7936_v5 }
0x1efe   :  { %7946 = vadd.xlane.f32.xlu0 %v7945_v14 }
0x1f00   :  { %8007 = vadd.xlane.f32.xlu1 %v8006_v41 }
0x1f02   :  { %7940 = vadd.xlane.f32.xlu0 %v7939_v44 }
0x1f04   :  { %8001 = vadd.xlane.f32.xlu1 %v8000_v52 }
0x1f06   :  { %8010 = vadd.xlane.f32.xlu0 %v8009_v30  ;;  %v19342_v30 = vld [vmem:[#allocation267_spill] sm:$0xff] }
0x1f0a   :  { %8004 = vadd.xlane.f32.xlu0 %v8003_v55 }
0x1f77   :  { %v7932_v61 = vpop.xlane.xlu0 %7931 }
0x1f78   :  { %v17496_v45 = vmul.f32 0.015625, %v7932_v61 }
0x1f79   :  { %v7996_v11 = vpop.xlane.xlu1 %7995 }
0x1f7a   :  { %v8070_v8 = vmul.f32 %v17496_v45, %v17496_v45  ;;  %v8054_v7 = vmul.f32 0.015625, %v7996_v11 }
0x1f7b   :  { %v7926_v49 = vpop.xlane.xlu0 %7925 }
0x1f7c   :  { %v17500_v10 = vmul.f32 0.015625, %v7926_v49  ;;  %v8086_v62 = vsub.f32 %v8054_v7, %v8070_v8  ;;  %v8102_v7 = vsub.f32 %v17415_v48, %v17496_v45 }
0x1f7d   :  { %v7929_v54 = vpop.xlane.xlu1 %7928 }
0x1f7e   :  { %v8068_v13 = vmul.f32 %v17500_v10, %v17500_v10  ;;  %v8118_v21 = vadd.f32 1e-05, %v8086_v62  ;;  %v17508_v50 = vmul.f32 0.015625, %v7929_v54 }
0x1f7f   :  { %v7935_v25 = vpop.xlane.xlu0 %7934 }
0x1f80   :  { %v17502_v35 = vmul.f32 0.015625, %v7935_v25  ;;  %12918 = vrsqrt.f32 %v8118_v21  ;;  %v8069_v22 = vmul.f32 %v17508_v50, %v17508_v50 }
0x1f81   :  { %v7990_v40 = vpop.xlane.xlu1 %7989 }
0x1f82   :  { %v8052_v33 = vmul.f32 0.015625, %v7990_v40  ;;  %v8071_v20 = vmul.f32 %v17502_v35, %v17502_v35  ;;  %v8103_v54 = vsub.f32 %v17431_v63, %v17502_v35  ;;  %v8100_v63 = vsub.f32 %v17419_v32, %v17500_v10 }
0x1f83   :  { %v7999_v24 = vpop.xlane.xlu0 %7998 }
0x1f84   :  { %v8084_v2 = vsub.f32 %v8052_v33, %v8068_v13  ;;  %v8055_v34 = vmul.f32 0.015625, %v7999_v24 }
0x1f85   :  { %v7944_v18 = vpop.xlane.xlu1 %7943 }
0x1f86   :  { %v8087_v6 = vsub.f32 %v8055_v34, %v8071_v20  ;;  %v8116_v17 = vadd.f32 1e-05, %v8084_v2  ;;  %v17512_v28 = vmul.f32 0.015625, %v7944_v18 }
0x1f87   :  { %v7993_v36 = vpop.xlane.xlu0 %7992 }
0x1f88   :  { %v8119_v31 = vadd.f32 1e-05, %v8087_v6  ;;  %v8053_v59 = vmul.f32 0.015625, %v7993_v36  ;;  %v8074_v14 = vmul.f32 %v17512_v28, %v17512_v28  ;;  %v8101_v36 = vsub.f32 %v17427_v26, %v17508_v50 }
0x1f89   :  { %v7938_v3 = vpop.xlane.xlu1 %7937  ;;  %v11963_v9 = vpop.f32.mrb[168].mxu1 }
0x1f8a   :  { %12920 = vrsqrt.f32 %v8119_v31  ;;  %v7900_v57 = vadd.f32 %v11963_v9, %v17410_v47  ;;  %v7842_v38 = vpop.f32.mrb[169].mxu1  ;;  %v8085_v43 = vsub.f32 %v8053_v59, %v8069_v22  ;;  %v17522_v41 = vmul.f32 0.015625, %v7938_v3  ;;  %v12919_v13 = vpop.eup %12918 }
0x1f8b   :  { %v7947_v42 = vpop.xlane.xlu0 %7946  ;;  %v7898_v1 = vadd.f32 %v17410_v47, %v7842_v38  ;;  %v11964_v53 = vpop.f32.mrb[170].mxu1  ;;  %12922 = vrsqrt.f32 %v8116_v17  ;;  %v8150_v3 = vmul.f32 %v12919_v13, %v8102_v7  ;;  %v19345_v7 = vld [vmem:[#allocation269_spill] sm:$0xff] }
0x1f8c   :  { %v17517_v39 = vadd.f32 %v7900_v57, %v19340_v56  ;;  %v7845_v0 = vpop.f32.mrb[171].mxu1  ;;  %v8117_v5 = vadd.f32 1e-05, %v8085_v43  ;;  %v7901_v4 = vadd.f32 %v11964_v53, %v17410_v47  ;;  %v17533_v16 = vmul.f32 0.015625, %v7947_v42  ;;  %v17567_v57 = vld [vmem:[%s18903_s7 + $0x12] ss:$0 sm:$0xff] }
0x1f8d   :  { %v8008_v19 = vpop.xlane.xlu1 %8007  ;;  %v7899_v44 = vadd.f32 %v17410_v47, %v7845_v0  ;;  %v17526_v52 = vadd.f32 %v7898_v1, %v19341_v23  ;;  %v8072_v25 = vmul.f32 %v17522_v41, %v17522_v41  ;;  %v19344_v23 = vld [vmem:[#allocation271_spill] sm:$0xff] }
0x1f8e   :  { %v8058_v60 = vmul.f32 0.015625, %v8008_v19  ;;  %12924 = vrsqrt.f32 %v8117_v5  ;;  %v17529_v46 = vadd.f32 %v7901_v4, %v19342_v30  ;;  %v7954_v37 = vsel %vm688_vm0, %v17517_v39, 0.0 }
0x1f8f   :  { %v7941_v55 = vpop.xlane.xlu0 %7940  ;;  %7955 = vadd.xlane.f32.xlu1 %v7954_v37  ;;  %v17536_v61 = vadd.f32 %v7899_v44, %v19343_v58  ;;  %v7948_v2 = vsel %vm688_vm0, %v17526_v52, 0.0  ;;  %v7982_v48 = vmul.f32 %v17517_v39, %v17517_v39  ;;  %v8075_v35 = vmul.f32 %v17533_v16, %v17533_v16  ;;  %v17588_v58 = vld [vmem:[%s18903_s7 + $0x13] ss:$0 sm:$0xff] }
0x1f90   :  { %v8090_v29 = vsub.f32 %v8058_v60, %v8074_v14  ;;  %v7957_v49 = vsel %vm688_vm0, %v17529_v46, 0.0  ;;  %v17546_v24 = vmul.f32 0.015625, %v7941_v55  ;;  %v7983_v22 = vmul.f32 %v17529_v46, %v17529_v46 }
0x1f91   :  { %v8002_v11 = vpop.xlane.xlu1 %8001  ;;  %v11967_v8 = vpop.f32.mrb[172].mxu1  ;;  %7958 = vadd.xlane.f32.xlu0 %v7957_v49  ;;  %v7951_v31 = vsel %vm688_vm0, %v17536_v61, 0.0  ;;  %v7980_v9 = vmul.f32 %v17526_v52, %v17526_v52  ;;  %v8018_v43 = vsel %vm688_vm0, %v7982_v48, 0.0  ;;  %v7981_v4 = vmul.f32 %v17536_v61, %v17536_v61 }
0x1f92   :  { %v8056_v62 = vmul.f32 0.015625, %v8002_v11  ;;  %v7858_v40 = vpop.f32.mrb[173].mxu1  ;;  %v8122_v33 = vadd.f32 1e-05, %v8090_v29  ;;  %v8073_v26 = vmul.f32 %v17546_v24, %v17546_v24  ;;  %v7904_v50 = vadd.f32 %v11967_v8, %v17410_v47 }
0x1f93   :  { %v8011_v20 = vpop.xlane.xlu0 %8010  ;;  %v11968_v34 = vpop.f32.mrb[174].mxu1  ;;  %7949 = vadd.xlane.f32.xlu1 %v7948_v2  ;;  %v8021_v5 = vsel %vm688_vm0, %v7983_v22, 0.0  ;;  %v8166_v14 = vmul.f32 %v8150_v3, %v17567_v57  ;;  %v7902_v55 = vadd.f32 %v17410_v47, %v7858_v40  ;;  %v8012_v37 = vsel %vm688_vm0, %v7980_v9, 0.0 }
0x1f94   :  { %v12921_v45 = vpop.eup %12920  ;;  %v8088_v21 = vsub.f32 %v8056_v62, %v8072_v25  ;;  %v8059_v18 = vmul.f32 0.015625, %v8011_v20  ;;  %v7861_v6 = vpop.f32.mrb[175].mxu1  ;;  %12926 = vrsqrt.f32 %v8122_v33  ;;  %v7905_v1 = vadd.f32 %v11968_v34, %v17410_v47  ;;  %v19346_v20 = vld [vmem:[#allocation272_spill] sm:$0xff] }
0x1f95   :  { %v8151_v17 = vmul.f32 %v12921_v45, %v8103_v54  ;;  %v12923_v59 = vpop.eup %12922  ;;  %7952 = vadd.xlane.f32.xlu0 %v7951_v31  ;;  %v17580_v30 = vadd.f32 %v7904_v50, %v19344_v23  ;;  %v7903_v25 = vadd.f32 %v17410_v47, %v7861_v6  ;;  %v8015_v62 = vsel %vm688_vm0, %v7981_v4, 0.0  ;;  %v19347_v45 = vld [vmem:[#allocation270_spill] sm:$0xff]  ;;  %v12337_v23 = vld [vmem:[%s18902_s6 + $0x58] sm:$0xff]  }
0x1f96   :  { %v8120_v32 = vadd.f32 1e-05, %v8088_v21  ;;  %v8091_v10 = vsub.f32 %v8059_v18, %v8075_v35  ;;  %v8148_v19 = vmul.f32 %v12923_v59, %v8100_v63  ;;  %v17595_v54 = vadd.f32 %v7905_v1, %v19345_v7 }
0x1f97   :  { %v8005_v38 = vpop.xlane.xlu0 %8004  ;;  %8019 = vadd.xlane.f32.xlu1 %v8018_v43  ;;  %v8167_v0 = vmul.f32 %v8151_v17, %v17567_v57  ;;  %v17606_v33 = vadd.f32 %v8166_v14, %v17588_v58  ;;  %v17609_v2 = vadd.f32 %v7902_v55, %v19346_v20  ;;  %v7966_v34 = vsel %vm688_vm0, %v17580_v30, 0.0  ;;  %v12334_v14 = vld [vmem:[%s18902_s6 + $0x40] sm:$0xff]  }
0x1f98   :  { %12928 = vrsqrt.f32 %v8120_v32  ;;  %v8123_v42 = vadd.f32 1e-05, %v8091_v10  ;;  %v8057_v53 = vmul.f32 0.015625, %v8005_v38  ;;  %v12925_v56 = vpop.eup %12924  ;;  %v8164_v29 = vmul.f32 %v8148_v19, %v17567_v57  ;;  %11993 = vmatprep.subr.bf16.mxu0 %v12334_v14  ;;  %v12338_v55 = vld [vmem:[%s18902_s6 + $0x60] sm:$0xff]  }
0x1f99   :  { %8022 = vadd.xlane.f32.xlu0 %v8021_v5  ;;  %v8149_v44 = vmul.f32 %v12925_v56, %v8101_v36  ;;  %v17592_v8 = vadd.f32 %v8167_v0, %v17588_v58  ;;  %v17616_v63 = vadd.f32 %v7903_v25, %v19347_v45  ;;  %v7969_v21 = vsel %vm688_vm0, %v17595_v54, 0.0 }
0x1f9a   :  { %12930 = vrsqrt.f32 %v8123_v42  ;;  %v8089_v60 = vsub.f32 %v8057_v53, %v8073_v26  ;;  %v17600_v40 = vadd.f32 %v8164_v29, %v17588_v58  ;;  %v8104_v6 = vsub.f32 %v17454_v15, %v17522_v41  ;;  %v12340_v29 = vld [vmem:[%s18902_s6 + $0x70] sm:$0xff]  }
0x1f9b   :  { %8013 = vadd.xlane.f32.xlu1 %v8012_v37  ;;  %v8165_v49 = vmul.f32 %v8149_v44, %v17567_v57  ;;  %v8197_v35 = vpack.c.bf16 %v17592_v8, %v17606_v33  ;;  %v8107_v36 = vsub.f32 %v17459_v27, %v17533_v16  ;;  %v7960_v17 = vsel %vm688_vm0, %v17609_v2, 0.0  ;;  %v12336_v44 = vld [vmem:[%s18902_s6 + $0x50] sm:$0xff]   ;;  %v12339_v37 = vld [vmem:[%s18902_s6 + $0x68] sm:$0xff]  }
0x1f9c   :  { %v8121_v11 = vadd.f32 1e-05, %v8089_v60  ;;  %v7984_v31 = vmul.f32 %v17609_v2, %v17609_v2  ;;  %v8106_v59 = vsub.f32 %v17445_v51, %v17512_v28  ;;  %v7963_v3 = vsel %vm688_vm0, %v17616_v63, 0.0  ;;  %v12335_v60 = vld [vmem:[%s18902_s6 + $0x48] sm:$0xff]  }
0x1f9d   :  { %8016 = vadd.xlane.f32.xlu0 %v8015_v62  ;;  %v17603_v13 = vadd.f32 %v8165_v49, %v17588_v58  ;;  %v7985_v15 = vmul.f32 %v17616_v63, %v17616_v63  ;;  %v8105_v32 = vsub.f32 %v17468_v12, %v17546_v24  ;;  %v7986_v9 = vmul.f32 %v17580_v30, %v17580_v30 }
0x1f9e   :  { %12932 = vrsqrt.f32 %v8121_v11  ;;  %v12927_v48 = vpop.eup %12926  ;;  %v8024_v10 = vsel %vm688_vm0, %v7984_v31, 0.0  ;;  %v7987_v50 = vmul.f32 %v17595_v54, %v17595_v54  ;;  %v12341_v11 = vld [vmem:[%s18902_s6 + $0x78] sm:$0xff]  }
0x1f9f   :  { %7967 = vadd.xlane.f32.xlu1 %v7966_v34  ;;  %v8196_v47 = vpack.c.bf16 %v17603_v13, %v17600_v40  ;;  %v8154_v16 = vmul.f32 %v12927_v48, %v8106_v59  ;;  %v8027_v26 = vsel %vm688_vm0, %v7985_v15, 0.0  ;;  %v8030_v24 = vsel %vm688_vm0, %v7986_v9, 0.0 }
0x1fa0   :  { %v8033_v53 = vsel %vm688_vm0, %v7987_v50, 0.0 }
0x1fa1   :  { %11977 = vmatprep.mubr.msk.bf16.mxu0 %vm688_vm0, %v8196_v47  ;;  %7970 = vadd.xlane.f32.xlu0 %v7969_v21  ;;  %v8170_v12 = vmul.f32 %v8154_v16, %v17567_v57 }
0x1fa2   :  { %v12929_v18 = vpop.eup %12928  ;;  %11978 = vmatmul.mubr.msk.bf16.vlgmr.msra.gmra.mrb[200].mxu0 %vm688_vm0, %v8197_v35 }
0x1fa3   :  { %7961 = vadd.xlane.f32.xlu1 %v7960_v17  ;;  %v8152_v27 = vmul.f32 %v12929_v18, %v8104_v6  ;;  %v17662_v5 = vadd.f32 %v8170_v12, %v17588_v58  ;;  %11994 = vmatpush3.bf16.msra.mxu0 %v12334_v14 }
0x1fa4   :  { %v12931_v22 = vpop.eup %12930  ;;  %11995 = vmatprep.subr.bf16.mxu0 %v12335_v60 }
0x1fa5   :  { %v8155_v41 = vmul.f32 %v12931_v22, %v8107_v36  ;;  %7964 = vadd.xlane.f32.xlu0 %v7963_v3  ;;  %v8168_v43 = vmul.f32 %v8152_v27, %v17567_v57 }
0x1fa7   :  { %8025 = vadd.xlane.f32.xlu1 %v8024_v10  ;;  %v8171_v28 = vmul.f32 %v8155_v41, %v17567_v57  ;;  %v17656_v56 = vadd.f32 %v8168_v43, %v17588_v58  ;;  %11996 = vmatpush3.bf16.msra.mxu0 %v12335_v60 }
0x1fa8   :  { %v12933_v51 = vpop.eup %12932  ;;  %11997 = vmatprep.subr.bf16.mxu0 %v12336_v44 }
0x1fa9   :  { %v8153_v38 = vmul.f32 %v12933_v51, %v8105_v32  ;;  %8028 = vadd.xlane.f32.xlu0 %v8027_v26  ;;  %v17652_v1 = vadd.f32 %v8171_v28, %v17588_v58 }
0x1fab   :  { %v8169_v42 = vmul.f32 %v8153_v38, %v17567_v57  ;;  %8031 = vadd.xlane.f32.xlu1 %v8030_v24  ;;  %v8199_v19 = vpack.c.bf16 %v17652_v1, %v17662_v5  ;;  %11998 = vmatpush3.bf16.msra.mxu0 %v12336_v44 }
0x1fac   :  { %11999 = vmatprep.subr.bf16.mxu0 %v12337_v23 }
0x1fad   :  { %v17659_v0 = vadd.f32 %v8169_v42, %v17588_v58  ;;  %8034 = vadd.xlane.f32.xlu0 %v8033_v53 }
0x1faf   :  { %v8198_v4 = vpack.c.bf16 %v17659_v0, %v17656_v56  ;;  %12000 = vmatpush3.bf16.msra.mxu0 %v12337_v23 }
0x1fb0   :  { %12001 = vmatprep.subr.bf16.mxu0 %v12338_v55 }
0x1fb1   :  { %11981 = vmatprep.mubr.msk.bf16.mxu0 %vm688_vm0, %v8198_v4 }
0x1fb2   :  { %11982 = vmatmul.mubr.msk.bf16.gmra.mrb[204].mxu0 %vm688_vm0, %v8199_v19 }
0x1fb3   :  { %12002 = vmatpush3.bf16.msra.mxu0 %v12338_v55 }
0x1fb4   :  { %12003 = vmatprep.subr.bf16.mxu0 %v12339_v37 }
0x1fb7   :  { %12004 = vmatpush3.bf16.msra.mxu0 %v12339_v37 }
0x1fb8   :  { %12005 = vmatprep.subr.bf16.mxu0 %v12340_v29 }
0x1fbb   :  { %12006 = vmatpush3.bf16.msra.mxu0 %v12340_v29 }
0x1fbc   :  { %12007 = vmatprep.subr.bf16.mxu0 %v12341_v11 }
0x1fbf   :  { %12008 = vmatpush3.bf16.msra.mxu0 %v12341_v11 }
0x201c   :  { %v7956_v49 = vpop.xlane.xlu1 %7955 }
0x201d   :  { %v8046_v62 = vmul.f32 0.015625, %v7956_v49 }
0x201e   :  { %v7959_v7 = vpop.xlane.xlu0 %7958 }
0x201f   :  { %v8047_v34 = vmul.f32 0.015625, %v7959_v7  ;;  %v8078_v48 = vmul.f32 %v8046_v62, %v8046_v62  ;;  %v8110_v37 = vsub.f32 %v17517_v39, %v8046_v62 }
0x2020   :  { %v7950_v25 = vpop.xlane.xlu1 %7949 }
0x2021   :  { %v8044_v45 = vmul.f32 0.015625, %v7950_v25  ;;  %v8079_v18 = vmul.f32 %v8047_v34, %v8047_v34  ;;  %v8111_v60 = vsub.f32 %v17529_v46, %v8047_v34 }
0x2022   :  { %v7953_v20 = vpop.xlane.xlu0 %7952 }
0x2023   :  { %v8045_v6 = vmul.f32 0.015625, %v7953_v20  ;;  %v8076_v22 = vmul.f32 %v8044_v45, %v8044_v45  ;;  %v8108_v7 = vsub.f32 %v17526_v52, %v8044_v45 }
0x2024   :  { %v8020_v47 = vpop.xlane.xlu1 %8019 }
0x2025   :  { %v8062_v35 = vmul.f32 0.015625, %v8020_v47  ;;  %v8077_v41 = vmul.f32 %v8045_v6, %v8045_v6  ;;  %v8109_v46 = vsub.f32 %v17536_v61, %v8045_v6 }
0x2026   :  { %v8023_v21 = vpop.xlane.xlu0 %8022 }
0x2027   :  { %v8094_v36 = vsub.f32 %v8062_v35, %v8078_v48  ;;  %v8063_v17 = vmul.f32 0.015625, %v8023_v21 }
0x2028   :  { %v8014_v31 = vpop.xlane.xlu1 %8013 }
0x2029   :  { %v8126_v59 = vadd.f32 1e-05, %v8094_v36  ;;  %v8095_v3 = vsub.f32 %v8063_v17, %v8079_v18  ;;  %v8060_v15 = vmul.f32 0.015625, %v8014_v31 }
0x202a   :  { %v8017_v27 = vpop.xlane.xlu0 %8016 }
0x202b   :  { %v8127_v16 = vadd.f32 1e-05, %v8095_v3  ;;  %v8092_v32 = vsub.f32 %v8060_v15, %v8076_v22  ;;  %v8061_v10 = vmul.f32 0.015625, %v8017_v27  ;;  %12934 = vrsqrt.f32 %v8126_v59 }
0x202c   :  { %v7968_v9 = vpop.xlane.xlu1 %7967 }
0x202d   :  { %12936 = vrsqrt.f32 %v8127_v16  ;;  %v8124_v51 = vadd.f32 1e-05, %v8092_v32  ;;  %v8093_v28 = vsub.f32 %v8061_v10, %v8077_v41  ;;  %v8050_v42 = vmul.f32 0.015625, %v7968_v9 }
0x202e   :  { %v7971_v26 = vpop.xlane.xlu0 %7970 }
0x202f   :  { %12938 = vrsqrt.f32 %v8124_v51  ;;  %v8125_v50 = vadd.f32 1e-05, %v8093_v28  ;;  %v8051_v44 = vmul.f32 0.015625, %v7971_v26  ;;  %v8082_v25 = vmul.f32 %v8050_v42, %v8050_v42 }
0x2030   :  { %v7962_v38 = vpop.xlane.xlu1 %7961 }
0x2031   :  { %12940 = vrsqrt.f32 %v8125_v50  ;;  %v8048_v43 = vmul.f32 0.015625, %v7962_v38  ;;  %v8083_v34 = vmul.f32 %v8051_v44, %v8051_v44 }
0x2032   :  { %v7965_v12 = vpop.xlane.xlu0 %7964 }
0x2033   :  { %v8049_v24 = vmul.f32 0.015625, %v7965_v12  ;;  %v8080_v4 = vmul.f32 %v8048_v43, %v8048_v43  ;;  %v8112_v26 = vsub.f32 %v17609_v2, %v8048_v43 }
0x2034   :  { %v8026_v53 = vpop.xlane.xlu1 %8025 }
0x2035   :  { %v8064_v19 = vmul.f32 0.015625, %v8026_v53  ;;  %v12935_v14 = vpop.eup %12934  ;;  %v8081_v29 = vmul.f32 %v8049_v24, %v8049_v24  ;;  %v8113_v38 = vsub.f32 %v17616_v63, %v8049_v24 }
0x2036   :  { %v8029_v23 = vpop.xlane.xlu0 %8028  ;;  %v8158_v36 = vmul.f32 %v12935_v14, %v8110_v37 }
0x2037   :  { %v12937_v55 = vpop.eup %12936  ;;  %v8096_v11 = vsub.f32 %v8064_v19, %v8080_v4  ;;  %v8065_v49 = vmul.f32 0.015625, %v8029_v23  ;;  %v8114_v4 = vsub.f32 %v17580_v30, %v8050_v42  ;;  %v8115_v23 = vsub.f32 %v17595_v54, %v8051_v44 }
0x2038   :  { %v8032_v20 = vpop.xlane.xlu1 %8031  ;;  %v8159_v47 = vmul.f32 %v12937_v55, %v8111_v60  ;;  %v8174_v41 = vmul.f32 %v8158_v36, %v17567_v57 }
0x2039   :  { %v12939_v48 = vpop.eup %12938  ;;  %v8128_v35 = vadd.f32 1e-05, %v8096_v11  ;;  %v8097_v21 = vsub.f32 %v8065_v49, %v8081_v29  ;;  %v8066_v18 = vmul.f32 0.015625, %v8032_v20  ;;  %v8213_v49 = vld [vmem:[%s18903_s7 + $0x14] ss:$0 sm:$0xff] }
0x203a   :  { %v8035_v17 = vpop.xlane.xlu0 %8034  ;;  %v8156_v31 = vmul.f32 %v12939_v48, %v8108_v7  ;;  %v8175_v39 = vmul.f32 %v8159_v47, %v17567_v57  ;;  %v17712_v9 = vadd.f32 %v8174_v41, %v17588_v58 }
0x203b   :  { %v12941_v62 = vpop.eup %12940  ;;  %12942 = vrsqrt.f32 %v8128_v35  ;;  %v8129_v22 = vadd.f32 1e-05, %v8097_v21  ;;  %v8098_v59 = vsub.f32 %v8066_v18, %v8082_v25  ;;  %v8067_v52 = vmul.f32 0.015625, %v8035_v17 }
0x203c   :  { %v8157_v45 = vmul.f32 %v12941_v62, %v8109_v46  ;;  %v8172_v3 = vmul.f32 %v8156_v31, %v17567_v57  ;;  %v17703_v16 = vadd.f32 %v8175_v39, %v17588_v58 }
0x203d   :  { %12944 = vrsqrt.f32 %v8129_v22  ;;  %v8130_v15 = vadd.f32 1e-05, %v8098_v59  ;;  %v8099_v27 = vsub.f32 %v8067_v52, %v8083_v34 }
0x203e   :  { %v8173_v61 = vmul.f32 %v8157_v45, %v17567_v57  ;;  %v17706_v32 = vadd.f32 %v8172_v3, %v17588_v58  ;;  %v8201_v28 = vpack.c.bf16 %v17703_v16, %v17712_v9 }
0x203f   :  { %12946 = vrsqrt.f32 %v8130_v15  ;;  %v8131_v6 = vadd.f32 1e-05, %v8099_v27 }
0x2040   :  { %v17709_v10 = vadd.f32 %v8173_v61, %v17588_v58 }
0x2041   :  { %12948 = vrsqrt.f32 %v8131_v6 }
0x2042   :  { %v8200_v51 = vpack.c.bf16 %v17709_v10, %v17706_v32 }
0x2044   :  { %11985 = vmatprep.mubr.msk.bf16.mxu0 %vm688_vm0, %v8200_v51 }
0x2045   :  { %v12943_v50 = vpop.eup %12942  ;;  %11986 = vmatmul.mubr.msk.bf16.gmra.mrb[208].mxu0 %vm688_vm0, %v8201_v28 }
0x2046   :  { %v8160_v12 = vmul.f32 %v12943_v50, %v8112_v26 }
0x2047   :  { %v12945_v53 = vpop.eup %12944 }
0x2048   :  { %v8161_v19 = vmul.f32 %v12945_v53, %v8113_v38  ;;  %v8176_v14 = vmul.f32 %v8160_v12, %v17567_v57 }
0x2049   :  { %v12947_v60 = vpop.eup %12946 }
0x204a   :  { %v8177_v55 = vmul.f32 %v8161_v19, %v17567_v57  ;;  %v8162_v2 = vmul.f32 %v12947_v60, %v8114_v4  ;;  %v17727_v37 = vadd.f32 %v8176_v14, %v17588_v58 }
0x204b   :  { %v12949_v43 = vpop.eup %12948 }
0x204c   :  { %v17730_v29 = vadd.f32 %v8177_v55, %v17588_v58  ;;  %v8163_v63 = vmul.f32 %v12949_v43, %v8115_v23  ;;  %v8178_v24 = vmul.f32 %v8162_v2, %v17567_v57 }
0x204e   :  { %v8202_v30 = vpack.c.bf16 %v17730_v29, %v17727_v37  ;;  %v8179_v42 = vmul.f32 %v8163_v63, %v17567_v57  ;;  %v17738_v54 = vadd.f32 %v8178_v24, %v17588_v58 }
0x2050   :  { %11989 = vmatprep.mubr.msk.bf16.mxu0 %vm688_vm0, %v8202_v30  ;;  %v17741_v44 = vadd.f32 %v8179_v42, %v17588_v58 }
0x2052   :  { %v8203_v11 = vpack.c.bf16 %v17741_v44, %v17738_v54 }
0x2054   :  { %11990 = vmatmul.mubr.msk.bf16.gmra.mrb[212].mxu0 %vm688_vm0, %v8203_v11 }
0x2075   :  { %v11979_v7 = vpop.f32.mrb[200].mxu0 }
0x2076   :  { %v8305_v25 = vadd.f32 %v11979_v7, %v8213_v49  ;;  %v8296_v57 = vpop.f32.mrb[201].mxu0 }
0x2077   :  { %v8297_v20 = vadd.f32 %v8296_v57, %v8213_v49  ;;  %v11980_v47 = vpop.f32.mrb[202].mxu0 }
0x2078   :  { %v8308_v48 = vadd.f32 %v11980_v47, %v8213_v49  ;;  %v8299_v35 = vpop.f32.mrb[203].mxu0  ;;  %v8361_v18 = vmax.f32 %v8305_v25, 0.0 }
0x2079   :  { %v8300_v21 = vadd.f32 %v8299_v35, %v8213_v49  ;;  %v8359_v36 = vmax.f32 %v8297_v20, 0.0 }
0x207a   :  { %v8362_v58 = vmax.f32 %v8308_v48, 0.0 }
0x207b   :  { %v8360_v46 = vmax.f32 %v8300_v21, 0.0 }
0x207c   :  { %v8376_v34 = vpack.c.bf16 %v8362_v58, %v8361_v18  ;;  %v17752_v58 = vld [vmem:[%s18903_s7 + $0x15] ss:$0 sm:$0xff] }
0x207d   :  { %v8375_v17 = vpack.c.bf16 %v8360_v46, %v8359_v36 }
0x207f   :  { %12009 = vmatprep.mubr.bf16.mxu0 %v8375_v17 }
0x2080   :  { %12010 = vmatmul.mubr.bf16.vlgmr.msra.gmra.mrb[216].mxu0 %v8376_v34 }
0x2085   :  { %v11983_v31 = vpop.f32.mrb[204].mxu0 }
0x2086   :  { %v8321_v39 = vadd.f32 %v11983_v31, %v8213_v49  ;;  %v8312_v62 = vpop.f32.mrb[205].mxu0 }
0x2087   :  { %v8313_v22 = vadd.f32 %v8312_v62, %v8213_v49  ;;  %v11984_v59 = vpop.f32.mrb[206].mxu0 }
0x2088   :  { %v8324_v52 = vadd.f32 %v11984_v59, %v8213_v49  ;;  %v8315_v45 = vpop.f32.mrb[207].mxu0  ;;  %v8365_v15 = vmax.f32 %v8321_v39, 0.0 }
0x2089   :  { %v8316_v3 = vadd.f32 %v8315_v45, %v8213_v49  ;;  %v8363_v41 = vmax.f32 %v8313_v22, 0.0 }
0x208a   :  { %v8366_v27 = vmax.f32 %v8324_v52, 0.0 }
0x208b   :  { %v8364_v61 = vmax.f32 %v8316_v3, 0.0 }
0x208c   :  { %v8378_v6 = vpack.c.bf16 %v8366_v27, %v8365_v15 }
0x208d   :  { %v8377_v51 = vpack.c.bf16 %v8364_v61, %v8363_v41 }
0x208f   :  { %12013 = vmatprep.mubr.bf16.mxu0 %v8377_v51 }
0x2090   :  { %12014 = vmatmul.mubr.bf16.gmra.mrb[220].mxu0 %v8378_v6 }
0x2118   :  { %v11987_v28 = vpop.f32.mrb[208].mxu0 }
0x2119   :  { %v8337_v26 = vadd.f32 %v11987_v28, %v8213_v49  ;;  %v8328_v50 = vpop.f32.mrb[209].mxu0 }
0x211a   :  { %v8329_v38 = vadd.f32 %v8328_v50, %v8213_v49  ;;  %v11988_v12 = vpop.f32.mrb[210].mxu0 }
0x211b   :  { %v8340_v53 = vadd.f32 %v11988_v12, %v8213_v49  ;;  %v8331_v4 = vpop.f32.mrb[211].mxu0  ;;  %v8369_v14 = vmax.f32 %v8337_v26, 0.0 }
0x211c   :  { %v8332_v19 = vadd.f32 %v8331_v4, %v8213_v49  ;;  %v8367_v23 = vmax.f32 %v8329_v38, 0.0 }
0x211d   :  { %v8370_v60 = vmax.f32 %v8340_v53, 0.0 }
0x211e   :  { %v8368_v55 = vmax.f32 %v8332_v19, 0.0 }
0x211f   :  { %v8380_v2 = vpack.c.bf16 %v8370_v60, %v8369_v14 }
0x2120   :  { %v8379_v43 = vpack.c.bf16 %v8368_v55, %v8367_v23 }
0x2122   :  { %12017 = vmatprep.mubr.bf16.mxu0 %v8379_v43 }
0x2123   :  { %12018 = vmatmul.mubr.bf16.gmra.mrb[224].mxu0 %v8380_v2 }
0x2127   :  { %v11991_v63 = vpop.f32.mrb[212].mxu0 }
0x2128   :  { %v8353_v24 = vadd.f32 %v11991_v63, %v8213_v49  ;;  %v8344_v30 = vpop.f32.mrb[213].mxu0 }
0x2129   :  { %v8345_v42 = vadd.f32 %v8344_v30, %v8213_v49  ;;  %v11992_v11 = vpop.f32.mrb[214].mxu0 }
0x212a   :  { %v8356_v7 = vadd.f32 %v11992_v11, %v8213_v49  ;;  %v8347_v25 = vpop.f32.mrb[215].mxu0  ;;  %v8373_v20 = vmax.f32 %v8353_v24, 0.0 }
0x212b   :  { %v8348_v57 = vadd.f32 %v8347_v25, %v8213_v49  ;;  %v8371_v48 = vmax.f32 %v8345_v42, 0.0 }
0x212c   :  { %v8374_v47 = vmax.f32 %v8356_v7, 0.0 }
0x212d   :  { %v8372_v35 = vmax.f32 %v8348_v57, 0.0 }
0x212e   :  { %v8382_v21 = vpack.c.bf16 %v8374_v47, %v8373_v20 }
0x212f   :  { %v8381_v18 = vpack.c.bf16 %v8372_v35, %v8371_v48 }
0x2131   :  { %12021 = vmatprep.mubr.bf16.mxu0 %v8381_v18 }
0x2132   :  { %12022 = vmatmul.mubr.bf16.gmra.mrb[228].mxu0 %v8382_v21 }
0x2153   :  { %v12011_v36 = vpop.f32.mrb[216].mxu0 }
0x2154   :  { %v8492_v46 = vadd.f32 %v12011_v36, %v17752_v58  ;;  %v8483_v34 = vpop.f32.mrb[217].mxu0 }
0x2155   :  { %v8484_v17 = vadd.f32 %v8483_v34, %v17752_v58  ;;  %v12012_v49 = vpop.f32.mrb[218].mxu0 }
0x2156   :  { %v17757_v31 = vadd.f32 %v8492_v46, %v17606_v33  ;;  %v8495_v39 = vadd.f32 %v12012_v49, %v17752_v58  ;;  %v8486_v62 = vpop.f32.mrb[219].mxu0 }
0x2157   :  { %v8487_v22 = vadd.f32 %v8486_v62, %v17752_v58  ;;  %v17762_v59 = vadd.f32 %v8484_v17, %v17600_v40 }
0x2158   :  { %v17765_v52 = vadd.f32 %v8495_v39, %v17592_v8  ;;  %v8570_v45 = vsel %vm688_vm0, %v17757_v31, 0.0  ;;  %v8614_v40 = vmul.f32 %v17757_v31, %v17757_v31 }
0x2159   :  { %8571 = vadd.xlane.f32.xlu1 %v8570_v45  ;;  %v17770_v3 = vadd.f32 %v8487_v22, %v17603_v13  ;;  %v8564_v15 = vsel %vm688_vm0, %v17762_v59, 0.0  ;;  %v8612_v41 = vmul.f32 %v17762_v59, %v17762_v59 }
0x215a   :  { %v8573_v33 = vsel %vm688_vm0, %v17765_v52, 0.0  ;;  %v8615_v27 = vmul.f32 %v17765_v52, %v17765_v52  ;;  %v8634_v13 = vsel %vm688_vm0, %v8614_v40, 0.0 }
0x215b   :  { %8574 = vadd.xlane.f32.xlu0 %v8573_v33  ;;  %v8567_v8 = vsel %vm688_vm0, %v17770_v3, 0.0  ;;  %v8613_v51 = vmul.f32 %v17770_v3, %v17770_v3  ;;  %v8628_v12 = vsel %vm688_vm0, %v8612_v41, 0.0 }
0x215c   :  { %v8637_v6 = vsel %vm688_vm0, %v8615_v27, 0.0 }
0x215d   :  { %8565 = vadd.xlane.f32.xlu1 %v8564_v15  ;;  %v8631_v60 = vsel %vm688_vm0, %v8613_v51, 0.0 }
0x215f   :  { %8568 = vadd.xlane.f32.xlu0 %v8567_v8 }
0x2161   :  { %8635 = vadd.xlane.f32.xlu1 %v8634_v13 }
0x2163   :  { %v12015_v61 = vpop.f32.mrb[220].mxu0  ;;  %8638 = vadd.xlane.f32.xlu0 %v8637_v6 }
0x2164   :  { %v8508_v28 = vadd.f32 %v12015_v61, %v17752_v58  ;;  %v8499_v26 = vpop.f32.mrb[221].mxu0 }
0x2165   :  { %v8500_v50 = vadd.f32 %v8499_v26, %v17752_v58  ;;  %v12016_v38 = vpop.f32.mrb[222].mxu0  ;;  %8629 = vadd.xlane.f32.xlu1 %v8628_v12 }
0x2166   :  { %v17792_v53 = vadd.f32 %v8508_v28, %v17662_v5  ;;  %v8511_v4 = vadd.f32 %v12016_v38, %v17752_v58  ;;  %v8502_v19 = vpop.f32.mrb[223].mxu0 }
0x2167   :  { %v8503_v14 = vadd.f32 %v8502_v19, %v17752_v58  ;;  %8632 = vadd.xlane.f32.xlu0 %v8631_v60  ;;  %v17803_v2 = vadd.f32 %v8500_v50, %v17656_v56 }
0x2168   :  { %v17798_v23 = vadd.f32 %v8511_v4, %v17652_v1  ;;  %v8582_v55 = vsel %vm688_vm0, %v17792_v53, 0.0  ;;  %v8618_v1 = vmul.f32 %v17792_v53, %v17792_v53 }
0x2169   :  { %8583 = vadd.xlane.f32.xlu1 %v8582_v55  ;;  %v17808_v43 = vadd.f32 %v8503_v14, %v17659_v0  ;;  %v8576_v63 = vsel %vm688_vm0, %v17803_v2, 0.0  ;;  %v8616_v0 = vmul.f32 %v17803_v2, %v17803_v2 }
0x216a   :  { %v8585_v5 = vsel %vm688_vm0, %v17798_v23, 0.0  ;;  %v8619_v56 = vmul.f32 %v17798_v23, %v17798_v23  ;;  %v8646_v30 = vsel %vm688_vm0, %v8618_v1, 0.0 }
0x216b   :  { %8586 = vadd.xlane.f32.xlu0 %v8585_v5  ;;  %v8579_v24 = vsel %vm688_vm0, %v17808_v43, 0.0  ;;  %v8617_v11 = vmul.f32 %v17808_v43, %v17808_v43  ;;  %v8640_v7 = vsel %vm688_vm0, %v8616_v0, 0.0 }
0x216c   :  { %v8649_v42 = vsel %vm688_vm0, %v8619_v56, 0.0 }
0x216d   :  { %8577 = vadd.xlane.f32.xlu1 %v8576_v63  ;;  %v8643_v25 = vsel %vm688_vm0, %v8617_v11, 0.0 }
0x216f   :  { %8580 = vadd.xlane.f32.xlu0 %v8579_v24 }
0x2171   :  { %8647 = vadd.xlane.f32.xlu1 %v8646_v30 }
0x2173   :  { %8650 = vadd.xlane.f32.xlu0 %v8649_v42 }
0x2175   :  { %8641 = vadd.xlane.f32.xlu1 %v8640_v7 }
0x2177   :  { %8644 = vadd.xlane.f32.xlu0 %v8643_v25 }
0x21e6   :  { %v8572_v24 = vpop.xlane.xlu1 %8571 }
0x21e8   :  { %v8575_v56 = vpop.xlane.xlu0 %8574 }
0x21ea   :  { %v8566_v30 = vpop.xlane.xlu1 %8565 }
0x21ec   :  { %v8569_v0 = vpop.xlane.xlu0 %8568 }
0x21ee   :  { %v8636_v42 = vpop.xlane.xlu1 %8635 }
0x21f0   :  { %v8639_v11 = vpop.xlane.xlu0 %8638 }
0x21f2   :  { %v8630_v7 = vpop.xlane.xlu1 %8629 }
0x21f4   :  { %v8633_v25 = vpop.xlane.xlu0 %8632 }
0x21f6   :  { %v12019_v57 = vpop.f32.mrb[224].mxu0 }
0x21f7   :  { %v8515_v20 = vpop.f32.mrb[225].mxu0  ;;  %v8524_v47 = vadd.f32 %v12019_v57, %v17752_v58  ;;  %v8584_v57 = vpop.xlane.xlu1 %8583 }
0x21f8   :  { %v8516_v48 = vadd.f32 %v8515_v20, %v17752_v58  ;;  %v12020_v35 = vpop.f32.mrb[226].mxu0  ;;  %v8678_v20 = vmul.f32 0.015625, %v8572_v24 }
0x21f9   :  { %v8518_v21 = vpop.f32.mrb[227].mxu0  ;;  %v17829_v18 = vadd.f32 %v8524_v47, %v17712_v9  ;;  %v8527_v36 = vadd.f32 %v12020_v35, %v17752_v58  ;;  %v8587_v47 = vpop.xlane.xlu0 %8586  ;;  %v8679_v35 = vmul.f32 0.015625, %v8575_v56 }
0x21fa   :  { %v8519_v46 = vadd.f32 %v8518_v21, %v17752_v58  ;;  %v17834_v34 = vadd.f32 %v8516_v48, %v17706_v32  ;;  %v8676_v48 = vmul.f32 0.015625, %v8566_v30  ;;  %v8694_v21 = vmul.f32 0.015625, %v8636_v42 }
0x21fb   :  { %v17837_v17 = vadd.f32 %v8527_v36, %v17703_v16  ;;  %v8594_v49 = vsel %vm688_vm0, %v17829_v18, 0.0  ;;  %v8622_v32 = vmul.f32 %v17829_v18, %v17829_v18  ;;  %v8677_v36 = vmul.f32 0.015625, %v8569_v0 }
0x21fc   :  { %8595 = vadd.xlane.f32.xlu1 %v8594_v49  ;;  %v17842_v39 = vadd.f32 %v8519_v46, %v17709_v10  ;;  %v8588_v62 = vsel %vm688_vm0, %v17834_v34, 0.0  ;;  %v8620_v45 = vmul.f32 %v17834_v34, %v17834_v34  ;;  %v8692_v46 = vmul.f32 0.015625, %v8630_v7  ;;  %v8578_v49 = vpop.xlane.xlu1 %8577 }
0x21fd   :  { %v8597_v9 = vsel %vm688_vm0, %v17837_v17, 0.0  ;;  %v8623_v22 = vmul.f32 %v17837_v17, %v17837_v17  ;;  %v8658_v10 = vsel %vm688_vm0, %v8622_v32, 0.0  ;;  %v8708_v32 = vmul.f32 %v8676_v48, %v8676_v48 }
0x21fe   :  { %8598 = vadd.xlane.f32.xlu0 %v8597_v9  ;;  %v8591_v16 = vsel %vm688_vm0, %v17842_v39, 0.0  ;;  %v8621_v27 = vmul.f32 %v17842_v39, %v17842_v39  ;;  %v8652_v51 = vsel %vm688_vm0, %v8620_v45, 0.0  ;;  %v8710_v9 = vmul.f32 %v8678_v20, %v8678_v20  ;;  %v8581_v45 = vpop.xlane.xlu0 %8580 }
0x21ff   :  { %v8661_v40 = vsel %vm688_vm0, %v8623_v22, 0.0  ;;  %v8711_v22 = vmul.f32 %v8679_v35, %v8679_v35 }
0x2200   :  { %8589 = vadd.xlane.f32.xlu1 %v8588_v62  ;;  %v8655_v38 = vsel %vm688_vm0, %v8621_v27, 0.0  ;;  %v8695_v62 = vmul.f32 0.015625, %v8639_v11  ;;  %v8648_v27 = vpop.xlane.xlu1 %8647 }
0x2202   :  { %8592 = vadd.xlane.f32.xlu0 %v8591_v16  ;;  %v8693_v16 = vmul.f32 0.015625, %v8633_v25  ;;  %v8742_v25 = vsub.f32 %v17757_v31, %v8678_v20 }
0x2204   :  { %8659 = vadd.xlane.f32.xlu1 %v8658_v10  ;;  %v8726_v10 = vsub.f32 %v8694_v21, %v8710_v9  ;;  %v8740_v21 = vsub.f32 %v17762_v59, %v8676_v48  ;;  %v17923_v59 = vld [vmem:[%s18903_s7 + $0x17] ss:$0 sm:$0xff] }
0x2205   :  { %v12023_v33 = vpop.f32.mrb[228].mxu0 }
0x2206   :  { %v8540_v15 = vadd.f32 %v12023_v33, %v17752_v58  ;;  %v8531_v8 = vpop.f32.mrb[229].mxu0  ;;  %8662 = vadd.xlane.f32.xlu0 %v8661_v40  ;;  %v8709_v33 = vmul.f32 %v8677_v36, %v8677_v36  ;;  %v8727_v40 = vsub.f32 %v8695_v62, %v8711_v22 }
0x2207   :  { %v12024_v13 = vpop.f32.mrb[230].mxu0  ;;  %v8532_v61 = vadd.f32 %v8531_v8, %v17752_v58 }
0x2208   :  { %v17862_v41 = vadd.f32 %v8540_v15, %v17738_v54  ;;  %v8543_v6 = vadd.f32 %v12024_v13, %v17752_v58  ;;  %v8534_v28 = vpop.f32.mrb[231].mxu0  ;;  %8653 = vadd.xlane.f32.xlu1 %v8652_v51  ;;  %v8724_v15 = vsub.f32 %v8692_v46, %v8708_v32  ;;  %v8725_v8 = vsub.f32 %v8693_v16, %v8709_v33  ;;  %v17917_v16 = vld [vmem:[%s18903_s7 + $0x16] ss:$0 sm:$0xff] }
0x2209   :  { %v8535_v50 = vadd.f32 %v8534_v28, %v17752_v58  ;;  %v17875_v54 = vadd.f32 %v8532_v61, %v17727_v37  ;;  %v8758_v13 = vadd.f32 1e-05, %v8726_v10  ;;  %v8682_v61 = vmul.f32 0.015625, %v8584_v57 }
0x220a   :  { %v17868_v26 = vadd.f32 %v8543_v6, %v17741_v44  ;;  %v8606_v12 = vsel %vm688_vm0, %v17862_v41, 0.0  ;;  %8656 = vadd.xlane.f32.xlu0 %v8655_v38  ;;  %v8756_v6 = vadd.f32 1e-05, %v8724_v15  ;;  %v8759_v51 = vadd.f32 1e-05, %v8727_v40 }
0x220b   :  { %v17880_v19 = vadd.f32 %v8535_v50, %v17730_v29  ;;  %v8600_v44 = vsel %vm688_vm0, %v17875_v54, 0.0  ;;  %v8624_v58 = vmul.f32 %v17875_v54, %v17875_v54  ;;  %v8626_v29 = vmul.f32 %v17862_v41, %v17862_v41  ;;  %v8651_v50 = vpop.xlane.xlu0 %8650 }
0x220c   :  { %v8609_v4 = vsel %vm688_vm0, %v17868_v26, 0.0  ;;  %8607 = vadd.xlane.f32.xlu1 %v8606_v12  ;;  %v8627_v5 = vmul.f32 %v17868_v26, %v17868_v26  ;;  %v8698_v28 = vmul.f32 0.015625, %v8648_v27  ;;  %v8757_v38 = vadd.f32 1e-05, %v8725_v8 }
0x220d   :  { %v8603_v14 = vsel %vm688_vm0, %v17880_v19, 0.0  ;;  %v8625_v37 = vmul.f32 %v17880_v19, %v17880_v19  ;;  %v8664_v60 = vsel %vm688_vm0, %v8624_v58, 0.0  ;;  %v8670_v63 = vsel %vm688_vm0, %v8626_v29, 0.0 }
0x220e   :  { %8610 = vadd.xlane.f32.xlu0 %v8609_v4  ;;  %v8673_v1 = vsel %vm688_vm0, %v8627_v5, 0.0  ;;  %v17898_v12 = vmul.f32 0.015625, %v8587_v47  ;;  %12950 = vrsqrt.f32 %v8758_v13  ;;  %v8714_v4 = vmul.f32 %v8682_v61, %v8682_v61 }
0x220f   :  { %v8667_v55 = vsel %vm688_vm0, %v8625_v37, 0.0  ;;  %12952 = vrsqrt.f32 %v8756_v6  ;;  %v8645_v29 = vpop.xlane.xlu0 %8644  ;;  %v8741_v32 = vsub.f32 %v17770_v3, %v8677_v36  ;;  %v8746_v33 = vsub.f32 %v17792_v53, %v8682_v61 }
0x2210   :  { %8601 = vadd.xlane.f32.xlu1 %v8600_v44  ;;  %v8699_v44 = vmul.f32 0.015625, %v8651_v50  ;;  %12954 = vrsqrt.f32 %v8759_v51  ;;  %v8730_v58 = vsub.f32 %v8698_v28, %v8714_v4  ;;  %v8715_v37 = vmul.f32 %v17898_v12, %v17898_v12 }
0x2211   :  { %12956 = vrsqrt.f32 %v8757_v38  ;;  %v8697_v56 = vmul.f32 0.015625, %v8645_v29  ;;  %v8747_v6 = vsub.f32 %v17798_v23, %v17898_v12 }
0x2212   :  { %8604 = vadd.xlane.f32.xlu0 %v8603_v14  ;;  %v8642_v14 = vpop.xlane.xlu1 %8641  ;;  %v8731_v5 = vsub.f32 %v8699_v44, %v8715_v37 }
0x2214   :  { %8665 = vadd.xlane.f32.xlu1 %v8664_v60  ;;  %v17902_v60 = vmul.f32 0.015625, %v8578_v49  ;;  %v8763_v0 = vadd.f32 1e-05, %v8731_v5  ;;  %v8743_v49 = vsub.f32 %v17765_v52, %v8679_v35 }
0x2216   :  { %8668 = vadd.xlane.f32.xlu0 %v8667_v55  ;;  %v17904_v55 = vmul.f32 0.015625, %v8581_v45  ;;  %v8712_v24 = vmul.f32 %v17902_v60, %v17902_v60  ;;  %v8744_v51 = vsub.f32 %v17803_v2, %v17902_v60 }
0x2218   :  { %8671 = vadd.xlane.f32.xlu1 %v8670_v63  ;;  %v8696_v63 = vmul.f32 0.015625, %v8642_v14  ;;  %v8713_v30 = vmul.f32 %v17904_v55, %v17904_v55  ;;  %v12951_v11 = vpop.eup %12950  ;;  %v8745_v53 = vsub.f32 %v17808_v43, %v17904_v55 }
0x2219   :  { %v12953_v7 = vpop.eup %12952  ;;  %v8790_v9 = vmul.f32 %v12951_v11, %v8742_v25 }
0x221a   :  { %8674 = vadd.xlane.f32.xlu0 %v8673_v1  ;;  %v8762_v1 = vadd.f32 1e-05, %v8730_v58  ;;  %v8728_v42 = vsub.f32 %v8696_v63, %v8712_v24  ;;  %v8729_v57 = vsub.f32 %v8697_v56, %v8713_v30  ;;  %v12955_v47 = vpop.eup %12954  ;;  %v8788_v22 = vmul.f32 %v12953_v7, %v8740_v21 }
0x221b   :  { %v12957_v46 = vpop.eup %12956  ;;  %v8791_v10 = vmul.f32 %v12955_v47, %v8743_v49  ;;  %v8806_v45 = vmul.f32 %v8790_v9, %v17917_v16 }
0x221c   :  { %12958 = vrsqrt.f32 %v8762_v1  ;;  %v8760_v62 = vadd.f32 1e-05, %v8728_v42  ;;  %v8761_v31 = vadd.f32 1e-05, %v8729_v57  ;;  %v8789_v20 = vmul.f32 %v12957_v46, %v8741_v32 }
0x221d   :  { %12960 = vrsqrt.f32 %v8763_v0  ;;  %v8804_v52 = vmul.f32 %v8788_v22, %v17917_v16  ;;  %v8807_v3 = vmul.f32 %v8791_v10, %v17917_v16  ;;  %v17929_v36 = vadd.f32 %v8806_v45, %v17923_v59 }
0x221e   :  { %12962 = vrsqrt.f32 %v8760_v62  ;;  %v8805_v35 = vmul.f32 %v8789_v20, %v17917_v16 }
0x221f   :  { %12964 = vrsqrt.f32 %v8761_v31  ;;  %v17933_v15 = vadd.f32 %v8804_v52, %v17923_v59  ;;  %v17936_v8 = vadd.f32 %v8807_v3, %v17923_v59  ;;  %v8930_v28 = vrot.slane %v17929_v36, 1 }
0x2220   :  { %v17939_v13 = vadd.f32 %v8805_v35, %v17923_v59  ;;  %v8939_v50 = vrot.slane %v17929_v36, 3  ;;  %v8949_v38 = vrot.slane %v17929_v36, 5  ;;  %v8959_v4 = vrot.slane %v17929_v36, 7 }
0x2221   :  { %v8861_v14 = vrot.slane %v17933_v15, 5  ;;  %v8871_v23 = vrot.slane %v17933_v15, 7  ;;  %v8842_v2 = vrot.slane %v17933_v15, 1  ;;  %v8851_v37 = vrot.slane %v17933_v15, 3 }
0x2222   :  { %v8974_v60 = vrot.slane %v17936_v8, 1  ;;  %v8983_v29 = vrot.slane %v17936_v8, 3  ;;  %v8993_v5 = vrot.slane %v17936_v8, 5  ;;  %v9003_v63 = vrot.slane %v17936_v8, 7 }
0x2223   :  { %v8886_v1 = vrot.slane %v17939_v13, 1  ;;  %v8895_v24 = vrot.slane %v17939_v13, 3  ;;  %v8905_v0 = vrot.slane %v17939_v13, 5  ;;  %v8915_v42 = vrot.slane %v17939_v13, 7 }
0x2224   :  { %v8935_v11 = vrot.slane %v17929_v36, 2  ;;  %v8945_v47 = vrot.slane %v17929_v36, 4  ;;  %v8955_v21 = vrot.slane %v17929_v36, 6 }
0x2226   :  { %v12959_v48 = vpop.eup %12958 }
0x2227   :  { %v12961_v40 = vpop.eup %12960  ;;  %v8794_v27 = vmul.f32 %v12959_v48, %v8746_v33 }
0x2228   :  { %v8795_v44 = vmul.f32 %v12961_v40, %v8747_v6  ;;  %v12963_v12 = vpop.eup %12962 }
0x2229   :  { %v8810_v43 = vmul.f32 %v8794_v27, %v17917_v16  ;;  %v12965_v56 = vpop.eup %12964  ;;  %v8792_v25 = vmul.f32 %v12963_v12, %v8744_v51 }
0x222a   :  { %v8811_v7 = vmul.f32 %v8795_v44, %v17917_v16  ;;  %v8793_v32 = vmul.f32 %v12965_v56, %v8745_v53 }
0x222b   :  { %v17971_v46 = vadd.f32 %v8810_v43, %v17923_v59  ;;  %v8808_v33 = vmul.f32 %v8792_v25, %v17917_v16 }
0x222c   :  { %v17986_v35 = vadd.f32 %v8811_v7, %v17923_v59 }
0x2289   :  { %v8596_v61 = vpop.xlane.xlu1 %8595 }
0x228a   :  { %v17962_v30 = vmul.f32 0.015625, %v8596_v61 }
0x228b   :  { %v8599_v58 = vpop.xlane.xlu0 %8598 }
0x228c   :  { %v17973_v49 = vmul.f32 0.015625, %v8599_v58  ;;  %v8718_v45 = vmul.f32 %v17962_v30, %v17962_v30  ;;  %v8809_v58 = vmul.f32 %v8793_v32, %v17917_v16 }
0x228d   :  { %v8590_v55 = vpop.xlane.xlu1 %8589 }
0x228e   :  { %v17982_v52 = vmul.f32 0.015625, %v8590_v55  ;;  %v8719_v51 = vmul.f32 %v17973_v49, %v17973_v49  ;;  %v18009_v10 = vadd.f32 %v8809_v58, %v17923_v59 }
0x228f   :  { %v8593_v57 = vpop.xlane.xlu0 %8592 }
0x2290   :  { %v17989_v40 = vmul.f32 0.015625, %v8593_v57  ;;  %v8716_v7 = vmul.f32 %v17982_v52, %v17982_v52 }
0x2291   :  { %v8660_v22 = vpop.xlane.xlu1 %8659 }
0x2292   :  { %v8702_v3 = vmul.f32 0.015625, %v8660_v22 }
0x2293   :  { %v8663_v27 = vpop.xlane.xlu0 %8662 }
0x2294   :  { %v8734_v53 = vsub.f32 %v8702_v3, %v8718_v45  ;;  %v8703_v61 = vmul.f32 0.015625, %v8663_v27  ;;  %v18002_v45 = vadd.f32 %v8808_v33, %v17923_v59  ;;  %v8717_v3 = vmul.f32 %v17989_v40, %v17989_v40 }
0x2295   :  { %v8654_v12 = vpop.xlane.xlu1 %8653 }
0x2296   :  { %v8766_v25 = vadd.f32 1e-05, %v8734_v53  ;;  %v8735_v57 = vsub.f32 %v8703_v61, %v8719_v51  ;;  %v8700_v22 = vmul.f32 0.015625, %v8654_v12  ;;  %v9018_v58 = vrot.slane %v18002_v45, 1 }
0x2297   :  { %v8657_v32 = vpop.xlane.xlu0 %8656 }
0x2298   :  { %12966 = vrsqrt.f32 %v8766_v25  ;;  %v8767_v48 = vadd.f32 1e-05, %v8735_v57  ;;  %v8732_v20 = vsub.f32 %v8700_v22, %v8716_v7  ;;  %v8701_v31 = vmul.f32 0.015625, %v8657_v32 }
0x2299   :  { %v8608_v51 = vpop.xlane.xlu1 %8607 }
0x229a   :  { %12968 = vrsqrt.f32 %v8767_v48  ;;  %v8764_v12 = vadd.f32 1e-05, %v8732_v20  ;;  %v8733_v62 = vsub.f32 %v8701_v31, %v8717_v3  ;;  %v8750_v3 = vsub.f32 %v17829_v18, %v17962_v30 }
0x229b   :  { %v8611_v6 = vpop.xlane.xlu0 %8610  ;;  %v8749_v18 = vsub.f32 %v17842_v39, %v17989_v40 }
0x229c   :  { %12970 = vrsqrt.f32 %v8764_v12  ;;  %v8765_v22 = vadd.f32 1e-05, %v8733_v62  ;;  %v18029_v12 = vmul.f32 0.015625, %v8608_v51  ;;  %v18041_v51 = vmul.f32 0.015625, %v8611_v6 }
0x229d   :  { %v8602_v48 = vpop.xlane.xlu1 %8601 }
0x229e   :  { %12972 = vrsqrt.f32 %v8765_v22  ;;  %v18025_v53 = vmul.f32 0.015625, %v8602_v48  ;;  %v8748_v48 = vsub.f32 %v17834_v34, %v17982_v52  ;;  %v8722_v6 = vmul.f32 %v18029_v12, %v18029_v12 }
0x229f   :  { %v8605_v27 = vpop.xlane.xlu0 %8604  ;;  %v8723_v39 = vmul.f32 %v18041_v51, %v18041_v51  ;;  %v8755_v52 = vsub.f32 %v17868_v26, %v18041_v51  ;;  %v19348_v51 = vrot.slane %v18002_v45, 5 }
0x22a0   :  { %v18034_v20 = vmul.f32 0.015625, %v8605_v27  ;;  %v8751_v27 = vsub.f32 %v17837_v17, %v17973_v49  ;;  %v8720_v9 = vmul.f32 %v18025_v53, %v18025_v53  ;;  %v8754_v17 = vsub.f32 %v17862_v41, %v18029_v12 }
0x22a1   :  { %v8666_v62 = vpop.xlane.xlu1 %8665 }
0x22a2   :  { %v12967_v43 = vpop.eup %12966  ;;  %v8704_v22 = vmul.f32 0.015625, %v8666_v62  ;;  %v8721_v49 = vmul.f32 %v18034_v20, %v18034_v20 }
0x22a3   :  { %v8798_v30 = vmul.f32 %v12967_v43, %v8750_v3  ;;  %v8669_v33 = vpop.xlane.xlu0 %8668  ;;  %v8752_v3 = vsub.f32 %v17875_v54, %v18025_v53 }
0x22a4   :  { %v12969_v61 = vpop.eup %12968  ;;  %v8736_v62 = vsub.f32 %v8704_v22, %v8720_v9  ;;  %v8705_v56 = vmul.f32 0.015625, %v8669_v33  ;;  %v8753_v22 = vsub.f32 %v17880_v19, %v18034_v20 }
0x22a5   :  { %v8814_v44 = vmul.f32 %v8798_v30, %v17917_v16  ;;  %v8799_v34 = vmul.f32 %v12969_v61, %v8751_v27  ;;  %v8672_v40 = vpop.xlane.xlu1 %8671 }
0x22a6   :  { %v12971_v43 = vpop.eup %12970  ;;  %v8768_v31 = vadd.f32 1e-05, %v8736_v62  ;;  %v8737_v55 = vsub.f32 %v8705_v56, %v8721_v49  ;;  %v8706_v57 = vmul.f32 0.015625, %v8672_v40 }
0x22a7   :  { %v18067_v9 = vadd.f32 %v8814_v44, %v17923_v59  ;;  %v8815_v33 = vmul.f32 %v8799_v34, %v17917_v16  ;;  %v8796_v61 = vmul.f32 %v12971_v43, %v8748_v48  ;;  %v8675_v27 = vpop.xlane.xlu0 %8674 }
0x22a8   :  { %v12973_v30 = vpop.eup %12972  ;;  %12974 = vrsqrt.f32 %v8768_v31  ;;  %v8769_v32 = vadd.f32 1e-05, %v8737_v55  ;;  %v8738_v7 = vsub.f32 %v8706_v57, %v8722_v6  ;;  %v8707_v25 = vmul.f32 0.015625, %v8675_v27 }
0x22a9   :  { %v18073_v54 = vadd.f32 %v8815_v33, %v17923_v59  ;;  %v8812_v56 = vmul.f32 %v8796_v61, %v17917_v16  ;;  %v8797_v53 = vmul.f32 %v12973_v30, %v8749_v18  ;;  %v8931_v44 = vsel %vm8839_vm2, %v18067_v9, %v8930_v28 }
0x22aa   :  { %12976 = vrsqrt.f32 %v8769_v32  ;;  %v8770_v48 = vadd.f32 1e-05, %v8738_v7  ;;  %v8739_v19 = vsub.f32 %v8707_v25, %v8723_v39  ;;  %v8940_v20 = vrot.slane %v18067_v9, 2 }
0x22ab   :  { %v18082_v55 = vadd.f32 %v8812_v56, %v17923_v59  ;;  %v8813_v57 = vmul.f32 %v8797_v53, %v17917_v16  ;;  %v8950_v31 = vrot.slane %v18067_v9, 4  ;;  %v8960_v6 = vrot.slane %v18067_v9, 6 }
0x22ac   :  { %12978 = vrsqrt.f32 %v8770_v48  ;;  %v8771_v18 = vadd.f32 1e-05, %v8739_v19  ;;  %v8941_v28 = vsel %vm8839_vm2, %v8940_v20, %v8939_v50  ;;  %v8975_v25 = vsel %vm8839_vm2, %v18073_v54, %v8974_v60 }
0x22ad   :  { %v18095_v7 = vadd.f32 %v8813_v57, %v17923_v59  ;;  %v12194_v32 = vpack.i.bf16 %v8941_v28, %v8931_v44  ;;  %v8951_v49 = vsel %vm8839_vm2, %v8950_v31, %v8949_v38  ;;  %v8961_v62 = vsel %vm8839_vm2, %v8960_v6, %v8959_v4 }
0x22ae   :  { %12980 = vrsqrt.f32 %v8771_v18  ;;  %v12199_v34 = vpack.i.bf16 %v8961_v62, %v8951_v49  ;;  %v8862_v50 = vrot.slane %v18082_v55, 4  ;;  %v8872_v39 = vrot.slane %v18082_v55, 6 }
0x22af   :  { %12195 = vrot.lane.b32.xlu0 %v12194_v32, %s13009_s19  ;;  %v8843_v60 = vsel %vm8839_vm2, %v18082_v55, %v8842_v2  ;;  %v8852_v40 = vrot.slane %v18082_v55, 2  ;;  %v8984_v38 = vrot.slane %v18073_v54, 2  ;;  %v8994_v43 = vrot.slane %v18073_v54, 4 }
0x22b0   :  { %12200 = vrot.lane.b32.xlu1 %v12199_v34, %s13009_s19  ;;  %v8863_v4 = vsel %vm8839_vm2, %v8862_v50, %v8861_v14  ;;  %v8873_v33 = vsel %vm8839_vm2, %v8872_v39, %v8871_v23  ;;  %v9004_v61 = vrot.slane %v18073_v54, 6  ;;  %v8887_v2 = vsel %vm8839_vm2, %v18095_v7, %v8886_v1 }
0x22b1   :  { %v12209_v27 = vpack.i.bf16 %v8873_v33, %v8863_v4  ;;  %v8853_v30 = vsel %vm8839_vm2, %v8852_v40, %v8851_v37  ;;  %v8985_v14 = vsel %vm8839_vm2, %v8984_v38, %v8983_v29  ;;  %v8995_v23 = vsel %vm8839_vm2, %v8994_v43, %v8993_v5 }
0x22b2   :  { %v12975_v56 = vpop.eup %12974  ;;  %v12204_v53 = vpack.i.bf16 %v8853_v30, %v8843_v60  ;;  %v12214_v44 = vpack.i.bf16 %v8985_v14, %v8975_v25  ;;  %v9005_v1 = vsel %vm8839_vm2, %v9004_v61, %v9003_v63  ;;  %v8896_v48 = vrot.slane %v18095_v7, 2 }
0x22b3   :  { %v8800_v19 = vmul.f32 %v12975_v56, %v8752_v3  ;;  %12210 = vrot.lane.b32.xlu0 %v12209_v27, %s13009_s19  ;;  %v12219_v37 = vpack.i.bf16 %v9005_v1, %v8995_v23  ;;  %v8906_v20 = vrot.slane %v18095_v7, 4  ;;  %v8916_v29 = vrot.slane %v18095_v7, 6 }
0x22b4   :  { %v12977_v57 = vpop.eup %12976  ;;  %12205 = vrot.lane.b32.xlu1 %v12204_v53, %s13009_s19  ;;  %v8897_v5 = vsel %vm8839_vm2, %v8896_v48, %v8895_v24  ;;  %v8927_v31 = vrot.slane %v18067_v9, 7  ;;  %v8936_v63 = vrot.slane %v18067_v9, 1  ;;  %v8946_v3 = vrot.slane %v18067_v9, 3 }
0x22b5   :  { %v8816_v6 = vmul.f32 %v8800_v19, %v17917_v16  ;;  %v8801_v18 = vmul.f32 %v12977_v57, %v8753_v22  ;;  %v12224_v28 = vpack.i.bf16 %v8897_v5, %v8887_v2  ;;  %v8907_v25 = vsel %vm8839_vm2, %v8906_v20, %v8905_v0 }
0x22b6   :  { %v12979_v32 = vpop.eup %12978  ;;  %v8917_v49 = vsel %vm8839_vm2, %v8916_v29, %v8915_v42  ;;  %v18157_v24 = vsel %vm8839_vm2, %v8927_v31, %v17929_v36  ;;  %v18162_v62 = vsel %vm8839_vm2, %v8936_v63, %v8935_v11  ;;  %v18167_v22 = vsel %vm8839_vm2, %v8946_v3, %v8945_v47 }
0x22b7   :  { %v18170_v0 = vadd.f32 %v8816_v6, %v17923_v59  ;;  %v8817_v34 = vmul.f32 %v8801_v18, %v17917_v16  ;;  %v8802_v42 = vmul.f32 %v12979_v32, %v8754_v17  ;;  %12215 = vrot.lane.b32.xlu0 %v12214_v44, %s13009_s19  ;;  %v12229_v50 = vpack.i.bf16 %v8917_v49, %v8907_v25 }
0x22b8   :  { %v12981_v39 = vpop.eup %12980  ;;  %12220 = vrot.lane.b32.xlu1 %v12219_v37, %s13009_s19  ;;  %v8956_v11 = vrot.slane %v18067_v9, 5  ;;  %v8858_v47 = vrot.slane %v18082_v55, 3  ;;  %v8868_v60 = vrot.slane %v18082_v55, 5  ;;  %v8838_v40 = vrot.slane %v18082_v55, 7 }
0x22b9   :  { %v18183_v38 = vadd.f32 %v8817_v34, %v17923_v59  ;;  %v8818_v41 = vmul.f32 %v8802_v42, %v17917_v16  ;;  %v8803_v12 = vmul.f32 %v12981_v39, %v8755_v52  ;;  %v9038_v17 = vrot.slane %v18170_v0, 4 }
0x22ba   :  { %v9048_v43 = vrot.slane %v18170_v0, 6  ;;  %v9019_v9 = vsel %vm8839_vm2, %v18170_v0, %v9018_v58  ;;  %v9028_v4 = vrot.slane %v18170_v0, 2  ;;  %v18199_v33 = vsel %vm8839_vm2, %v8956_v11, %v8955_v21 }
0x22bb   :  { %v18202_v61 = vadd.f32 %v8818_v41, %v17923_v59  ;;  %v8819_v26 = vmul.f32 %v8803_v12, %v17917_v16  ;;  %v9039_v52 = vsel %vm8839_vm2, %v9038_v17, %v19348_v51  ;;  %v9082_v2 = vrot.slane %v18183_v38, 4 }
0x22bc   :  { %12225 = vrot.lane.b32.xlu1 %v12224_v28, %s13009_s19  ;;  %v19349_v58 = vrot.slane %v18002_v45, 7  ;;  %v19350_v21 = vrot.slane %v18002_v45, 3  ;;  %v9092_v30 = vrot.slane %v18183_v38, 6  ;;  %v19351_v16 = vrot.slane %v18009_v10, 1 }
0x22bd   :  { %v18222_v23 = vadd.f32 %v8819_v26, %v17923_v59  ;;  %v9126_v56 = vrot.slane %v18202_v61, 4  ;;  %v9136_v53 = vrot.slane %v18202_v61, 6  ;;  %v19352_v44 = vrot.slane %v17971_v46, 1 }
0x22be   :  { %v9049_v36 = vsel %vm8839_vm2, %v9048_v43, %v19349_v58  ;;  %v9029_v27 = vsel %vm8839_vm2, %v9028_v4, %v19350_v21  ;;  %v9063_v14 = vsel %vm8839_vm2, %v18183_v38, %v19351_v16  ;;  %v9116_v48 = vrot.slane %v18202_v61, 2 }
0x22bf   :  { %v9107_v1 = vsel %vm8839_vm2, %v18202_v61, %v19352_v44  ;;  %v12249_v19 = vpack.i.bf16 %v9049_v36, %v9039_v52  ;;  %v12244_v37 = vpack.i.bf16 %v9029_v27, %v9019_v9  ;;  %v19353_v20 = vrot.slane %v18009_v10, 5 }
0x22c0   :  { %v19354_v59 = vrot.slane %v17971_v46, 5  ;;  %v19355_v5 = vrot.slane %v17971_v46, 7  ;;  %v19356_v63 = vrot.slane %v18009_v10, 7  ;;  %v9072_v6 = vrot.slane %v18183_v38, 2  ;;  %12230 = vrot.lane.b32.xlu1 %v12229_v50, %s13009_s19 }
0x22c1   :  { %v9083_v29 = vsel %vm8839_vm2, %v9082_v2, %v19353_v20  ;;  %v19357_v28 = vrot.slane %v17971_v46, 3  ;;  %v9170_v49 = vrot.slane %v18222_v23, 4  ;;  %v19358_v42 = vrot.slane %v18009_v10, 3 }
0x22c2   :  { %v9127_v57 = vsel %vm8839_vm2, %v9126_v56, %v19354_v59  ;;  %v9137_v31 = vsel %vm8839_vm2, %v9136_v53, %v19355_v5  ;;  %v9093_v3 = vsel %vm8839_vm2, %v9092_v30, %v19356_v63  ;;  %v9180_v11 = vrot.slane %v18222_v23, 6 }
0x22c3   :  { %v12239_v18 = vpack.i.bf16 %v9137_v31, %v9127_v57  ;;  %v9117_v25 = vsel %vm8839_vm2, %v9116_v48, %v19357_v28  ;;  %v12259_v32 = vpack.i.bf16 %v9093_v3, %v9083_v29  ;;  %v9073_v39 = vsel %vm8839_vm2, %v9072_v6, %v19358_v42 }
0x22c4   :  { %v12234_v34 = vpack.i.bf16 %v9117_v25, %v9107_v1  ;;  %v19359_v41 = vrot.slane %v17986_v35, 1  ;;  %v12254_v12 = vpack.i.bf16 %v9073_v39, %v9063_v14  ;;  %v19360_v17 = vrot.slane %v17986_v35, 5 }
0x22c5   :  { %v9160_v9 = vrot.slane %v18222_v23, 2  ;;  %v19361_v4 = vrot.slane %v17933_v15, 4  ;;  %v19362_v51 = vrot.slane %v17986_v35, 7  ;;  %v19363_v2 = vrot.slane %v17933_v15, 6  ;;  %12240 = vrot.lane.b32.xlu1 %v12239_v18, %s13009_s19 }
0x22c6   :  { %v9151_v50 = vsel %vm8839_vm2, %v18222_v23, %v19359_v41  ;;  %v9171_v43 = vsel %vm8839_vm2, %v9170_v49, %v19360_v17  ;;  %12235 = vrot.lane.b32.xlu0 %v12234_v34, %s13009_s19  ;;  %v18277_v36 = vsel %vm8839_vm2, %v8838_v40, %v17933_v15  ;;  %v8848_v21 = vrot.slane %v18082_v55, 1 }
0x22c7   :  { %v18264_v26 = vsel %vm8839_vm2, %v8858_v47, %v19361_v4  ;;  %v9181_v52 = vsel %vm8839_vm2, %v9180_v11, %v19362_v51  ;;  %v18273_v58 = vsel %vm8839_vm2, %v8868_v60, %v19363_v2  ;;  %v19364_v27 = vrot.slane %v17986_v35, 3 }
0x22c8   :  { %v12269_v47 = vpack.i.bf16 %v9181_v52, %v9171_v43  ;;  %v8971_v16 = vrot.slane %v18073_v54, 7  ;;  %v8980_v14 = vrot.slane %v18073_v54, 1  ;;  %v19365_v60 = vrot.slane %v17933_v15, 2 }
0x22c9   :  { %v9161_v30 = vsel %vm8839_vm2, %v9160_v9, %v19364_v27  ;;  %v8990_v40 = vrot.slane %v18073_v54, 3  ;;  %v9000_v55 = vrot.slane %v18073_v54, 5  ;;  %v19366_v1 = vrot.slane %v17936_v8, 2  ;;  %12250 = vrot.lane.b32.xlu1 %v12249_v19, %s13009_s19 }
0x22ca   :  { %v12264_v56 = vpack.i.bf16 %v9161_v30, %v9151_v50  ;;  %v18289_v53 = vsel %vm8839_vm2, %v8848_v21, %v19365_v60  ;;  %v18295_v44 = vsel %vm8839_vm2, %v8971_v16, %v17936_v8  ;;  %v8883_v20 = vrot.slane %v18095_v7, 7  ;;  %12245 = vrot.lane.b32.xlu0 %v12244_v37, %s13009_s19 }
0x22cb   :  { %v18300_v48 = vsel %vm8839_vm2, %v8980_v14, %v19366_v1  ;;  %v8892_v15 = vrot.slane %v18095_v7, 1  ;;  %v19367_v29 = vrot.slane %v17936_v8, 4  ;;  %v19368_v54 = vrot.slane %v17936_v8, 6 }
0x22cc   :  { %v8902_v5 = vrot.slane %v18095_v7, 3  ;;  %v8912_v31 = vrot.slane %v18095_v7, 5  ;;  %v18320_v63 = vsel %vm8839_vm2, %v8883_v20, %v17939_v13  ;;  %v19369_v37 = vrot.slane %v17939_v13, 2 }
0x22cd   :  { %v18308_v59 = vsel %vm8839_vm2, %v8990_v40, %v19367_v29  ;;  %v18313_v57 = vsel %vm8839_vm2, %v9000_v55, %v19368_v54  ;;  %v9112_v8 = vrot.slane %v18202_v61, 1  ;;  %v9103_v6 = vrot.slane %v18202_v61, 7  ;;  %12260 = vrot.lane.b32.xlu1 %v12259_v32, %s13009_s19 }
0x22ce   :  { %v18325_v3 = vsel %vm8839_vm2, %v8892_v15, %v19369_v37  ;;  %v19370_v18 = vrot.slane %v17939_v13, 4  ;;  %v19371_v7 = vrot.slane %v17939_v13, 6  ;;  %v9122_v25 = vrot.slane %v18202_v61, 3  ;;  %12255 = vrot.lane.b32.xlu0 %v12254_v12, %s13009_s19 }
0x22cf   :  { %v9132_v49 = vrot.slane %v18202_v61, 5  ;;  %v19372_v34 = vrot.slane %v17971_v46, 2  ;;  %v18348_v39 = vsel %vm8839_vm2, %v9103_v6, %v17971_v46  ;;  %v9015_v11 = vrot.slane %v18170_v0, 7 }
0x22d0   :  { %v18332_v28 = vsel %vm8839_vm2, %v8902_v5, %v19370_v18  ;;  %v18337_v19 = vsel %vm8839_vm2, %v8912_v31, %v19371_v7  ;;  %v9024_v13 = vrot.slane %v18170_v0, 1  ;;  %v19373_v41 = vrot.slane %v17971_v46, 4 }
0x22d1   :  { %v18344_v42 = vsel %vm8839_vm2, %v9112_v8, %v19372_v34  ;;  %v19374_v61 = vrot.slane %v17971_v46, 6  ;;  %v9034_v43 = vrot.slane %v18170_v0, 3  ;;  %v9044_v9 = vrot.slane %v18170_v0, 5  ;;  %12270 = vrot.lane.b32.xlu1 %v12269_v47, %s13009_s19 }
0x22d2   :  { %v18356_v50 = vsel %vm8839_vm2, %v9122_v25, %v19373_v41  ;;  %v18368_v4 = vsel %vm8839_vm2, %v9015_v11, %v18002_v45  ;;  %v19375_v12 = vrot.slane %v18002_v45, 2  ;;  %v9059_v46 = vrot.slane %v18183_v38, 7  ;;  %12265 = vrot.lane.b32.xlu0 %v12264_v56, %s13009_s19 }
0x22d3   :  { %v18361_v17 = vsel %vm8839_vm2, %v9132_v49, %v19374_v61  ;;  %v9068_v52 = vrot.slane %v18183_v38, 1  ;;  %v19376_v2 = vrot.slane %v18002_v45, 4  ;;  %v19377_v0 = vrot.slane %v18002_v45, 6 }
0x22d4   :  { %v18373_v51 = vsel %vm8839_vm2, %v9024_v13, %v19375_v12  ;;  %v9078_v27 = vrot.slane %v18183_v38, 3  ;;  %v9088_v30 = vrot.slane %v18183_v38, 5  ;;  %v18391_v16 = vsel %vm8839_vm2, %v9059_v46, %v18009_v10 }
0x22d5   :  { %v18380_v21 = vsel %vm8839_vm2, %v9034_v43, %v19376_v2  ;;  %v18385_v32 = vsel %vm8839_vm2, %v9044_v9, %v19377_v0  ;;  %v19378_v14 = vrot.slane %v18009_v10, 2  ;;  %v9147_v40 = vrot.slane %v18222_v23, 7 }
0x22d6   :  { %v9156_v45 = vrot.slane %v18222_v23, 1  ;;  %v19379_v55 = vrot.slane %v18009_v10, 4  ;;  %v19380_v38 = vrot.slane %v18009_v10, 6  ;;  %v9166_v15 = vrot.slane %v18222_v23, 3 }
0x22d7   :  { %v18396_v60 = vsel %vm8839_vm2, %v9068_v52, %v19378_v14  ;;  %v9176_v29 = vrot.slane %v18222_v23, 5  ;;  %v18416_v54 = vsel %vm8839_vm2, %v9147_v40, %v17986_v35  ;;  %v19381_v56 = vrot.slane %v17986_v35, 2 }
0x22d8   :  { %v18404_v1 = vsel %vm8839_vm2, %v9078_v27, %v19379_v55  ;;  %v18409_v20 = vsel %vm8839_vm2, %v9088_v30, %v19380_v38  ;;  %v19382_v10 = vrot.slane %v17986_v35, 4  ;;  %v19383_v37 = vrot.slane %v17986_v35, 6 }
0x22d9   :  { %v18421_v5 = vsel %vm8839_vm2, %v9156_v45, %v19381_v56 }
0x22da   :  { %v18426_v31 = vsel %vm8839_vm2, %v9166_v15, %v19382_v10  ;;  %v18431_v23 = vsel %vm8839_vm2, %v9176_v29, %v19383_v37 }
0x2321   :  { %v12196_v47 = vpop.permute.xlu0 %12195 }
0x2322   :  { %v12198_v8 = vunpack.i.h.bf16 %v12196_v47  ;;  %v12197_v6 = vunpack.i.l.bf16 %v12196_v47  ;;  %v12201_v18 = vpop.permute.xlu1 %12200 }
0x2323   :  { %v12203_v7 = vunpack.i.h.bf16 %v12201_v18  ;;  %v12202_v25 = vunpack.i.l.bf16 %v12201_v18 }
0x2324   :  { %v18435_v49 = vsel %vm688_vm0, %v18162_v62, %v12198_v8  ;;  %v18439_v34 = vsel %vm688_vm0, %v18157_v24, %v12197_v6 }
0x2325   :  { %v18443_v35 = vsel %vm688_vm0, %v18199_v33, %v12203_v7  ;;  %v18447_v11 = vsel %vm688_vm0, %v18167_v22, %v12202_v25  ;;  %v12211_v13 = vpop.permute.xlu0 %12210 }
0x2326   :  { %v12213_v41 = vunpack.i.h.bf16 %v12211_v13  ;;  %v12212_v61 = vunpack.i.l.bf16 %v12211_v13  ;;  %v12206_v43 = vpop.permute.xlu1 %12205 }
0x2327   :  { %v12208_v9 = vunpack.i.h.bf16 %v12206_v43  ;;  %v12207_v12 = vunpack.i.l.bf16 %v12206_v43 }
0x2328   :  { %v18451_v62 = vsel %vm688_vm0, %v18273_v58, %v12213_v41  ;;  %v18455_v24 = vsel %vm688_vm0, %v18264_v26, %v12212_v61 }
0x2329   :  { %v18459_v33 = vsel %vm688_vm0, %v18289_v53, %v12208_v9  ;;  %v18463_v22 = vsel %vm688_vm0, %v18277_v36, %v12207_v12  ;;  %v12216_v46 = vpop.permute.xlu0 %12215 }
0x232a   :  { %v12218_v52 = vunpack.i.h.bf16 %v12216_v46  ;;  %v12217_v2 = vunpack.i.l.bf16 %v12216_v46  ;;  %v12221_v0 = vpop.permute.xlu1 %12220 }
0x232b   :  { %v12223_v27 = vunpack.i.h.bf16 %v12221_v0  ;;  %v12222_v30 = vunpack.i.l.bf16 %v12221_v0 }
0x232c   :  { %v18467_v58 = vsel %vm688_vm0, %v18300_v48, %v12218_v52  ;;  %v18471_v26 = vsel %vm688_vm0, %v18295_v44, %v12217_v2 }
0x232d   :  { %v18475_v53 = vsel %vm688_vm0, %v18313_v57, %v12223_v27  ;;  %v18479_v36 = vsel %vm688_vm0, %v18308_v59, %v12222_v30 }
0x232e   :  { %v12226_v14 = vpop.permute.xlu1 %12225 }
0x232f   :  { %v12228_v40 = vunpack.i.h.bf16 %v12226_v14  ;;  %v12227_v45 = vunpack.i.l.bf16 %v12226_v14 }
0x2331   :  { %v18483_v55 = vsel %vm688_vm0, %v18325_v3, %v12228_v40  ;;  %v18487_v48 = vsel %vm688_vm0, %v18320_v63, %v12227_v45  ;;  %v19384_v45 = vld [vmem:[#allocation17_spill] sm:$0xff] }
0x2332   :  { %v12231_v44 = vpop.permute.xlu1 %12230  ;;  %10881 = vmatprep.subr.bf16.mxu1 %v19384_v45 }
0x2333   :  { %v12233_v38 = vunpack.i.h.bf16 %v12231_v44  ;;  %v12232_v15 = vunpack.i.l.bf16 %v12231_v44  ;;  %v19385_v44 = vld [vmem:[#allocation33_spill] sm:$0xff] }
0x2334   :  { %10903 = vmatprep.subr.bf16.mxu0 %v19385_v44 }
0x2335   :  { %v18491_v57 = vsel %vm688_vm0, %v18337_v19, %v12233_v38  ;;  %v18495_v59 = vsel %vm688_vm0, %v18332_v28, %v12232_v15  ;;  %v9196_v38 = vpack.c.bf16 %v18451_v62, %v18451_v62 }
0x2337   :  { %v12241_v3 = vpop.permute.xlu1 %12240 }
0x2338   :  { %v12236_v29 = vpop.permute.xlu0 %12235  ;;  %v12243_v37 = vunpack.i.h.bf16 %v12241_v3  ;;  %v12242_v47 = vunpack.i.l.bf16 %v12241_v3 }
0x2339   :  { %v12238_v56 = vunpack.i.h.bf16 %v12236_v29  ;;  %v12237_v10 = vunpack.i.l.bf16 %v12236_v29 }
0x233a   :  { %v18507_v19 = vsel %vm688_vm0, %v18361_v17, %v12243_v37  ;;  %v18511_v28 = vsel %vm688_vm0, %v18356_v50, %v12242_v47 }
0x233b   :  { %v18499_v63 = vsel %vm688_vm0, %v18344_v42, %v12238_v56  ;;  %v18503_v8 = vsel %vm688_vm0, %v18348_v39, %v12237_v10  ;;  %v12251_v25 = vpop.permute.xlu1 %12250 }
0x233c   :  { %v12246_v6 = vpop.permute.xlu0 %12245  ;;  %v12253_v13 = vunpack.i.h.bf16 %v12251_v25  ;;  %v12252_v41 = vunpack.i.l.bf16 %v12251_v25 }
0x233d   :  { %v12248_v18 = vunpack.i.h.bf16 %v12246_v6  ;;  %v12247_v7 = vunpack.i.l.bf16 %v12246_v6 }
0x233e   :  { %v18523_v17 = vsel %vm688_vm0, %v18385_v32, %v12253_v13  ;;  %v18527_v50 = vsel %vm688_vm0, %v18380_v21, %v12252_v41 }
0x233f   :  { %v18515_v42 = vsel %vm688_vm0, %v18373_v51, %v12248_v18  ;;  %v18519_v39 = vsel %vm688_vm0, %v18368_v4, %v12247_v7  ;;  %v12261_v12 = vpop.permute.xlu1 %12260 }
0x2340   :  { %v12256_v61 = vpop.permute.xlu0 %12255  ;;  %v12263_v46 = vunpack.i.h.bf16 %v12261_v12  ;;  %v12262_v52 = vunpack.i.l.bf16 %v12261_v12 }
0x2341   :  { %v12258_v43 = vunpack.i.h.bf16 %v12256_v61  ;;  %v12257_v9 = vunpack.i.l.bf16 %v12256_v61 }
0x2342   :  { %v18539_v32 = vsel %vm688_vm0, %v18409_v20, %v12263_v46  ;;  %v18543_v21 = vsel %vm688_vm0, %v18404_v1, %v12262_v52 }
0x2343   :  { %v18531_v51 = vsel %vm688_vm0, %v18396_v60, %v12258_v43  ;;  %v18535_v4 = vsel %vm688_vm0, %v18391_v16, %v12257_v9  ;;  %v12271_v30 = vpop.permute.xlu1 %12270 }
0x2344   :  { %v12266_v2 = vpop.permute.xlu0 %12265  ;;  %v12273_v14 = vunpack.i.h.bf16 %v12271_v30  ;;  %v12272_v40 = vunpack.i.l.bf16 %v12271_v30 }
0x2345   :  { %v12268_v0 = vunpack.i.h.bf16 %v12266_v2  ;;  %v12267_v27 = vunpack.i.l.bf16 %v12266_v2 }
0x2346   :  { %v18555_v20 = vsel %vm688_vm0, %v18431_v23, %v12273_v14  ;;  %v18559_v1 = vsel %vm688_vm0, %v18426_v31, %v12272_v40 }
0x2347   :  { %v18547_v60 = vsel %vm688_vm0, %v18421_v5, %v12268_v0  ;;  %v18551_v16 = vsel %vm688_vm0, %v18416_v54, %v12267_v27  ;;  %v9194_v5 = vpack.c.bf16 %v18459_v33, %v18459_v33 }
0x2348   :  { %13004 = dma.done.wait [#allocation3], 32768 }
0x2349   :  { %13005 = vsyncadd [#allocation3], 4294934528  ;;  %v19386_v54 = vld [vmem:[#allocation9_spill] sm:$0xff]  ;;  %v19388_v15 = vld [vmem:[#allocation18_spill] sm:$0xff]  ;;  %9514 = vmatprep.mubr.bf16.mxu1 %v9194_v5  ;;  %9554 = vmatprep.mubr.bf16.mxu0 %v9196_v38  ;;  %v9193_v14 = vpack.c.bf16 %v18463_v22, %v18463_v22  ;;  %v9195_v40 = vpack.c.bf16 %v18455_v24, %v18455_v24 }
0x234a   :  { %10882 = vmatpush3.bf16.msra.mxu1 %v19386_v54  ;;  %v19387_v23 = vld [vmem:[#allocation25_spill] sm:$0xff]  ;;  %v19389_v31 = vld [vmem:[#allocation34_spill] sm:$0xff]  ;;  %v19392_v33 = vld [vmem:[#allocation19_spill] sm:$0xff]  ;;  %v9198_v54 = vpack.c.bf16 %v18483_v55, %v18483_v55 }
0x234b   :  { %10904 = vmatpush3.bf16.msra.mxu0 %v19387_v23  ;;  %10883 = vmatprep.subr.bf16.mxu1 %v19388_v15  ;;  %v19390_v29 = vld [vmem:[#allocation10_spill] sm:$0xff]  ;;  %v19393_v10 = vld [vmem:[#allocation35_spill] sm:$0xff]  ;;  %v19396_v37 = vld [vmem:[#allocation20_spill] sm:$0xff]  ;;  %v9200_v23 = vpack.c.bf16 %v18491_v57, %v18491_v57 }
0x234c   :  { %10905 = vmatprep.subr.bf16.mxu0 %v19389_v31  ;;  %v19391_v56 = vld [vmem:[#allocation26_spill] sm:$0xff]  ;;  %v19394_v62 = vld [vmem:[#allocation11_spill] sm:$0xff]  ;;  %v19397_v47 = vld [vmem:[#allocation36_spill] sm:$0xff] }
0x234d   :  { %v19395_v3 = vld [vmem:[#allocation27_spill] sm:$0xff]  ;;  %v19398_v6 = vld [vmem:[#allocation12_spill] sm:$0xff]  ;;  %v19400_v7 = vld [vmem:[#allocation21_spill] sm:$0xff] }
0x234e   :  { %10884 = vmatpush3.bf16.msra.mxu1 %v19390_v29  ;;  %v19399_v18 = vld [vmem:[#allocation28_spill] sm:$0xff]  ;;  %v19401_v25 = vld [vmem:[#allocation37_spill] sm:$0xff]  ;;  %v19404_v61 = vld [vmem:[#allocation22_spill] sm:$0xff] }
0x234f   :  { %10906 = vmatpush3.bf16.msra.mxu0 %v19391_v56  ;;  %10885 = vmatprep.subr.bf16.mxu1 %v19392_v33  ;;  %v19402_v13 = vld [vmem:[#allocation13_spill] sm:$0xff]  ;;  %v19405_v43 = vld [vmem:[#allocation38_spill] sm:$0xff]  ;;  %v19408_v46 = vld [vmem:[#allocation23_spill] sm:$0xff] }
0x2350   :  { %10907 = vmatprep.subr.bf16.mxu0 %v19393_v10  ;;  %v19403_v41 = vld [vmem:[#allocation29_spill] sm:$0xff]  ;;  %v19406_v9 = vld [vmem:[#allocation14_spill] sm:$0xff]  ;;  %v19409_v52 = vld [vmem:[#allocation39_spill] sm:$0xff] }
0x2351   :  { %v19407_v12 = vld [vmem:[#allocation30_spill] sm:$0xff]  ;;  %v19410_v2 = vld [vmem:[#allocation15_spill] sm:$0xff]  ;;  %v19412_v27 = vld [vmem:[#allocation24_spill] sm:$0xff] }
0x2352   :  { %10886 = vmatpush3.bf16.msra.mxu1 %v19394_v62  ;;  %v19411_v0 = vld [vmem:[#allocation31_spill] sm:$0xff]  ;;  %v19413_v30 = vld [vmem:[#allocation40_spill] sm:$0xff]  ;;  %v19416_v5 = vld [vmem:[#allocation49_spill] sm:$0xff] }
0x2353   :  { %10908 = vmatpush3.bf16.msra.mxu0 %v19395_v3  ;;  %10887 = vmatprep.subr.bf16.mxu1 %v19396_v37  ;;  %v19414_v45 = vld [vmem:[#allocation16_spill] sm:$0xff]  ;;  %v19417_v38 = vld [vmem:[#allocation65_spill] sm:$0xff]  ;;  %v19420_v24 = vld [vmem:[#allocation50_spill] sm:$0xff] }
0x2354   :  { %10909 = vmatprep.subr.bf16.mxu0 %v19397_v47  ;;  %v19415_v44 = vld [vmem:[#allocation32_spill] sm:$0xff]  ;;  %v19418_v22 = vld [vmem:[#allocation41_spill] sm:$0xff]  ;;  %v19421_v31 = vld [vmem:[#allocation66_spill] sm:$0xff] }
0x2355   :  { %v19419_v15 = vld [vmem:[#allocation57_spill] sm:$0xff]  ;;  %v19422_v29 = vld [vmem:[#allocation42_spill] sm:$0xff]  ;;  %v19424_v55 = vld [vmem:[#allocation51_spill] sm:$0xff] }
0x2356   :  { %10888 = vmatpush3.bf16.msra.mxu1 %v19398_v6  ;;  %v19423_v56 = vld [vmem:[#allocation58_spill] sm:$0xff]  ;;  %v19425_v33 = vld [vmem:[#allocation67_spill] sm:$0xff]  ;;  %v19428_v62 = vld [vmem:[#allocation52_spill] sm:$0xff] }
0x2357   :  { %10910 = vmatpush3.bf16.msra.mxu0 %v19399_v18  ;;  %10889 = vmatprep.subr.bf16.mxu1 %v19400_v7  ;;  %v19426_v57 = vld [vmem:[#allocation43_spill] sm:$0xff]  ;;  %v19429_v3 = vld [vmem:[#allocation68_spill] sm:$0xff]  ;;  %v19432_v6 = vld [vmem:[#allocation53_spill] sm:$0xff] }
0x2358   :  { %10911 = vmatprep.subr.bf16.mxu0 %v19401_v25  ;;  %v19427_v10 = vld [vmem:[#allocation59_spill] sm:$0xff]  ;;  %v19430_v37 = vld [vmem:[#allocation44_spill] sm:$0xff]  ;;  %v19433_v18 = vld [vmem:[#allocation69_spill] sm:$0xff] }
0x2359   :  { %v19431_v47 = vld [vmem:[#allocation60_spill] sm:$0xff]  ;;  %v19434_v7 = vld [vmem:[#allocation45_spill] sm:$0xff] }
0x235a   :  { %10890 = vmatpush3.bf16.msra.mxu1 %v19402_v13  ;;  %v19435_v25 = vld [vmem:[#allocation61_spill] sm:$0xff]  ;;  %v19436_v13 = vld [vmem:[#allocation54_spill] sm:$0xff] }
0x235b   :  { %10912 = vmatpush3.bf16.msra.mxu0 %v19403_v41  ;;  %10891 = vmatprep.subr.bf16.mxu1 %v19404_v61  ;;  %v19437_v41 = vld [vmem:[#allocation70_spill] sm:$0xff] }
0x235c   :  { %10913 = vmatprep.subr.bf16.mxu0 %v19405_v43  ;;  %v19438_v61 = vld [vmem:[#allocation46_spill] sm:$0xff] }
0x235d   :  { %v19439_v43 = vld [vmem:[#allocation62_spill] sm:$0xff] }
0x235e   :  { %10892 = vmatpush3.bf16.msra.mxu1 %v19406_v9  ;;  %v19440_v9 = vld [vmem:[#allocation55_spill] sm:$0xff] }
0x235f   :  { %10914 = vmatpush3.bf16.msra.mxu0 %v19407_v12  ;;  %10893 = vmatprep.subr.bf16.mxu1 %v19408_v46  ;;  %v19441_v12 = vld [vmem:[#allocation71_spill] sm:$0xff] }
0x2360   :  { %10915 = vmatprep.subr.bf16.mxu0 %v19409_v52  ;;  %v19442_v46 = vld [vmem:[#allocation47_spill] sm:$0xff] }
0x2361   :  { %v19443_v52 = vld [vmem:[#allocation63_spill] sm:$0xff] }
0x2362   :  { %10894 = vmatpush3.bf16.msra.mxu1 %v19410_v2  ;;  %v19444_v2 = vld [vmem:[#allocation56_spill] sm:$0xff] }
0x2363   :  { %10916 = vmatpush3.bf16.msra.mxu0 %v19411_v0  ;;  %10895 = vmatprep.subr.bf16.mxu1 %v19412_v27  ;;  %v19445_v0 = vld [vmem:[#allocation72_spill] sm:$0xff]  ;;  %v9197_v27 = vpack.c.bf16 %v18487_v48, %v18487_v48  ;;  %v19450_v48 = vld [vmem:[#allocation73_spill] sm:$0xff] }
0x2364   :  { %10917 = vmatprep.subr.bf16.mxu0 %v19413_v30  ;;  %v9199_v30 = vpack.c.bf16 %v18495_v59, %v18495_v59  ;;  %v19452_v59 = vld [vmem:[#allocation82_spill] sm:$0xff] }
0x2366   :  { %10896 = vmatpush3.bf16.msra.mxu1 %v19414_v45  ;;  %v19448_v45 = vld [vmem:[#allocation81_spill] sm:$0xff] }
0x2367   :  { %10918 = vmatpush3.bf16.msra.mxu0 %v19415_v44  ;;  %10925 = vmatprep.subr.bf16.mxu1 %v19416_v5  ;;  %v19449_v44 = vld [vmem:[#allocation97_spill] sm:$0xff]  ;;  %v9202_v5 = vpack.c.bf16 %v18435_v49, %v18435_v49  ;;  %v19456_v49 = vld [vmem:[#allocation83_spill] sm:$0xff] }
0x2368   :  { %10947 = vmatprep.subr.bf16.mxu0 %v19417_v38  ;;  %v9204_v38 = vpack.c.bf16 %v18443_v35, %v18443_v35  ;;  %v19458_v35 = vld [vmem:[#allocation75_spill] sm:$0xff] }
0x2369   :  { %9515 = vmatmul.mubr.bf16.vlgmr.msra.gmra.mrb[200].mxu1 %v9193_v14  ;;  %v19446_v14 = vld [vmem:[#allocation48_spill] sm:$0xff] }
0x236a   :  { %9555 = vmatmul.mubr.bf16.vlgmr.msra.gmra.mrb[232].mxu0 %v9195_v40  ;;  %10926 = vmatpush3.bf16.msra.mxu1 %v19418_v22  ;;  %v19447_v40 = vld [vmem:[#allocation64_spill] sm:$0xff]  ;;  %v19454_v22 = vld [vmem:[#allocation74_spill] sm:$0xff] }
0x236b   :  { %10948 = vmatpush3.bf16.msra.mxu0 %v19419_v15  ;;  %10927 = vmatprep.subr.bf16.mxu1 %v19420_v24  ;;  %v19455_v15 = vld [vmem:[#allocation90_spill] sm:$0xff]  ;;  %v19457_v24 = vld [vmem:[#allocation99_spill] sm:$0xff] }
0x236c   :  { %10949 = vmatprep.subr.bf16.mxu0 %v19421_v31  ;;  %9594 = vmatprep.mubr.bf16.mxu1 %v9198_v54  ;;  %v19451_v54 = vld [vmem:[#allocation89_spill] sm:$0xff]  ;;  %v19459_v31 = vld [vmem:[#allocation91_spill] sm:$0xff] }
0x236d   :  { %9634 = vmatprep.mubr.bf16.mxu0 %v9200_v23  ;;  %v19453_v23 = vld [vmem:[#allocation98_spill] sm:$0xff] }
0x236e   :  { %10928 = vmatpush3.bf16.msra.mxu1 %v19422_v29  ;;  %v19460_v29 = vld [vmem:[#allocation84_spill] sm:$0xff] }
0x236f   :  { %10950 = vmatpush3.bf16.msra.mxu0 %v19423_v56  ;;  %10929 = vmatprep.subr.bf16.mxu1 %v19424_v55  ;;  %v19461_v56 = vld [vmem:[#allocation100_spill] sm:$0xff] }
0x2370   :  { %10951 = vmatprep.subr.bf16.mxu0 %v19425_v33  ;;  %v19462_v55 = vld [vmem:[#allocation76_spill] sm:$0xff] }
0x2371   :  { %v19463_v33 = vld [vmem:[#allocation92_spill] sm:$0xff] }
0x2372   :  { %10930 = vmatpush3.bf16.msra.mxu1 %v19426_v57  ;;  %v19464_v57 = vld [vmem:[#allocation85_spill] sm:$0xff] }
0x2373   :  { %10952 = vmatpush3.bf16.msra.mxu0 %v19427_v10  ;;  %10931 = vmatprep.subr.bf16.mxu1 %v19428_v62  ;;  %v19465_v10 = vld [vmem:[#allocation101_spill] sm:$0xff] }
0x2374   :  { %10953 = vmatprep.subr.bf16.mxu0 %v19429_v3  ;;  %v19466_v62 = vld [vmem:[#allocation77_spill] sm:$0xff] }
0x2375   :  { %v19467_v3 = vld [vmem:[#allocation93_spill] sm:$0xff] }
0x2376   :  { %10932 = vmatpush3.bf16.msra.mxu1 %v19430_v37  ;;  %v19468_v37 = vld [vmem:[#allocation86_spill] sm:$0xff] }
0x2377   :  { %10954 = vmatpush3.bf16.msra.mxu0 %v19431_v47  ;;  %10933 = vmatprep.subr.bf16.mxu1 %v19432_v6  ;;  %v19469_v47 = vld [vmem:[#allocation102_spill] sm:$0xff] }
0x2378   :  { %10955 = vmatprep.subr.bf16.mxu0 %v19433_v18  ;;  %v19470_v6 = vld [vmem:[#allocation78_spill] sm:$0xff] }
0x2379   :  { %v19471_v18 = vld [vmem:[#allocation94_spill] sm:$0xff] }
0x237a   :  { %10934 = vmatpush3.bf16.msra.mxu1 %v19434_v7  ;;  %v19472_v7 = vld [vmem:[#allocation87_spill] sm:$0xff] }
0x237b   :  { %10956 = vmatpush3.bf16.msra.mxu0 %v19435_v25  ;;  %10935 = vmatprep.subr.bf16.mxu1 %v19436_v13  ;;  %v19473_v25 = vld [vmem:[#allocation103_spill] sm:$0xff] }
0x237c   :  { %10957 = vmatprep.subr.bf16.mxu0 %v19437_v41  ;;  %v19474_v13 = vld [vmem:[#allocation79_spill] sm:$0xff] }
0x237d   :  { %v19475_v41 = vld [vmem:[#allocation95_spill] sm:$0xff] }
0x237e   :  { %10936 = vmatpush3.bf16.msra.mxu1 %v19438_v61  ;;  %v19476_v61 = vld [vmem:[#allocation88_spill] sm:$0xff] }
0x237f   :  { %10958 = vmatpush3.bf16.msra.mxu0 %v19439_v43  ;;  %10937 = vmatprep.subr.bf16.mxu1 %v19440_v9  ;;  %v19477_v43 = vld [vmem:[#allocation104_spill] sm:$0xff]  ;;  %v9201_v9 = vpack.c.bf16 %v18439_v34, %v18439_v34  ;;  %v19482_v34 = vld [vmem:[#allocation105_spill] sm:$0xff] }
0x2380   :  { %10959 = vmatprep.subr.bf16.mxu0 %v19441_v12  ;;  %v9203_v12 = vpack.c.bf16 %v18447_v11, %v18447_v11  ;;  %v19484_v11 = vld [vmem:[#allocation114_spill] sm:$0xff] }
0x2382   :  { %10938 = vmatpush3.bf16.msra.mxu1 %v19442_v46  ;;  %v19478_v46 = vld [vmem:[#allocation80_spill] sm:$0xff] }
0x2383   :  { %10960 = vmatpush3.bf16.msra.mxu0 %v19443_v52  ;;  %10939 = vmatprep.subr.bf16.mxu1 %v19444_v2  ;;  %v19479_v52 = vld [vmem:[#allocation96_spill] sm:$0xff]  ;;  %v19480_v2 = vld [vmem:[#allocation113_spill] sm:$0xff] }
0x2384   :  { %10961 = vmatprep.subr.bf16.mxu0 %v19445_v0  ;;  %v19481_v0 = vld [vmem:[#allocation129_spill] sm:$0xff] }
0x2386   :  { %10940 = vmatpush3.bf16.msra.mxu1 %v19446_v14  ;;  %v19483_v14 = vld [vmem:[#allocation121_spill] sm:$0xff] }
0x2387   :  { %10962 = vmatpush3.bf16.msra.mxu0 %v19447_v40  ;;  %10969 = vmatprep.subr.bf16.mxu1 %v19448_v45  ;;  %v19485_v40 = vld [vmem:[#allocation130_spill] sm:$0xff] }
0x2388   :  { %10991 = vmatprep.subr.bf16.mxu0 %v19449_v44  ;;  %v19486_v45 = vld [vmem:[#allocation106_spill] sm:$0xff] }
0x2389   :  { %9595 = vmatmul.mubr.bf16.vlgmr.msra.gmra.mrb[204].mxu1 %v9197_v27  ;;  %v9206_v27 = vpack.c.bf16 %v18467_v58, %v18467_v58  ;;  %v19487_v44 = vld [vmem:[#allocation122_spill] sm:$0xff]  ;;  %v19488_v58 = vld [vmem:[#allocation115_spill] sm:$0xff] }
0x238a   :  { %9635 = vmatmul.mubr.bf16.vlgmr.msra.gmra.mrb[236].mxu0 %v9199_v30  ;;  %10970 = vmatpush3.bf16.msra.mxu1 %v19450_v48  ;;  %v9208_v30 = vpack.c.bf16 %v18475_v53, %v18475_v53  ;;  %v19490_v53 = vld [vmem:[#allocation107_spill] sm:$0xff]  ;;  %v19492_v48 = vld [vmem:[#allocation116_spill] sm:$0xff] }
0x238b   :  { %10992 = vmatpush3.bf16.msra.mxu0 %v19451_v54  ;;  %10971 = vmatprep.subr.bf16.mxu1 %v19452_v59  ;;  %v19493_v54 = vld [vmem:[#allocation132_spill] sm:$0xff] }
0x238c   :  { %10993 = vmatprep.subr.bf16.mxu0 %v19453_v23  ;;  %9674 = vmatprep.mubr.bf16.mxu1 %v9202_v5  ;;  %v19489_v5 = vld [vmem:[#allocation131_spill] sm:$0xff]  ;;  %v19494_v59 = vld [vmem:[#allocation108_spill] sm:$0xff] }
0x238d   :  { %9714 = vmatprep.mubr.bf16.mxu0 %v9204_v38  ;;  %v19491_v38 = vld [vmem:[#allocation123_spill] sm:$0xff]  ;;  %v19495_v23 = vld [vmem:[#allocation124_spill] sm:$0xff] }
0x238e   :  { %10972 = vmatpush3.bf16.msra.mxu1 %v19454_v22  ;;  %v19496_v22 = vld [vmem:[#allocation117_spill] sm:$0xff] }
0x238f   :  { %10994 = vmatpush3.bf16.msra.mxu0 %v19455_v15  ;;  %10973 = vmatprep.subr.bf16.mxu1 %v19456_v49  ;;  %v19497_v15 = vld [vmem:[#allocation133_spill] sm:$0xff] }
0x2390   :  { %10995 = vmatprep.subr.bf16.mxu0 %v19457_v24  ;;  %v19498_v49 = vld [vmem:[#allocation109_spill] sm:$0xff] }
0x2391   :  { %v19499_v24 = vld [vmem:[#allocation125_spill] sm:$0xff] }
0x2392   :  { %10974 = vmatpush3.bf16.msra.mxu1 %v19458_v35  ;;  %v19500_v35 = vld [vmem:[#allocation118_spill] sm:$0xff] }
0x2393   :  { %10996 = vmatpush3.bf16.msra.mxu0 %v19459_v31  ;;  %10975 = vmatprep.subr.bf16.mxu1 %v19460_v29  ;;  %v19501_v31 = vld [vmem:[#allocation134_spill] sm:$0xff] }
0x2394   :  { %10997 = vmatprep.subr.bf16.mxu0 %v19461_v56  ;;  %v19502_v29 = vld [vmem:[#allocation110_spill] sm:$0xff] }
0x2395   :  { %v19503_v56 = vld [vmem:[#allocation126_spill] sm:$0xff] }
0x2396   :  { %10976 = vmatpush3.bf16.msra.mxu1 %v19462_v55  ;;  %v19504_v55 = vld [vmem:[#allocation119_spill] sm:$0xff] }
0x2397   :  { %10998 = vmatpush3.bf16.msra.mxu0 %v19463_v33  ;;  %10977 = vmatprep.subr.bf16.mxu1 %v19464_v57  ;;  %v19505_v33 = vld [vmem:[#allocation135_spill] sm:$0xff] }
0x2398   :  { %10999 = vmatprep.subr.bf16.mxu0 %v19465_v10  ;;  %v19506_v57 = vld [vmem:[#allocation111_spill] sm:$0xff] }
0x2399   :  { %v19507_v10 = vld [vmem:[#allocation127_spill] sm:$0xff] }
0x239a   :  { %10978 = vmatpush3.bf16.msra.mxu1 %v19466_v62  ;;  %v19508_v62 = vld [vmem:[#allocation120_spill] sm:$0xff] }
0x239b   :  { %11000 = vmatpush3.bf16.msra.mxu0 %v19467_v3  ;;  %10979 = vmatprep.subr.bf16.mxu1 %v19468_v37  ;;  %v19509_v3 = vld [vmem:[#allocation136_spill] sm:$0xff]  ;;  %v9205_v37 = vpack.c.bf16 %v18471_v26, %v18471_v26  ;;  %v19514_v26 = vld [vmem:[#allocation137_spill] sm:$0xff] }
0x239c   :  { %11001 = vmatprep.subr.bf16.mxu0 %v19469_v47  ;;  %v9207_v47 = vpack.c.bf16 %v18479_v36, %v18479_v36  ;;  %v19516_v36 = vld [vmem:[#allocation146_spill] sm:$0xff] }
0x239e   :  { %10980 = vmatpush3.bf16.msra.mxu1 %v19470_v6  ;;  %v19510_v6 = vld [vmem:[#allocation112_spill] sm:$0xff] }
0x239f   :  { %11002 = vmatpush3.bf16.msra.mxu0 %v19471_v18  ;;  %10981 = vmatprep.subr.bf16.mxu1 %v19472_v7  ;;  %v19511_v18 = vld [vmem:[#allocation128_spill] sm:$0xff]  ;;  %v19512_v7 = vld [vmem:[#allocation145_spill] sm:$0xff] }
0x23a0   :  { %11003 = vmatprep.subr.bf16.mxu0 %v19473_v25  ;;  %v19513_v25 = vld [vmem:[#allocation161_spill] sm:$0xff] }
0x23a2   :  { %10982 = vmatpush3.bf16.msra.mxu1 %v19474_v13  ;;  %v9210_v13 = vpack.c.bf16 %v18515_v42, %v18515_v42  ;;  %v19520_v42 = vld [vmem:[#allocation147_spill] sm:$0xff] }
0x23a3   :  { %11004 = vmatpush3.bf16.msra.mxu0 %v19475_v41  ;;  %10983 = vmatprep.subr.bf16.mxu1 %v19476_v61  ;;  %v9212_v41 = vpack.c.bf16 %v18523_v17, %v18523_v17  ;;  %v19515_v61 = vld [vmem:[#allocation153_spill] sm:$0xff]  ;;  %v19522_v17 = vld [vmem:[#allocation139_spill] sm:$0xff] }
0x23a4   :  { %11005 = vmatprep.subr.bf16.mxu0 %v19477_v43  ;;  %v19517_v43 = vld [vmem:[#allocation162_spill] sm:$0xff] }
0x23a6   :  { %10984 = vmatpush3.bf16.msra.mxu1 %v19478_v46  ;;  %v19521_v46 = vld [vmem:[#allocation163_spill] sm:$0xff] }
0x23a7   :  { %11006 = vmatpush3.bf16.msra.mxu0 %v19479_v52  ;;  %11013 = vmatprep.subr.bf16.mxu1 %v19480_v2  ;;  %v19523_v52 = vld [vmem:[#allocation155_spill] sm:$0xff]  ;;  %v19524_v2 = vld [vmem:[#allocation148_spill] sm:$0xff] }
0x23a8   :  { %11035 = vmatprep.subr.bf16.mxu0 %v19481_v0  ;;  %v19525_v0 = vld [vmem:[#allocation164_spill] sm:$0xff] }
0x23a9   :  { %9675 = vmatmul.mubr.bf16.vlgmr.msra.gmra.mrb[208].mxu1 %v9201_v9  ;;  %v19518_v9 = vld [vmem:[#allocation138_spill] sm:$0xff] }
0x23aa   :  { %9715 = vmatmul.mubr.bf16.vlgmr.msra.gmra.mrb[240].mxu0 %v9203_v12  ;;  %11014 = vmatpush3.bf16.msra.mxu1 %v19482_v34  ;;  %v19519_v12 = vld [vmem:[#allocation154_spill] sm:$0xff]  ;;  %v19528_v34 = vld [vmem:[#allocation149_spill] sm:$0xff] }
0x23ab   :  { %11036 = vmatpush3.bf16.msra.mxu0 %v19483_v14  ;;  %11015 = vmatprep.subr.bf16.mxu1 %v19484_v11  ;;  %v19529_v14 = vld [vmem:[#allocation165_spill] sm:$0xff] }
0x23ac   :  { %11037 = vmatprep.subr.bf16.mxu0 %v19485_v40  ;;  %9754 = vmatprep.mubr.bf16.mxu1 %v9206_v27  ;;  %v19526_v27 = vld [vmem:[#allocation140_spill] sm:$0xff]  ;;  %v19530_v11 = vld [vmem:[#allocation141_spill] sm:$0xff] }
0x23ad   :  { %9794 = vmatprep.mubr.bf16.mxu0 %v9208_v30  ;;  %v19527_v30 = vld [vmem:[#allocation156_spill] sm:$0xff]  ;;  %v19531_v40 = vld [vmem:[#allocation157_spill] sm:$0xff] }
0x23ae   :  { %11016 = vmatpush3.bf16.msra.mxu1 %v19486_v45  ;;  %v19532_v45 = vld [vmem:[#allocation150_spill] sm:$0xff] }
0x23af   :  { %11038 = vmatpush3.bf16.msra.mxu0 %v19487_v44  ;;  %11017 = vmatprep.subr.bf16.mxu1 %v19488_v58  ;;  %v19533_v44 = vld [vmem:[#allocation166_spill] sm:$0xff] }
0x23b0   :  { %11039 = vmatprep.subr.bf16.mxu0 %v19489_v5  ;;  %v19534_v58 = vld [vmem:[#allocation142_spill] sm:$0xff] }
0x23b1   :  { %v19535_v5 = vld [vmem:[#allocation158_spill] sm:$0xff] }
0x23b2   :  { %11018 = vmatpush3.bf16.msra.mxu1 %v19490_v53  ;;  %v19536_v53 = vld [vmem:[#allocation151_spill] sm:$0xff] }
0x23b3   :  { %11040 = vmatpush3.bf16.msra.mxu0 %v19491_v38  ;;  %11019 = vmatprep.subr.bf16.mxu1 %v19492_v48  ;;  %v19537_v38 = vld [vmem:[#allocation167_spill] sm:$0xff] }
0x23b4   :  { %11041 = vmatprep.subr.bf16.mxu0 %v19493_v54  ;;  %v19538_v48 = vld [vmem:[#allocation143_spill] sm:$0xff] }
0x23b5   :  { %v19539_v54 = vld [vmem:[#allocation159_spill] sm:$0xff] }
0x23b6   :  { %11020 = vmatpush3.bf16.msra.mxu1 %v19494_v59  ;;  %v19540_v59 = vld [vmem:[#allocation152_spill] sm:$0xff] }
0x23b7   :  { %11042 = vmatpush3.bf16.msra.mxu0 %v19495_v23  ;;  %11021 = vmatprep.subr.bf16.mxu1 %v19496_v22  ;;  %v19541_v23 = vld [vmem:[#allocation168_spill] sm:$0xff]  ;;  %v9209_v22 = vpack.c.bf16 %v18519_v39, %v18519_v39  ;;  %v19546_v39 = vld [vmem:[#allocation169_spill] sm:$0xff] }
0x23b8   :  { %11043 = vmatprep.subr.bf16.mxu0 %v19497_v15  ;;  %v9211_v15 = vpack.c.bf16 %v18527_v50, %v18527_v50  ;;  %v19548_v50 = vld [vmem:[#allocation178_spill] sm:$0xff] }
0x23ba   :  { %11022 = vmatpush3.bf16.msra.mxu1 %v19498_v49  ;;  %v19542_v49 = vld [vmem:[#allocation144_spill] sm:$0xff] }
0x23bb   :  { %11044 = vmatpush3.bf16.msra.mxu0 %v19499_v24  ;;  %11023 = vmatprep.subr.bf16.mxu1 %v19500_v35  ;;  %v19543_v24 = vld [vmem:[#allocation160_spill] sm:$0xff]  ;;  %v19544_v35 = vld [vmem:[#allocation177_spill] sm:$0xff] }
0x23bc   :  { %11045 = vmatprep.subr.bf16.mxu0 %v19501_v31  ;;  %v19545_v31 = vld [vmem:[#allocation193_spill] sm:$0xff] }
0x23be   :  { %11024 = vmatpush3.bf16.msra.mxu1 %v19502_v29  ;;  %v9214_v29 = vpack.c.bf16 %v18531_v51, %v18531_v51  ;;  %v19552_v51 = vld [vmem:[#allocation179_spill] sm:$0xff] }
0x23bf   :  { %11046 = vmatpush3.bf16.msra.mxu0 %v19503_v56  ;;  %11025 = vmatprep.subr.bf16.mxu1 %v19504_v55  ;;  %v9216_v56 = vpack.c.bf16 %v18539_v32, %v18539_v32  ;;  %v19547_v55 = vld [vmem:[#allocation185_spill] sm:$0xff]  ;;  %v19554_v32 = vld [vmem:[#allocation171_spill] sm:$0xff] }
0x23c0   :  { %11047 = vmatprep.subr.bf16.mxu0 %v19505_v33  ;;  %v19549_v33 = vld [vmem:[#allocation194_spill] sm:$0xff] }
0x23c2   :  { %11026 = vmatpush3.bf16.msra.mxu1 %v19506_v57  ;;  %v19550_v57 = vld [vmem:[#allocation170_spill] sm:$0xff] }
0x23c3   :  { %11048 = vmatpush3.bf16.msra.mxu0 %v19507_v10  ;;  %11027 = vmatprep.subr.bf16.mxu1 %v19508_v62  ;;  %v19551_v10 = vld [vmem:[#allocation186_spill] sm:$0xff]  ;;  %v19553_v62 = vld [vmem:[#allocation195_spill] sm:$0xff] }
0x23c4   :  { %11049 = vmatprep.subr.bf16.mxu0 %v19509_v3  ;;  %v19555_v3 = vld [vmem:[#allocation187_spill] sm:$0xff] }
0x23c6   :  { %11028 = vmatpush3.bf16.msra.mxu1 %v19510_v6  ;;  %v19558_v6 = vld [vmem:[#allocation172_spill] sm:$0xff] }
0x23c7   :  { %11050 = vmatpush3.bf16.msra.mxu0 %v19511_v18  ;;  %11057 = vmatprep.subr.bf16.mxu1 %v19512_v7  ;;  %v19559_v18 = vld [vmem:[#allocation188_spill] sm:$0xff]  ;;  %v19560_v7 = vld [vmem:[#allocation181_spill] sm:$0xff] }
0x23c8   :  { %11079 = vmatprep.subr.bf16.mxu0 %v19513_v25  ;;  %v19561_v25 = vld [vmem:[#allocation197_spill] sm:$0xff] }
0x23c9   :  { %9755 = vmatmul.mubr.bf16.vlgmr.msra.gmra.mrb[212].mxu1 %v9205_v37  ;;  %v19556_v37 = vld [vmem:[#allocation180_spill] sm:$0xff] }
0x23ca   :  { %9795 = vmatmul.mubr.bf16.vlgmr.msra.gmra.mrb[244].mxu0 %v9207_v47  ;;  %11058 = vmatpush3.bf16.msra.mxu1 %v19514_v26  ;;  %v19557_v47 = vld [vmem:[#allocation196_spill] sm:$0xff]  ;;  %v19564_v26 = vld [vmem:[#allocation182_spill] sm:$0xff] }
0x23cb   :  { %11080 = vmatpush3.bf16.msra.mxu0 %v19515_v61  ;;  %11059 = vmatprep.subr.bf16.mxu1 %v19516_v36  ;;  %v19565_v61 = vld [vmem:[#allocation198_spill] sm:$0xff] }
0x23cc   :  { %11081 = vmatprep.subr.bf16.mxu0 %v19517_v43  ;;  %9834 = vmatprep.mubr.bf16.mxu1 %v9210_v13  ;;  %v19562_v13 = vld [vmem:[#allocation173_spill] sm:$0xff]  ;;  %v19566_v36 = vld [vmem:[#allocation174_spill] sm:$0xff] }
0x23cd   :  { %9874 = vmatprep.mubr.bf16.mxu0 %v9212_v41  ;;  %v19563_v41 = vld [vmem:[#allocation189_spill] sm:$0xff]  ;;  %v19567_v43 = vld [vmem:[#allocation190_spill] sm:$0xff] }
0x23ce   :  { %11060 = vmatpush3.bf16.msra.mxu1 %v19518_v9  ;;  %v19568_v9 = vld [vmem:[#allocation183_spill] sm:$0xff] }
0x23cf   :  { %11082 = vmatpush3.bf16.msra.mxu0 %v19519_v12  ;;  %11061 = vmatprep.subr.bf16.mxu1 %v19520_v42  ;;  %v19569_v12 = vld [vmem:[#allocation199_spill] sm:$0xff] }
0x23d0   :  { %11083 = vmatprep.subr.bf16.mxu0 %v19521_v46  ;;  %v19570_v42 = vld [vmem:[#allocation175_spill] sm:$0xff] }
0x23d1   :  { %v19571_v46 = vld [vmem:[#allocation191_spill] sm:$0xff] }
0x23d2   :  { %11062 = vmatpush3.bf16.msra.mxu1 %v19522_v17  ;;  %v19572_v17 = vld [vmem:[#allocation184_spill] sm:$0xff] }
0x23d3   :  { %11084 = vmatpush3.bf16.msra.mxu0 %v19523_v52  ;;  %11063 = vmatprep.subr.bf16.mxu1 %v19524_v2  ;;  %v19573_v52 = vld [vmem:[#allocation200_spill] sm:$0xff]  ;;  %v9213_v2 = vpack.c.bf16 %v18535_v4, %v18535_v4  ;;  %v19578_v4 = vld [vmem:[#allocation201_spill] sm:$0xff] }
0x23d4   :  { %11085 = vmatprep.subr.bf16.mxu0 %v19525_v0  ;;  %v9215_v0 = vpack.c.bf16 %v18543_v21, %v18543_v21  ;;  %v19580_v21 = vld [vmem:[#allocation210_spill] sm:$0xff] }
0x23d6   :  { %11064 = vmatpush3.bf16.msra.mxu1 %v19526_v27  ;;  %v19574_v27 = vld [vmem:[#allocation176_spill] sm:$0xff] }
0x23d7   :  { %11086 = vmatpush3.bf16.msra.mxu0 %v19527_v30  ;;  %11065 = vmatprep.subr.bf16.mxu1 %v19528_v34  ;;  %v19575_v30 = vld [vmem:[#allocation192_spill] sm:$0xff]  ;;  %v19576_v34 = vld [vmem:[#allocation209_spill] sm:$0xff] }
0x23d8   :  { %11087 = vmatprep.subr.bf16.mxu0 %v19529_v14  ;;  %v19577_v14 = vld [vmem:[#allocation225_spill] sm:$0xff] }
0x23da   :  { %11066 = vmatpush3.bf16.msra.mxu1 %v19530_v11  ;;  %v9218_v11 = vpack.c.bf16 %v18499_v63, %v18499_v63  ;;  %v19584_v63 = vld [vmem:[#allocation211_spill] sm:$0xff] }
0x23db   :  { %11088 = vmatpush3.bf16.msra.mxu0 %v19531_v40  ;;  %11067 = vmatprep.subr.bf16.mxu1 %v19532_v45  ;;  %v9220_v40 = vpack.c.bf16 %v18507_v19, %v18507_v19  ;;  %v19579_v45 = vld [vmem:[#allocation217_spill] sm:$0xff]  ;;  %v19586_v19 = vld [vmem:[#allocation203_spill] sm:$0xff] }
0x23dc   :  { %11089 = vmatprep.subr.bf16.mxu0 %v19533_v44  ;;  %v19581_v44 = vld [vmem:[#allocation226_spill] sm:$0xff] }
0x23de   :  { %11068 = vmatpush3.bf16.msra.mxu1 %v19534_v58  ;;  %v19582_v58 = vld [vmem:[#allocation202_spill] sm:$0xff] }
0x23df   :  { %11090 = vmatpush3.bf16.msra.mxu0 %v19535_v5  ;;  %11069 = vmatprep.subr.bf16.mxu1 %v19536_v53  ;;  %v19583_v5 = vld [vmem:[#allocation218_spill] sm:$0xff]  ;;  %v19585_v53 = vld [vmem:[#allocation227_spill] sm:$0xff] }
0x23e0   :  { %11091 = vmatprep.subr.bf16.mxu0 %v19537_v38  ;;  %v19587_v38 = vld [vmem:[#allocation219_spill] sm:$0xff] }
0x23e2   :  { %11070 = vmatpush3.bf16.msra.mxu1 %v19538_v48  ;;  %v19588_v48 = vld [vmem:[#allocation212_spill] sm:$0xff] }
0x23e3   :  { %11092 = vmatpush3.bf16.msra.mxu0 %v19539_v54  ;;  %11071 = vmatprep.subr.bf16.mxu1 %v19540_v59  ;;  %v19589_v54 = vld [vmem:[#allocation228_spill] sm:$0xff] }
0x23e4   :  { %11093 = vmatprep.subr.bf16.mxu0 %v19541_v23  ;;  %v19590_v59 = vld [vmem:[#allocation204_spill] sm:$0xff] }
0x23e5   :  { %v19591_v23 = vld [vmem:[#allocation220_spill] sm:$0xff] }
0x23e6   :  { %11072 = vmatpush3.bf16.msra.mxu1 %v19542_v49  ;;  %v19594_v49 = vld [vmem:[#allocation205_spill] sm:$0xff] }
0x23e7   :  { %11094 = vmatpush3.bf16.msra.mxu0 %v19543_v24  ;;  %11101 = vmatprep.subr.bf16.mxu1 %v19544_v35  ;;  %v19595_v24 = vld [vmem:[#allocation221_spill] sm:$0xff]  ;;  %v19596_v35 = vld [vmem:[#allocation214_spill] sm:$0xff] }
0x23e8   :  { %11123 = vmatprep.subr.bf16.mxu0 %v19545_v31  ;;  %v19597_v31 = vld [vmem:[#allocation230_spill] sm:$0xff] }
0x23e9   :  { %9835 = vmatmul.mubr.bf16.vlgmr.msra.gmra.mrb[216].mxu1 %v9209_v22  ;;  %v19592_v22 = vld [vmem:[#allocation213_spill] sm:$0xff] }
0x23ea   :  { %9875 = vmatmul.mubr.bf16.vlgmr.msra.gmra.mrb[248].mxu0 %v9211_v15  ;;  %11102 = vmatpush3.bf16.msra.mxu1 %v19546_v39  ;;  %v19593_v15 = vld [vmem:[#allocation229_spill] sm:$0xff]  ;;  %v19600_v39 = vld [vmem:[#allocation215_spill] sm:$0xff] }
0x23eb   :  { %11124 = vmatpush3.bf16.msra.mxu0 %v19547_v55  ;;  %11103 = vmatprep.subr.bf16.mxu1 %v19548_v50  ;;  %v19601_v55 = vld [vmem:[#allocation231_spill] sm:$0xff] }
0x23ec   :  { %11125 = vmatprep.subr.bf16.mxu0 %v19549_v33  ;;  %9914 = vmatprep.mubr.bf16.mxu1 %v9214_v29  ;;  %v19598_v29 = vld [vmem:[#allocation206_spill] sm:$0xff]  ;;  %v19602_v50 = vld [vmem:[#allocation207_spill] sm:$0xff] }
0x23ed   :  { %9954 = vmatprep.mubr.bf16.mxu0 %v9216_v56  ;;  %v19599_v56 = vld [vmem:[#allocation222_spill] sm:$0xff]  ;;  %v19603_v33 = vld [vmem:[#allocation223_spill] sm:$0xff] }
0x23ee   :  { %11104 = vmatpush3.bf16.msra.mxu1 %v19550_v57  ;;  %v19604_v57 = vld [vmem:[#allocation216_spill] sm:$0xff] }
0x23ef   :  { %11126 = vmatpush3.bf16.msra.mxu0 %v19551_v10  ;;  %11105 = vmatprep.subr.bf16.mxu1 %v19552_v51  ;;  %v19605_v10 = vld [vmem:[#allocation232_spill] sm:$0xff]  ;;  %v9217_v51 = vpack.c.bf16 %v18503_v8, %v18503_v8  ;;  %v19610_v8 = vld [vmem:[#allocation233_spill] sm:$0xff] }
0x23f0   :  { %11127 = vmatprep.subr.bf16.mxu0 %v19553_v62  ;;  %v9219_v62 = vpack.c.bf16 %v18511_v28, %v18511_v28  ;;  %v19612_v28 = vld [vmem:[#allocation242_spill] sm:$0xff] }
0x23f2   :  { %11106 = vmatpush3.bf16.msra.mxu1 %v19554_v32  ;;  %v19606_v32 = vld [vmem:[#allocation208_spill] sm:$0xff] }
0x23f3   :  { %11128 = vmatpush3.bf16.msra.mxu0 %v19555_v3  ;;  %11107 = vmatprep.subr.bf16.mxu1 %v19556_v37  ;;  %v19607_v3 = vld [vmem:[#allocation224_spill] sm:$0xff]  ;;  %v19608_v37 = vld [vmem:[#allocation241_spill] sm:$0xff] }
0x23f4   :  { %11129 = vmatprep.subr.bf16.mxu0 %v19557_v47  ;;  %v19609_v47 = vld [vmem:[#allocation257_spill] sm:$0xff] }
0x23f6   :  { %11108 = vmatpush3.bf16.msra.mxu1 %v19558_v6  ;;  %v9222_v6 = vpack.c.bf16 %v18547_v60, %v18547_v60  ;;  %v19616_v60 = vld [vmem:[#allocation243_spill] sm:$0xff] }
0x23f7   :  { %11130 = vmatpush3.bf16.msra.mxu0 %v19559_v18  ;;  %11109 = vmatprep.subr.bf16.mxu1 %v19560_v7  ;;  %v9224_v18 = vpack.c.bf16 %v18555_v20, %v18555_v20  ;;  %v19611_v7 = vld [vmem:[#allocation249_spill] sm:$0xff]  ;;  %v19618_v20 = vld [vmem:[#allocation235_spill] sm:$0xff] }
0x23f8   :  { %11131 = vmatprep.subr.bf16.mxu0 %v19561_v25  ;;  %v19613_v25 = vld [vmem:[#allocation258_spill] sm:$0xff] }
0x23fa   :  { %11110 = vmatpush3.bf16.msra.mxu1 %v19562_v13  ;;  %v19614_v13 = vld [vmem:[#allocation234_spill] sm:$0xff] }
0x23fb   :  { %11132 = vmatpush3.bf16.msra.mxu0 %v19563_v41  ;;  %11111 = vmatprep.subr.bf16.mxu1 %v19564_v26  ;;  %v19615_v41 = vld [vmem:[#allocation250_spill] sm:$0xff]  ;;  %v19617_v26 = vld [vmem:[#allocation259_spill] sm:$0xff] }
0x23fc   :  { %11133 = vmatprep.subr.bf16.mxu0 %v19565_v61  ;;  %v19619_v61 = vld [vmem:[#allocation251_spill] sm:$0xff] }
0x23fe   :  { %11112 = vmatpush3.bf16.msra.mxu1 %v19566_v36  ;;  %v19620_v36 = vld [vmem:[#allocation244_spill] sm:$0xff] }
0x23ff   :  { %11134 = vmatpush3.bf16.msra.mxu0 %v19567_v43  ;;  %11113 = vmatprep.subr.bf16.mxu1 %v19568_v9  ;;  %v19621_v43 = vld [vmem:[#allocation260_spill] sm:$0xff] }
0x2400   :  { %11135 = vmatprep.subr.bf16.mxu0 %v19569_v12  ;;  %v19622_v9 = vld [vmem:[#allocation236_spill] sm:$0xff] }
0x2401   :  { %v19623_v12 = vld [vmem:[#allocation252_spill] sm:$0xff] }
0x2402   :  { %11114 = vmatpush3.bf16.msra.mxu1 %v19570_v42  ;;  %v19624_v42 = vld [vmem:[#allocation245_spill] sm:$0xff] }
0x2403   :  { %11136 = vmatpush3.bf16.msra.mxu0 %v19571_v46  ;;  %11115 = vmatprep.subr.bf16.mxu1 %v19572_v17  ;;  %v19625_v46 = vld [vmem:[#allocation261_spill] sm:$0xff] }
0x2404   :  { %11137 = vmatprep.subr.bf16.mxu0 %v19573_v52  ;;  %v19626_v17 = vld [vmem:[#allocation237_spill] sm:$0xff] }
0x2405   :  { %v19627_v52 = vld [vmem:[#allocation253_spill] sm:$0xff] }
0x2406   :  { %11116 = vmatpush3.bf16.msra.mxu1 %v19574_v27 }
0x2407   :  { %11138 = vmatpush3.bf16.msra.mxu0 %v19575_v30  ;;  %11145 = vmatprep.subr.bf16.mxu1 %v19576_v34  ;;  %v9481_v34 = vld [vmem:[%s18903_s7 + $0x20] ss:$0 sm:$0xff]  ;;  %s13016_s7 = smov [#allocation4]  }
0x2408   :  { %11167 = vmatprep.subr.bf16.mxu0 %v19577_v14  ;;  %s10129_s25 = sshll.u32 %s13016_s7, 4  ;;  %s10130_s25 = int_to_ptr.vmem [resolvable:$true] %s10129_s25 }
0x2409   :  { %9915 = vmatmul.mubr.bf16.vlgmr.msra.gmra.mrb[220].mxu1 %v9213_v2  ;;  %v19628_v2 = vld [vmem:[#allocation246_spill] sm:$0xff]  ;;  %s12982_s26 = scalar_lea.vmem %s10130_s25, 32  ;;  %p12987_p1 = scmp.lt.s32.totalorder %s10130_s25, %s10130_s25 }
0x240a   :  { %9955 = vmatmul.mubr.bf16.vlgmr.msra.gmra.mrb[252].mxu0 %v9215_v0  ;;  %11146 = vmatpush3.bf16.msra.mxu1 %v19578_v4  ;;  %v19629_v0 = vld [vmem:[#allocation262_spill] sm:$0xff]  ;;  %p12983_p0 = scmp.ne.s32.totalorder %s10130_s25, %s12982_s26  ;;  %p12988_p2 = scmp.lt.s32.totalorder %s12982_s26, %s12982_s26 }
0x240b   :  { %11168 = vmatpush3.bf16.msra.mxu0 %v19579_v45  ;;  %11147 = vmatprep.subr.bf16.mxu1 %v19580_v21 }
0x240c   :  { %11169 = vmatprep.subr.bf16.mxu0 %v19581_v44  ;;  %9994 = vmatprep.mubr.bf16.mxu1 %v9218_v11  ;;  %v19630_v44 = vld [vmem:[#allocation238_spill] sm:$0xff]  ;;  %p12989_p3 = por %p12988_p2, %p12987_p1 }
0x240d   :  { %10034 = vmatprep.mubr.bf16.mxu0 %v9220_v40 }
0x240e   :  { %11148 = vmatpush3.bf16.msra.mxu1 %v19582_v58  ;;  %v19631_v58 = vld [vmem:[#allocation254_spill] sm:$0xff]  ;;  %p12990_p4 = pnand %p12989_p3, %p12983_p0 }
0x240f   :  { %11170 = vmatpush3.bf16.msra.mxu0 %v19583_v5  ;;  %11149 = vmatprep.subr.bf16.mxu1 %v19584_v63 }
0x2410   :  { %11171 = vmatprep.subr.bf16.mxu0 %v19585_v53  ;;  %v19632_v53 = vld [vmem:[#allocation247_spill] sm:$0xff] }
0x2412   :  { %11150 = vmatpush3.bf16.msra.mxu1 %v19586_v19  ;;  %v19633_v19 = vld [vmem:[#allocation263_spill] sm:$0xff] }
0x2413   :  { %11172 = vmatpush3.bf16.msra.mxu0 %v19587_v38  ;;  %11151 = vmatprep.subr.bf16.mxu1 %v19588_v48 }
0x2414   :  { %11173 = vmatprep.subr.bf16.mxu0 %v19589_v54  ;;  %v19634_v54 = vld [vmem:[#allocation239_spill] sm:$0xff] }
0x2416   :  { %11152 = vmatpush3.bf16.msra.mxu1 %v19590_v59  ;;  %v19635_v59 = vld [vmem:[#allocation255_spill] sm:$0xff] }
0x2417   :  { %11174 = vmatpush3.bf16.msra.mxu0 %v19591_v23  ;;  %11153 = vmatprep.subr.bf16.mxu1 %v19592_v22  ;;  %v19636_v23 = vld [vmem:[#allocation248_spill] sm:$0xff] }
0x2418   :  { %11175 = vmatprep.subr.bf16.mxu0 %v19593_v15  ;;  %v19637_v22 = vld [vmem:[#allocation264_spill] sm:$0xff]  ;;  %v9221_v15 = vpack.c.bf16 %v18551_v16, %v18551_v16 }
0x241a   :  { %11154 = vmatpush3.bf16.msra.mxu1 %v19594_v49  ;;  %v9223_v49 = vpack.c.bf16 %v18559_v1, %v18559_v1 }
0x241b   :  { %11176 = vmatpush3.bf16.msra.mxu0 %v19595_v24  ;;  %11155 = vmatprep.subr.bf16.mxu1 %v19596_v35  ;;  %v19638_v24 = vld [vmem:[#allocation240_spill] sm:$0xff] }
0x241c   :  { %11177 = vmatprep.subr.bf16.mxu0 %v19597_v31  ;;  %v19639_v35 = vld [vmem:[#allocation256_spill] sm:$0xff] }
0x241e   :  { %11156 = vmatpush3.bf16.msra.mxu1 %v19598_v29 }
0x241f   :  { %11178 = vmatpush3.bf16.msra.mxu0 %v19599_v56  ;;  %11157 = vmatprep.subr.bf16.mxu1 %v19600_v39 }
0x2420   :  { %11179 = vmatprep.subr.bf16.mxu0 %v19601_v55 }
0x2422   :  { %11158 = vmatpush3.bf16.msra.mxu1 %v19602_v50 }
0x2423   :  { %11180 = vmatpush3.bf16.msra.mxu0 %v19603_v33  ;;  %11159 = vmatprep.subr.bf16.mxu1 %v19604_v57 }
0x2424   :  { %11181 = vmatprep.subr.bf16.mxu0 %v19605_v10 }
0x2426   :  { %11160 = vmatpush3.bf16.msra.mxu1 %v19606_v32 }
0x2427   :  { %11182 = vmatpush3.bf16.msra.mxu0 %v19607_v3  ;;  %11189 = vmatprep.subr.bf16.mxu1 %v19608_v37 }
0x2428   :  { %11211 = vmatprep.subr.bf16.mxu0 %v19609_v47 }
0x2429   :  { %9995 = vmatmul.mubr.bf16.vlgmr.msra.gmra.mrb[224].mxu1 %v9217_v51 }
0x242a   :  { %10035 = vmatmul.mubr.bf16.vlgmr.msra.gmra.mrb[0].mxu0 %v9219_v62  ;;  %11190 = vmatpush3.bf16.msra.mxu1 %v19610_v8 }
0x242b   :  { %11212 = vmatpush3.bf16.msra.mxu0 %v19611_v7  ;;  %11191 = vmatprep.subr.bf16.mxu1 %v19612_v28 }
0x242c   :  { %11213 = vmatprep.subr.bf16.mxu0 %v19613_v25  ;;  %10074 = vmatprep.mubr.bf16.mxu1 %v9222_v6 }
0x242d   :  { %10114 = vmatprep.mubr.bf16.mxu0 %v9224_v18 }
0x242e   :  { %11192 = vmatpush3.bf16.msra.mxu1 %v19614_v13 }
0x242f   :  { %11214 = vmatpush3.bf16.msra.mxu0 %v19615_v41  ;;  %11193 = vmatprep.subr.bf16.mxu1 %v19616_v60 }
0x2430   :  { %11215 = vmatprep.subr.bf16.mxu0 %v19617_v26 }
0x2432   :  { %11194 = vmatpush3.bf16.msra.mxu1 %v19618_v20 }
0x2433   :  { %11216 = vmatpush3.bf16.msra.mxu0 %v19619_v61  ;;  %11195 = vmatprep.subr.bf16.mxu1 %v19620_v36 }
0x2434   :  { %11217 = vmatprep.subr.bf16.mxu0 %v19621_v43 }
0x2436   :  { %11196 = vmatpush3.bf16.msra.mxu1 %v19622_v9 }
0x2437   :  { %11218 = vmatpush3.bf16.msra.mxu0 %v19623_v12  ;;  %11197 = vmatprep.subr.bf16.mxu1 %v19624_v42 }
0x2438   :  { %11219 = vmatprep.subr.bf16.mxu0 %v19625_v46 }
0x243a   :  { %11198 = vmatpush3.bf16.msra.mxu1 %v19626_v17 }
0x243b   :  { %11220 = vmatpush3.bf16.msra.mxu0 %v19627_v52  ;;  %11199 = vmatprep.subr.bf16.mxu1 %v19628_v2 }
0x243c   :  { %11221 = vmatprep.subr.bf16.mxu0 %v19629_v0  ;;  %v10897_v27 = vpop.f32.mrb[200].mxu1 }
0x243d   :  { %v10919_v30 = vpop.f32.mrb[232].mxu0  ;;  %v10898_v14 = vpop.f32.mrb[201].mxu1 }
0x243e   :  { %v10920_v11 = vpop.f32.mrb[233].mxu0  ;;  %v10899_v40 = vadd.f32 %v10898_v14, %v10897_v27  ;;  %v10900_v45 = vpop.f32.mrb[202].mxu1  ;;  %11200 = vmatpush3.bf16.msra.mxu1 %v19630_v44 }
0x243f   :  { %v10921_v4 = vadd.f32 %v10920_v11, %v10919_v30  ;;  %v10922_v21 = vpop.f32.mrb[234].mxu0  ;;  %11222 = vmatpush3.bf16.msra.mxu0 %v19631_v58  ;;  %v10901_v5 = vpop.f32.mrb[203].mxu1  ;;  %11201 = vmatprep.subr.bf16.mxu1 %v19632_v53 }
0x2440   :  { %v10923_v63 = vpop.f32.mrb[235].mxu0  ;;  %11223 = vmatprep.subr.bf16.mxu0 %v19633_v19  ;;  %v9517_v38 = vadd.f32 %v10899_v40, %v9481_v34 }
0x2442   :  { %v9557_v48 = vadd.f32 %v10921_v4, %v9517_v38  ;;  %11202 = vmatpush3.bf16.msra.mxu1 %v19634_v54 }
0x2443   :  { %11224 = vmatpush3.bf16.msra.mxu0 %v19635_v59  ;;  %11203 = vmatprep.subr.bf16.mxu1 %v19636_v23 }
0x2444   :  { %11225 = vmatprep.subr.bf16.mxu0 %v19637_v22 }
0x2446   :  { %11204 = vmatpush3.bf16.msra.mxu1 %v19638_v24 }
0x2447   :  { %11226 = vmatpush3.bf16.msra.mxu0 %v19639_v35 }
0x2449   :  { %10075 = vmatmul.mubr.bf16.vlgmr.msra.gmra.mrb[228].mxu1 %v9221_v15 }
0x244a   :  { %10115 = vmatmul.mubr.bf16.vlgmr.msra.gmra.mrb[4].mxu0 %v9223_v49 }
0x245c   :  { %v10941_v31 = vpop.f32.mrb[204].mxu1 }
0x245d   :  { %v10963_v29 = vpop.f32.mrb[236].mxu0  ;;  %v10942_v56 = vpop.f32.mrb[205].mxu1 }
0x245e   :  { %v10964_v39 = vpop.f32.mrb[237].mxu0  ;;  %v10943_v55 = vadd.f32 %v10942_v56, %v10941_v31  ;;  %v10944_v33 = vpop.f32.mrb[206].mxu1 }
0x245f   :  { %v10965_v50 = vadd.f32 %v10964_v39, %v10963_v29  ;;  %v10966_v57 = vpop.f32.mrb[238].mxu0  ;;  %v10945_v10 = vpop.f32.mrb[207].mxu1 }
0x2460   :  { %v10967_v51 = vpop.f32.mrb[239].mxu0  ;;  %v9597_v16 = vadd.f32 %v10943_v55, %v9557_v48 }
0x2462   :  { %v9637_v62 = vadd.f32 %v10965_v50, %v9597_v16 }
0x247c   :  { %v10985_v32 = vpop.f32.mrb[208].mxu1 }
0x247d   :  { %v11007_v1 = vpop.f32.mrb[240].mxu0  ;;  %v10986_v3 = vpop.f32.mrb[209].mxu1 }
0x247e   :  { %v11008_v37 = vpop.f32.mrb[241].mxu0  ;;  %v10987_v47 = vadd.f32 %v10986_v3, %v10985_v32  ;;  %v10988_v18 = vpop.f32.mrb[210].mxu1 }
0x247f   :  { %v11009_v6 = vadd.f32 %v11008_v37, %v11007_v1  ;;  %v11010_v8 = vpop.f32.mrb[242].mxu0  ;;  %v10989_v7 = vpop.f32.mrb[211].mxu1 }
0x2480   :  { %v11011_v28 = vpop.f32.mrb[243].mxu0  ;;  %v9677_v25 = vadd.f32 %v10987_v47, %v9637_v62 }
0x2482   :  { %v9717_v13 = vadd.f32 %v11009_v6, %v9677_v25 }
0x249c   :  { %v11029_v41 = vpop.f32.mrb[212].mxu1 }
0x249d   :  { %v11051_v60 = vpop.f32.mrb[244].mxu0  ;;  %v11030_v26 = vpop.f32.mrb[213].mxu1 }
0x249e   :  { %v11052_v20 = vpop.f32.mrb[245].mxu0  ;;  %v11031_v61 = vadd.f32 %v11030_v26, %v11029_v41  ;;  %v11032_v43 = vpop.f32.mrb[214].mxu1 }
0x249f   :  { %v11053_v36 = vadd.f32 %v11052_v20, %v11051_v60  ;;  %v11054_v9 = vpop.f32.mrb[246].mxu0  ;;  %v11033_v12 = vpop.f32.mrb[215].mxu1 }
0x24a0   :  { %v11055_v42 = vpop.f32.mrb[247].mxu0  ;;  %v9757_v46 = vadd.f32 %v11031_v61, %v9717_v13 }
0x24a2   :  { %v9797_v17 = vadd.f32 %v11053_v36, %v9757_v46 }
0x24bc   :  { %v11073_v52 = vpop.f32.mrb[216].mxu1 }
0x24bd   :  { %v11095_v2 = vpop.f32.mrb[248].mxu0  ;;  %v11074_v0 = vpop.f32.mrb[217].mxu1 }
0x24be   :  { %v11096_v27 = vpop.f32.mrb[249].mxu0  ;;  %v11075_v30 = vadd.f32 %v11074_v0, %v11073_v52  ;;  %v11076_v14 = vpop.f32.mrb[218].mxu1 }
0x24bf   :  { %v11097_v34 = vadd.f32 %v11096_v27, %v11095_v2  ;;  %v11098_v11 = vpop.f32.mrb[250].mxu0  ;;  %v11077_v40 = vpop.f32.mrb[219].mxu1 }
0x24c0   :  { %v11099_v4 = vpop.f32.mrb[251].mxu0  ;;  %v9837_v45 = vadd.f32 %v11075_v30, %v9797_v17 }
0x24c2   :  { %v9877_v21 = vadd.f32 %v11097_v34, %v9837_v45 }
0x24dc   :  { %v11117_v44 = vpop.f32.mrb[220].mxu1 }
0x24dd   :  { %v11139_v58 = vpop.f32.mrb[252].mxu0  ;;  %v11118_v5 = vpop.f32.mrb[221].mxu1 }
0x24de   :  { %v11140_v63 = vpop.f32.mrb[253].mxu0  ;;  %v11119_v53 = vadd.f32 %v11118_v5, %v11117_v44  ;;  %v11120_v38 = vpop.f32.mrb[222].mxu1 }
0x24df   :  { %v11141_v19 = vadd.f32 %v11140_v63, %v11139_v58  ;;  %v11142_v48 = vpop.f32.mrb[254].mxu0  ;;  %v11121_v54 = vpop.f32.mrb[223].mxu1 }
0x24e0   :  { %v11143_v59 = vpop.f32.mrb[255].mxu0  ;;  %v9917_v23 = vadd.f32 %v11119_v53, %v9877_v21 }
0x24e2   :  { %v9957_v22 = vadd.f32 %v11141_v19, %v9917_v23 }
0x24fc   :  { %v11161_v15 = vpop.f32.mrb[224].mxu1 }
0x24fd   :  { %v11183_v49 = vpop.f32.mrb[0].mxu0  ;;  %v11162_v24 = vpop.f32.mrb[225].mxu1 }
0x24fe   :  { %v11184_v35 = vpop.f32.mrb[1].mxu0  ;;  %v11163_v31 = vadd.f32 %v11162_v24, %v11161_v15  ;;  %v11164_v56 = vpop.f32.mrb[226].mxu1 }
0x24ff   :  { %v11185_v29 = vadd.f32 %v11184_v35, %v11183_v49  ;;  %v11186_v39 = vpop.f32.mrb[2].mxu0  ;;  %v11165_v55 = vpop.f32.mrb[227].mxu1 }
0x2500   :  { %v11187_v50 = vpop.f32.mrb[3].mxu0  ;;  %v9997_v33 = vadd.f32 %v11163_v31, %v9957_v22 }
0x2502   :  { %v10037_v57 = vadd.f32 %v11185_v29, %v9997_v33 }
0x251c   :  { %v11205_v10 = vpop.f32.mrb[228].mxu1 }
0x251d   :  { %v11227_v51 = vpop.f32.mrb[4].mxu0  ;;  %v11206_v16 = vpop.f32.mrb[229].mxu1 }
0x251e   :  { %v11228_v62 = vpop.f32.mrb[5].mxu0  ;;  %v11207_v32 = vadd.f32 %v11206_v16, %v11205_v10  ;;  %v11208_v3 = vpop.f32.mrb[230].mxu1 }
0x251f   :  { %v11229_v1 = vadd.f32 %v11228_v62, %v11227_v51  ;;  %v11230_v37 = vpop.f32.mrb[6].mxu0  ;;  %v11209_v47 = vpop.f32.mrb[231].mxu1 }
0x2520   :  { %v11231_v6 = vpop.f32.mrb[7].mxu0  ;;  %v10077_v18 = vadd.f32 %v11207_v32, %v10037_v57 }
0x2522   :  { %v10117_v8 = vadd.f32 %v11229_v1, %v10077_v18 }
0x2524   :  { %10122 = vst [vmem:[#allocation4] sm:$0x3] %v10117_v8 }
0x2525   :  { %12993 = shalt.err (!%p12990_p4)
}
0x2526   :  { %s12994_s29 = scalar_lea.hbm %s18905_s9, 32 }
0x2527   :  { %p12995_p5 = scmp.ne.s32.totalorder %s18905_s9, %s12994_s29  ;;  %p12998_p6 = scmp.lt.u32.totalorder %s12994_s29, %s18905_s9 }
0x2529   :  { %p13000_p7 = pnand %p12998_p6, %p12995_p5 }
0x252b   :  { %13003 = shalt.err (!%p13000_p7)
}
0x252c   :  { %10132 = dma.vmem_to_hbm [thread:$0]  %s10130_s25, 32, %s18905_s9, [#allocation5]  }
0x252d   :  { %13006 = dma.done.wait [#allocation5], 32  }
0x252e   :  { %13007 = vsyncadd [#allocation5], 4294967264 }
0x252f   :  { %10136 = vsyncpa [#allocation5], 1 }
0x2530   :  { %10137 = vsyncmov [#allocation3] }
0x2533   :  { %s10138_s12 = vpop.sfrf %10137 }
0x2534   :  { %p10484_p8 = scmp.ne.s32.totalorder %s10138_s12, 0 }
0x2536   :  { %10142 = shalt.err (%p10484_p8)  }

</bundles_post_ra>
